<compile_context>
chip_gen: v7x
topology: tpu7x:2x2x1
jax: 0.10.0
libtpu: 0.0.40
codegen_flags: <defaults>
</compile_context>

<pallas_src>
import functools

import numpy as np
import jax
import jax.numpy as jnp
from jax import lax
from jax.experimental import pallas as pl
from jax.experimental.pallas import tpu as pltpu


CIN_PAD0 = 8        # conv1 input channels padded 3 -> 8 (so K = 16*8 = 128)
OUT_LANES = 128     # FC output padded to one full lane register


# ---------------------------------------------------------------------------
# Static per-layer metadata
# ---------------------------------------------------------------------------
def _conv_out(size, stride):
    # kernel=3, padding=1, dilation=1
    return (size + 2 * 1 - 1 * (3 - 1) - 1) // stride + 1


def _layer_dims(input_hw):
    chans = [CIN_PAD0, 32, 64, 128, 256]
    strides = [1, 2, 2, 2]
    dims, h = [], input_hw
    for li in range(4):
        s = strides[li]
        oh = _conv_out(h, s)
        dims.append(dict(cin=chans[li], cout=chans[li + 1], s=s,
                         hin=h, hout=oh, hp_in=h + 2,
                         k=h * chans[li], n=oh * chans[li + 1]))
        h = oh
    return dims


# ---------------------------------------------------------------------------
# One-time weight packing (host side, NOT in the per-forward path)
# ---------------------------------------------------------------------------
def _band_conv_weight(w_oihw, w_in, ow, stride, cin_pad):
    """PyTorch (Cout, Cin, 3, 3) conv weight -> (3, w_in*cin_pad, ow*Cout)
    banded matrices so that  out_row(oh) = sum_kh in_row(s*oh + kh) @ B[kh]
    implements the 3x3 / pad=1 conv (W-taps and W-stride folded into B)."""
    wt = np.asarray(w_oihw, np.float32)
    cout, cin = wt.shape[0], wt.shape[1]
    wt = np.transpose(wt, (2, 3, 1, 0))                       # (kh, kw, cin, cout)
    band = np.zeros((3, w_in * cin_pad, ow * cout), np.float32)
    for kh in range(3):
        for o in range(ow):
            for kw in range(3):
                col = stride * o + kw - 1                     # input W column
                if 0 <= col < w_in:                           # W-pad taps drop out
                    band[kh, col * cin_pad: col * cin_pad + cin,
                         o * cout:(o + 1) * cout] = wt[kh, kw]
    return jnp.asarray(band, jnp.bfloat16)


def _tile_bias(bias, ow):
    # acc column layout is [ow*Cout + o]  ->  bias tiled ow times, kept f32.
    return jnp.asarray(np.tile(np.asarray(bias, np.float32), ow)[None, :])


def _pack_fc(w_fc, b_fc, o4, latent_dim):
    """nn.Linear weight (latent, 256*o4*o4) over the NCHW flatten order ->
    o4 matrices V[h] of shape (o4*256, OUT_LANES) that directly consume the
    kernel's conv4 row layout (w-major, channel-minor); output padded to 128."""
    wf = np.asarray(w_fc, np.float32).reshape(latent_dim, 256, o4, o4)  # (j,c,h,w)
    v = np.zeros((o4, o4 * 256, OUT_LANES), np.float32)
    for h in range(o4):
        t = np.transpose(wf[:, :, h, :], (2, 1, 0))           # (w, c, j)
        v[h, :, :latent_dim] = t.reshape(o4 * 256, latent_dim)
    bb = np.zeros((1, OUT_LANES), np.float32)
    bb[0, :latent_dim] = np.asarray(b_fc, np.float32)
    return jnp.asarray(v, jnp.bfloat16), jnp.asarray(bb)


def pack_params(params, input_hw, latent_dim):
    dims = _layer_dims(input_hw)
    packed = {}
    for li, d in enumerate(dims, start=1):
        packed[f"w{li}"] = _band_conv_weight(params[f"w{li}"], d["hin"],
                                             d["hout"], d["s"], d["cin"])
        packed[f"b{li}"] = _tile_bias(params[f"b{li}"], d["hout"])
    o4 = dims[-1]["hout"]
    packed["w_fc"], packed["b_fc"] = _pack_fc(params["w_fc"], params["b_fc"],
                                              o4, latent_dim)
    return packed


# ---------------------------------------------------------------------------
# Fused encoder kernel (4 convs + FC, activations resident in VMEM)
# ---------------------------------------------------------------------------
def _encoder_kernel(x_ref, w1, b1, b2, b3, b4, bfc,
                    w2_hbm, w3_hbm, w4_hbm, wfc_hbm,
                    out_ref,
                    a1, a2, a3, w2v, w3v, w4v, wfcv, sem,
                    *, dims, n, o4):
    # ---- overlap: start heavy-weight DMAs now, conv1..conv3 run under them ----
    cp2 = pltpu.make_async_copy(w2_hbm, w2v, sem.at[0]); cp2.start()
    cp3 = pltpu.make_async_copy(w3_hbm, w3v, sem.at[1]); cp3.start()
    cp4 = pltpu.make_async_copy(w4_hbm, w4v, sem.at[2]); cp4.start()
    cpf = pltpu.make_async_copy(wfc_hbm, wfcv, sem.at[3]); cpf.start()

    # ---- zero only the conv zero-padding rows (interiors fully overwritten) ----
    for buf, d in ((a1, dims[1]), (a2, dims[2]), (a3, dims[3])):
        hp = d["hp_in"]
        z = jnp.zeros((n, buf.shape[1]), buf.dtype)
        buf[0:n, :] = z                               # padded row 0
        buf[(hp - 1) * n: hp * n, :] = z              # padded row hp-1

    def conv(in_ref, w_ref, b_ref, d, kh_start):
        """3x3 conv (pad=1, stride d['s']) as 3 GEMMs with M = n*OH."""
        rows_m = d["hout"] * n
        acc = None
        for kh in range(3):
            s0 = kh_start(kh)
            lhs = in_ref[s0:s0 + rows_m, :]           # (n*OH, K) bf16
            part = jnp.dot(lhs, w_ref[kh],            # (n*OH, OW*Cout) f32
                           preferred_element_type=jnp.float32)
            acc = part if acc is None else acc + part
        return acc + b_ref[...]

    def parity_start(d):
        # Reader of a parity-deinterleaved buffer (stride-2 layers): for each
        # kernel row kh the needed padded rows form one contiguous slab.
        ne = d["hp_in"] // 2
        return lambda kh: ((kh // 2) if kh % 2 == 0 else ne + kh // 2) * n

    def write_parity(y, out_buf, d_next):
        # Producer output rows (oh-major, batch-minor) -> parity-deinterleaved
        # padded-row layout of the next (stride-2) layer's input buffer.
        ne = d_next["hp_in"] // 2
        for oh in range(d_next["hin"]):
            p = oh + 1                                # padded row index
            blk = p // 2 if p % 2 == 0 else ne + p // 2
            out_buf[blk * n:(blk + 1) * n, :] = y[oh * n:(oh + 1) * n, :]

    # conv1 (stride 1) reads the linear-layout packed input.
    acc = conv(x_ref, w1, b1, dims[0], lambda kh: kh * n)
    write_parity(jnp.maximum(acc, 0.0).astype(jnp.bfloat16), a1, dims[1])

    cp2.wait()
    acc = conv(a1, w2v, b2, dims[1], parity_start(dims[1]))
    write_parity(jnp.maximum(acc, 0.0).astype(jnp.bfloat16), a2, dims[2])

    cp3.wait()
    acc = conv(a2, w3v, b3, dims[2], parity_start(dims[2]))
    write_parity(jnp.maximum(acc, 0.0).astype(jnp.bfloat16), a3, dims[3])

    cp4.wait()
    acc4 = conv(a3, w4v, b4, dims[3], parity_start(dims[3]))   # no ReLU
    # acc4 rows are (output-row h, batch) -> FC consumes contiguous slabs.

    # Flatten + Linear: contraction split over the o4 conv4 output rows; the
    # FC weight was pre-permuted to this (h, w, c) order at pack time.
    # TODO(synk): on v7x drive the kh/FC partial sums through MRB accumulation.
    cpf.wait()
    fc = None
    for h in range(o4):
        xh = acc4[h * n:(h + 1) * n, :].astype(jnp.bfloat16)   # (n, o4*256)
        part = jnp.dot(xh, wfcv[h], preferred_element_type=jnp.float32)
        fc = part if fc is None else fc + part
    out_ref[...] = fc + bfc[...]


# ---------------------------------------------------------------------------
# Public forward
# ---------------------------------------------------------------------------
def encoder_forward(x_nchw, packed, *, input_hw, latent_dim):
    dims = _layer_dims(input_hw)
    n, c_in, h, w = x_nchw.shape
    assert h == w == input_hw and c_in <= CIN_PAD0
    assert latent_dim <= OUT_LANES
    for d in dims[1:]:
        assert d["hin"] % 2 == 0, "parity layout assumes even feature heights"
    o4 = dims[-1]["hout"]
    hp0 = dims[0]["hp_in"]

    # Pack the NCHW input into the kernel's 2-D activation layout:
    # rows = (padded image row) * batch + batch_index (batch-minor),
    # row vector = [w, c] with channels zero-padded to CIN_PAD0; bf16 MXU feed.
    xt = jnp.transpose(x_nchw, (0, 2, 3, 1))                     # (n, h, w, c)
    xt = jnp.pad(xt, ((0, 0), (1, 1), (0, 0), (0, CIN_PAD0 - c_in)))
    xt = xt.reshape(n, hp0, input_hw * CIN_PAD0)
    x_packed = jnp.transpose(xt, (1, 0, 2)).reshape(
        hp0 * n, input_hw * CIN_PAD0).astype(jnp.bfloat16)

    kernel = functools.partial(_encoder_kernel, dims=dims, n=n, o4=o4)
    vmem = pl.BlockSpec(memory_space=pltpu.MemorySpace.VMEM)
    hbm = pl.BlockSpec(memory_space=pl.ANY)
    out = pl.pallas_call(
        kernel,
        out_shape=jax.ShapeDtypeStruct((n, OUT_LANES), jnp.float32),
        in_specs=[vmem] * 7 + [hbm] * 4,
        out_specs=pl.BlockSpec(memory_space=pltpu.MemorySpace.VMEM),
        scratch_shapes=[
            pltpu.VMEM((dims[1]["hp_in"] * n, dims[1]["k"]), jnp.bfloat16),  # a1
            pltpu.VMEM((dims[2]["hp_in"] * n, dims[2]["k"]), jnp.bfloat16),  # a2
            pltpu.VMEM((dims[3]["hp_in"] * n, dims[3]["k"]), jnp.bfloat16),  # a3
            pltpu.VMEM(packed["w2"].shape, jnp.bfloat16),                    # w2 VMEM stage
            pltpu.VMEM(packed["w3"].shape, jnp.bfloat16),                    # w3 VMEM stage
            pltpu.VMEM(packed["w4"].shape, jnp.bfloat16),                    # w4 VMEM stage
            pltpu.VMEM(packed["w_fc"].shape, jnp.bfloat16),                  # fc VMEM stage
            pltpu.SemaphoreType.DMA((4,)),
        ],
    )(x_packed,
      packed["w1"], packed["b1"], packed["b2"], packed["b3"], packed["b4"],
      packed["b_fc"],
      packed["w2"], packed["w3"], packed["w4"], packed["w_fc"])
    return out[:, :latent_dim]


# ---------------------------------------------------------------------------
# Plain-JAX reference (correctness check only)
# ---------------------------------------------------------------------------
def reference_forward(x_nchw, params):
    def conv(x, wgt, b, stride):
        y = lax.conv_general_dilated(
            x, wgt, window_strides=(stride, stride), padding=((1, 1), (1, 1)),
            dimension_numbers=("NCHW", "OIHW", "NCHW"))
        return y + b.reshape(1, -1, 1, 1)

    x = jnp.maximum(conv(x_nchw, params["w1"], params["b1"], 1), 0.0)
    x = jnp.maximum(conv(x, params["w2"], params["b2"], 2), 0.0)
    x = jnp.maximum(conv(x, params["w3"], params["b3"], 2), 0.0)
    x = conv(x, params["w4"], params["b4"], 2)
    flat = x.reshape(x.shape[0], -1)                 # NCHW flatten, like .view
    return flat @ params["w_fc"].T + params["b_fc"]


# ---------------------------------------------------------------------------
# Deterministic PyTorch-shaped parameters
# ---------------------------------------------------------------------------
def init_params(key, latent_dim, flat_dim):
    ks = jax.random.split(key, 10)
    s = 0.05
    return {
        "w1": s * jax.random.normal(ks[0], (32, 3, 3, 3), jnp.float32),
        "b1": s * jax.random.normal(ks[1], (32,), jnp.float32),
        "w2": s * jax.random.normal(ks[2], (64, 32, 3, 3), jnp.float32),
        "b2": s * jax.random.normal(ks[3], (64,), jnp.float32),
        "w3": s * jax.random.normal(ks[4], (128, 64, 3, 3), jnp.float32),
        "b3": s * jax.random.normal(ks[5], (128,), jnp.float32),
        "w4": s * jax.random.normal(ks[6], (256, 128, 3, 3), jnp.float32),
        "b4": s * jax.random.normal(ks[7], (256,), jnp.float32),
        "w_fc": s * jax.random.normal(ks[8], (latent_dim, flat_dim), jnp.float32),
        "b_fc": s * jax.random.normal(ks[9], (latent_dim,), jnp.float32),
    }


if __name__ == "__main__":
    BATCH, C_IN, HW, LATENT = 2, 3, 16, 8

    key = jax.random.PRNGKey(0)
    k_x, k_p = jax.random.split(key)

    dims = _layer_dims(HW)
    flat_dim = 256 * dims[-1]["hout"] ** 2           # 256 * 2 * 2 = 1024

    x = jax.random.normal(k_x, (BATCH, C_IN, HW, HW), jnp.float32)  # NCHW
    params = init_params(k_p, LATENT, flat_dim)
    packed = pack_params(params, HW, LATENT)         # one-time weight packing

    fwd = jax.jit(functools.partial(encoder_forward, input_hw=HW,
                                    latent_dim=LATENT))
    out = jax.block_until_ready(fwd(x, packed))

    ref = reference_forward(x, params)
    assert out.shape == (BATCH, LATENT)
    # bf16 MXU operands (f32 accumulation) -> loose-ish tolerance vs f32 ref.
    assert jnp.allclose(out, ref, atol=3e-2, rtol=3e-2)
    print("KERNEL_OK")
</pallas_src>

<mosaic_0001>
module attributes {stable_mosaic.version = 11 : i64} {
  func.func @_encoder_kernel(%arg0: memref<36x128xbf16, #tpu.memory_space<vmem>>, %arg1: memref<3x128x512xbf16, #tpu.memory_space<vmem>>, %arg2: memref<1x512xf32, #tpu.memory_space<vmem>>, %arg3: memref<1x512xf32, #tpu.memory_space<vmem>>, %arg4: memref<1x512xf32, #tpu.memory_space<vmem>>, %arg5: memref<1x512xf32, #tpu.memory_space<vmem>>, %arg6: memref<1x128xf32, #tpu.memory_space<vmem>>, %arg7: memref<3x512x512xbf16, #tpu.memory_space<any>>, %arg8: memref<3x512x512xbf16, #tpu.memory_space<any>>, %arg9: memref<3x512x512xbf16, #tpu.memory_space<any>>, %arg10: memref<2x512x128xbf16, #tpu.memory_space<any>>, %arg11: memref<2x128xf32, #tpu.memory_space<vmem>>, %arg12: memref<36x512xbf16, #tpu.memory_space<vmem>>, %arg13: memref<20x512xbf16, #tpu.memory_space<vmem>>, %arg14: memref<12x512xbf16, #tpu.memory_space<vmem>>, %arg15: memref<3x512x512xbf16, #tpu.memory_space<vmem>>, %arg16: memref<3x512x512xbf16, #tpu.memory_space<vmem>>, %arg17: memref<3x512x512xbf16, #tpu.memory_space<vmem>>, %arg18: memref<2x512x128xbf16, #tpu.memory_space<vmem>>, %arg19: memref<4x!tpu.dma_semaphore, #tpu.memory_space<semaphore_mem>>) attributes {dimension_semantics = [], scalar_prefetch = 0 : i64, scratch_operands = 8 : i64, tpu.core_type = #tpu.core_type<tc>} {
    %c0_i32 = arith.constant 0 : i32
    %0 = tpu.memref_slice %arg19[%c0_i32] : memref<4x!tpu.dma_semaphore, #tpu.memory_space<semaphore_mem>> -> memref<1x!tpu.dma_semaphore, #tpu.memory_space<semaphore_mem>>
    %1 = tpu.memref_squeeze %0 : memref<1x!tpu.dma_semaphore, #tpu.memory_space<semaphore_mem>> -> memref<!tpu.dma_semaphore, #tpu.memory_space<semaphore_mem>>
    tpu.enqueue_dma source(%arg7 : memref<3x512x512xbf16, #tpu.memory_space<any>>) target(%arg15 : memref<3x512x512xbf16, #tpu.memory_space<vmem>>) target_semaphore(%1 : memref<!tpu.dma_semaphore, #tpu.memory_space<semaphore_mem>>)
    %c1_i32 = arith.constant 1 : i32
    %2 = tpu.memref_slice %arg19[%c1_i32] : memref<4x!tpu.dma_semaphore, #tpu.memory_space<semaphore_mem>> -> memref<1x!tpu.dma_semaphore, #tpu.memory_space<semaphore_mem>>
    %3 = tpu.memref_squeeze %2 : memref<1x!tpu.dma_semaphore, #tpu.memory_space<semaphore_mem>> -> memref<!tpu.dma_semaphore, #tpu.memory_space<semaphore_mem>>
    tpu.enqueue_dma source(%arg8 : memref<3x512x512xbf16, #tpu.memory_space<any>>) target(%arg16 : memref<3x512x512xbf16, #tpu.memory_space<vmem>>) target_semaphore(%3 : memref<!tpu.dma_semaphore, #tpu.memory_space<semaphore_mem>>)
    %c2_i32 = arith.constant 2 : i32
    %4 = tpu.memref_slice %arg19[%c2_i32] : memref<4x!tpu.dma_semaphore, #tpu.memory_space<semaphore_mem>> -> memref<1x!tpu.dma_semaphore, #tpu.memory_space<semaphore_mem>>
    %5 = tpu.memref_squeeze %4 : memref<1x!tpu.dma_semaphore, #tpu.memory_space<semaphore_mem>> -> memref<!tpu.dma_semaphore, #tpu.memory_space<semaphore_mem>>
    tpu.enqueue_dma source(%arg9 : memref<3x512x512xbf16, #tpu.memory_space<any>>) target(%arg17 : memref<3x512x512xbf16, #tpu.memory_space<vmem>>) target_semaphore(%5 : memref<!tpu.dma_semaphore, #tpu.memory_space<semaphore_mem>>)
    %c3_i32 = arith.constant 3 : i32
    %6 = tpu.memref_slice %arg19[%c3_i32] : memref<4x!tpu.dma_semaphore, #tpu.memory_space<semaphore_mem>> -> memref<1x!tpu.dma_semaphore, #tpu.memory_space<semaphore_mem>>
    %7 = tpu.memref_squeeze %6 : memref<1x!tpu.dma_semaphore, #tpu.memory_space<semaphore_mem>> -> memref<!tpu.dma_semaphore, #tpu.memory_space<semaphore_mem>>
    tpu.enqueue_dma source(%arg10 : memref<2x512x128xbf16, #tpu.memory_space<any>>) target(%arg18 : memref<2x512x128xbf16, #tpu.memory_space<vmem>>) target_semaphore(%7 : memref<!tpu.dma_semaphore, #tpu.memory_space<semaphore_mem>>)
    %cst = arith.constant 0.000000e+00 : bf16
    %8 = vector.broadcast %cst : bf16 to vector<2x512xbf16>
    %c0 = arith.constant 0 : index
    %c0_0 = arith.constant 0 : index
    %9 = vector.load %arg12[%c0, %c0_0] : memref<36x512xbf16, #tpu.memory_space<vmem>>, vector<2x512xbf16>
    tpu.vector_store %arg12[%c0, %c0_0], %8 {strides = array<i32>} : memref<36x512xbf16, #tpu.memory_space<vmem>>, vector<2x512xbf16>,
    %c34 = arith.constant 34 : index
    %c0_1 = arith.constant 0 : index
    %10 = vector.load %arg12[%c34, %c0_1] : memref<36x512xbf16, #tpu.memory_space<vmem>>, vector<2x512xbf16>
    tpu.vector_store %arg12[%c34, %c0_1], %8 {strides = array<i32>} : memref<36x512xbf16, #tpu.memory_space<vmem>>, vector<2x512xbf16>,
    %cst_2 = arith.constant 0.000000e+00 : bf16
    %11 = vector.broadcast %cst_2 : bf16 to vector<2x512xbf16>
    %c0_3 = arith.constant 0 : index
    %c0_4 = arith.constant 0 : index
    %12 = vector.load %arg13[%c0_3, %c0_4] : memref<20x512xbf16, #tpu.memory_space<vmem>>, vector<2x512xbf16>
    tpu.vector_store %arg13[%c0_3, %c0_4], %11 {strides = array<i32>} : memref<20x512xbf16, #tpu.memory_space<vmem>>, vector<2x512xbf16>,
    %c18 = arith.constant 18 : index
    %c0_5 = arith.constant 0 : index
    %13 = vector.load %arg13[%c18, %c0_5] : memref<20x512xbf16, #tpu.memory_space<vmem>>, vector<2x512xbf16>
    tpu.vector_store %arg13[%c18, %c0_5], %11 {strides = array<i32>} : memref<20x512xbf16, #tpu.memory_space<vmem>>, vector<2x512xbf16>,
    %cst_6 = arith.constant 0.000000e+00 : bf16
    %14 = vector.broadcast %cst_6 : bf16 to vector<2x512xbf16>
    %c0_7 = arith.constant 0 : index
    %c0_8 = arith.constant 0 : index
    %15 = vector.load %arg14[%c0_7, %c0_8] : memref<12x512xbf16, #tpu.memory_space<vmem>>, vector<2x512xbf16>
    tpu.vector_store %arg14[%c0_7, %c0_8], %14 {strides = array<i32>} : memref<12x512xbf16, #tpu.memory_space<vmem>>, vector<2x512xbf16>,
    %c10 = arith.constant 10 : index
    %c0_9 = arith.constant 0 : index
    %16 = vector.load %arg14[%c10, %c0_9] : memref<12x512xbf16, #tpu.memory_space<vmem>>, vector<2x512xbf16>
    tpu.vector_store %arg14[%c10, %c0_9], %14 {strides = array<i32>} : memref<12x512xbf16, #tpu.memory_space<vmem>>, vector<2x512xbf16>,
    %c0_10 = arith.constant 0 : index
    %c0_11 = arith.constant 0 : index
    %17 = vector.load %arg0[%c0_10, %c0_11] : memref<36x128xbf16, #tpu.memory_space<vmem>>, vector<32x128xbf16>
    %c0_12 = arith.constant 0 : index
    %c0_13 = arith.constant 0 : index
    %c0_14 = arith.constant 0 : index
    %18 = vector.load %arg1[%c0_12, %c0_13, %c0_14] : memref<3x128x512xbf16, #tpu.memory_space<vmem>>, vector<1x128x512xbf16>
    %19 = vector.shape_cast %18 : vector<1x128x512xbf16> to vector<128x512xbf16>
    %cst_15 = arith.constant dense<0.000000e+00> : vector<32x512xf32>
    %20 = tpu.matmul %17, %19, %cst_15 {dimension_numbers = #tpu.dot_dimension_numbers<[1], [0], [0], [1], [0, 0, 1, 1], [], []>} : vector<32x128xbf16>, vector<128x512xbf16>, vector<32x512xf32> -> vector<32x512xf32>
    %c2 = arith.constant 2 : index
    %c0_16 = arith.constant 0 : index
    %21 = vector.load %arg0[%c2, %c0_16] : memref<36x128xbf16, #tpu.memory_space<vmem>>, vector<32x128xbf16>
    %c1 = arith.constant 1 : index
    %c0_17 = arith.constant 0 : index
    %c0_18 = arith.constant 0 : index
    %22 = vector.load %arg1[%c1, %c0_17, %c0_18] : memref<3x128x512xbf16, #tpu.memory_space<vmem>>, vector<1x128x512xbf16>
    %23 = vector.shape_cast %22 : vector<1x128x512xbf16> to vector<128x512xbf16>
    %cst_19 = arith.constant dense<0.000000e+00> : vector<32x512xf32>
    %24 = tpu.matmul %21, %23, %cst_19 {dimension_numbers = #tpu.dot_dimension_numbers<[1], [0], [0], [1], [0, 0, 1, 1], [], []>} : vector<32x128xbf16>, vector<128x512xbf16>, vector<32x512xf32> -> vector<32x512xf32>
    %25 = arith.addf %20, %24 : vector<32x512xf32>
    %c4 = arith.constant 4 : index
    %c0_20 = arith.constant 0 : index
    %26 = vector.load %arg0[%c4, %c0_20] : memref<36x128xbf16, #tpu.memory_space<vmem>>, vector<32x128xbf16>
    %c2_21 = arith.constant 2 : index
    %c0_22 = arith.constant 0 : index
    %c0_23 = arith.constant 0 : index
    %27 = vector.load %arg1[%c2_21, %c0_22, %c0_23] : memref<3x128x512xbf16, #tpu.memory_space<vmem>>, vector<1x128x512xbf16>
    %28 = vector.shape_cast %27 : vector<1x128x512xbf16> to vector<128x512xbf16>
    %cst_24 = arith.constant dense<0.000000e+00> : vector<32x512xf32>
    %29 = tpu.matmul %26, %28, %cst_24 {dimension_numbers = #tpu.dot_dimension_numbers<[1], [0], [0], [1], [0, 0, 1, 1], [], []>} : vector<32x128xbf16>, vector<128x512xbf16>, vector<32x512xf32> -> vector<32x512xf32>
    %30 = arith.addf %25, %29 : vector<32x512xf32>
    %c0_25 = arith.constant 0 : index
    %c0_26 = arith.constant 0 : index
    %31 = vector.load %arg2[%c0_25, %c0_26] : memref<1x512xf32, #tpu.memory_space<vmem>>, vector<1x512xf32>
    %32 = vector.broadcast %31 : vector<1x512xf32> to vector<32x512xf32>
    %33 = arith.addf %30, %32 : vector<32x512xf32>
    %cst_27 = arith.constant 0.000000e+00 : f32
    %34 = vector.broadcast %cst_27 : f32 to vector<32x512xf32>
    %35 = arith.maximumf %33, %34 : vector<32x512xf32>
    %36 = arith.truncf %35 : vector<32x512xf32> to vector<32x512xbf16>
    %37 = vector.extract_strided_slice %36 {offsets = [0, 0], sizes = [2, 512], strides = [1, 1]} : vector<32x512xbf16> to vector<2x512xbf16>
    %c18_28 = arith.constant 18 : index
    %c0_29 = arith.constant 0 : index
    %38 = vector.load %arg12[%c18_28, %c0_29] : memref<36x512xbf16, #tpu.memory_space<vmem>>, vector<2x512xbf16>
    tpu.vector_store %arg12[%c18_28, %c0_29], %37 {strides = array<i32>} : memref<36x512xbf16, #tpu.memory_space<vmem>>, vector<2x512xbf16>,
    %39 = vector.extract_strided_slice %36 {offsets = [2, 0], sizes = [2, 512], strides = [1, 1]} : vector<32x512xbf16> to vector<2x512xbf16>
    %c2_30 = arith.constant 2 : index
    %c0_31 = arith.constant 0 : index
    %40 = vector.load %arg12[%c2_30, %c0_31] : memref<36x512xbf16, #tpu.memory_space<vmem>>, vector<2x512xbf16>
    tpu.vector_store %arg12[%c2_30, %c0_31], %39 {strides = array<i32>} : memref<36x512xbf16, #tpu.memory_space<vmem>>, vector<2x512xbf16>,
    %41 = vector.extract_strided_slice %36 {offsets = [4, 0], sizes = [2, 512], strides = [1, 1]} : vector<32x512xbf16> to vector<2x512xbf16>
    %c20 = arith.constant 20 : index
    %c0_32 = arith.constant 0 : index
    %42 = vector.load %arg12[%c20, %c0_32] : memref<36x512xbf16, #tpu.memory_space<vmem>>, vector<2x512xbf16>
    tpu.vector_store %arg12[%c20, %c0_32], %41 {strides = array<i32>} : memref<36x512xbf16, #tpu.memory_space<vmem>>, vector<2x512xbf16>,
    %43 = vector.extract_strided_slice %36 {offsets = [6, 0], sizes = [2, 512], strides = [1, 1]} : vector<32x512xbf16> to vector<2x512xbf16>
    %c4_33 = arith.constant 4 : index
    %c0_34 = arith.constant 0 : index
    %44 = vector.load %arg12[%c4_33, %c0_34] : memref<36x512xbf16, #tpu.memory_space<vmem>>, vector<2x512xbf16>
    tpu.vector_store %arg12[%c4_33, %c0_34], %43 {strides = array<i32>} : memref<36x512xbf16, #tpu.memory_space<vmem>>, vector<2x512xbf16>,
    %45 = vector.extract_strided_slice %36 {offsets = [8, 0], sizes = [2, 512], strides = [1, 1]} : vector<32x512xbf16> to vector<2x512xbf16>
    %c22 = arith.constant 22 : index
    %c0_35 = arith.constant 0 : index
    %46 = vector.load %arg12[%c22, %c0_35] : memref<36x512xbf16, #tpu.memory_space<vmem>>, vector<2x512xbf16>
    tpu.vector_store %arg12[%c22, %c0_35], %45 {strides = array<i32>} : memref<36x512xbf16, #tpu.memory_space<vmem>>, vector<2x512xbf16>,
    %47 = vector.extract_strided_slice %36 {offsets = [10, 0], sizes = [2, 512], strides = [1, 1]} : vector<32x512xbf16> to vector<2x512xbf16>
    %c6 = arith.constant 6 : index
    %c0_36 = arith.constant 0 : index
    %48 = vector.load %arg12[%c6, %c0_36] : memref<36x512xbf16, #tpu.memory_space<vmem>>, vector<2x512xbf16>
    tpu.vector_store %arg12[%c6, %c0_36], %47 {strides = array<i32>} : memref<36x512xbf16, #tpu.memory_space<vmem>>, vector<2x512xbf16>,
    %49 = vector.extract_strided_slice %36 {offsets = [12, 0], sizes = [2, 512], strides = [1, 1]} : vector<32x512xbf16> to vector<2x512xbf16>
    %c24 = arith.constant 24 : index
    %c0_37 = arith.constant 0 : index
    %50 = vector.load %arg12[%c24, %c0_37] : memref<36x512xbf16, #tpu.memory_space<vmem>>, vector<2x512xbf16>
    tpu.vector_store %arg12[%c24, %c0_37], %49 {strides = array<i32>} : memref<36x512xbf16, #tpu.memory_space<vmem>>, vector<2x512xbf16>,
    %51 = vector.extract_strided_slice %36 {offsets = [14, 0], sizes = [2, 512], strides = [1, 1]} : vector<32x512xbf16> to vector<2x512xbf16>
    %c8 = arith.constant 8 : index
    %c0_38 = arith.constant 0 : index
    %52 = vector.load %arg12[%c8, %c0_38] : memref<36x512xbf16, #tpu.memory_space<vmem>>, vector<2x512xbf16>
    tpu.vector_store %arg12[%c8, %c0_38], %51 {strides = array<i32>} : memref<36x512xbf16, #tpu.memory_space<vmem>>, vector<2x512xbf16>,
    %53 = vector.extract_strided_slice %36 {offsets = [16, 0], sizes = [2, 512], strides = [1, 1]} : vector<32x512xbf16> to vector<2x512xbf16>
    %c26 = arith.constant 26 : index
    %c0_39 = arith.constant 0 : index
    %54 = vector.load %arg12[%c26, %c0_39] : memref<36x512xbf16, #tpu.memory_space<vmem>>, vector<2x512xbf16>
    tpu.vector_store %arg12[%c26, %c0_39], %53 {strides = array<i32>} : memref<36x512xbf16, #tpu.memory_space<vmem>>, vector<2x512xbf16>,
    %55 = vector.extract_strided_slice %36 {offsets = [18, 0], sizes = [2, 512], strides = [1, 1]} : vector<32x512xbf16> to vector<2x512xbf16>
    %c10_40 = arith.constant 10 : index
    %c0_41 = arith.constant 0 : index
    %56 = vector.load %arg12[%c10_40, %c0_41] : memref<36x512xbf16, #tpu.memory_space<vmem>>, vector<2x512xbf16>
    tpu.vector_store %arg12[%c10_40, %c0_41], %55 {strides = array<i32>} : memref<36x512xbf16, #tpu.memory_space<vmem>>, vector<2x512xbf16>,
    %57 = vector.extract_strided_slice %36 {offsets = [20, 0], sizes = [2, 512], strides = [1, 1]} : vector<32x512xbf16> to vector<2x512xbf16>
    %c28 = arith.constant 28 : index
    %c0_42 = arith.constant 0 : index
    %58 = vector.load %arg12[%c28, %c0_42] : memref<36x512xbf16, #tpu.memory_space<vmem>>, vector<2x512xbf16>
    tpu.vector_store %arg12[%c28, %c0_42], %57 {strides = array<i32>} : memref<36x512xbf16, #tpu.memory_space<vmem>>, vector<2x512xbf16>,
    %59 = vector.extract_strided_slice %36 {offsets = [22, 0], sizes = [2, 512], strides = [1, 1]} : vector<32x512xbf16> to vector<2x512xbf16>
    %c12 = arith.constant 12 : index
    %c0_43 = arith.constant 0 : index
    %60 = vector.load %arg12[%c12, %c0_43] : memref<36x512xbf16, #tpu.memory_space<vmem>>, vector<2x512xbf16>
    tpu.vector_store %arg12[%c12, %c0_43], %59 {strides = array<i32>} : memref<36x512xbf16, #tpu.memory_space<vmem>>, vector<2x512xbf16>,
    %61 = vector.extract_strided_slice %36 {offsets = [24, 0], sizes = [2, 512], strides = [1, 1]} : vector<32x512xbf16> to vector<2x512xbf16>
    %c30 = arith.constant 30 : index
    %c0_44 = arith.constant 0 : index
    %62 = vector.load %arg12[%c30, %c0_44] : memref<36x512xbf16, #tpu.memory_space<vmem>>, vector<2x512xbf16>
    tpu.vector_store %arg12[%c30, %c0_44], %61 {strides = array<i32>} : memref<36x512xbf16, #tpu.memory_space<vmem>>, vector<2x512xbf16>,
    %63 = vector.extract_strided_slice %36 {offsets = [26, 0], sizes = [2, 512], strides = [1, 1]} : vector<32x512xbf16> to vector<2x512xbf16>
    %c14 = arith.constant 14 : index
    %c0_45 = arith.constant 0 : index
    %64 = vector.load %arg12[%c14, %c0_45] : memref<36x512xbf16, #tpu.memory_space<vmem>>, vector<2x512xbf16>
    tpu.vector_store %arg12[%c14, %c0_45], %63 {strides = array<i32>} : memref<36x512xbf16, #tpu.memory_space<vmem>>, vector<2x512xbf16>,
    %65 = vector.extract_strided_slice %36 {offsets = [28, 0], sizes = [2, 512], strides = [1, 1]} : vector<32x512xbf16> to vector<2x512xbf16>
    %c32 = arith.constant 32 : index
    %c0_46 = arith.constant 0 : index
    %66 = vector.load %arg12[%c32, %c0_46] : memref<36x512xbf16, #tpu.memory_space<vmem>>, vector<2x512xbf16>
    tpu.vector_store %arg12[%c32, %c0_46], %65 {strides = array<i32>} : memref<36x512xbf16, #tpu.memory_space<vmem>>, vector<2x512xbf16>,
    %67 = vector.extract_strided_slice %36 {offsets = [30, 0], sizes = [2, 512], strides = [1, 1]} : vector<32x512xbf16> to vector<2x512xbf16>
    %c16 = arith.constant 16 : index
    %c0_47 = arith.constant 0 : index
    %68 = vector.load %arg12[%c16, %c0_47] : memref<36x512xbf16, #tpu.memory_space<vmem>>, vector<2x512xbf16>
    tpu.vector_store %arg12[%c16, %c0_47], %67 {strides = array<i32>} : memref<36x512xbf16, #tpu.memory_space<vmem>>, vector<2x512xbf16>,
    %c0_i32_48 = arith.constant 0 : i32
    %69 = tpu.memref_slice %arg19[%c0_i32_48] : memref<4x!tpu.dma_semaphore, #tpu.memory_space<semaphore_mem>> -> memref<1x!tpu.dma_semaphore, #tpu.memory_space<semaphore_mem>>
    %70 = tpu.memref_squeeze %69 : memref<1x!tpu.dma_semaphore, #tpu.memory_space<semaphore_mem>> -> memref<!tpu.dma_semaphore, #tpu.memory_space<semaphore_mem>>
    tpu.wait_dma2 semaphore(%70 : memref<!tpu.dma_semaphore, #tpu.memory_space<semaphore_mem>>) src(%arg7 : memref<3x512x512xbf16, #tpu.memory_space<any>>) dst(%arg15 : memref<3x512x512xbf16, #tpu.memory_space<vmem>>)
    %c0_49 = arith.constant 0 : index
    %c0_50 = arith.constant 0 : index
    %71 = vector.load %arg12[%c0_49, %c0_50] : memref<36x512xbf16, #tpu.memory_space<vmem>>, vector<16x512xbf16>
    %c0_51 = arith.constant 0 : index
    %c0_52 = arith.constant 0 : index
    %c0_53 = arith.constant 0 : index
    %72 = vector.load %arg15[%c0_51, %c0_52, %c0_53] : memref<3x512x512xbf16, #tpu.memory_space<vmem>>, vector<1x512x512xbf16>
    %73 = vector.shape_cast %72 : vector<1x512x512xbf16> to vector<512x512xbf16>
    %cst_54 = arith.constant dense<0.000000e+00> : vector<16x512xf32>
    %74 = tpu.matmul %71, %73, %cst_54 {dimension_numbers = #tpu.dot_dimension_numbers<[1], [0], [0], [1], [0, 0, 1, 1], [], []>} : vector<16x512xbf16>, vector<512x512xbf16>, vector<16x512xf32> -> vector<16x512xf32>
    %c18_55 = arith.constant 18 : index
    %c0_56 = arith.constant 0 : index
    %75 = vector.load %arg12[%c18_55, %c0_56] : memref<36x512xbf16, #tpu.memory_space<vmem>>, vector<16x512xbf16>
    %c1_57 = arith.constant 1 : index
    %c0_58 = arith.constant 0 : index
    %c0_59 = arith.constant 0 : index
    %76 = vector.load %arg15[%c1_57, %c0_58, %c0_59] : memref<3x512x512xbf16, #tpu.memory_space<vmem>>, vector<1x512x512xbf16>
    %77 = vector.shape_cast %76 : vector<1x512x512xbf16> to vector<512x512xbf16>
    %cst_60 = arith.constant dense<0.000000e+00> : vector<16x512xf32>
    %78 = tpu.matmul %75, %77, %cst_60 {dimension_numbers = #tpu.dot_dimension_numbers<[1], [0], [0], [1], [0, 0, 1, 1], [], []>} : vector<16x512xbf16>, vector<512x512xbf16>, vector<16x512xf32> -> vector<16x512xf32>
    %79 = arith.addf %74, %78 : vector<16x512xf32>
    %c2_61 = arith.constant 2 : index
    %c0_62 = arith.constant 0 : index
    %80 = vector.load %arg12[%c2_61, %c0_62] : memref<36x512xbf16, #tpu.memory_space<vmem>>, vector<16x512xbf16>
    %c2_63 = arith.constant 2 : index
    %c0_64 = arith.constant 0 : index
    %c0_65 = arith.constant 0 : index
    %81 = vector.load %arg15[%c2_63, %c0_64, %c0_65] : memref<3x512x512xbf16, #tpu.memory_space<vmem>>, vector<1x512x512xbf16>
    %82 = vector.shape_cast %81 : vector<1x512x512xbf16> to vector<512x512xbf16>
    %cst_66 = arith.constant dense<0.000000e+00> : vector<16x512xf32>
    %83 = tpu.matmul %80, %82, %cst_66 {dimension_numbers = #tpu.dot_dimension_numbers<[1], [0], [0], [1], [0, 0, 1, 1], [], []>} : vector<16x512xbf16>, vector<512x512xbf16>, vector<16x512xf32> -> vector<16x512xf32>
    %84 = arith.addf %79, %83 : vector<16x512xf32>
    %c0_67 = arith.constant 0 : index
    %c0_68 = arith.constant 0 : index
    %85 = vector.load %arg3[%c0_67, %c0_68] : memref<1x512xf32, #tpu.memory_space<vmem>>, vector<1x512xf32>
    %86 = vector.broadcast %85 : vector<1x512xf32> to vector<16x512xf32>
    %87 = arith.addf %84, %86 : vector<16x512xf32>
    %cst_69 = arith.constant 0.000000e+00 : f32
    %88 = vector.broadcast %cst_69 : f32 to vector<16x512xf32>
    %89 = arith.maximumf %87, %88 : vector<16x512xf32>
    %90 = arith.truncf %89 : vector<16x512xf32> to vector<16x512xbf16>
    %91 = vector.extract_strided_slice %90 {offsets = [0, 0], sizes = [2, 512], strides = [1, 1]} : vector<16x512xbf16> to vector<2x512xbf16>
    %c10_70 = arith.constant 10 : index
    %c0_71 = arith.constant 0 : index
    %92 = vector.load %arg13[%c10_70, %c0_71] : memref<20x512xbf16, #tpu.memory_space<vmem>>, vector<2x512xbf16>
    tpu.vector_store %arg13[%c10_70, %c0_71], %91 {strides = array<i32>} : memref<20x512xbf16, #tpu.memory_space<vmem>>, vector<2x512xbf16>,
    %93 = vector.extract_strided_slice %90 {offsets = [2, 0], sizes = [2, 512], strides = [1, 1]} : vector<16x512xbf16> to vector<2x512xbf16>
    %c2_72 = arith.constant 2 : index
    %c0_73 = arith.constant 0 : index
    %94 = vector.load %arg13[%c2_72, %c0_73] : memref<20x512xbf16, #tpu.memory_space<vmem>>, vector<2x512xbf16>
    tpu.vector_store %arg13[%c2_72, %c0_73], %93 {strides = array<i32>} : memref<20x512xbf16, #tpu.memory_space<vmem>>, vector<2x512xbf16>,
    %95 = vector.extract_strided_slice %90 {offsets = [4, 0], sizes = [2, 512], strides = [1, 1]} : vector<16x512xbf16> to vector<2x512xbf16>
    %c12_74 = arith.constant 12 : index
    %c0_75 = arith.constant 0 : index
    %96 = vector.load %arg13[%c12_74, %c0_75] : memref<20x512xbf16, #tpu.memory_space<vmem>>, vector<2x512xbf16>
    tpu.vector_store %arg13[%c12_74, %c0_75], %95 {strides = array<i32>} : memref<20x512xbf16, #tpu.memory_space<vmem>>, vector<2x512xbf16>,
    %97 = vector.extract_strided_slice %90 {offsets = [6, 0], sizes = [2, 512], strides = [1, 1]} : vector<16x512xbf16> to vector<2x512xbf16>
    %c4_76 = arith.constant 4 : index
    %c0_77 = arith.constant 0 : index
    %98 = vector.load %arg13[%c4_76, %c0_77] : memref<20x512xbf16, #tpu.memory_space<vmem>>, vector<2x512xbf16>
    tpu.vector_store %arg13[%c4_76, %c0_77], %97 {strides = array<i32>} : memref<20x512xbf16, #tpu.memory_space<vmem>>, vector<2x512xbf16>,
    %99 = vector.extract_strided_slice %90 {offsets = [8, 0], sizes = [2, 512], strides = [1, 1]} : vector<16x512xbf16> to vector<2x512xbf16>
    %c14_78 = arith.constant 14 : index
    %c0_79 = arith.constant 0 : index
    %100 = vector.load %arg13[%c14_78, %c0_79] : memref<20x512xbf16, #tpu.memory_space<vmem>>, vector<2x512xbf16>
    tpu.vector_store %arg13[%c14_78, %c0_79], %99 {strides = array<i32>} : memref<20x512xbf16, #tpu.memory_space<vmem>>, vector<2x512xbf16>,
    %101 = vector.extract_strided_slice %90 {offsets = [10, 0], sizes = [2, 512], strides = [1, 1]} : vector<16x512xbf16> to vector<2x512xbf16>
    %c6_80 = arith.constant 6 : index
    %c0_81 = arith.constant 0 : index
    %102 = vector.load %arg13[%c6_80, %c0_81] : memref<20x512xbf16, #tpu.memory_space<vmem>>, vector<2x512xbf16>
    tpu.vector_store %arg13[%c6_80, %c0_81], %101 {strides = array<i32>} : memref<20x512xbf16, #tpu.memory_space<vmem>>, vector<2x512xbf16>,
    %103 = vector.extract_strided_slice %90 {offsets = [12, 0], sizes = [2, 512], strides = [1, 1]} : vector<16x512xbf16> to vector<2x512xbf16>
    %c16_82 = arith.constant 16 : index
    %c0_83 = arith.constant 0 : index
    %104 = vector.load %arg13[%c16_82, %c0_83] : memref<20x512xbf16, #tpu.memory_space<vmem>>, vector<2x512xbf16>
    tpu.vector_store %arg13[%c16_82, %c0_83], %103 {strides = array<i32>} : memref<20x512xbf16, #tpu.memory_space<vmem>>, vector<2x512xbf16>,
    %105 = vector.extract_strided_slice %90 {offsets = [14, 0], sizes = [2, 512], strides = [1, 1]} : vector<16x512xbf16> to vector<2x512xbf16>
    %c8_84 = arith.constant 8 : index
    %c0_85 = arith.constant 0 : index
    %106 = vector.load %arg13[%c8_84, %c0_85] : memref<20x512xbf16, #tpu.memory_space<vmem>>, vector<2x512xbf16>
    tpu.vector_store %arg13[%c8_84, %c0_85], %105 {strides = array<i32>} : memref<20x512xbf16, #tpu.memory_space<vmem>>, vector<2x512xbf16>,
    %c1_i32_86 = arith.constant 1 : i32
    %107 = tpu.memref_slice %arg19[%c1_i32_86] : memref<4x!tpu.dma_semaphore, #tpu.memory_space<semaphore_mem>> -> memref<1x!tpu.dma_semaphore, #tpu.memory_space<semaphore_mem>>
    %108 = tpu.memref_squeeze %107 : memref<1x!tpu.dma_semaphore, #tpu.memory_space<semaphore_mem>> -> memref<!tpu.dma_semaphore, #tpu.memory_space<semaphore_mem>>
    tpu.wait_dma2 semaphore(%108 : memref<!tpu.dma_semaphore, #tpu.memory_space<semaphore_mem>>) src(%arg8 : memref<3x512x512xbf16, #tpu.memory_space<any>>) dst(%arg16 : memref<3x512x512xbf16, #tpu.memory_space<vmem>>)
    %c0_87 = arith.constant 0 : index
    %c0_88 = arith.constant 0 : index
    %109 = vector.load %arg13[%c0_87, %c0_88] : memref<20x512xbf16, #tpu.memory_space<vmem>>, vector<8x512xbf16>
    %c0_89 = arith.constant 0 : index
    %c0_90 = arith.constant 0 : index
    %c0_91 = arith.constant 0 : index
    %110 = vector.load %arg16[%c0_89, %c0_90, %c0_91] : memref<3x512x512xbf16, #tpu.memory_space<vmem>>, vector<1x512x512xbf16>
    %111 = vector.shape_cast %110 : vector<1x512x512xbf16> to vector<512x512xbf16>
    %cst_92 = arith.constant dense<0.000000e+00> : vector<8x512xf32>
    %112 = tpu.matmul %109, %111, %cst_92 {dimension_numbers = #tpu.dot_dimension_numbers<[1], [0], [0], [1], [0, 0, 1, 1], [], []>} : vector<8x512xbf16>, vector<512x512xbf16>, vector<8x512xf32> -> vector<8x512xf32>
    %c10_93 = arith.constant 10 : index
    %c0_94 = arith.constant 0 : index
    %113 = vector.load %arg13[%c10_93, %c0_94] : memref<20x512xbf16, #tpu.memory_space<vmem>>, vector<8x512xbf16>
    %c1_95 = arith.constant 1 : index
    %c0_96 = arith.constant 0 : index
    %c0_97 = arith.constant 0 : index
    %114 = vector.load %arg16[%c1_95, %c0_96, %c0_97] : memref<3x512x512xbf16, #tpu.memory_space<vmem>>, vector<1x512x512xbf16>
    %115 = vector.shape_cast %114 : vector<1x512x512xbf16> to vector<512x512xbf16>
    %cst_98 = arith.constant dense<0.000000e+00> : vector<8x512xf32>
    %116 = tpu.matmul %113, %115, %cst_98 {dimension_numbers = #tpu.dot_dimension_numbers<[1], [0], [0], [1], [0, 0, 1, 1], [], []>} : vector<8x512xbf16>, vector<512x512xbf16>, vector<8x512xf32> -> vector<8x512xf32>
    %117 = arith.addf %112, %116 : vector<8x512xf32>
    %c2_99 = arith.constant 2 : index
    %c0_100 = arith.constant 0 : index
    %118 = vector.load %arg13[%c2_99, %c0_100] : memref<20x512xbf16, #tpu.memory_space<vmem>>, vector<8x512xbf16>
    %c2_101 = arith.constant 2 : index
    %c0_102 = arith.constant 0 : index
    %c0_103 = arith.constant 0 : index
    %119 = vector.load %arg16[%c2_101, %c0_102, %c0_103] : memref<3x512x512xbf16, #tpu.memory_space<vmem>>, vector<1x512x512xbf16>
    %120 = vector.shape_cast %119 : vector<1x512x512xbf16> to vector<512x512xbf16>
    %cst_104 = arith.constant dense<0.000000e+00> : vector<8x512xf32>
    %121 = tpu.matmul %118, %120, %cst_104 {dimension_numbers = #tpu.dot_dimension_numbers<[1], [0], [0], [1], [0, 0, 1, 1], [], []>} : vector<8x512xbf16>, vector<512x512xbf16>, vector<8x512xf32> -> vector<8x512xf32>
    %122 = arith.addf %117, %121 : vector<8x512xf32>
    %c0_105 = arith.constant 0 : index
    %c0_106 = arith.constant 0 : index
    %123 = vector.load %arg4[%c0_105, %c0_106] : memref<1x512xf32, #tpu.memory_space<vmem>>, vector<1x512xf32>
    %124 = vector.broadcast %123 : vector<1x512xf32> to vector<8x512xf32>
    %125 = arith.addf %122, %124 : vector<8x512xf32>
    %cst_107 = arith.constant 0.000000e+00 : f32
    %126 = vector.broadcast %cst_107 : f32 to vector<8x512xf32>
    %127 = arith.maximumf %125, %126 : vector<8x512xf32>
    %128 = arith.truncf %127 : vector<8x512xf32> to vector<8x512xbf16>
    %129 = vector.extract_strided_slice %128 {offsets = [0, 0], sizes = [2, 512], strides = [1, 1]} : vector<8x512xbf16> to vector<2x512xbf16>
    %c6_108 = arith.constant 6 : index
    %c0_109 = arith.constant 0 : index
    %130 = vector.load %arg14[%c6_108, %c0_109] : memref<12x512xbf16, #tpu.memory_space<vmem>>, vector<2x512xbf16>
    tpu.vector_store %arg14[%c6_108, %c0_109], %129 {strides = array<i32>} : memref<12x512xbf16, #tpu.memory_space<vmem>>, vector<2x512xbf16>,
    %131 = vector.extract_strided_slice %128 {offsets = [2, 0], sizes = [2, 512], strides = [1, 1]} : vector<8x512xbf16> to vector<2x512xbf16>
    %c2_110 = arith.constant 2 : index
    %c0_111 = arith.constant 0 : index
    %132 = vector.load %arg14[%c2_110, %c0_111] : memref<12x512xbf16, #tpu.memory_space<vmem>>, vector<2x512xbf16>
    tpu.vector_store %arg14[%c2_110, %c0_111], %131 {strides = array<i32>} : memref<12x512xbf16, #tpu.memory_space<vmem>>, vector<2x512xbf16>,
    %133 = vector.extract_strided_slice %128 {offsets = [4, 0], sizes = [2, 512], strides = [1, 1]} : vector<8x512xbf16> to vector<2x512xbf16>
    %c8_112 = arith.constant 8 : index
    %c0_113 = arith.constant 0 : index
    %134 = vector.load %arg14[%c8_112, %c0_113] : memref<12x512xbf16, #tpu.memory_space<vmem>>, vector<2x512xbf16>
    tpu.vector_store %arg14[%c8_112, %c0_113], %133 {strides = array<i32>} : memref<12x512xbf16, #tpu.memory_space<vmem>>, vector<2x512xbf16>,
    %135 = vector.extract_strided_slice %128 {offsets = [6, 0], sizes = [2, 512], strides = [1, 1]} : vector<8x512xbf16> to vector<2x512xbf16>
    %c4_114 = arith.constant 4 : index
    %c0_115 = arith.constant 0 : index
    %136 = vector.load %arg14[%c4_114, %c0_115] : memref<12x512xbf16, #tpu.memory_space<vmem>>, vector<2x512xbf16>
    tpu.vector_store %arg14[%c4_114, %c0_115], %135 {strides = array<i32>} : memref<12x512xbf16, #tpu.memory_space<vmem>>, vector<2x512xbf16>,
    %c2_i32_116 = arith.constant 2 : i32
    %137 = tpu.memref_slice %arg19[%c2_i32_116] : memref<4x!tpu.dma_semaphore, #tpu.memory_space<semaphore_mem>> -> memref<1x!tpu.dma_semaphore, #tpu.memory_space<semaphore_mem>>
    %138 = tpu.memref_squeeze %137 : memref<1x!tpu.dma_semaphore, #tpu.memory_space<semaphore_mem>> -> memref<!tpu.dma_semaphore, #tpu.memory_space<semaphore_mem>>
    tpu.wait_dma2 semaphore(%138 : memref<!tpu.dma_semaphore, #tpu.memory_space<semaphore_mem>>) src(%arg9 : memref<3x512x512xbf16, #tpu.memory_space<any>>) dst(%arg17 : memref<3x512x512xbf16, #tpu.memory_space<vmem>>)
    %c0_117 = arith.constant 0 : index
    %c0_118 = arith.constant 0 : index
    %139 = vector.load %arg14[%c0_117, %c0_118] : memref<12x512xbf16, #tpu.memory_space<vmem>>, vector<4x512xbf16>
    %c0_119 = arith.constant 0 : index
    %c0_120 = arith.constant 0 : index
    %c0_121 = arith.constant 0 : index
    %140 = vector.load %arg17[%c0_119, %c0_120, %c0_121] : memref<3x512x512xbf16, #tpu.memory_space<vmem>>, vector<1x512x512xbf16>
    %141 = vector.shape_cast %140 : vector<1x512x512xbf16> to vector<512x512xbf16>
    %cst_122 = arith.constant dense<0.000000e+00> : vector<4x512xf32>
    %142 = tpu.matmul %139, %141, %cst_122 {dimension_numbers = #tpu.dot_dimension_numbers<[1], [0], [0], [1], [0, 0, 1, 1], [], []>} : vector<4x512xbf16>, vector<512x512xbf16>, vector<4x512xf32> -> vector<4x512xf32>
    %c6_123 = arith.constant 6 : index
    %c0_124 = arith.constant 0 : index
    %143 = vector.load %arg14[%c6_123, %c0_124] : memref<12x512xbf16, #tpu.memory_space<vmem>>, vector<4x512xbf16>
    %c1_125 = arith.constant 1 : index
    %c0_126 = arith.constant 0 : index
    %c0_127 = arith.constant 0 : index
    %144 = vector.load %arg17[%c1_125, %c0_126, %c0_127] : memref<3x512x512xbf16, #tpu.memory_space<vmem>>, vector<1x512x512xbf16>
    %145 = vector.shape_cast %144 : vector<1x512x512xbf16> to vector<512x512xbf16>
    %cst_128 = arith.constant dense<0.000000e+00> : vector<4x512xf32>
    %146 = tpu.matmul %143, %145, %cst_128 {dimension_numbers = #tpu.dot_dimension_numbers<[1], [0], [0], [1], [0, 0, 1, 1], [], []>} : vector<4x512xbf16>, vector<512x512xbf16>, vector<4x512xf32> -> vector<4x512xf32>
    %147 = arith.addf %142, %146 : vector<4x512xf32>
    %c2_129 = arith.constant 2 : index
    %c0_130 = arith.constant 0 : index
    %148 = vector.load %arg14[%c2_129, %c0_130] : memref<12x512xbf16, #tpu.memory_space<vmem>>, vector<4x512xbf16>
    %c2_131 = arith.constant 2 : index
    %c0_132 = arith.constant 0 : index
    %c0_133 = arith.constant 0 : index
    %149 = vector.load %arg17[%c2_131, %c0_132, %c0_133] : memref<3x512x512xbf16, #tpu.memory_space<vmem>>, vector<1x512x512xbf16>
    %150 = vector.shape_cast %149 : vector<1x512x512xbf16> to vector<512x512xbf16>
    %cst_134 = arith.constant dense<0.000000e+00> : vector<4x512xf32>
    %151 = tpu.matmul %148, %150, %cst_134 {dimension_numbers = #tpu.dot_dimension_numbers<[1], [0], [0], [1], [0, 0, 1, 1], [], []>} : vector<4x512xbf16>, vector<512x512xbf16>, vector<4x512xf32> -> vector<4x512xf32>
    %152 = arith.addf %147, %151 : vector<4x512xf32>
    %c0_135 = arith.constant 0 : index
    %c0_136 = arith.constant 0 : index
    %153 = vector.load %arg5[%c0_135, %c0_136] : memref<1x512xf32, #tpu.memory_space<vmem>>, vector<1x512xf32>
    %154 = vector.broadcast %153 : vector<1x512xf32> to vector<4x512xf32>
    %155 = arith.addf %152, %154 : vector<4x512xf32>
    %c3_i32_137 = arith.constant 3 : i32
    %156 = tpu.memref_slice %arg19[%c3_i32_137] : memref<4x!tpu.dma_semaphore, #tpu.memory_space<semaphore_mem>> -> memref<1x!tpu.dma_semaphore, #tpu.memory_space<semaphore_mem>>
    %157 = tpu.memref_squeeze %156 : memref<1x!tpu.dma_semaphore, #tpu.memory_space<semaphore_mem>> -> memref<!tpu.dma_semaphore, #tpu.memory_space<semaphore_mem>>
    tpu.wait_dma2 semaphore(%157 : memref<!tpu.dma_semaphore, #tpu.memory_space<semaphore_mem>>) src(%arg10 : memref<2x512x128xbf16, #tpu.memory_space<any>>) dst(%arg18 : memref<2x512x128xbf16, #tpu.memory_space<vmem>>)
    %158 = vector.extract_strided_slice %155 {offsets = [0, 0], sizes = [2, 512], strides = [1, 1]} : vector<4x512xf32> to vector<2x512xf32>
    %159 = arith.truncf %158 : vector<2x512xf32> to vector<2x512xbf16>
    %c0_138 = arith.constant 0 : index
    %c0_139 = arith.constant 0 : index
    %c0_140 = arith.constant 0 : index
    %160 = vector.load %arg18[%c0_138, %c0_139, %c0_140] : memref<2x512x128xbf16, #tpu.memory_space<vmem>>, vector<1x512x128xbf16>
    %161 = vector.shape_cast %160 : vector<1x512x128xbf16> to vector<512x128xbf16>
    %cst_141 = arith.constant dense<0.000000e+00> : vector<2x128xf32>
    %162 = tpu.matmul %159, %161, %cst_141 {dimension_numbers = #tpu.dot_dimension_numbers<[1], [0], [0], [1], [0, 0, 1, 1], [], []>} : vector<2x512xbf16>, vector<512x128xbf16>, vector<2x128xf32> -> vector<2x128xf32>
    %163 = vector.extract_strided_slice %155 {offsets = [2, 0], sizes = [2, 512], strides = [1, 1]} : vector<4x512xf32> to vector<2x512xf32>
    %164 = arith.truncf %163 : vector<2x512xf32> to vector<2x512xbf16>
    %c1_142 = arith.constant 1 : index
    %c0_143 = arith.constant 0 : index
    %c0_144 = arith.constant 0 : index
    %165 = vector.load %arg18[%c1_142, %c0_143, %c0_144] : memref<2x512x128xbf16, #tpu.memory_space<vmem>>, vector<1x512x128xbf16>
    %166 = vector.shape_cast %165 : vector<1x512x128xbf16> to vector<512x128xbf16>
    %cst_145 = arith.constant dense<0.000000e+00> : vector<2x128xf32>
    %167 = tpu.matmul %164, %166, %cst_145 {dimension_numbers = #tpu.dot_dimension_numbers<[1], [0], [0], [1], [0, 0, 1, 1], [], []>} : vector<2x512xbf16>, vector<512x128xbf16>, vector<2x128xf32> -> vector<2x128xf32>
    %168 = arith.addf %162, %167 : vector<2x128xf32>
    %c0_146 = arith.constant 0 : index
    %c0_147 = arith.constant 0 : index
    %169 = vector.load %arg6[%c0_146, %c0_147] : memref<1x128xf32, #tpu.memory_space<vmem>>, vector<1x128xf32>
    %170 = vector.broadcast %169 : vector<1x128xf32> to vector<2x128xf32>
    %171 = arith.addf %168, %170 : vector<2x128xf32>
    %c0_148 = arith.constant 0 : index
    %c0_149 = arith.constant 0 : index
    %172 = vector.load %arg11[%c0_148, %c0_149] : memref<2x128xf32, #tpu.memory_space<vmem>>, vector<2x128xf32>
    tpu.vector_store %arg11[%c0_148, %c0_149], %171 {strides = array<i32>} : memref<2x128xf32, #tpu.memory_space<vmem>>, vector<2x128xf32>,
    return
  }
}

</mosaic_0001>

<bundles_post_ra>
// kernel: encoder_forward.1
= control target key start
LH: loop header
LB: loop body
LE: loop exit
PB: predicated region body
PF: predicated region fallthrough
CT: control target
= control target key end

     0   :  { %16 = vsyncpa [#allocation11], 0  ;;  %s6196_s0 = inlined_call_operand.vmem [shape: bf16[36,128], index: 0, kind: input, shape index: {}]   ;;  %s6197_s1 = inlined_call_operand.hbm [shape: bf16[3,128,512], index: 1, kind: input, shape index: {}]   ;;  %s6198_s2 = inlined_call_operand.hbm [shape: f32[1,512], index: 2, kind: input, shape index: {}]   ;;  %s6199_s3 = inlined_call_operand.hbm [shape: f32[1,512], index: 3, kind: input, shape index: {}]   ;;  %s6200_s4 = inlined_call_operand.hbm [shape: f32[1,512], index: 4, kind: input, shape index: {}]   ;;  %s6201_s5 = inlined_call_operand.hbm [shape: f32[1,512], index: 5, kind: input, shape index: {}]   ;;  %s6202_s6 = inlined_call_operand.hbm [shape: f32[1,128], index: 6, kind: input, shape index: {}]   ;;  %s6203_s7 = inlined_call_operand.hbm [shape: bf16[3,512,512], index: 7, kind: input, shape index: {}]   ;;  %s6204_s8 = inlined_call_operand.hbm [shape: bf16[3,512,512], index: 8, kind: input, shape index: {}]   ;;  %s6205_s9 = inlined_call_operand.hbm [shape: bf16[3,512,512], index: 9, kind: input, shape index: {}]   ;;  %s6206_s10 = inlined_call_operand.hbm [shape: bf16[2,512,128], index: 10, kind: input, shape index: {}]   ;;  %s6207_s11 = inlined_call_operand.hbm [shape: f32[2,128], index: 11, kind: output, shape index: {}]  }
   0x1   :  { %17 = vsyncpa [#allocation14], 0 }
   0x2   :  { %18 = vsyncpa [#allocation17], 0 }
   0x3   :  { %19 = vsyncpa [#allocation20], 0 }
   0x4   :  { %20 = vsyncpa [#allocation12], 0  ;;  %s5596_s17 = smov [#allocation13]   ;;  %s5597_s19 = smov [#allocation16]  }
   0x5   :  { %s41_s18 = sshll.u32 %s5596_s17, 4  ;;  %s61_s20 = sshll.u32 %s5597_s19, 4  ;;  %s42_s18 = int_to_ptr.vmem [resolvable:$true] %s41_s18  ;;  %s62_s20 = int_to_ptr.vmem [resolvable:$true] %s61_s20 }
   0x6   :  { %s5402_s23 = scalar_lea.hbm %s6198_s2, 64 }
   0x7   :  { %p5403_p0 = scmp.ne.s32.totalorder %s6198_s2, %s5402_s23  ;;  %p5406_p1 = scmp.lt.u32.totalorder %s5402_s23, %s6198_s2 }
   0x9   :  { %p5408_p2 = pnand %p5406_p1, %p5403_p0 }
   0xb   :  { %5411 = shalt.err (!%p5408_p2)
}
   0xc   :  { %s5412_s28 = scalar_lea.vmem %s42_s18, 64  ;;  %p5417_p4 = scmp.lt.s32.totalorder %s42_s18, %s42_s18 }
   0xd   :  { %p5413_p3 = scmp.ne.s32.totalorder %s42_s18, %s5412_s28  ;;  %p5418_p5 = scmp.lt.s32.totalorder %s5412_s28, %s5412_s28 }
   0xf   :  { %p5419_p6 = por %p5418_p5, %p5417_p4 }
  0x11   :  { %p5420_p7 = pnand %p5419_p6, %p5413_p3 }
  0x13   :  { %5423 = shalt.err (!%p5420_p7)
}
  0x14   :  { %44 = dma.hbm_to_vmem [thread:$0]  %s6198_s2, 64, %s42_s18, [#allocation14]  }
  0x15   :  { %s5424_s14 = scalar_lea.hbm %s6200_s4, 64 }
  0x16   :  { %p5425_p8 = scmp.ne.s32.totalorder %s6200_s4, %s5424_s14  ;;  %p5428_p9 = scmp.lt.u32.totalorder %s5424_s14, %s6200_s4 }
  0x18   :  { %p5430_p10 = pnand %p5428_p9, %p5425_p8 }
  0x1a   :  { %5433 = shalt.err (!%p5430_p10)
}
  0x1b   :  { %s5434_s21 = scalar_lea.vmem %s62_s20, 64  ;;  %p5439_p12 = scmp.lt.s32.totalorder %s62_s20, %s62_s20 }
  0x1c   :  { %p5435_p11 = scmp.ne.s32.totalorder %s62_s20, %s5434_s21  ;;  %p5440_p13 = scmp.lt.s32.totalorder %s5434_s21, %s5434_s21 }
  0x1e   :  { %p5441_p0 = por %p5440_p13, %p5439_p12 }
  0x20   :  { %p5442_p1 = pnand %p5441_p0, %p5435_p11 }
  0x22   :  { %5445 = shalt.err (!%p5442_p1)
}
  0x23   :  { %64 = dma.hbm_to_vmem [thread:$0]  %s6200_s4, 64, %s62_s20, [#allocation17]  }
  0x24   :  { %s5598_s22 = smov [#allocation10]   ;;  %s5446_s26 = scalar_lea.hbm %s6197_s1, 12288 }
  0x25   :  { %s28_s23 = sshll.u32 %s5598_s22, 4  ;;  %p5447_p2 = scmp.ne.s32.totalorder %s6197_s1, %s5446_s26  ;;  %s29_s23 = int_to_ptr.vmem [resolvable:$true] %s28_s23 }
  0x26   :  { %p5450_p3 = scmp.lt.u32.totalorder %s5446_s26, %s6197_s1 }
  0x28   :  { %p5452_p4 = pnand %p5450_p3, %p5447_p2 }
  0x2a   :  { %5455 = shalt.err (!%p5452_p4)
}
  0x2b   :  { %s5456_s12 = scalar_lea.vmem %s29_s23, 12288  ;;  %p5461_p6 = scmp.lt.s32.totalorder %s29_s23, %s29_s23 }
  0x2c   :  { %p5457_p5 = scmp.ne.s32.totalorder %s29_s23, %s5456_s12  ;;  %p5462_p7 = scmp.lt.s32.totalorder %s5456_s12, %s5456_s12 }
  0x2e   :  { %p5463_p8 = por %p5462_p7, %p5461_p6 }
  0x30   :  { %p5464_p9 = pnand %p5463_p8, %p5457_p5 }
  0x32   :  { %5467 = shalt.err (!%p5464_p9)
}
  0x33   :  { %s5599_s4 = smov 256   ;;  %s5600_s20 = smov 16  }
  0x34   :  { %34 = dma.hbm_to_vmem [thread:$0]  %s6197_s1, 12288, %s29_s23, [#allocation11], %s5599_s4, %s5599_s4, %s5600_s20  }
  0x35   :  { %s5601_s15 = smov [#allocation15]   ;;  %s5602_s17 = smov [#allocation18]  }
  0x36   :  { %s51_s16 = sshll.u32 %s5601_s15, 4  ;;  %s71_s19 = sshll.u32 %s5602_s17, 4  ;;  %s52_s16 = int_to_ptr.vmem [resolvable:$true] %s51_s16  ;;  %s72_s19 = int_to_ptr.vmem [resolvable:$true] %s71_s19 }
  0x37   :  { %s5468_s18 = scalar_lea.hbm %s6199_s3, 64 }
  0x38   :  { %p5469_p10 = scmp.ne.s32.totalorder %s6199_s3, %s5468_s18  ;;  %p5472_p11 = scmp.lt.u32.totalorder %s5468_s18, %s6199_s3 }
  0x3a   :  { %p5474_p12 = pnand %p5472_p11, %p5469_p10 }
  0x3c   :  { %5477 = shalt.err (!%p5474_p12)
}
  0x3d   :  { %s5478_s1 = scalar_lea.vmem %s52_s16, 64  ;;  %p5483_p0 = scmp.lt.s32.totalorder %s52_s16, %s52_s16 }
  0x3e   :  { %p5479_p13 = scmp.ne.s32.totalorder %s52_s16, %s5478_s1  ;;  %p5484_p1 = scmp.lt.s32.totalorder %s5478_s1, %s5478_s1 }
  0x40   :  { %p5485_p2 = por %p5484_p1, %p5483_p0 }
  0x42   :  { %p5486_p3 = pnand %p5485_p2, %p5479_p13 }
  0x44   :  { %5489 = shalt.err (!%p5486_p3)
}
  0x45   :  { %54 = dma.hbm_to_vmem [thread:$0]  %s6199_s3, 64, %s52_s16, [#allocation14]  }
  0x46   :  { %s5490_s30 = scalar_lea.hbm %s6201_s5, 64 }
  0x47   :  { %p5491_p4 = scmp.ne.s32.totalorder %s6201_s5, %s5490_s30  ;;  %p5494_p5 = scmp.lt.u32.totalorder %s5490_s30, %s6201_s5 }
  0x49   :  { %p5496_p6 = pnand %p5494_p5, %p5491_p4 }
  0x4b   :  { %5499 = shalt.err (!%p5496_p6)
}
  0x4c   :  { %s5500_s15 = scalar_lea.vmem %s72_s19, 64  ;;  %p5505_p8 = scmp.lt.s32.totalorder %s72_s19, %s72_s19 }
  0x4d   :  { %p5501_p7 = scmp.ne.s32.totalorder %s72_s19, %s5500_s15  ;;  %p5506_p9 = scmp.lt.s32.totalorder %s5500_s15, %s5500_s15 }
  0x4f   :  { %p5507_p10 = por %p5506_p9, %p5505_p8 }
  0x51   :  { %p5508_p11 = pnand %p5507_p10, %p5501_p7 }
  0x53   :  { %5511 = shalt.err (!%p5508_p11)
}
  0x54   :  { %74 = dma.hbm_to_vmem [thread:$0]  %s6201_s5, 64, %s72_s19, [#allocation17]  }
  0x55   :  { %s5603_s17 = smov [#allocation19]   ;;  %s5512_s22 = scalar_lea.hbm %s6202_s6, 16 }
  0x56   :  { %s81_s21 = sshll.u32 %s5603_s17, 4  ;;  %p5513_p12 = scmp.ne.s32.totalorder %s6202_s6, %s5512_s22  ;;  %s82_s21 = int_to_ptr.vmem [resolvable:$true] %s81_s21 }
  0x57   :  { %p5516_p13 = scmp.lt.u32.totalorder %s5512_s22, %s6202_s6 }
  0x59   :  { %p5518_p0 = pnand %p5516_p13, %p5513_p12 }
  0x5b   :  { %5521 = shalt.err (!%p5518_p0)
}
  0x5c   :  { %s5522_s23 = scalar_lea.vmem %s82_s21, 16  ;;  %s5526_s5 = scalar_lea.vmem %s82_s21, 32 }
  0x5d   :  { %p5523_p1 = scmp.ne.s32.totalorder %s82_s21, %s5522_s23  ;;  %p5527_p2 = scmp.lt.s32.totalorder %s82_s21, %s82_s21 }
  0x5e   :  { %p5528_p3 = scmp.lt.s32.totalorder %s5526_s5, %s5522_s23 }
  0x60   :  { %p5529_p4 = por %p5528_p3, %p5527_p2 }
  0x62   :  { %p5530_p5 = pnand %p5529_p4, %p5523_p1 }
  0x64   :  { %5533 = shalt.err (!%p5530_p5)
}
  0x65   :  { %84 = dma.hbm_to_vmem [thread:$0]  %s6202_s6, 16, %s82_s21, [#allocation20]  }
  0x66   :  { %5578 = dma.done.wait [#allocation11], 12288  }
  0x67   :  { %5579 = vsyncadd [#allocation11], 4294955008 }
  0x68   :  { %5580 = dma.done.wait [#allocation14], 128  }
  0x69   :  { %5581 = vsyncadd [#allocation14], 4294967168 }
  0x6a   :  { %5582 = dma.done.wait [#allocation17], 128  }
  0x6b   :  { %5583 = vsyncadd [#allocation17], 4294967168 }
  0x6c   :  { %5584 = dma.done.wait [#allocation20], 16  }
  0x6d   :  { %5585 = vsyncadd [#allocation20], 4294967280  ;;  %s108_s28 = sld [smem:[#allocation0]]   ;;  %s5604_s29 = smov 512   ;;  %v5605_v0 = vmov 0   ;;  %vm317_vm0 = vcmask 1046528  }
  0x6e   :  { %120 = sst [smem:[#allocation23]] %s5604_s29  ;;  %517 = vmatprep.mubr.bf16.mxu0 %v5605_v0  ;;  %570 = vmatprep.mubr.bf16.mxu1 %v5605_v0  ;;  %s5606_s6 = smov 4   ;;  %vm903_vm1 = vcmask 1045504  }
  0x6f   :  { %122 = sst [smem:[#allocation23 + $0x1]] %s5604_s29  ;;  %s5607_s30 = smov 64  }
  0x70   :  { %124 = sst [smem:[#allocation23 + $0x2]] %s5606_s6  ;;  %s5608_s12 = smov [#allocation5]  }
  0x71   :  { %126 = sst [smem:[#allocation23 + $0x3]] %s5607_s30  ;;  %s116_s20 = sshll.u32 %s5608_s12, 4  ;;  %s117_s20 = int_to_ptr.vmem [resolvable:$true] %s116_s20 }
  0x72   :  { %132 = sst [smem:[#allocation23 + $0x6]] %s5599_s4  ;;  %s5609_s15 = smov 128  }
  0x73   :  { %134 = sst [smem:[#allocation23 + $0x7]] %s5607_s30  ;;  %s4816_s13 = sshll.u32 %s108_s28, 26 }
  0x74   :  { %136 = sst [smem:[#allocation23 + $0x8]] %s5606_s6  ;;  %s5764_s14 = sadd.s32 134217728, %s4816_s13 }
  0x75   :  { %128 = sst [smem:[#allocation23 + $0x4]] %s5609_s15  ;;  %s5610_s3 = smov 2  }
  0x76   :  { %130 = sst [smem:[#allocation23 + $0x5]] %s5610_s3  ;;  %s5611_s16 = smov [#allocation9]  }
  0x77   :  { %s5612_s17 = smov [#allocation22]   ;;  %s5613_s18 = smov [#allocation6]  }
  0x78   :  { %138 = dma.general %s6203_s7, 49152, %s117_s20, %s5611_s16, %s5612_s17, [#allocation23], %s5764_s14, 0  }
  0x79   :  { %155 = sst [smem:[#allocation25]] %s5604_s29  ;;  %s151_s22 = sshll.u32 %s5613_s18, 4  ;;  %s152_s22 = int_to_ptr.vmem [resolvable:$true] %s151_s22 }
  0x7a   :  { %157 = sst [smem:[#allocation25 + $0x1]] %s5604_s29  ;;  %s5614_s7 = smov [#allocation9 + $0x1]  }
  0x7b   :  { %159 = sst [smem:[#allocation25 + $0x2]] %s5606_s6  ;;  %s5615_s24 = smov [#allocation24]  }
  0x7c   :  { %161 = sst [smem:[#allocation25 + $0x3]] %s5607_s30  ;;  %s5616_s1 = smov [#allocation7]  }
  0x7d   :  { %163 = sst [smem:[#allocation25 + $0x4]] %s5609_s15  ;;  %s186_s23 = sshll.u32 %s5616_s1, 4  ;;  %s187_s23 = int_to_ptr.vmem [resolvable:$true] %s186_s23 }
  0x7e   :  { %165 = sst [smem:[#allocation25 + $0x5]] %s5610_s3  ;;  %s5618_s5 = smov [#allocation26]  }
  0x7f   :  { %167 = sst [smem:[#allocation25 + $0x6]] %s5599_s4  ;;  %s5619_s21 = smov [#allocation8]  }
  0x80   :  { %169 = sst [smem:[#allocation25 + $0x7]] %s5607_s30  ;;  %s217_s2 = sshll.u32 %s5619_s21, 4  ;;  %s218_s2 = int_to_ptr.vmem [resolvable:$true] %s217_s2 }
  0x81   :  { %171 = sst [smem:[#allocation25 + $0x8]] %s5606_s6 }
  0x82   :  { %173 = dma.general %s6204_s8, 49152, %s152_s22, %s5614_s7, %s5615_s24, [#allocation25], %s5764_s14, 0  }
  0x83   :  { %190 = sst [smem:[#allocation27]] %s5604_s29  ;;  %s5617_s8 = smov [#allocation9 + $0x2]  }
  0x84   :  { %192 = sst [smem:[#allocation27 + $0x1]] %s5604_s29 }
  0x85   :  { %194 = sst [smem:[#allocation27 + $0x2]] %s5606_s6 }
  0x86   :  { %196 = sst [smem:[#allocation27 + $0x3]] %s5607_s30 }
  0x87   :  { %198 = sst [smem:[#allocation27 + $0x4]] %s5609_s15 }
  0x88   :  { %200 = sst [smem:[#allocation27 + $0x5]] %s5610_s3 }
  0x89   :  { %202 = sst [smem:[#allocation27 + $0x6]] %s5599_s4 }
  0x8a   :  { %204 = sst [smem:[#allocation27 + $0x7]] %s5607_s30 }
  0x8b   :  { %206 = sst [smem:[#allocation27 + $0x8]] %s5606_s6 }
  0x8c   :  { %208 = dma.general %s6205_s9, 49152, %s187_s23, %s5617_s8, %s5618_s5, [#allocation27], %s5764_s14, 0  }
  0x8d   :  { %221 = vst [vmem:[#allocation2] sm:$0x11] %v5605_v0  ;;  %222 = vst [vmem:[#allocation2 + $0x8] sm:$0x11] %v5605_v0  ;;  %v5200_v1 = vld [vmem:[#allocation10 + $0x104] ss:$16 sps:$4 sm:$0xff]  }
  0x8e   :  { %225 = vst [vmem:[#allocation3] sm:$0x11] %v5605_v0  ;;  %226 = vst [vmem:[#allocation3 + $0x8] sm:$0x11] %v5605_v0  ;;  %v5202_v2 = vld [vmem:[#allocation10 + $0x10c] ss:$16 sps:$4 sm:$0xff]   ;;  %485 = vmatprep.subr.bf16.mxu0 %v5200_v1 }
  0x8f   :  { %229 = vst [vmem:[#allocation4] sm:$0x11] %v5605_v0  ;;  %230 = vst [vmem:[#allocation4 + $0x8] sm:$0x11] %v5605_v0  ;;  %v5204_v3 = vld [vmem:[#allocation10 + $0x100] ss:$16 sps:$4 sm:$0xff]   ;;  %538 = vmatprep.subr.bf16.mxu1 %v5202_v2 }
  0x90   :  { %v5205_v4 = vld [vmem:[#allocation10 + $0x108] ss:$16 sps:$4 sm:$0xff]   ;;  %v5206_v5 = vld [vmem:[#allocation10 + $0x124] ss:$16 sps:$4 sm:$0xff]   ;;  %486 = vmatpush1.bf16.msra.mxu0 %v5204_v3  ;;  %v5208_v6 = vld [vmem:[#allocation10 + $0x12c] ss:$16 sps:$4 sm:$0xff]  }
  0x91   :  { %539 = vmatpush1.bf16.msra.mxu1 %v5205_v4  ;;  %v5210_v7 = vld [vmem:[#allocation10 + $0x120] ss:$16 sps:$4 sm:$0xff]   ;;  %487 = vmatprep.subr.bf16.mxu0 %v5206_v5  ;;  %v5211_v8 = vld [vmem:[#allocation10 + $0x128] ss:$16 sps:$4 sm:$0xff]   ;;  %v5212_v9 = vld [vmem:[#allocation10 + $0x144] ss:$16 sps:$4 sm:$0xff]  }
  0x92   :  { %540 = vmatprep.subr.bf16.mxu1 %v5208_v6  ;;  %v5214_v10 = vld [vmem:[#allocation10 + $0x14c] ss:$16 sps:$4 sm:$0xff]   ;;  %v5216_v11 = vld [vmem:[#allocation10 + $0x140] ss:$16 sps:$4 sm:$0xff]   ;;  %v5217_v12 = vld [vmem:[#allocation10 + $0x148] ss:$16 sps:$4 sm:$0xff]  }
  0x93   :  { %v5218_v13 = vld [vmem:[#allocation10 + $0x164] ss:$16 sps:$4 sm:$0xff]   ;;  %v5220_v14 = vld [vmem:[#allocation10 + $0x16c] ss:$16 sps:$4 sm:$0xff]   ;;  %v5222_v15 = vld [vmem:[#allocation10 + $0x160] ss:$16 sps:$4 sm:$0xff]  }
  0x94   :  { %488 = vmatpush1.bf16.msra.mxu0 %v5210_v7  ;;  %v5223_v16 = vld [vmem:[#allocation10 + $0x168] ss:$16 sps:$4 sm:$0xff]   ;;  %v5224_v17 = vld [vmem:[#allocation10 + $0x184] ss:$16 sps:$4 sm:$0xff]   ;;  %v5226_v18 = vld [vmem:[#allocation10 + $0x18c] ss:$16 sps:$4 sm:$0xff]  }
  0x95   :  { %541 = vmatpush1.bf16.msra.mxu1 %v5211_v8  ;;  %489 = vmatprep.subr.bf16.mxu0 %v5212_v9  ;;  %v5228_v19 = vld [vmem:[#allocation10 + $0x180] ss:$16 sps:$4 sm:$0xff]   ;;  %v5229_v20 = vld [vmem:[#allocation10 + $0x188] ss:$16 sps:$4 sm:$0xff]   ;;  %v5230_v21 = vld [vmem:[#allocation10 + $0x1a4] ss:$16 sps:$4 sm:$0xff]  }
  0x96   :  { %542 = vmatprep.subr.bf16.mxu1 %v5214_v10  ;;  %v5232_v22 = vld [vmem:[#allocation10 + $0x1ac] ss:$16 sps:$4 sm:$0xff]   ;;  %v5234_v23 = vld [vmem:[#allocation10 + $0x1a0] ss:$16 sps:$4 sm:$0xff]   ;;  %v5235_v24 = vld [vmem:[#allocation10 + $0x1a8] ss:$16 sps:$4 sm:$0xff]  }
  0x97   :  { %v5236_v25 = vld [vmem:[#allocation10 + $0x1c4] ss:$16 sps:$4 sm:$0xff]   ;;  %v5238_v26 = vld [vmem:[#allocation10 + $0x1cc] ss:$16 sps:$4 sm:$0xff]   ;;  %v5240_v27 = vld [vmem:[#allocation10 + $0x1c0] ss:$16 sps:$4 sm:$0xff]  }
  0x98   :  { %490 = vmatpush1.bf16.msra.mxu0 %v5216_v11  ;;  %v5241_v28 = vld [vmem:[#allocation10 + $0x1c8] ss:$16 sps:$4 sm:$0xff]   ;;  %v5242_v29 = vld [vmem:[#allocation10 + $0x1e4] ss:$16 sps:$4 sm:$0xff]   ;;  %v5244_v30 = vld [vmem:[#allocation10 + $0x1ec] ss:$16 sps:$4 sm:$0xff]  }
  0x99   :  { %543 = vmatpush1.bf16.msra.mxu1 %v5217_v12  ;;  %491 = vmatprep.subr.bf16.mxu0 %v5218_v13  ;;  %v5801_v31 = vld [vmem:[%s6196_s0 + $0x4] sm:$0xf]  ;;  %v269_v32 = vld [vmem:[%s6196_s0] sm:$0xe]  ;;  %v5809_v33 = vld [vmem:[%s6196_s0 + $0x8] sm:$0xff]  }
  0x9a   :  { %544 = vmatprep.subr.bf16.mxu1 %v5220_v14  ;;  %v4822_v34 = vcombine.low %v269_v32, %v5801_v31  ;;  %v5246_v35 = vld [vmem:[#allocation10 + $0x1e0] ss:$16 sps:$4 sm:$0xff]   ;;  %v5247_v36 = vld [vmem:[#allocation10 + $0x1e8] ss:$16 sps:$4 sm:$0xff]   ;;  %v319_v38 = vrot.slane %v5809_v33, 1 }
  0x9b   :  { %v5250_v39 = vld [vmem:[#allocation10 + $0x4] ss:$16 sps:$4 sm:$0xff]   ;;  %v5253_v40 = vld [vmem:[#allocation10 + $0xc] ss:$16 sps:$4 sm:$0xff]   ;;  %v5248_v41 = vld [vmem:[#allocation10] ss:$16 sps:$4 sm:$0xff]  }
  0x9c   :  { %492 = vmatpush1.bf16.msra.mxu0 %v5222_v15  ;;  %v318_v37 = vrot.slane %v4822_v34, 1  ;;  %v5251_v42 = vld [vmem:[#allocation10 + $0x8] ss:$16 sps:$4 sm:$0xff]   ;;  %v5259_v44 = vld [vmem:[#allocation10 + $0x24] ss:$16 sps:$4 sm:$0xff]  }
  0x9d   :  { %545 = vmatpush1.bf16.msra.mxu1 %v5223_v16  ;;  %493 = vmatprep.subr.bf16.mxu0 %v5224_v17  ;;  %v5262_v45 = vld [vmem:[#allocation10 + $0x2c] ss:$16 sps:$4 sm:$0xff]   ;;  %v5257_v46 = vld [vmem:[#allocation10 + $0x20] ss:$16 sps:$4 sm:$0xff]   ;;  %v5260_v47 = vld [vmem:[#allocation10 + $0x28] ss:$16 sps:$4 sm:$0xff]  }
  0x9e   :  { %546 = vmatprep.subr.bf16.mxu1 %v5226_v18  ;;  %v320_v43 = vsel %vm317_vm0, %v318_v37, %v319_v38  ;;  %v5265_v48 = vld [vmem:[#allocation10 + $0x44] ss:$16 sps:$4 sm:$0xff]   ;;  %v5268_v49 = vld [vmem:[#allocation10 + $0x4c] ss:$16 sps:$4 sm:$0xff]   ;;  %v5263_v50 = vld [vmem:[#allocation10 + $0x40] ss:$16 sps:$4 sm:$0xff]  }
  0x9f   :  { %v5266_v51 = vld [vmem:[#allocation10 + $0x48] ss:$16 sps:$4 sm:$0xff]   ;;  %v5271_v52 = vld [vmem:[#allocation10 + $0x64] ss:$16 sps:$4 sm:$0xff]   ;;  %v5274_v53 = vld [vmem:[#allocation10 + $0x6c] ss:$16 sps:$4 sm:$0xff]  }
  0xa0   :  { %494 = vmatpush1.bf16.msra.mxu0 %v5228_v19  ;;  %v5293_v54 = vld [vmem:[%s6196_s0 + $0x10] ss:$0 sps:$4 sm:$0x11]   ;;  %v5272_v56 = vld [vmem:[#allocation10 + $0x68] ss:$16 sps:$4 sm:$0xff]  }
  0xa1   :  { %547 = vmatpush1.bf16.msra.mxu1 %v5229_v20  ;;  %495 = vmatprep.subr.bf16.mxu0 %v5230_v21  ;;  %v5269_v55 = vld [vmem:[#allocation10 + $0x60] ss:$16 sps:$4 sm:$0xff]   ;;  %v5277_v57 = vld [vmem:[#allocation10 + $0x84] ss:$16 sps:$4 sm:$0xff]   ;;  %v321_v58 = vrot.slane %v5293_v54, 1 }
  0xa2   :  { %548 = vmatprep.subr.bf16.mxu1 %v5232_v22  ;;  %v5280_v59 = vld [vmem:[#allocation10 + $0x8c] ss:$16 sps:$4 sm:$0xff]   ;;  %v5275_v61 = vld [vmem:[#allocation10 + $0x80] ss:$16 sps:$4 sm:$0xff]   ;;  %v5278_v62 = vld [vmem:[#allocation10 + $0x88] ss:$16 sps:$4 sm:$0xff]  }
  0xa3   :  { %v322_v60 = vsel %vm317_vm0, %v319_v38, %v321_v58  ;;  %v5283_v63 = vld [vmem:[#allocation10 + $0xa4] ss:$16 sps:$4 sm:$0xff]   ;;  %v5286_v1 = vld [vmem:[#allocation10 + $0xac] ss:$16 sps:$4 sm:$0xff]   ;;  %v5281_v2 = vld [vmem:[#allocation10 + $0xa0] ss:$16 sps:$4 sm:$0xff]  }
  0xa4   :  { %496 = vmatpush1.bf16.msra.mxu0 %v5234_v23  ;;  %v5284_v3 = vld [vmem:[#allocation10 + $0xa8] ss:$16 sps:$4 sm:$0xff]   ;;  %v5289_v4 = vld [vmem:[#allocation10 + $0xc4] ss:$16 sps:$4 sm:$0xff]   ;;  %v5292_v5 = vld [vmem:[#allocation10 + $0xcc] ss:$16 sps:$4 sm:$0xff]  }
  0xa5   :  { %549 = vmatpush1.bf16.msra.mxu1 %v5235_v24  ;;  %497 = vmatprep.subr.bf16.mxu0 %v5236_v25  ;;  %v5287_v6 = vld [vmem:[#allocation10 + $0xc0] ss:$16 sps:$4 sm:$0xff]   ;;  %v5290_v7 = vld [vmem:[#allocation10 + $0xc8] ss:$16 sps:$4 sm:$0xff]   ;;  %v5296_v8 = vld [vmem:[#allocation10 + $0xe4] ss:$16 sps:$4 sm:$0xff]  }
  0xa6   :  { %550 = vmatprep.subr.bf16.mxu1 %v5238_v26  ;;  %v5299_v9 = vld [vmem:[#allocation10 + $0xec] ss:$16 sps:$4 sm:$0xff]   ;;  %v233_v10 = vld [vmem:[%s6196_s0] sm:$0xf]  ;;  %v5297_v12 = vld [vmem:[#allocation10 + $0xe8] ss:$16 sps:$4 sm:$0xff]  }
  0xa7   :  { %v5294_v11 = vld [vmem:[#allocation10 + $0xe0] ss:$16 sps:$4 sm:$0xff]   ;;  %v5302_v13 = vld [vmem:[#allocation10 + $0x204] ss:$16 sps:$4 sm:$0xff]   ;;  %v5305_v14 = vld [vmem:[#allocation10 + $0x20c] ss:$16 sps:$4 sm:$0xff]   ;;  %v4857_v15 = vcombine.low %v233_v10, %v5801_v31 }
  0xa8   :  { %498 = vmatpush1.bf16.msra.mxu0 %v5240_v27  ;;  %v5300_v16 = vld [vmem:[#allocation10 + $0x200] ss:$16 sps:$4 sm:$0xff]   ;;  %v5303_v17 = vld [vmem:[#allocation10 + $0x208] ss:$16 sps:$4 sm:$0xff]   ;;  %v5308_v18 = vld [vmem:[#allocation10 + $0x224] ss:$16 sps:$4 sm:$0xff]  }
  0xa9   :  { %551 = vmatpush1.bf16.msra.mxu1 %v5241_v28  ;;  %499 = vmatprep.subr.bf16.mxu0 %v5242_v29  ;;  %v5311_v19 = vld [vmem:[#allocation10 + $0x22c] ss:$16 sps:$4 sm:$0xff]   ;;  %v862_v20 = vld [vmem:[%s6196_s0] sm:$0xc]  ;;  %v905_v22 = vrot.slane %v5809_v33, 2 }
  0xaa   :  { %552 = vmatprep.subr.bf16.mxu1 %v5244_v30  ;;  %v4890_v21 = vcombine.low %v862_v20, %v5801_v31  ;;  %v5306_v23 = vld [vmem:[#allocation10 + $0x220] ss:$16 sps:$4 sm:$0xff]   ;;  %v5309_v24 = vld [vmem:[#allocation10 + $0x228] ss:$16 sps:$4 sm:$0xff]   ;;  %v5314_v25 = vld [vmem:[#allocation10 + $0x244] ss:$16 sps:$4 sm:$0xff]  }
  0xab   :  { %v5317_v26 = vld [vmem:[#allocation10 + $0x24c] ss:$16 sps:$4 sm:$0xff]   ;;  %v5312_v29 = vld [vmem:[#allocation10 + $0x240] ss:$16 sps:$4 sm:$0xff]   ;;  %v5315_v30 = vld [vmem:[#allocation10 + $0x248] ss:$16 sps:$4 sm:$0xff]  }
  0xac   :  { %500 = vmatpush1.bf16.msra.mxu0 %v5246_v35  ;;  %v904_v27 = vrot.slane %v4890_v21, 2  ;;  %v5320_v31 = vld [vmem:[#allocation10 + $0x264] ss:$16 sps:$4 sm:$0xff]   ;;  %v5323_v32 = vld [vmem:[#allocation10 + $0x26c] ss:$16 sps:$4 sm:$0xff]  }
  0xad   :  { %553 = vmatpush1.bf16.msra.mxu1 %v5247_v36  ;;  %756 = vmatprep.subr.bf16.mxu0 %v5250_v39  ;;  %v5318_v34 = vld [vmem:[#allocation10 + $0x260] ss:$16 sps:$4 sm:$0xff]   ;;  %v5321_v35 = vld [vmem:[#allocation10 + $0x268] ss:$16 sps:$4 sm:$0xff]   ;;  %v5326_v36 = vld [vmem:[#allocation10 + $0x284] ss:$16 sps:$4 sm:$0xff]  }
  0xae   :  { %809 = vmatprep.subr.bf16.mxu1 %v5253_v40  ;;  %v906_v28 = vsel %vm903_vm1, %v904_v27, %v905_v22  ;;  %v5329_v37 = vld [vmem:[#allocation10 + $0x28c] ss:$16 sps:$4 sm:$0xff]   ;;  %v5324_v38 = vld [vmem:[#allocation10 + $0x280] ss:$16 sps:$4 sm:$0xff]   ;;  %v5327_v39 = vld [vmem:[#allocation10 + $0x288] ss:$16 sps:$4 sm:$0xff]  }
  0xaf   :  { %518 = vmatmul.mubr.bf16.vlgmr.msra.gmra.mrb[0].mxu0 %v320_v43  ;;  %v5332_v40 = vld [vmem:[#allocation10 + $0x2a4] ss:$16 sps:$4 sm:$0xff]  }
  0xb0   :  { %571 = vmatmul.mubr.bf16.vlgmr.msra.gmra.mrb[0].mxu1 %v320_v43  ;;  %757 = vmatpush1.bf16.msra.mxu0 %v5248_v41  ;;  %v5335_v41 = vld [vmem:[#allocation10 + $0x2ac] ss:$16 sps:$4 sm:$0xff]   ;;  %v5333_v43 = vld [vmem:[#allocation10 + $0x2a8] ss:$16 sps:$4 sm:$0xff]  }
  0xb1   :  { %810 = vmatpush1.bf16.msra.mxu1 %v5251_v42  ;;  %758 = vmatprep.subr.bf16.mxu0 %v5259_v44  ;;  %v5330_v42 = vld [vmem:[#allocation10 + $0x2a0] ss:$16 sps:$4 sm:$0xff]   ;;  %v5338_v44 = vld [vmem:[#allocation10 + $0x2c4] ss:$16 sps:$4 sm:$0xff]  }
  0xb2   :  { %811 = vmatprep.subr.bf16.mxu1 %v5262_v45  ;;  %527 = vmatprep.mubr.bf16.mxu0 %v5605_v0  ;;  %v5341_v45 = vld [vmem:[#allocation10 + $0x2cc] ss:$16 sps:$4 sm:$0xff]  }
  0xb3   :  { %580 = vmatprep.mubr.bf16.mxu1 %v5605_v0 }
  0xb4   :  { %759 = vmatpush1.bf16.msra.mxu0 %v5257_v46  ;;  %v5336_v46 = vld [vmem:[#allocation10 + $0x2c0] ss:$16 sps:$4 sm:$0xff]  }
  0xb5   :  { %812 = vmatpush1.bf16.msra.mxu1 %v5260_v47  ;;  %760 = vmatprep.subr.bf16.mxu0 %v5265_v48  ;;  %v5339_v47 = vld [vmem:[#allocation10 + $0x2c8] ss:$16 sps:$4 sm:$0xff]   ;;  %v5344_v48 = vld [vmem:[#allocation10 + $0x2e4] ss:$16 sps:$4 sm:$0xff]  }
  0xb6   :  { %813 = vmatprep.subr.bf16.mxu1 %v5268_v49  ;;  %v5347_v49 = vld [vmem:[#allocation10 + $0x2ec] ss:$16 sps:$4 sm:$0xff]  }
  0xb7   :  { %528 = vmatmul.mubr.bf16.gmra.mrb[4].mxu0 %v322_v60 }
  0xb8   :  { %761 = vmatpush1.bf16.msra.mxu0 %v5263_v50  ;;  %581 = vmatmul.mubr.bf16.gmra.mrb[4].mxu1 %v322_v60  ;;  %v5342_v50 = vld [vmem:[#allocation10 + $0x2e0] ss:$16 sps:$4 sm:$0xff]  }
  0xb9   :  { %814 = vmatpush1.bf16.msra.mxu1 %v5266_v51  ;;  %762 = vmatprep.subr.bf16.mxu0 %v5271_v52  ;;  %v5345_v51 = vld [vmem:[#allocation10 + $0x2e8] ss:$16 sps:$4 sm:$0xff]   ;;  %v5349_v52 = vld [vmem:[%s6196_s0 + $0x10] ss:$0 sps:$4 sm:$0x33]   ;;  %s5534_s0 = scalar_lea.hbm %s6206_s10, 8192 }
  0xba   :  { %815 = vmatprep.subr.bf16.mxu1 %v5274_v53  ;;  %788 = vmatprep.mubr.bf16.mxu0 %v5605_v0  ;;  %v907_v53 = vrot.slane %v5349_v52, 2  ;;  %p5535_p6 = scmp.ne.s32.totalorder %s6206_s10, %s5534_s0  ;;  %p5538_p7 = scmp.lt.u32.totalorder %s5534_s0, %s6206_s10 }
  0xbb   :  { %841 = vmatprep.mubr.bf16.mxu1 %v5605_v0 }
  0xbc   :  { %763 = vmatpush1.bf16.msra.mxu0 %v5269_v55  ;;  %v908_v54 = vsel %vm903_vm1, %v905_v22, %v907_v53  ;;  %p5540_p8 = pnand %p5538_p7, %p5535_p6 }
  0xbd   :  { %816 = vmatpush1.bf16.msra.mxu1 %v5272_v56  ;;  %764 = vmatprep.subr.bf16.mxu0 %v5277_v57 }
  0xbe   :  { %817 = vmatprep.subr.bf16.mxu1 %v5280_v59 }
  0xc0   :  { %765 = vmatpush1.bf16.msra.mxu0 %v5275_v61 }
  0xc1   :  { %818 = vmatpush1.bf16.msra.mxu1 %v5278_v62  ;;  %766 = vmatprep.subr.bf16.mxu0 %v5283_v63 }
  0xc2   :  { %819 = vmatprep.subr.bf16.mxu1 %v5286_v1 }
  0xc4   :  { %767 = vmatpush1.bf16.msra.mxu0 %v5281_v2 }
  0xc5   :  { %820 = vmatpush1.bf16.msra.mxu1 %v5284_v3  ;;  %768 = vmatprep.subr.bf16.mxu0 %v5289_v4 }
  0xc6   :  { %821 = vmatprep.subr.bf16.mxu1 %v5292_v5 }
  0xc8   :  { %769 = vmatpush1.bf16.msra.mxu0 %v5287_v6 }
  0xc9   :  { %822 = vmatpush1.bf16.msra.mxu1 %v5290_v7  ;;  %770 = vmatprep.subr.bf16.mxu0 %v5296_v8 }
  0xca   :  { %823 = vmatprep.subr.bf16.mxu1 %v5299_v9 }
  0xcc   :  { %771 = vmatpush1.bf16.msra.mxu0 %v5294_v11 }
  0xcd   :  { %824 = vmatpush1.bf16.msra.mxu1 %v5297_v12  ;;  %1071 = vmatprep.subr.bf16.mxu0 %v5302_v13 }
  0xce   :  { %1124 = vmatprep.subr.bf16.mxu1 %v5305_v14 }
  0xcf   :  { %789 = vmatmul.mubr.bf16.vlgmr.msra.gmra.mrb[0].mxu0 %v4857_v15 }
  0xd0   :  { %842 = vmatmul.mubr.bf16.vlgmr.msra.gmra.mrb[0].mxu1 %v4857_v15  ;;  %1072 = vmatpush1.bf16.msra.mxu0 %v5300_v16 }
  0xd1   :  { %1125 = vmatpush1.bf16.msra.mxu1 %v5303_v17  ;;  %1073 = vmatprep.subr.bf16.mxu0 %v5308_v18 }
  0xd2   :  { %1126 = vmatprep.subr.bf16.mxu1 %v5311_v19  ;;  %798 = vmatprep.mubr.bf16.mxu0 %v5605_v0 }
  0xd3   :  { %851 = vmatprep.mubr.bf16.mxu1 %v5605_v0 }
  0xd4   :  { %1074 = vmatpush1.bf16.msra.mxu0 %v5306_v23 }
  0xd5   :  { %1127 = vmatpush1.bf16.msra.mxu1 %v5309_v24  ;;  %1075 = vmatprep.subr.bf16.mxu0 %v5314_v25 }
  0xd6   :  { %1128 = vmatprep.subr.bf16.mxu1 %v5317_v26 }
  0xd7   :  { %799 = vmatmul.mubr.bf16.gmra.mrb[4].mxu0 %v5809_v33 }
  0xd8   :  { %852 = vmatmul.mubr.bf16.gmra.mrb[4].mxu1 %v5809_v33  ;;  %1076 = vmatpush1.bf16.msra.mxu0 %v5312_v29 }
  0xd9   :  { %1129 = vmatpush1.bf16.msra.mxu1 %v5315_v30  ;;  %1077 = vmatprep.subr.bf16.mxu0 %v5320_v31 }
  0xda   :  { %1130 = vmatprep.subr.bf16.mxu1 %v5323_v32  ;;  %1103 = vmatprep.mubr.bf16.mxu0 %v5605_v0 }
  0xdb   :  { %1156 = vmatprep.mubr.bf16.mxu1 %v5605_v0 }
  0xdc   :  { %1078 = vmatpush1.bf16.msra.mxu0 %v5318_v34 }
  0xdd   :  { %1131 = vmatpush1.bf16.msra.mxu1 %v5321_v35  ;;  %1079 = vmatprep.subr.bf16.mxu0 %v5326_v36 }
  0xde   :  { %1132 = vmatprep.subr.bf16.mxu1 %v5329_v37 }
  0xe0   :  { %1080 = vmatpush1.bf16.msra.mxu0 %v5324_v38 }
  0xe1   :  { %1133 = vmatpush1.bf16.msra.mxu1 %v5327_v39  ;;  %1081 = vmatprep.subr.bf16.mxu0 %v5332_v40 }
  0xe2   :  { %1134 = vmatprep.subr.bf16.mxu1 %v5335_v41 }
  0xe4   :  { %1082 = vmatpush1.bf16.msra.mxu0 %v5330_v42 }
  0xe5   :  { %1135 = vmatpush1.bf16.msra.mxu1 %v5333_v43  ;;  %1083 = vmatprep.subr.bf16.mxu0 %v5338_v44 }
  0xe6   :  { %1136 = vmatprep.subr.bf16.mxu1 %v5341_v45 }
  0xe8   :  { %1084 = vmatpush1.bf16.msra.mxu0 %v5336_v46 }
  0xe9   :  { %1137 = vmatpush1.bf16.msra.mxu1 %v5339_v47  ;;  %1085 = vmatprep.subr.bf16.mxu0 %v5344_v48 }
  0xea   :  { %1138 = vmatprep.subr.bf16.mxu1 %v5347_v49 }
  0xec   :  { %1086 = vmatpush1.bf16.msra.mxu0 %v5342_v50 }
  0xed   :  { %1139 = vmatpush1.bf16.msra.mxu1 %v5345_v51 }
  0xef   :  { %1104 = vmatmul.mubr.bf16.vlgmr.msra.gmra.mrb[0].mxu0 %v906_v28 }
  0xf0   :  { %1157 = vmatmul.mubr.bf16.vlgmr.msra.gmra.mrb[0].mxu1 %v906_v28  ;;  %1113 = vmatprep.mubr.bf16.mxu0 %v5605_v0 }
  0xf1   :  { %1166 = vmatprep.mubr.bf16.mxu1 %v5605_v0 }
  0xf7   :  { %1114 = vmatmul.mubr.bf16.gmra.mrb[4].mxu0 %v908_v54 }
  0xf8   :  { %1167 = vmatmul.mubr.bf16.gmra.mrb[4].mxu1 %v908_v54 }
  0xf9   :  { %5543 = shalt.err (!%p5540_p8)  }
  0xfa   :  { %s5544_s1 = scalar_lea.vmem %s218_s2, 8192  ;;  %p5549_p10 = scmp.lt.s32.totalorder %s218_s2, %s218_s2 }
  0xfb   :  { %p5545_p9 = scmp.ne.s32.totalorder %s218_s2, %s5544_s1  ;;  %p5550_p11 = scmp.lt.s32.totalorder %s5544_s1, %s5544_s1 }
  0xfd   :  { %p5551_p12 = por %p5550_p11, %p5549_p10 }
  0xff   :  { %p5552_p13 = pnand %p5551_p12, %p5545_p9 }
 0x101   :  { %5555 = shalt.err (!%p5552_p13)  }
 0x102   :  { %220 = dma.hbm_to_vmem [thread:$0]  %s6206_s10, 8192, %s218_s2, [#allocation9 + $0x3]  ;;  %v1195_v0 = vlaneseq  ;;  %v1193_v57 = vld [vmem:[#allocation13] sm:$0xf] }
 0x104   :  { %v1196_v33 = vshrl.u32 %v1195_v0, 7 }
 0x106   :  { %v5860_v55 = vsub.s32 0, %v1196_v33  ;;  %v5862_v56 = vsub.s32 2, %v1196_v33  ;;  %v5864_v58 = vsub.s32 1, %v1196_v33  ;;  %v5866_v59 = vsub.s32 3, %v1196_v33 }
 0x108   :  { %v5869_v60 = vrot.slane %v1193_v57, %v5860_v55  ;;  %v5872_v61 = vrot.slane %v1193_v57, %v5862_v56  ;;  %v5875_v62 = vrot.slane %v1193_v57, %v5864_v58  ;;  %v5878_v63 = vrot.slane %v1193_v57, %v5866_v59 }
 0x1c2   :  { %v1105_v1 = vpop.f32.mrb[0].mxu0 }
 0x1c3   :  { %v1158_v2 = vpop.f32.mrb[0].mxu1  ;;  %v1215_v3 = vadd.f32 %v5869_v60, %v1105_v1  ;;  %v1107_v5 = vpop.f32.mrb[1].mxu0 }
 0x1c4   :  { %v1217_v4 = vadd.f32 %v5872_v61, %v1158_v2  ;;  %v1160_v6 = vpop.f32.mrb[1].mxu1  ;;  %v1216_v7 = vadd.f32 %v5875_v62, %v1107_v5  ;;  %v1109_v9 = vpop.f32.mrb[2].mxu0 }
 0x1c5   :  { %v1218_v8 = vadd.f32 %v5878_v63, %v1160_v6  ;;  %v1162_v10 = vpop.f32.mrb[2].mxu1  ;;  %v1231_v11 = vmax.f32 %v1215_v3, 0.0  ;;  %v1219_v13 = vadd.f32 %v5869_v60, %v1109_v9  ;;  %v1111_v15 = vpop.f32.mrb[3].mxu0 }
 0x1c6   :  { %v1233_v12 = vmax.f32 %v1217_v4, 0.0  ;;  %v1221_v14 = vadd.f32 %v5872_v61, %v1162_v10  ;;  %v1164_v16 = vpop.f32.mrb[3].mxu1  ;;  %v1232_v17 = vmax.f32 %v1216_v7, 0.0  ;;  %v1220_v19 = vadd.f32 %v5875_v62, %v1111_v15 }
 0x1c7   :  { %v1234_v18 = vmax.f32 %v1218_v8, 0.0  ;;  %v1222_v20 = vadd.f32 %v5878_v63, %v1164_v16  ;;  %v1235_v21 = vmax.f32 %v1219_v13, 0.0 }
 0x1c8   :  { %v1237_v22 = vmax.f32 %v1221_v14, 0.0  ;;  %v5001_v23 = vpack.c.bf16 %v1232_v17, %v1231_v11  ;;  %v1236_v25 = vmax.f32 %v1220_v19, 0.0 }
 0x1c9   :  { %v5002_v24 = vpack.c.bf16 %v1234_v18, %v1233_v12  ;;  %v1238_v26 = vmax.f32 %v1222_v20, 0.0 }
 0x1ca   :  { %v1265_v27 = vrot.slane %v5001_v23, 7  ;;  %1273 = vst [vmem:[#allocation2] sm:$0x22] %v5001_v23  ;;  %1275 = vst [vmem:[#allocation2 + $0x20] sm:$0x44] %v5001_v23  ;;  %v4926_v28 = vrot.slane %v5001_v23, 9  ;;  %v5003_v34 = vpack.c.bf16 %v1236_v25, %v1235_v21 }
 0x1cb   :  { %v1266_v29 = vrot.slane %v5002_v24, 7  ;;  %1274 = vst [vmem:[#allocation2 + $0x8] sm:$0x22] %v5002_v24  ;;  %1276 = vst [vmem:[#allocation2 + $0x28] sm:$0x44] %v5002_v24  ;;  %v4927_v30 = vrot.slane %v5002_v24, 9  ;;  %v5004_v35 = vpack.c.bf16 %v1238_v26, %v1237_v22 }
 0x1cc   :  { %v1115_v31 = vpop.f32.mrb[4].mxu0  ;;  %v1168_v32 = vpop.f32.mrb[4].mxu1  ;;  %1269 = vst [vmem:[#allocation2 + $0x20] sm:$0x22] %v1265_v27  ;;  %1283 = vst [vmem:[#allocation2] sm:$0x44] %v4926_v28 }
 0x1cd   :  { %v1223_v36 = vadd.f32 %v5869_v60, %v1115_v31  ;;  %v1225_v37 = vadd.f32 %v5872_v61, %v1168_v32  ;;  %v1117_v38 = vpop.f32.mrb[5].mxu0  ;;  %v1170_v39 = vpop.f32.mrb[5].mxu1  ;;  %1270 = vst [vmem:[#allocation2 + $0x28] sm:$0x22] %v1266_v29  ;;  %1284 = vst [vmem:[#allocation2 + $0x8] sm:$0x44] %v4927_v30 }
 0x1ce   :  { %v1224_v40 = vadd.f32 %v5875_v62, %v1117_v38  ;;  %v1226_v41 = vadd.f32 %v5878_v63, %v1170_v39  ;;  %v1119_v42 = vpop.f32.mrb[6].mxu0  ;;  %v1172_v43 = vpop.f32.mrb[6].mxu1  ;;  %v1291_v44 = vrot.slane %v5003_v34, 5  ;;  %v1297_v45 = vrot.slane %v5003_v34, 6 }
 0x1cf   :  { %v4930_v46 = vrot.slane %v5003_v34, 11  ;;  %v1292_v47 = vrot.slane %v5004_v35, 5  ;;  %v1121_v48 = vpop.f32.mrb[7].mxu0  ;;  %v1174_v49 = vpop.f32.mrb[7].mxu1  ;;  %v1298_v50 = vrot.slane %v5004_v35, 6  ;;  %v4931_v51 = vrot.slane %v5004_v35, 11 }
 0x1d0   :  { %v1239_v52 = vmax.f32 %v1223_v36, 0.0  ;;  %v1241_v53 = vmax.f32 %v1225_v37, 0.0  ;;  %1295 = vst [vmem:[#allocation2 + $0x20] sm:$0x88] %v1291_v44  ;;  %1301 = vst [vmem:[#allocation2] sm:$0x88] %v1297_v45  ;;  %v1227_v57 = vadd.f32 %v5869_v60, %v1119_v42  ;;  %v1229_v2 = vadd.f32 %v5872_v61, %v1172_v43 }
 0x1d1   :  { %v1303_v54 = vrot.slane %v1297_v45, 4  ;;  %1315 = vst [vmem:[#allocation2 + $0x10] sm:$0x11] %v4930_v46  ;;  %1296 = vst [vmem:[#allocation2 + $0x28] sm:$0x88] %v1292_v47  ;;  %v1240_v0 = vmax.f32 %v1224_v40, 0.0  ;;  %v1228_v3 = vadd.f32 %v5875_v62, %v1121_v48  ;;  %v1230_v4 = vadd.f32 %v5878_v63, %v1174_v49 }
 0x1d2   :  { %v1242_v33 = vmax.f32 %v1226_v41, 0.0  ;;  %1302 = vst [vmem:[#allocation2 + $0x8] sm:$0x88] %v1298_v50  ;;  %v1304_v1 = vrot.slane %v1298_v50, 4  ;;  %1316 = vst [vmem:[#allocation2 + $0x18] sm:$0x11] %v4931_v51 }
 0x1d3   :  { %1307 = vst [vmem:[#allocation2 + $0x30] sm:$0x11] %v1303_v54  ;;  %v5005_v5 = vpack.c.bf16 %v1240_v0, %v1239_v52  ;;  %v1243_v7 = vmax.f32 %v1227_v57, 0.0  ;;  %v1245_v8 = vmax.f32 %v1229_v2, 0.0  ;;  %v1244_v9 = vmax.f32 %v1228_v3, 0.0 }
 0x1d4   :  { %v5006_v6 = vpack.c.bf16 %v1242_v33, %v1241_v53  ;;  %1308 = vst [vmem:[#allocation2 + $0x38] sm:$0x11] %v1304_v1  ;;  %v1246_v10 = vmax.f32 %v1230_v4, 0.0 }
 0x1d5   :  { %v1327_v11 = vrot.slane %v5005_v5, 7  ;;  %1335 = vst [vmem:[#allocation2 + $0x10] sm:$0x22] %v5005_v5  ;;  %1337 = vst [vmem:[#allocation2 + $0x30] sm:$0x44] %v5005_v5  ;;  %v4934_v60 = vrot.slane %v5005_v5, 9  ;;  %v5007_v13 = vpack.c.bf16 %v1244_v9, %v1243_v7 }
 0x1d6   :  { %v1328_v12 = vrot.slane %v5006_v6, 7  ;;  %1336 = vst [vmem:[#allocation2 + $0x18] sm:$0x22] %v5006_v6  ;;  %1338 = vst [vmem:[#allocation2 + $0x38] sm:$0x44] %v5006_v6  ;;  %v4935_v61 = vrot.slane %v5006_v6, 9  ;;  %v5008_v62 = vpack.c.bf16 %v1246_v10, %v1245_v8 }
 0x1d7   :  { %1331 = vst [vmem:[#allocation2 + $0x30] sm:$0x22] %v1327_v11  ;;  %1345 = vst [vmem:[#allocation2 + $0x10] sm:$0x44] %v4934_v60  ;;  %v1353_v63 = vrot.slane %v5007_v13, 5  ;;  %v1359_v14 = vrot.slane %v5007_v13, 6 }
 0x1d8   :  { %1332 = vst [vmem:[#allocation2 + $0x38] sm:$0x22] %v1328_v12  ;;  %1346 = vst [vmem:[#allocation2 + $0x18] sm:$0x44] %v4935_v61  ;;  %v4938_v15 = vrot.slane %v5007_v13, 11  ;;  %v1354_v16 = vrot.slane %v5008_v62, 5 }
 0x1d9   :  { %v1360_v17 = vrot.slane %v5008_v62, 6  ;;  %v4939_v18 = vrot.slane %v5008_v62, 11  ;;  %1357 = vst [vmem:[#allocation2 + $0x30] sm:$0x88] %v1353_v63  ;;  %1363 = vst [vmem:[#allocation2 + $0x10] sm:$0x88] %v1359_v14 }
 0x1da   :  { %v1365_v19 = vrot.slane %v1359_v14, 4  ;;  %1377 = vst [vmem:[#allocation2 + $0x20] sm:$0x11] %v4938_v15  ;;  %1358 = vst [vmem:[#allocation2 + $0x38] sm:$0x88] %v1354_v16 }
 0x1db   :  { %1364 = vst [vmem:[#allocation2 + $0x18] sm:$0x88] %v1360_v17  ;;  %v1366_v20 = vrot.slane %v1360_v17, 4  ;;  %1378 = vst [vmem:[#allocation2 + $0x28] sm:$0x11] %v4939_v18 }
 0x1dc   :  { %1369 = vst [vmem:[#allocation2 + $0x40] sm:$0x11] %v1365_v19 }
 0x1dd   :  { %1370 = vst [vmem:[#allocation2 + $0x48] sm:$0x11] %v1366_v20 }
 0x1de   :  { %5586 = dma.done.wait [#allocation9], 49152 }
 0x1df   :  { %5587 = vsyncadd [#allocation9], 4294918144  ;;  %v1524_v21 = vld [vmem:[#allocation5 + $0x408] sm:$0xff]  ;;  %v1526_v22 = vld [vmem:[#allocation5 + $0x418] sm:$0xff] }
 0x1e0   :  { %v1523_v23 = vld [vmem:[#allocation5 + $0x400] sm:$0xff]  ;;  %1693 = vmatprep.subr.bf16.mxu0 %v1524_v21  ;;  %1779 = vmatprep.subr.bf16.mxu1 %v1526_v22  ;;  %v1525_v24 = vld [vmem:[#allocation5 + $0x410] sm:$0xff]  ;;  %v1528_v25 = vld [vmem:[#allocation5 + $0x428] sm:$0xff] }
 0x1e1   :  { %v1530_v26 = vld [vmem:[#allocation5 + $0x438] sm:$0xff]  ;;  %1694 = vmatpush1.bf16.msra.mxu0 %v1523_v23  ;;  %1780 = vmatpush1.bf16.msra.mxu1 %v1525_v24  ;;  %v1527_v27 = vld [vmem:[#allocation5 + $0x420] sm:$0xff]  ;;  %v1529_v28 = vld [vmem:[#allocation5 + $0x430] sm:$0xff] }
 0x1e2   :  { %1695 = vmatprep.subr.bf16.mxu0 %v1528_v25  ;;  %1781 = vmatprep.subr.bf16.mxu1 %v1530_v26  ;;  %v1532_v29 = vld [vmem:[#allocation5 + $0x448] sm:$0xff]  ;;  %v1534_v30 = vld [vmem:[#allocation5 + $0x458] sm:$0xff]  ;;  %v1531_v31 = vld [vmem:[#allocation5 + $0x440] sm:$0xff] }
 0x1e3   :  { %v1533_v32 = vld [vmem:[#allocation5 + $0x450] sm:$0xff]  ;;  %v1536_v34 = vld [vmem:[#allocation5 + $0x468] sm:$0xff]  ;;  %v1538_v35 = vld [vmem:[#allocation5 + $0x478] sm:$0xff] }
 0x1e4   :  { %v1535_v36 = vld [vmem:[#allocation5 + $0x460] sm:$0xff]  ;;  %v1537_v37 = vld [vmem:[#allocation5 + $0x470] sm:$0xff]  ;;  %v1540_v38 = vld [vmem:[#allocation5 + $0x488] sm:$0xff] }
 0x1e5   :  { %1696 = vmatpush1.bf16.msra.mxu0 %v1527_v27  ;;  %1782 = vmatpush1.bf16.msra.mxu1 %v1529_v28  ;;  %v1542_v39 = vld [vmem:[#allocation5 + $0x498] sm:$0xff]  ;;  %v1539_v40 = vld [vmem:[#allocation5 + $0x480] sm:$0xff]  ;;  %v1541_v41 = vld [vmem:[#allocation5 + $0x490] sm:$0xff] }
 0x1e6   :  { %1697 = vmatprep.subr.bf16.mxu0 %v1532_v29  ;;  %1783 = vmatprep.subr.bf16.mxu1 %v1534_v30  ;;  %v1544_v42 = vld [vmem:[#allocation5 + $0x4a8] sm:$0xff]  ;;  %v1546_v43 = vld [vmem:[#allocation5 + $0x4b8] sm:$0xff]  ;;  %v1543_v44 = vld [vmem:[#allocation5 + $0x4a0] sm:$0xff] }
 0x1e7   :  { %v1545_v45 = vld [vmem:[#allocation5 + $0x4b0] sm:$0xff]  ;;  %v1548_v46 = vld [vmem:[#allocation5 + $0x4c8] sm:$0xff]  ;;  %v1550_v47 = vld [vmem:[#allocation5 + $0x4d8] sm:$0xff] }
 0x1e8   :  { %v5896_v48 = vld [vmem:[#allocation2 + $0x40] sm:$0x11]  ;;  %v5350_v49 = vld [vmem:[#allocation2 + $0x24] ss:$16 sps:$4 sm:$0xfe]   ;;  %v1552_v53 = vld [vmem:[#allocation5 + $0x4e8] sm:$0xff] }
 0x1e9   :  { %1698 = vmatpush1.bf16.msra.mxu0 %v1531_v31  ;;  %1784 = vmatpush1.bf16.msra.mxu1 %v1533_v32  ;;  %v1547_v50 = vld [vmem:[#allocation5 + $0x4c0] sm:$0xff]  ;;  %v1549_v51 = vld [vmem:[#allocation5 + $0x4d0] sm:$0xff]  ;;  %v4945_v52 = vcombine.high %v5896_v48, %v5896_v48  ;;  %v1554_v54 = vld [vmem:[#allocation5 + $0x4f8] sm:$0xff]  ;;  %v1680_v0 = vrot.slane %v5350_v49, 1  ;;  %v4944_v26 = vcombine.low %v5896_v48, %v5896_v48 }
 0x1ea   :  { %1699 = vmatprep.subr.bf16.mxu0 %v1536_v34  ;;  %1785 = vmatprep.subr.bf16.mxu1 %v1538_v35  ;;  %v1551_v57 = vld [vmem:[#allocation5 + $0x4e0] sm:$0xff]  ;;  %v1553_v1 = vld [vmem:[#allocation5 + $0x4f0] sm:$0xff]  ;;  %v1556_v3 = vld [vmem:[#allocation5 + $0x508] sm:$0xff] }
 0x1eb   :  { %v1681_v33 = vrot.slane %v4945_v52, 1  ;;  %v1558_v4 = vld [vmem:[#allocation5 + $0x518] sm:$0xff]  ;;  %v1555_v5 = vld [vmem:[#allocation5 + $0x500] sm:$0xff]  ;;  %v1557_v6 = vld [vmem:[#allocation5 + $0x510] sm:$0xff] }
 0x1ec   :  { %v1560_v7 = vld [vmem:[#allocation5 + $0x528] sm:$0xff]  ;;  %v1562_v8 = vld [vmem:[#allocation5 + $0x538] sm:$0xff]  ;;  %v1559_v9 = vld [vmem:[#allocation5 + $0x520] sm:$0xff] }
 0x1ed   :  { %1700 = vmatpush1.bf16.msra.mxu0 %v1535_v36  ;;  %1786 = vmatpush1.bf16.msra.mxu1 %v1537_v37  ;;  %v1682_v2 = vsel %vm317_vm0, %v1680_v0, %v1681_v33  ;;  %v1561_v10 = vld [vmem:[#allocation5 + $0x530] sm:$0xff]  ;;  %v1564_v11 = vld [vmem:[#allocation5 + $0x548] sm:$0xff]  ;;  %v1566_v60 = vld [vmem:[#allocation5 + $0x558] sm:$0xff]  ;;  %v1678_v36 = vrot.slane %v4944_v26, 1 }
 0x1ee   :  { %1701 = vmatprep.subr.bf16.mxu0 %v1540_v38  ;;  %1787 = vmatprep.subr.bf16.mxu1 %v1542_v39  ;;  %v1563_v12 = vld [vmem:[#allocation5 + $0x540] sm:$0xff]  ;;  %v1565_v61 = vld [vmem:[#allocation5 + $0x550] sm:$0xff]  ;;  %v1568_v13 = vld [vmem:[#allocation5 + $0x568] sm:$0xff] }
 0x1ef   :  { %1725 = vmatprep.mubr.bf16.mxu0 %v1682_v2  ;;  %1811 = vmatprep.mubr.bf16.mxu1 %v1682_v2  ;;  %v1570_v62 = vld [vmem:[#allocation5 + $0x578] sm:$0xff]  ;;  %v1567_v63 = vld [vmem:[#allocation5 + $0x560] sm:$0xff]  ;;  %v1569_v14 = vld [vmem:[#allocation5 + $0x570] sm:$0xff] }
 0x1f0   :  { %v1572_v15 = vld [vmem:[#allocation5 + $0x588] sm:$0xff]  ;;  %v1574_v16 = vld [vmem:[#allocation5 + $0x598] sm:$0xff]  ;;  %v1571_v17 = vld [vmem:[#allocation5 + $0x580] sm:$0xff] }
 0x1f1   :  { %1702 = vmatpush1.bf16.msra.mxu0 %v1539_v40  ;;  %1788 = vmatpush1.bf16.msra.mxu1 %v1541_v41  ;;  %v1573_v18 = vld [vmem:[#allocation5 + $0x590] sm:$0xff]  ;;  %v1576_v19 = vld [vmem:[#allocation5 + $0x5a8] sm:$0xff]  ;;  %v1578_v20 = vld [vmem:[#allocation5 + $0x5b8] sm:$0xff] }
 0x1f2   :  { %1703 = vmatprep.subr.bf16.mxu0 %v1544_v42  ;;  %1789 = vmatprep.subr.bf16.mxu1 %v1546_v43  ;;  %v1575_v21 = vld [vmem:[#allocation5 + $0x5a0] sm:$0xff]  ;;  %v1577_v22 = vld [vmem:[#allocation5 + $0x5b0] sm:$0xff]  ;;  %v1580_v23 = vld [vmem:[#allocation5 + $0x5c8] sm:$0xff] }
 0x1f3   :  { %v1582_v24 = vld [vmem:[#allocation5 + $0x5d8] sm:$0xff]  ;;  %v5353_v25 = vld [vmem:[#allocation2 + $0x20] ss:$16 sps:$4 sm:$0xfe]   ;;  %v5903_v27 = vld [vmem:[#allocation2 + $0x48] sm:$0x11] }
 0x1f4   :  { %v1579_v28 = vld [vmem:[#allocation5 + $0x5c0] sm:$0xff]  ;;  %v1581_v29 = vld [vmem:[#allocation5 + $0x5d0] sm:$0xff]  ;;  %v1584_v30 = vld [vmem:[#allocation5 + $0x5e8] sm:$0xff]  ;;  %v4947_v34 = vcombine.high %v5903_v27, %v5903_v27  ;;  %v1677_v35 = vrot.slane %v5353_v25, 1 }
 0x1f5   :  { %1704 = vmatpush1.bf16.msra.mxu0 %v1543_v44  ;;  %1790 = vmatpush1.bf16.msra.mxu1 %v1545_v45  ;;  %v1586_v31 = vld [vmem:[#allocation5 + $0x5f8] sm:$0xff]  ;;  %v1583_v37 = vld [vmem:[#allocation5 + $0x5e0] sm:$0xff]  ;;  %v1585_v38 = vld [vmem:[#allocation5 + $0x5f0] sm:$0xff] }
 0x1f6   :  { %1705 = vmatprep.subr.bf16.mxu0 %v1548_v46  ;;  %1791 = vmatprep.subr.bf16.mxu1 %v1550_v47  ;;  %v5355_v32 = vld [vmem:[#allocation2 + $0x2c] ss:$16 sps:$4 sm:$0xfe]   ;;  %v1687_v42 = vrot.slane %v4947_v34, 1  ;;  %v1679_v43 = vsel %vm317_vm0, %v1677_v35, %v1678_v36  ;;  %v1587_v44 = vld [vmem:[#allocation5 + $0x600] sm:$0xff]  ;;  %v1589_v45 = vld [vmem:[#allocation5 + $0x610] sm:$0xff] }
 0x1f7   :  { %v1588_v39 = vld [vmem:[#allocation5 + $0x608] sm:$0xff]  ;;  %v1590_v40 = vld [vmem:[#allocation5 + $0x618] sm:$0xff]  ;;  %v1686_v41 = vrot.slane %v5355_v32, 1  ;;  %v1591_v49 = vld [vmem:[#allocation5 + $0x620] sm:$0xff] }
 0x1f8   :  { %v1592_v46 = vld [vmem:[#allocation5 + $0x628] sm:$0xff]  ;;  %v1594_v47 = vld [vmem:[#allocation5 + $0x638] sm:$0xff]  ;;  %v1629_v25 = vld [vmem:[#allocation5 + $0x750] sm:$0xff] }
 0x1f9   :  { %1706 = vmatpush1.bf16.msra.mxu0 %v1547_v50  ;;  %1792 = vmatpush1.bf16.msra.mxu1 %v1549_v51  ;;  %v1688_v48 = vsel %vm317_vm0, %v1686_v41, %v1687_v42  ;;  %v1593_v50 = vld [vmem:[#allocation5 + $0x630] sm:$0xff]  ;;  %v1596_v51 = vld [vmem:[#allocation5 + $0x648] sm:$0xff]  ;;  %v1598_v52 = vld [vmem:[#allocation5 + $0x658] sm:$0xff] }
 0x1fa   :  { %1707 = vmatprep.subr.bf16.mxu0 %v1552_v53  ;;  %1793 = vmatprep.subr.bf16.mxu1 %v1554_v54  ;;  %v1595_v53 = vld [vmem:[#allocation5 + $0x640] sm:$0xff]  ;;  %v1597_v54 = vld [vmem:[#allocation5 + $0x650] sm:$0xff]  ;;  %v1600_v0 = vld [vmem:[#allocation5 + $0x668] sm:$0xff] }
 0x1fb   :  { %v1602_v33 = vld [vmem:[#allocation5 + $0x678] sm:$0xff]  ;;  %v1604_v2 = vld [vmem:[#allocation5 + $0x688] sm:$0xff]  ;;  %v1635_v34 = vld [vmem:[#allocation5 + $0x780] sm:$0xff] }
 0x1fc   :  { %v1632_v26 = vld [vmem:[#allocation5 + $0x768] sm:$0xff]  ;;  %v1638_v32 = vld [vmem:[#allocation5 + $0x798] sm:$0xff]  ;;  %v1637_v35 = vld [vmem:[#allocation5 + $0x790] sm:$0xff] }
 0x1fd   :  { %1708 = vmatpush1.bf16.msra.mxu0 %v1551_v57  ;;  %1794 = vmatpush1.bf16.msra.mxu1 %v1553_v1  ;;  %v1599_v57 = vld [vmem:[#allocation5 + $0x660] sm:$0xff]  ;;  %v1601_v1 = vld [vmem:[#allocation5 + $0x670] sm:$0xff]  ;;  %v1640_v36 = vld [vmem:[#allocation5 + $0x7a8] sm:$0xff] }
 0x1fe   :  { %1709 = vmatprep.subr.bf16.mxu0 %v1556_v3  ;;  %1795 = vmatprep.subr.bf16.mxu1 %v1558_v4  ;;  %v1606_v3 = vld [vmem:[#allocation5 + $0x698] sm:$0xff]  ;;  %v1603_v4 = vld [vmem:[#allocation5 + $0x680] sm:$0xff] }
 0x1ff   :  { %v1646_v41 = vld [vmem:[#allocation5 + $0x7d8] sm:$0xff] }
 0x200   :  { %v5358_v42 = vld [vmem:[#allocation2 + $0x28] ss:$16 sps:$4 sm:$0xfe]  }
 0x201   :  { %1710 = vmatpush1.bf16.msra.mxu0 %v1555_v5  ;;  %1796 = vmatpush1.bf16.msra.mxu1 %v1557_v6  ;;  %v1605_v5 = vld [vmem:[#allocation5 + $0x690] sm:$0xff]  ;;  %v1608_v6 = vld [vmem:[#allocation5 + $0x6a8] sm:$0xff] }
 0x202   :  { %1711 = vmatprep.subr.bf16.mxu0 %v1560_v7  ;;  %1797 = vmatprep.subr.bf16.mxu1 %v1562_v8  ;;  %v1610_v7 = vld [vmem:[#allocation5 + $0x6b8] sm:$0xff]  ;;  %v1607_v8 = vld [vmem:[#allocation5 + $0x6a0] sm:$0xff] }
 0x205   :  { %1712 = vmatpush1.bf16.msra.mxu0 %v1559_v9  ;;  %1798 = vmatpush1.bf16.msra.mxu1 %v1561_v10  ;;  %v1609_v9 = vld [vmem:[#allocation5 + $0x6b0] sm:$0xff]  ;;  %v1612_v10 = vld [vmem:[#allocation5 + $0x6c8] sm:$0xff] }
 0x206   :  { %1713 = vmatprep.subr.bf16.mxu0 %v1564_v11  ;;  %1799 = vmatprep.subr.bf16.mxu1 %v1566_v60  ;;  %v1614_v11 = vld [vmem:[#allocation5 + $0x6d8] sm:$0xff]  ;;  %v1611_v60 = vld [vmem:[#allocation5 + $0x6c0] sm:$0xff] }
 0x209   :  { %1714 = vmatpush1.bf16.msra.mxu0 %v1563_v12  ;;  %1800 = vmatpush1.bf16.msra.mxu1 %v1565_v61  ;;  %v1613_v12 = vld [vmem:[#allocation5 + $0x6d0] sm:$0xff]  ;;  %v1616_v61 = vld [vmem:[#allocation5 + $0x6e8] sm:$0xff] }
 0x20a   :  { %1715 = vmatprep.subr.bf16.mxu0 %v1568_v13  ;;  %1801 = vmatprep.subr.bf16.mxu1 %v1570_v62  ;;  %v1618_v13 = vld [vmem:[#allocation5 + $0x6f8] sm:$0xff]  ;;  %v1615_v62 = vld [vmem:[#allocation5 + $0x6e0] sm:$0xff] }
 0x20d   :  { %1716 = vmatpush1.bf16.msra.mxu0 %v1567_v63  ;;  %1802 = vmatpush1.bf16.msra.mxu1 %v1569_v14  ;;  %v1617_v63 = vld [vmem:[#allocation5 + $0x6f0] sm:$0xff]  ;;  %v1620_v14 = vld [vmem:[#allocation5 + $0x708] sm:$0xff] }
 0x20e   :  { %1717 = vmatprep.subr.bf16.mxu0 %v1572_v15  ;;  %1803 = vmatprep.subr.bf16.mxu1 %v1574_v16  ;;  %v1622_v15 = vld [vmem:[#allocation5 + $0x718] sm:$0xff]  ;;  %v1619_v16 = vld [vmem:[#allocation5 + $0x700] sm:$0xff] }
 0x211   :  { %1718 = vmatpush1.bf16.msra.mxu0 %v1571_v17  ;;  %1804 = vmatpush1.bf16.msra.mxu1 %v1573_v18  ;;  %v1621_v17 = vld [vmem:[#allocation5 + $0x710] sm:$0xff]  ;;  %v1624_v18 = vld [vmem:[#allocation5 + $0x728] sm:$0xff] }
 0x212   :  { %1719 = vmatprep.subr.bf16.mxu0 %v1576_v19  ;;  %1805 = vmatprep.subr.bf16.mxu1 %v1578_v20  ;;  %v1626_v19 = vld [vmem:[#allocation5 + $0x738] sm:$0xff]  ;;  %v1623_v20 = vld [vmem:[#allocation5 + $0x720] sm:$0xff] }
 0x215   :  { %1720 = vmatpush1.bf16.msra.mxu0 %v1575_v21  ;;  %1806 = vmatpush1.bf16.msra.mxu1 %v1577_v22  ;;  %v1625_v21 = vld [vmem:[#allocation5 + $0x730] sm:$0xff]  ;;  %v1628_v22 = vld [vmem:[#allocation5 + $0x748] sm:$0xff] }
 0x216   :  { %1721 = vmatprep.subr.bf16.mxu0 %v1580_v23  ;;  %1807 = vmatprep.subr.bf16.mxu1 %v1582_v24  ;;  %v1630_v23 = vld [vmem:[#allocation5 + $0x758] sm:$0xff]  ;;  %v1627_v24 = vld [vmem:[#allocation5 + $0x740] sm:$0xff] }
 0x219   :  { %1722 = vmatpush1.bf16.msra.mxu0 %v1579_v28  ;;  %1808 = vmatpush1.bf16.msra.mxu1 %v1581_v29  ;;  %v1634_v28 = vld [vmem:[#allocation5 + $0x778] sm:$0xff]  ;;  %v1631_v29 = vld [vmem:[#allocation5 + $0x760] sm:$0xff] }
 0x21a   :  { %1723 = vmatprep.subr.bf16.mxu0 %v1584_v30  ;;  %1809 = vmatprep.subr.bf16.mxu1 %v1586_v31  ;;  %v1633_v30 = vld [vmem:[#allocation5 + $0x770] sm:$0xff]  ;;  %v1636_v31 = vld [vmem:[#allocation5 + $0x788] sm:$0xff] }
 0x21d   :  { %1724 = vmatpush1.bf16.msra.mxu0 %v1583_v37  ;;  %1810 = vmatpush1.bf16.msra.mxu1 %v1585_v38  ;;  %v1642_v37 = vld [vmem:[#allocation5 + $0x7b8] sm:$0xff]  ;;  %v1639_v38 = vld [vmem:[#allocation5 + $0x7a0] sm:$0xff] }
 0x21e   :  { %1736 = vmatprep.subr.bf16.mxu0 %v1588_v39  ;;  %1822 = vmatprep.subr.bf16.mxu1 %v1590_v40  ;;  %v1641_v39 = vld [vmem:[#allocation5 + $0x7b0] sm:$0xff]  ;;  %v1644_v40 = vld [vmem:[#allocation5 + $0x7c8] sm:$0xff] }
 0x220   :  { %1726 = vmatmul.mubr.bf16.vlgmr.msra.gmra.mrb[8].mxu0 %v1679_v43  ;;  %1812 = vmatmul.mubr.bf16.vlgmr.msra.gmra.mrb[8].mxu1 %v1679_v43  ;;  %v4946_v43 = vcombine.low %v5903_v27, %v5903_v27 }
 0x221   :  { %1737 = vmatpush1.bf16.msra.mxu0 %v1587_v44  ;;  %1823 = vmatpush1.bf16.msra.mxu1 %v1589_v45  ;;  %v1643_v44 = vld [vmem:[#allocation5 + $0x7c0] sm:$0xff]  ;;  %v1645_v45 = vld [vmem:[#allocation5 + $0x7d0] sm:$0xff] }
 0x222   :  { %1738 = vmatprep.subr.bf16.mxu0 %v1592_v46  ;;  %1824 = vmatprep.subr.bf16.mxu1 %v1594_v47  ;;  %v1648_v46 = vld [vmem:[#allocation5 + $0x7e8] sm:$0xff]  ;;  %v1650_v47 = vld [vmem:[#allocation5 + $0x7f8] sm:$0xff] }
 0x223   :  { %1768 = vmatprep.mubr.bf16.mxu0 %v1688_v48  ;;  %1854 = vmatprep.mubr.bf16.mxu1 %v1688_v48  ;;  %v1683_v48 = vrot.slane %v5358_v42, 1  ;;  %v1432_v42 = vld [vmem:[#allocation5 + $0x160] sm:$0xff] }
 0x225   :  { %1739 = vmatpush1.bf16.msra.mxu0 %v1591_v49  ;;  %1825 = vmatpush1.bf16.msra.mxu1 %v1593_v50  ;;  %v1684_v49 = vrot.slane %v4946_v43, 1  ;;  %v1647_v50 = vld [vmem:[#allocation5 + $0x7e0] sm:$0xff]  ;;  %v1434_v43 = vld [vmem:[#allocation5 + $0x170] sm:$0xff] }
 0x226   :  { %1740 = vmatprep.subr.bf16.mxu0 %v1596_v51  ;;  %1826 = vmatprep.subr.bf16.mxu1 %v1598_v52  ;;  %v1649_v51 = vld [vmem:[#allocation5 + $0x7f0] sm:$0xff]  ;;  %v1389_v52 = vld [vmem:[#allocation5 + $0x8] sm:$0xff] }
 0x227   :  { %v1685_v27 = vsel %vm317_vm0, %v1683_v48, %v1684_v49  ;;  %v1441_v48 = vld [vmem:[#allocation5 + $0x1a8] sm:$0xff]  ;;  %v1443_v49 = vld [vmem:[#allocation5 + $0x1b8] sm:$0xff] }
 0x229   :  { %1741 = vmatpush1.bf16.msra.mxu0 %v1595_v53  ;;  %1827 = vmatpush1.bf16.msra.mxu1 %v1597_v54  ;;  %v1391_v53 = vld [vmem:[#allocation5 + $0x18] sm:$0xff]  ;;  %v5911_v54 = vld [vmem:[#allocation2] sm:$0xff] }
 0x22a   :  { %1742 = vmatprep.subr.bf16.mxu0 %v1600_v0  ;;  %1828 = vmatprep.subr.bf16.mxu1 %v1602_v33  ;;  %v5913_v0 = vld [vmem:[#allocation2 + $0x10] sm:$0xff]  ;;  %v1388_v33 = vld [vmem:[#allocation5] sm:$0xff] }
 0x22d   :  { %1743 = vmatpush1.bf16.msra.mxu0 %v1599_v57  ;;  %1829 = vmatpush1.bf16.msra.mxu1 %v1601_v1  ;;  %v1390_v57 = vld [vmem:[#allocation5 + $0x10] sm:$0xff]  ;;  %v1393_v1 = vld [vmem:[#allocation5 + $0x28] sm:$0xff] }
 0x22e   :  { %1744 = vmatprep.subr.bf16.mxu0 %v1604_v2  ;;  %1830 = vmatprep.subr.bf16.mxu1 %v1606_v3  ;;  %v1395_v2 = vld [vmem:[#allocation5 + $0x38] sm:$0xff]  ;;  %v4949_v3 = vcombine.high %v5911_v54, %v5913_v0 }
 0x231   :  { %1745 = vmatpush1.bf16.msra.mxu0 %v1603_v4  ;;  %1831 = vmatpush1.bf16.msra.mxu1 %v1605_v5  ;;  %v1392_v4 = vld [vmem:[#allocation5 + $0x20] sm:$0xff]  ;;  %v1394_v5 = vld [vmem:[#allocation5 + $0x30] sm:$0xff] }
 0x232   :  { %1746 = vmatprep.subr.bf16.mxu0 %v1608_v6  ;;  %1832 = vmatprep.subr.bf16.mxu1 %v1610_v7  ;;  %v1397_v6 = vld [vmem:[#allocation5 + $0x48] sm:$0xff]  ;;  %v1399_v7 = vld [vmem:[#allocation5 + $0x58] sm:$0xff] }
 0x235   :  { %1747 = vmatpush1.bf16.msra.mxu0 %v1607_v8  ;;  %1833 = vmatpush1.bf16.msra.mxu1 %v1609_v9  ;;  %v1396_v8 = vld [vmem:[#allocation5 + $0x40] sm:$0xff]  ;;  %v1398_v9 = vld [vmem:[#allocation5 + $0x50] sm:$0xff] }
 0x236   :  { %1748 = vmatprep.subr.bf16.mxu0 %v1612_v10  ;;  %1834 = vmatprep.subr.bf16.mxu1 %v1614_v11  ;;  %v1401_v10 = vld [vmem:[#allocation5 + $0x68] sm:$0xff]  ;;  %v1403_v11 = vld [vmem:[#allocation5 + $0x78] sm:$0xff] }
 0x239   :  { %1749 = vmatpush1.bf16.msra.mxu0 %v1611_v60  ;;  %1835 = vmatpush1.bf16.msra.mxu1 %v1613_v12  ;;  %v1400_v60 = vld [vmem:[#allocation5 + $0x60] sm:$0xff]  ;;  %v1402_v12 = vld [vmem:[#allocation5 + $0x70] sm:$0xff] }
 0x23a   :  { %1750 = vmatprep.subr.bf16.mxu0 %v1616_v61  ;;  %1836 = vmatprep.subr.bf16.mxu1 %v1618_v13  ;;  %v1405_v61 = vld [vmem:[#allocation5 + $0x88] sm:$0xff]  ;;  %v1407_v13 = vld [vmem:[#allocation5 + $0x98] sm:$0xff] }
 0x23d   :  { %1751 = vmatpush1.bf16.msra.mxu0 %v1615_v62  ;;  %1837 = vmatpush1.bf16.msra.mxu1 %v1617_v63  ;;  %v1404_v62 = vld [vmem:[#allocation5 + $0x80] sm:$0xff]  ;;  %v1406_v63 = vld [vmem:[#allocation5 + $0x90] sm:$0xff] }
 0x23e   :  { %1752 = vmatprep.subr.bf16.mxu0 %v1620_v14  ;;  %1838 = vmatprep.subr.bf16.mxu1 %v1622_v15  ;;  %v1409_v14 = vld [vmem:[#allocation5 + $0xa8] sm:$0xff]  ;;  %v1411_v15 = vld [vmem:[#allocation5 + $0xb8] sm:$0xff] }
 0x241   :  { %1753 = vmatpush1.bf16.msra.mxu0 %v1619_v16  ;;  %1839 = vmatpush1.bf16.msra.mxu1 %v1621_v17  ;;  %v1408_v16 = vld [vmem:[#allocation5 + $0xa0] sm:$0xff]  ;;  %v1410_v17 = vld [vmem:[#allocation5 + $0xb0] sm:$0xff] }
 0x242   :  { %1754 = vmatprep.subr.bf16.mxu0 %v1624_v18  ;;  %1840 = vmatprep.subr.bf16.mxu1 %v1626_v19  ;;  %v1413_v18 = vld [vmem:[#allocation5 + $0xc8] sm:$0xff]  ;;  %v1415_v19 = vld [vmem:[#allocation5 + $0xd8] sm:$0xff] }
 0x245   :  { %1755 = vmatpush1.bf16.msra.mxu0 %v1623_v20  ;;  %1841 = vmatpush1.bf16.msra.mxu1 %v1625_v21  ;;  %v1412_v20 = vld [vmem:[#allocation5 + $0xc0] sm:$0xff]  ;;  %v1414_v21 = vld [vmem:[#allocation5 + $0xd0] sm:$0xff] }
 0x246   :  { %1756 = vmatprep.subr.bf16.mxu0 %v1628_v22  ;;  %1842 = vmatprep.subr.bf16.mxu1 %v1630_v23  ;;  %v1417_v22 = vld [vmem:[#allocation5 + $0xe8] sm:$0xff]  ;;  %v1419_v23 = vld [vmem:[#allocation5 + $0xf8] sm:$0xff] }
 0x249   :  { %1757 = vmatpush1.bf16.msra.mxu0 %v1627_v24  ;;  %1843 = vmatpush1.bf16.msra.mxu1 %v1629_v25  ;;  %v1416_v24 = vld [vmem:[#allocation5 + $0xe0] sm:$0xff]  ;;  %v1418_v25 = vld [vmem:[#allocation5 + $0xf0] sm:$0xff] }
 0x24a   :  { %1758 = vmatprep.subr.bf16.mxu0 %v1632_v26  ;;  %1844 = vmatprep.subr.bf16.mxu1 %v1634_v28  ;;  %v1421_v26 = vld [vmem:[#allocation5 + $0x108] sm:$0xff]  ;;  %v1423_v28 = vld [vmem:[#allocation5 + $0x118] sm:$0xff] }
 0x24d   :  { %1759 = vmatpush1.bf16.msra.mxu0 %v1631_v29  ;;  %1845 = vmatpush1.bf16.msra.mxu1 %v1633_v30  ;;  %v1420_v29 = vld [vmem:[#allocation5 + $0x100] sm:$0xff]  ;;  %v1422_v30 = vld [vmem:[#allocation5 + $0x110] sm:$0xff] }
 0x24e   :  { %1760 = vmatprep.subr.bf16.mxu0 %v1636_v31  ;;  %1846 = vmatprep.subr.bf16.mxu1 %v1638_v32  ;;  %v1425_v31 = vld [vmem:[#allocation5 + $0x128] sm:$0xff]  ;;  %v1427_v32 = vld [vmem:[#allocation5 + $0x138] sm:$0xff] }
 0x251   :  { %1761 = vmatpush1.bf16.msra.mxu0 %v1635_v34  ;;  %1847 = vmatpush1.bf16.msra.mxu1 %v1637_v35  ;;  %v1424_v34 = vld [vmem:[#allocation5 + $0x120] sm:$0xff]  ;;  %v1426_v35 = vld [vmem:[#allocation5 + $0x130] sm:$0xff] }
 0x252   :  { %1762 = vmatprep.subr.bf16.mxu0 %v1640_v36  ;;  %1848 = vmatprep.subr.bf16.mxu1 %v1642_v37  ;;  %v1429_v36 = vld [vmem:[#allocation5 + $0x148] sm:$0xff]  ;;  %v1431_v37 = vld [vmem:[#allocation5 + $0x158] sm:$0xff] }
 0x255   :  { %1763 = vmatpush1.bf16.msra.mxu0 %v1639_v38  ;;  %1849 = vmatpush1.bf16.msra.mxu1 %v1641_v39  ;;  %v1428_v38 = vld [vmem:[#allocation5 + $0x140] sm:$0xff]  ;;  %v1430_v39 = vld [vmem:[#allocation5 + $0x150] sm:$0xff] }
 0x256   :  { %1764 = vmatprep.subr.bf16.mxu0 %v1644_v40  ;;  %1850 = vmatprep.subr.bf16.mxu1 %v1646_v41  ;;  %v1433_v40 = vld [vmem:[#allocation5 + $0x168] sm:$0xff]  ;;  %v1435_v41 = vld [vmem:[#allocation5 + $0x178] sm:$0xff] }
 0x259   :  { %1765 = vmatpush1.bf16.msra.mxu0 %v1643_v44  ;;  %1851 = vmatpush1.bf16.msra.mxu1 %v1645_v45  ;;  %v1437_v44 = vld [vmem:[#allocation5 + $0x188] sm:$0xff]  ;;  %v1439_v45 = vld [vmem:[#allocation5 + $0x198] sm:$0xff] }
 0x25a   :  { %1766 = vmatprep.subr.bf16.mxu0 %v1648_v46  ;;  %1852 = vmatprep.subr.bf16.mxu1 %v1650_v47  ;;  %v1436_v46 = vld [vmem:[#allocation5 + $0x180] sm:$0xff]  ;;  %v1438_v47 = vld [vmem:[#allocation5 + $0x190] sm:$0xff] }
 0x25d   :  { %1767 = vmatpush1.bf16.msra.mxu0 %v1647_v50  ;;  %1853 = vmatpush1.bf16.msra.mxu1 %v1649_v51  ;;  %v1440_v50 = vld [vmem:[#allocation5 + $0x1a0] sm:$0xff]  ;;  %v1442_v51 = vld [vmem:[#allocation5 + $0x1b0] sm:$0xff] }
 0x25e   :  { %1885 = vmatprep.subr.bf16.mxu0 %v1389_v52  ;;  %1971 = vmatprep.subr.bf16.mxu1 %v1391_v53  ;;  %v1445_v52 = vld [vmem:[#allocation5 + $0x1c8] sm:$0xff]  ;;  %v1447_v53 = vld [vmem:[#allocation5 + $0x1d8] sm:$0xff] }
 0x260   :  { %1769 = vmatmul.mubr.bf16.vlgmr.msra.gmra.mrb[8].mxu0 %v1685_v27  ;;  %1855 = vmatmul.mubr.bf16.vlgmr.msra.gmra.mrb[8].mxu1 %v1685_v27  ;;  %v1444_v27 = vld [vmem:[#allocation5 + $0x1c0] sm:$0xff] }
 0x261   :  { %1886 = vmatpush1.bf16.msra.mxu0 %v1388_v33  ;;  %1972 = vmatpush1.bf16.msra.mxu1 %v1390_v57  ;;  %v1446_v33 = vld [vmem:[#allocation5 + $0x1d0] sm:$0xff]  ;;  %v1449_v57 = vld [vmem:[#allocation5 + $0x1e8] sm:$0xff] }
 0x262   :  { %1887 = vmatprep.subr.bf16.mxu0 %v1393_v1  ;;  %1973 = vmatprep.subr.bf16.mxu1 %v1395_v2  ;;  %v1451_v1 = vld [vmem:[#allocation5 + $0x1f8] sm:$0xff]  ;;  %v1448_v2 = vld [vmem:[#allocation5 + $0x1e0] sm:$0xff] }
 0x263   :  { %1917 = vmatprep.mubr.bf16.mxu0 %v4949_v3  ;;  %2003 = vmatprep.mubr.bf16.mxu1 %v4949_v3  ;;  %v1450_v3 = vld [vmem:[#allocation5 + $0x1f0] sm:$0xff] }
 0x265   :  { %1888 = vmatpush1.bf16.msra.mxu0 %v1392_v4  ;;  %1974 = vmatpush1.bf16.msra.mxu1 %v1394_v5  ;;  %v1453_v4 = vld [vmem:[#allocation5 + $0x208] sm:$0xff]  ;;  %v1455_v5 = vld [vmem:[#allocation5 + $0x218] sm:$0xff] }
 0x266   :  { %1889 = vmatprep.subr.bf16.mxu0 %v1397_v6  ;;  %1975 = vmatprep.subr.bf16.mxu1 %v1399_v7  ;;  %v4948_v6 = vcombine.low %v5911_v54, %v5913_v0  ;;  %v5920_v7 = vld [vmem:[#allocation2 + $0x8] sm:$0xff]  ;;  %v1456_v54 = vld [vmem:[#allocation5 + $0x220] sm:$0xff] }
 0x269   :  { %1890 = vmatpush1.bf16.msra.mxu0 %v1396_v8  ;;  %1976 = vmatpush1.bf16.msra.mxu1 %v1398_v9  ;;  %v5922_v8 = vld [vmem:[#allocation2 + $0x18] sm:$0xff]  ;;  %v1452_v9 = vld [vmem:[#allocation5 + $0x200] sm:$0xff] }
 0x26a   :  { %1891 = vmatprep.subr.bf16.mxu0 %v1401_v10  ;;  %1977 = vmatprep.subr.bf16.mxu1 %v1403_v11  ;;  %v1454_v10 = vld [vmem:[#allocation5 + $0x210] sm:$0xff]  ;;  %v1457_v11 = vld [vmem:[#allocation5 + $0x228] sm:$0xff] }
 0x26d   :  { %1892 = vmatpush1.bf16.msra.mxu0 %v1400_v60  ;;  %1978 = vmatpush1.bf16.msra.mxu1 %v1402_v12  ;;  %v1459_v60 = vld [vmem:[#allocation5 + $0x238] sm:$0xff]  ;;  %v4951_v12 = vcombine.high %v5920_v7, %v5922_v8 }
 0x26e   :  { %1893 = vmatprep.subr.bf16.mxu0 %v1405_v61  ;;  %1979 = vmatprep.subr.bf16.mxu1 %v1407_v13  ;;  %v1458_v61 = vld [vmem:[#allocation5 + $0x230] sm:$0xff]  ;;  %v1461_v13 = vld [vmem:[#allocation5 + $0x248] sm:$0xff] }
 0x271   :  { %1894 = vmatpush1.bf16.msra.mxu0 %v1404_v62  ;;  %1980 = vmatpush1.bf16.msra.mxu1 %v1406_v63  ;;  %v1463_v62 = vld [vmem:[#allocation5 + $0x258] sm:$0xff]  ;;  %v1460_v63 = vld [vmem:[#allocation5 + $0x240] sm:$0xff] }
 0x272   :  { %1895 = vmatprep.subr.bf16.mxu0 %v1409_v14  ;;  %1981 = vmatprep.subr.bf16.mxu1 %v1411_v15  ;;  %v1462_v14 = vld [vmem:[#allocation5 + $0x250] sm:$0xff]  ;;  %v1465_v15 = vld [vmem:[#allocation5 + $0x268] sm:$0xff] }
 0x275   :  { %1896 = vmatpush1.bf16.msra.mxu0 %v1408_v16  ;;  %1982 = vmatpush1.bf16.msra.mxu1 %v1410_v17  ;;  %v1467_v16 = vld [vmem:[#allocation5 + $0x278] sm:$0xff]  ;;  %v1464_v17 = vld [vmem:[#allocation5 + $0x260] sm:$0xff] }
 0x276   :  { %1897 = vmatprep.subr.bf16.mxu0 %v1413_v18  ;;  %1983 = vmatprep.subr.bf16.mxu1 %v1415_v19  ;;  %v1466_v18 = vld [vmem:[#allocation5 + $0x270] sm:$0xff]  ;;  %v1469_v19 = vld [vmem:[#allocation5 + $0x288] sm:$0xff] }
 0x279   :  { %1898 = vmatpush1.bf16.msra.mxu0 %v1412_v20  ;;  %1984 = vmatpush1.bf16.msra.mxu1 %v1414_v21  ;;  %v1471_v20 = vld [vmem:[#allocation5 + $0x298] sm:$0xff]  ;;  %v1468_v21 = vld [vmem:[#allocation5 + $0x280] sm:$0xff] }
 0x27a   :  { %1899 = vmatprep.subr.bf16.mxu0 %v1417_v22  ;;  %1985 = vmatprep.subr.bf16.mxu1 %v1419_v23  ;;  %v1470_v22 = vld [vmem:[#allocation5 + $0x290] sm:$0xff]  ;;  %v1473_v23 = vld [vmem:[#allocation5 + $0x2a8] sm:$0xff] }
 0x27d   :  { %1900 = vmatpush1.bf16.msra.mxu0 %v1416_v24  ;;  %1986 = vmatpush1.bf16.msra.mxu1 %v1418_v25  ;;  %v1475_v24 = vld [vmem:[#allocation5 + $0x2b8] sm:$0xff]  ;;  %v1472_v25 = vld [vmem:[#allocation5 + $0x2a0] sm:$0xff] }
 0x27e   :  { %1901 = vmatprep.subr.bf16.mxu0 %v1421_v26  ;;  %1987 = vmatprep.subr.bf16.mxu1 %v1423_v28  ;;  %v1474_v26 = vld [vmem:[#allocation5 + $0x2b0] sm:$0xff]  ;;  %v1477_v28 = vld [vmem:[#allocation5 + $0x2c8] sm:$0xff] }
 0x281   :  { %1902 = vmatpush1.bf16.msra.mxu0 %v1420_v29  ;;  %1988 = vmatpush1.bf16.msra.mxu1 %v1422_v30  ;;  %v1479_v29 = vld [vmem:[#allocation5 + $0x2d8] sm:$0xff]  ;;  %v1476_v30 = vld [vmem:[#allocation5 + $0x2c0] sm:$0xff] }
 0x282   :  { %1903 = vmatprep.subr.bf16.mxu0 %v1425_v31  ;;  %1989 = vmatprep.subr.bf16.mxu1 %v1427_v32  ;;  %v1478_v31 = vld [vmem:[#allocation5 + $0x2d0] sm:$0xff]  ;;  %v1481_v32 = vld [vmem:[#allocation5 + $0x2e8] sm:$0xff] }
 0x285   :  { %1904 = vmatpush1.bf16.msra.mxu0 %v1424_v34  ;;  %1990 = vmatpush1.bf16.msra.mxu1 %v1426_v35  ;;  %v1483_v34 = vld [vmem:[#allocation5 + $0x2f8] sm:$0xff]  ;;  %v1480_v35 = vld [vmem:[#allocation5 + $0x2e0] sm:$0xff] }
 0x286   :  { %1905 = vmatprep.subr.bf16.mxu0 %v1429_v36  ;;  %1991 = vmatprep.subr.bf16.mxu1 %v1431_v37  ;;  %v1482_v36 = vld [vmem:[#allocation5 + $0x2f0] sm:$0xff]  ;;  %v1485_v37 = vld [vmem:[#allocation5 + $0x308] sm:$0xff] }
 0x289   :  { %1906 = vmatpush1.bf16.msra.mxu0 %v1428_v38  ;;  %1992 = vmatpush1.bf16.msra.mxu1 %v1430_v39  ;;  %v1487_v38 = vld [vmem:[#allocation5 + $0x318] sm:$0xff]  ;;  %v1484_v39 = vld [vmem:[#allocation5 + $0x300] sm:$0xff] }
 0x28a   :  { %1907 = vmatprep.subr.bf16.mxu0 %v1433_v40  ;;  %1993 = vmatprep.subr.bf16.mxu1 %v1435_v41  ;;  %v1486_v40 = vld [vmem:[#allocation5 + $0x310] sm:$0xff]  ;;  %v1489_v41 = vld [vmem:[#allocation5 + $0x328] sm:$0xff] }
 0x28d   :  { %1908 = vmatpush1.bf16.msra.mxu0 %v1432_v42  ;;  %1994 = vmatpush1.bf16.msra.mxu1 %v1434_v43  ;;  %v1491_v42 = vld [vmem:[#allocation5 + $0x338] sm:$0xff]  ;;  %v1488_v43 = vld [vmem:[#allocation5 + $0x320] sm:$0xff] }
 0x28e   :  { %1909 = vmatprep.subr.bf16.mxu0 %v1437_v44  ;;  %1995 = vmatprep.subr.bf16.mxu1 %v1439_v45  ;;  %v1490_v44 = vld [vmem:[#allocation5 + $0x330] sm:$0xff]  ;;  %v1493_v45 = vld [vmem:[#allocation5 + $0x348] sm:$0xff] }
 0x291   :  { %1910 = vmatpush1.bf16.msra.mxu0 %v1436_v46  ;;  %1996 = vmatpush1.bf16.msra.mxu1 %v1438_v47  ;;  %v1495_v46 = vld [vmem:[#allocation5 + $0x358] sm:$0xff]  ;;  %v1492_v47 = vld [vmem:[#allocation5 + $0x340] sm:$0xff] }
 0x292   :  { %1911 = vmatprep.subr.bf16.mxu0 %v1441_v48  ;;  %1997 = vmatprep.subr.bf16.mxu1 %v1443_v49  ;;  %v1494_v48 = vld [vmem:[#allocation5 + $0x350] sm:$0xff]  ;;  %v1497_v49 = vld [vmem:[#allocation5 + $0x368] sm:$0xff] }
 0x295   :  { %1912 = vmatpush1.bf16.msra.mxu0 %v1440_v50  ;;  %1998 = vmatpush1.bf16.msra.mxu1 %v1442_v51  ;;  %v1499_v50 = vld [vmem:[#allocation5 + $0x378] sm:$0xff]  ;;  %v1496_v51 = vld [vmem:[#allocation5 + $0x360] sm:$0xff] }
 0x296   :  { %1913 = vmatprep.subr.bf16.mxu0 %v1445_v52  ;;  %1999 = vmatprep.subr.bf16.mxu1 %v1447_v53  ;;  %v1498_v52 = vld [vmem:[#allocation5 + $0x370] sm:$0xff]  ;;  %v1501_v53 = vld [vmem:[#allocation5 + $0x388] sm:$0xff] }
 0x299   :  { %1914 = vmatpush1.bf16.msra.mxu0 %v1444_v27  ;;  %2000 = vmatpush1.bf16.msra.mxu1 %v1446_v33  ;;  %v1503_v27 = vld [vmem:[#allocation5 + $0x398] sm:$0xff]  ;;  %v1500_v33 = vld [vmem:[#allocation5 + $0x380] sm:$0xff] }
 0x29a   :  { %1915 = vmatprep.subr.bf16.mxu0 %v1449_v57  ;;  %2001 = vmatprep.subr.bf16.mxu1 %v1451_v1  ;;  %v1502_v57 = vld [vmem:[#allocation5 + $0x390] sm:$0xff]  ;;  %v1505_v1 = vld [vmem:[#allocation5 + $0x3a8] sm:$0xff] }
 0x29d   :  { %1916 = vmatpush1.bf16.msra.mxu0 %v1448_v2  ;;  %2002 = vmatpush1.bf16.msra.mxu1 %v1450_v3  ;;  %v1507_v2 = vld [vmem:[#allocation5 + $0x3b8] sm:$0xff]  ;;  %v1504_v3 = vld [vmem:[#allocation5 + $0x3a0] sm:$0xff] }
 0x29e   :  { %1928 = vmatprep.subr.bf16.mxu0 %v1453_v4  ;;  %2014 = vmatprep.subr.bf16.mxu1 %v1455_v5  ;;  %v1506_v4 = vld [vmem:[#allocation5 + $0x3b0] sm:$0xff]  ;;  %v1509_v5 = vld [vmem:[#allocation5 + $0x3c8] sm:$0xff] }
 0x2a0   :  { %1918 = vmatmul.mubr.bf16.vlgmr.msra.gmra.mrb[8].mxu0 %v4948_v6  ;;  %2004 = vmatmul.mubr.bf16.vlgmr.msra.gmra.mrb[8].mxu1 %v4948_v6  ;;  %v1511_v6 = vld [vmem:[#allocation5 + $0x3d8] sm:$0xff] }
 0x2a1   :  { %1929 = vmatpush1.bf16.msra.mxu0 %v1452_v9  ;;  %2015 = vmatpush1.bf16.msra.mxu1 %v1454_v10  ;;  %v5926_v9 = vld [vmem:[#allocation2] sm:$0xee]  ;;  %v5928_v10 = vld [vmem:[#allocation2 + $0x20] sm:$0x11] }
 0x2a2   :  { %1930 = vmatprep.subr.bf16.mxu0 %v1457_v11  ;;  %2016 = vmatprep.subr.bf16.mxu1 %v1459_v60  ;;  %v1508_v11 = vld [vmem:[#allocation5 + $0x3c0] sm:$0xff]  ;;  %v1510_v60 = vld [vmem:[#allocation5 + $0x3d0] sm:$0xff] }
 0x2a3   :  { %1960 = vmatprep.mubr.bf16.mxu0 %v4951_v12  ;;  %2046 = vmatprep.mubr.bf16.mxu1 %v4951_v12  ;;  %v1513_v12 = vld [vmem:[#allocation5 + $0x3e8] sm:$0xff] }
 0x2a5   :  { %1931 = vmatpush1.bf16.msra.mxu0 %v1456_v54  ;;  %2017 = vmatpush1.bf16.msra.mxu1 %v1458_v61  ;;  %v1515_v54 = vld [vmem:[#allocation5 + $0x3f8] sm:$0xff]  ;;  %v4953_v61 = vcombine.high %v5926_v9, %v5913_v0 }
 0x2a6   :  { %1932 = vmatprep.subr.bf16.mxu0 %v1461_v13  ;;  %2018 = vmatprep.subr.bf16.mxu1 %v1463_v62  ;;  %v4957_v13 = vcombine.high %v5928_v10, %v5928_v10  ;;  %v1512_v62 = vld [vmem:[#allocation5 + $0x3e0] sm:$0xff] }
 0x2a9   :  { %1933 = vmatpush1.bf16.msra.mxu0 %v1460_v63  ;;  %2019 = vmatpush1.bf16.msra.mxu1 %v1462_v14  ;;  %v1514_v63 = vld [vmem:[#allocation5 + $0x3f0] sm:$0xff]  ;;  %v2065_v14 = vld [vmem:[#allocation5 + $0x808] sm:$0xff] }
 0x2aa   :  { %1934 = vmatprep.subr.bf16.mxu0 %v1465_v15  ;;  %2020 = vmatprep.subr.bf16.mxu1 %v1467_v16  ;;  %v2067_v15 = vld [vmem:[#allocation5 + $0x818] sm:$0xff]  ;;  %v4950_v16 = vcombine.low %v5920_v7, %v5922_v8  ;;  %v2070_v7 = vld [vmem:[#allocation5 + $0x830] sm:$0xff] }
 0x2ad   :  { %1935 = vmatpush1.bf16.msra.mxu0 %v1464_v17  ;;  %2021 = vmatpush1.bf16.msra.mxu1 %v1466_v18  ;;  %v2221_v17 = vrot.slane %v4953_v61, 1  ;;  %v2222_v18 = vrot.slane %v4957_v13, 1  ;;  %v2113_v61 = vld [vmem:[#allocation5 + $0x988] sm:$0xff]  ;;  %v2115_v13 = vld [vmem:[#allocation5 + $0x998] sm:$0xff] }
 0x2ae   :  { %1936 = vmatprep.subr.bf16.mxu0 %v1469_v19  ;;  %2022 = vmatprep.subr.bf16.mxu1 %v1471_v20  ;;  %v2064_v19 = vld [vmem:[#allocation5 + $0x800] sm:$0xff]  ;;  %v2066_v20 = vld [vmem:[#allocation5 + $0x810] sm:$0xff] }
 0x2b1   :  { %1937 = vmatpush1.bf16.msra.mxu0 %v1468_v21  ;;  %2023 = vmatpush1.bf16.msra.mxu1 %v1470_v22  ;;  %v2069_v21 = vld [vmem:[#allocation5 + $0x828] sm:$0xff]  ;;  %v2071_v22 = vld [vmem:[#allocation5 + $0x838] sm:$0xff] }
 0x2b2   :  { %1938 = vmatprep.subr.bf16.mxu0 %v1473_v23  ;;  %2024 = vmatprep.subr.bf16.mxu1 %v1475_v24  ;;  %v2223_v23 = vsel %vm317_vm0, %v2221_v17, %v2222_v18  ;;  %v2068_v24 = vld [vmem:[#allocation5 + $0x820] sm:$0xff]  ;;  %v2118_v17 = vld [vmem:[#allocation5 + $0x9b0] sm:$0xff]  ;;  %v2121_v18 = vld [vmem:[#allocation5 + $0x9c8] sm:$0xff] }
 0x2b5   :  { %1939 = vmatpush1.bf16.msra.mxu0 %v1472_v25  ;;  %2025 = vmatpush1.bf16.msra.mxu1 %v1474_v26  ;;  %v2073_v25 = vld [vmem:[#allocation5 + $0x848] sm:$0xff]  ;;  %v2075_v26 = vld [vmem:[#allocation5 + $0x858] sm:$0xff] }
 0x2b6   :  { %1940 = vmatprep.subr.bf16.mxu0 %v1477_v28  ;;  %2026 = vmatprep.subr.bf16.mxu1 %v1479_v29  ;;  %v2072_v28 = vld [vmem:[#allocation5 + $0x840] sm:$0xff]  ;;  %v2074_v29 = vld [vmem:[#allocation5 + $0x850] sm:$0xff] }
 0x2b9   :  { %1941 = vmatpush1.bf16.msra.mxu0 %v1476_v30  ;;  %2027 = vmatpush1.bf16.msra.mxu1 %v1478_v31  ;;  %v2077_v30 = vld [vmem:[#allocation5 + $0x868] sm:$0xff]  ;;  %v2079_v31 = vld [vmem:[#allocation5 + $0x878] sm:$0xff] }
 0x2ba   :  { %1942 = vmatprep.subr.bf16.mxu0 %v1481_v32  ;;  %2028 = vmatprep.subr.bf16.mxu1 %v1483_v34  ;;  %v2076_v32 = vld [vmem:[#allocation5 + $0x860] sm:$0xff]  ;;  %v2078_v34 = vld [vmem:[#allocation5 + $0x870] sm:$0xff] }
 0x2bd   :  { %1943 = vmatpush1.bf16.msra.mxu0 %v1480_v35  ;;  %2029 = vmatpush1.bf16.msra.mxu1 %v1482_v36  ;;  %v2081_v35 = vld [vmem:[#allocation5 + $0x888] sm:$0xff]  ;;  %v2083_v36 = vld [vmem:[#allocation5 + $0x898] sm:$0xff] }
 0x2be   :  { %1944 = vmatprep.subr.bf16.mxu0 %v1485_v37  ;;  %2030 = vmatprep.subr.bf16.mxu1 %v1487_v38  ;;  %v2080_v37 = vld [vmem:[#allocation5 + $0x880] sm:$0xff]  ;;  %v2082_v38 = vld [vmem:[#allocation5 + $0x890] sm:$0xff] }
 0x2c1   :  { %1945 = vmatpush1.bf16.msra.mxu0 %v1484_v39  ;;  %2031 = vmatpush1.bf16.msra.mxu1 %v1486_v40  ;;  %v2085_v39 = vld [vmem:[#allocation5 + $0x8a8] sm:$0xff]  ;;  %v2087_v40 = vld [vmem:[#allocation5 + $0x8b8] sm:$0xff] }
 0x2c2   :  { %1946 = vmatprep.subr.bf16.mxu0 %v1489_v41  ;;  %2032 = vmatprep.subr.bf16.mxu1 %v1491_v42  ;;  %v2084_v41 = vld [vmem:[#allocation5 + $0x8a0] sm:$0xff]  ;;  %v2086_v42 = vld [vmem:[#allocation5 + $0x8b0] sm:$0xff] }
 0x2c5   :  { %1947 = vmatpush1.bf16.msra.mxu0 %v1488_v43  ;;  %2033 = vmatpush1.bf16.msra.mxu1 %v1490_v44  ;;  %v2089_v43 = vld [vmem:[#allocation5 + $0x8c8] sm:$0xff]  ;;  %v2091_v44 = vld [vmem:[#allocation5 + $0x8d8] sm:$0xff] }
 0x2c6   :  { %1948 = vmatprep.subr.bf16.mxu0 %v1493_v45  ;;  %2034 = vmatprep.subr.bf16.mxu1 %v1495_v46  ;;  %v2088_v45 = vld [vmem:[#allocation5 + $0x8c0] sm:$0xff]  ;;  %v2090_v46 = vld [vmem:[#allocation5 + $0x8d0] sm:$0xff] }
 0x2c9   :  { %1949 = vmatpush1.bf16.msra.mxu0 %v1492_v47  ;;  %2035 = vmatpush1.bf16.msra.mxu1 %v1494_v48  ;;  %v2093_v47 = vld [vmem:[#allocation5 + $0x8e8] sm:$0xff]  ;;  %v2095_v48 = vld [vmem:[#allocation5 + $0x8f8] sm:$0xff] }
 0x2ca   :  { %1950 = vmatprep.subr.bf16.mxu0 %v1497_v49  ;;  %2036 = vmatprep.subr.bf16.mxu1 %v1499_v50  ;;  %v2092_v49 = vld [vmem:[#allocation5 + $0x8e0] sm:$0xff]  ;;  %v2094_v50 = vld [vmem:[#allocation5 + $0x8f0] sm:$0xff] }
 0x2cd   :  { %1951 = vmatpush1.bf16.msra.mxu0 %v1496_v51  ;;  %2037 = vmatpush1.bf16.msra.mxu1 %v1498_v52  ;;  %v2097_v51 = vld [vmem:[#allocation5 + $0x908] sm:$0xff]  ;;  %v2099_v52 = vld [vmem:[#allocation5 + $0x918] sm:$0xff] }
 0x2ce   :  { %1952 = vmatprep.subr.bf16.mxu0 %v1501_v53  ;;  %2038 = vmatprep.subr.bf16.mxu1 %v1503_v27  ;;  %v2096_v53 = vld [vmem:[#allocation5 + $0x900] sm:$0xff]  ;;  %v2098_v27 = vld [vmem:[#allocation5 + $0x910] sm:$0xff] }
 0x2d1   :  { %1953 = vmatpush1.bf16.msra.mxu0 %v1500_v33  ;;  %2039 = vmatpush1.bf16.msra.mxu1 %v1502_v57  ;;  %v2101_v33 = vld [vmem:[#allocation5 + $0x928] sm:$0xff]  ;;  %v2103_v57 = vld [vmem:[#allocation5 + $0x938] sm:$0xff] }
 0x2d2   :  { %1954 = vmatprep.subr.bf16.mxu0 %v1505_v1  ;;  %2040 = vmatprep.subr.bf16.mxu1 %v1507_v2  ;;  %v2100_v1 = vld [vmem:[#allocation5 + $0x920] sm:$0xff]  ;;  %v2102_v2 = vld [vmem:[#allocation5 + $0x930] sm:$0xff] }
 0x2d5   :  { %1955 = vmatpush1.bf16.msra.mxu0 %v1504_v3  ;;  %2041 = vmatpush1.bf16.msra.mxu1 %v1506_v4  ;;  %v2105_v3 = vld [vmem:[#allocation5 + $0x948] sm:$0xff]  ;;  %v2107_v4 = vld [vmem:[#allocation5 + $0x958] sm:$0xff] }
 0x2d6   :  { %1956 = vmatprep.subr.bf16.mxu0 %v1509_v5  ;;  %2042 = vmatprep.subr.bf16.mxu1 %v1511_v6  ;;  %v2104_v5 = vld [vmem:[#allocation5 + $0x940] sm:$0xff]  ;;  %v2106_v6 = vld [vmem:[#allocation5 + $0x950] sm:$0xff] }
 0x2d9   :  { %1957 = vmatpush1.bf16.msra.mxu0 %v1508_v11  ;;  %2043 = vmatpush1.bf16.msra.mxu1 %v1510_v60  ;;  %v2109_v11 = vld [vmem:[#allocation5 + $0x968] sm:$0xff]  ;;  %v2111_v60 = vld [vmem:[#allocation5 + $0x978] sm:$0xff] }
 0x2da   :  { %1958 = vmatprep.subr.bf16.mxu0 %v1513_v12  ;;  %2044 = vmatprep.subr.bf16.mxu1 %v1515_v54  ;;  %v2108_v12 = vld [vmem:[#allocation5 + $0x960] sm:$0xff]  ;;  %v2110_v54 = vld [vmem:[#allocation5 + $0x970] sm:$0xff] }
 0x2dd   :  { %1959 = vmatpush1.bf16.msra.mxu0 %v1512_v62  ;;  %2045 = vmatpush1.bf16.msra.mxu1 %v1514_v63  ;;  %v2112_v62 = vld [vmem:[#allocation5 + $0x980] sm:$0xff]  ;;  %v2114_v63 = vld [vmem:[#allocation5 + $0x990] sm:$0xff] }
 0x2de   :  { %2234 = vmatprep.subr.bf16.mxu0 %v2065_v14  ;;  %2320 = vmatprep.subr.bf16.mxu1 %v2067_v15  ;;  %v2117_v14 = vld [vmem:[#allocation5 + $0x9a8] sm:$0xff]  ;;  %v2119_v15 = vld [vmem:[#allocation5 + $0x9b8] sm:$0xff] }
 0x2e0   :  { %1961 = vmatmul.mubr.bf16.vlgmr.msra.gmra.mrb[8].mxu0 %v4950_v16  ;;  %2047 = vmatmul.mubr.bf16.vlgmr.msra.gmra.mrb[8].mxu1 %v4950_v16  ;;  %v2116_v16 = vld [vmem:[#allocation5 + $0x9a0] sm:$0xff] }
 0x2e1   :  { %2235 = vmatpush1.bf16.msra.mxu0 %v2064_v19  ;;  %2321 = vmatpush1.bf16.msra.mxu1 %v2066_v20  ;;  %v2123_v19 = vld [vmem:[#allocation5 + $0x9d8] sm:$0xff]  ;;  %v4952_v20 = vcombine.low %v5926_v9, %v5913_v0 }
 0x2e2   :  { %2236 = vmatprep.subr.bf16.mxu0 %v2069_v21  ;;  %2322 = vmatprep.subr.bf16.mxu1 %v2071_v22  ;;  %v4956_v21 = vcombine.low %v5928_v10, %v5928_v10  ;;  %v5941_v22 = vld [vmem:[#allocation2 + $0x8] sm:$0xee]  ;;  %v2124_v10 = vld [vmem:[#allocation5 + $0x9e0] sm:$0xff] }
 0x2e3   :  { %2266 = vmatprep.mubr.bf16.mxu0 %v2223_v23  ;;  %2352 = vmatprep.mubr.bf16.mxu1 %v2223_v23  ;;  %v5943_v23 = vld [vmem:[#allocation2 + $0x28] sm:$0x11]  ;;  %v2218_v0 = vrot.slane %v4952_v20, 1  ;;  %v2171_v20 = vld [vmem:[#allocation5 + $0xb58] sm:$0xff] }
 0x2e4   :  { %v2219_v9 = vrot.slane %v4956_v21, 1  ;;  %v2168_v21 = vld [vmem:[#allocation5 + $0xb40] sm:$0xff] }
 0x2e5   :  { %2237 = vmatpush1.bf16.msra.mxu0 %v2068_v24  ;;  %2323 = vmatpush1.bf16.msra.mxu1 %v2070_v7  ;;  %v2120_v24 = vld [vmem:[#allocation5 + $0x9c0] sm:$0xff]  ;;  %v2122_v7 = vld [vmem:[#allocation5 + $0x9d0] sm:$0xff] }
 0x2e6   :  { %2238 = vmatprep.subr.bf16.mxu0 %v2073_v25  ;;  %2324 = vmatprep.subr.bf16.mxu1 %v2075_v26  ;;  %v2125_v25 = vld [vmem:[#allocation5 + $0x9e8] sm:$0xff]  ;;  %v2127_v26 = vld [vmem:[#allocation5 + $0x9f8] sm:$0xff] }
 0x2e9   :  { %2239 = vmatpush1.bf16.msra.mxu0 %v2072_v28  ;;  %2325 = vmatpush1.bf16.msra.mxu1 %v2074_v29  ;;  %v4955_v28 = vcombine.high %v5941_v22, %v5922_v8  ;;  %v4959_v29 = vcombine.high %v5943_v23, %v5943_v23 }
 0x2ea   :  { %2240 = vmatprep.subr.bf16.mxu0 %v2077_v30  ;;  %2326 = vmatprep.subr.bf16.mxu1 %v2079_v31  ;;  %v2126_v30 = vld [vmem:[#allocation5 + $0x9f0] sm:$0xff]  ;;  %v2129_v31 = vld [vmem:[#allocation5 + $0xa08] sm:$0xff] }
 0x2ed   :  { %2241 = vmatpush1.bf16.msra.mxu0 %v2076_v32  ;;  %2327 = vmatpush1.bf16.msra.mxu1 %v2078_v34  ;;  %v2131_v32 = vld [vmem:[#allocation5 + $0xa18] sm:$0xff]  ;;  %v2227_v34 = vrot.slane %v4955_v28, 1  ;;  %v2174_v28 = vld [vmem:[#allocation5 + $0xb70] sm:$0xff] }
 0x2ee   :  { %2242 = vmatprep.subr.bf16.mxu0 %v2081_v35  ;;  %2328 = vmatprep.subr.bf16.mxu1 %v2083_v36  ;;  %v2228_v35 = vrot.slane %v4959_v29, 1  ;;  %v2220_v36 = vsel %vm317_vm0, %v2218_v0, %v2219_v9  ;;  %v2177_v29 = vld [vmem:[#allocation5 + $0xb88] sm:$0xff]  ;;  %v2179_v0 = vld [vmem:[#allocation5 + $0xb98] sm:$0xff]  ;;  %v2176_v9 = vld [vmem:[#allocation5 + $0xb80] sm:$0xff] }
 0x2f1   :  { %2243 = vmatpush1.bf16.msra.mxu0 %v2080_v37  ;;  %2329 = vmatpush1.bf16.msra.mxu1 %v2082_v38  ;;  %v2128_v37 = vld [vmem:[#allocation5 + $0xa00] sm:$0xff]  ;;  %v2130_v38 = vld [vmem:[#allocation5 + $0xa10] sm:$0xff] }
 0x2f2   :  { %2244 = vmatprep.subr.bf16.mxu0 %v2085_v39  ;;  %2330 = vmatprep.subr.bf16.mxu1 %v2087_v40  ;;  %v2133_v39 = vld [vmem:[#allocation5 + $0xa28] sm:$0xff]  ;;  %v2135_v40 = vld [vmem:[#allocation5 + $0xa38] sm:$0xff] }
 0x2f5   :  { %2245 = vmatpush1.bf16.msra.mxu0 %v2084_v41  ;;  %2331 = vmatpush1.bf16.msra.mxu1 %v2086_v42  ;;  %v2229_v41 = vsel %vm317_vm0, %v2227_v34, %v2228_v35  ;;  %v2132_v42 = vld [vmem:[#allocation5 + $0xa20] sm:$0xff]  ;;  %v2182_v34 = vld [vmem:[#allocation5 + $0xbb0] sm:$0xff]  ;;  %v2185_v35 = vld [vmem:[#allocation5 + $0xbc8] sm:$0xff] }
 0x2f6   :  { %2246 = vmatprep.subr.bf16.mxu0 %v2089_v43  ;;  %2332 = vmatprep.subr.bf16.mxu1 %v2091_v44  ;;  %v2134_v43 = vld [vmem:[#allocation5 + $0xa30] sm:$0xff]  ;;  %v2137_v44 = vld [vmem:[#allocation5 + $0xa48] sm:$0xff] }
 0x2f9   :  { %2247 = vmatpush1.bf16.msra.mxu0 %v2088_v45  ;;  %2333 = vmatpush1.bf16.msra.mxu1 %v2090_v46  ;;  %v2139_v45 = vld [vmem:[#allocation5 + $0xa58] sm:$0xff]  ;;  %v2136_v46 = vld [vmem:[#allocation5 + $0xa40] sm:$0xff] }
 0x2fa   :  { %2248 = vmatprep.subr.bf16.mxu0 %v2093_v47  ;;  %2334 = vmatprep.subr.bf16.mxu1 %v2095_v48  ;;  %v2138_v47 = vld [vmem:[#allocation5 + $0xa50] sm:$0xff]  ;;  %v2141_v48 = vld [vmem:[#allocation5 + $0xa68] sm:$0xff] }
 0x2fd   :  { %2249 = vmatpush1.bf16.msra.mxu0 %v2092_v49  ;;  %2335 = vmatpush1.bf16.msra.mxu1 %v2094_v50  ;;  %v2143_v49 = vld [vmem:[#allocation5 + $0xa78] sm:$0xff]  ;;  %v2140_v50 = vld [vmem:[#allocation5 + $0xa60] sm:$0xff] }
 0x2fe   :  { %2250 = vmatprep.subr.bf16.mxu0 %v2097_v51  ;;  %2336 = vmatprep.subr.bf16.mxu1 %v2099_v52  ;;  %v2142_v51 = vld [vmem:[#allocation5 + $0xa70] sm:$0xff]  ;;  %v2145_v52 = vld [vmem:[#allocation5 + $0xa88] sm:$0xff] }
 0x301   :  { %2251 = vmatpush1.bf16.msra.mxu0 %v2096_v53  ;;  %2337 = vmatpush1.bf16.msra.mxu1 %v2098_v27  ;;  %v2147_v53 = vld [vmem:[#allocation5 + $0xa98] sm:$0xff]  ;;  %v2144_v27 = vld [vmem:[#allocation5 + $0xa80] sm:$0xff] }
 0x302   :  { %2252 = vmatprep.subr.bf16.mxu0 %v2101_v33  ;;  %2338 = vmatprep.subr.bf16.mxu1 %v2103_v57  ;;  %v2146_v33 = vld [vmem:[#allocation5 + $0xa90] sm:$0xff]  ;;  %v2149_v57 = vld [vmem:[#allocation5 + $0xaa8] sm:$0xff] }
 0x305   :  { %2253 = vmatpush1.bf16.msra.mxu0 %v2100_v1  ;;  %2339 = vmatpush1.bf16.msra.mxu1 %v2102_v2  ;;  %v2151_v1 = vld [vmem:[#allocation5 + $0xab8] sm:$0xff]  ;;  %v2148_v2 = vld [vmem:[#allocation5 + $0xaa0] sm:$0xff] }
 0x306   :  { %2254 = vmatprep.subr.bf16.mxu0 %v2105_v3  ;;  %2340 = vmatprep.subr.bf16.mxu1 %v2107_v4  ;;  %v2150_v3 = vld [vmem:[#allocation5 + $0xab0] sm:$0xff]  ;;  %v2153_v4 = vld [vmem:[#allocation5 + $0xac8] sm:$0xff] }
 0x309   :  { %2255 = vmatpush1.bf16.msra.mxu0 %v2104_v5  ;;  %2341 = vmatpush1.bf16.msra.mxu1 %v2106_v6  ;;  %v2155_v5 = vld [vmem:[#allocation5 + $0xad8] sm:$0xff]  ;;  %v2152_v6 = vld [vmem:[#allocation5 + $0xac0] sm:$0xff] }
 0x30a   :  { %2256 = vmatprep.subr.bf16.mxu0 %v2109_v11  ;;  %2342 = vmatprep.subr.bf16.mxu1 %v2111_v60  ;;  %v2154_v11 = vld [vmem:[#allocation5 + $0xad0] sm:$0xff]  ;;  %v2157_v60 = vld [vmem:[#allocation5 + $0xae8] sm:$0xff] }
 0x30d   :  { %2257 = vmatpush1.bf16.msra.mxu0 %v2108_v12  ;;  %2343 = vmatpush1.bf16.msra.mxu1 %v2110_v54  ;;  %v2159_v12 = vld [vmem:[#allocation5 + $0xaf8] sm:$0xff]  ;;  %v2156_v54 = vld [vmem:[#allocation5 + $0xae0] sm:$0xff] }
 0x30e   :  { %2258 = vmatprep.subr.bf16.mxu0 %v2113_v61  ;;  %2344 = vmatprep.subr.bf16.mxu1 %v2115_v13  ;;  %v2158_v61 = vld [vmem:[#allocation5 + $0xaf0] sm:$0xff]  ;;  %v2161_v13 = vld [vmem:[#allocation5 + $0xb08] sm:$0xff] }
 0x311   :  { %2259 = vmatpush1.bf16.msra.mxu0 %v2112_v62  ;;  %2345 = vmatpush1.bf16.msra.mxu1 %v2114_v63  ;;  %v2163_v62 = vld [vmem:[#allocation5 + $0xb18] sm:$0xff]  ;;  %v2160_v63 = vld [vmem:[#allocation5 + $0xb00] sm:$0xff] }
 0x312   :  { %2260 = vmatprep.subr.bf16.mxu0 %v2117_v14  ;;  %2346 = vmatprep.subr.bf16.mxu1 %v2119_v15  ;;  %v2162_v14 = vld [vmem:[#allocation5 + $0xb10] sm:$0xff]  ;;  %v2165_v15 = vld [vmem:[#allocation5 + $0xb28] sm:$0xff] }
 0x315   :  { %2261 = vmatpush1.bf16.msra.mxu0 %v2116_v16  ;;  %2347 = vmatpush1.bf16.msra.mxu1 %v2118_v17  ;;  %v2167_v16 = vld [vmem:[#allocation5 + $0xb38] sm:$0xff]  ;;  %v2164_v17 = vld [vmem:[#allocation5 + $0xb20] sm:$0xff] }
 0x316   :  { %2262 = vmatprep.subr.bf16.mxu0 %v2121_v18  ;;  %2348 = vmatprep.subr.bf16.mxu1 %v2123_v19  ;;  %v2166_v18 = vld [vmem:[#allocation5 + $0xb30] sm:$0xff]  ;;  %v2169_v19 = vld [vmem:[#allocation5 + $0xb48] sm:$0xff] }
 0x319   :  { %2263 = vmatpush1.bf16.msra.mxu0 %v2120_v24  ;;  %2349 = vmatpush1.bf16.msra.mxu1 %v2122_v7  ;;  %v2170_v24 = vld [vmem:[#allocation5 + $0xb50] sm:$0xff]  ;;  %v2173_v7 = vld [vmem:[#allocation5 + $0xb68] sm:$0xff] }
 0x31a   :  { %2264 = vmatprep.subr.bf16.mxu0 %v2125_v25  ;;  %2350 = vmatprep.subr.bf16.mxu1 %v2127_v26  ;;  %v2175_v25 = vld [vmem:[#allocation5 + $0xb78] sm:$0xff]  ;;  %v2172_v26 = vld [vmem:[#allocation5 + $0xb60] sm:$0xff] }
 0x31d   :  { %2265 = vmatpush1.bf16.msra.mxu0 %v2124_v10  ;;  %2351 = vmatpush1.bf16.msra.mxu1 %v2126_v30  ;;  %v2178_v10 = vld [vmem:[#allocation5 + $0xb90] sm:$0xff]  ;;  %v2181_v30 = vld [vmem:[#allocation5 + $0xba8] sm:$0xff] }
 0x31e   :  { %2277 = vmatprep.subr.bf16.mxu0 %v2129_v31  ;;  %2363 = vmatprep.subr.bf16.mxu1 %v2131_v32  ;;  %v2183_v31 = vld [vmem:[#allocation5 + $0xbb8] sm:$0xff]  ;;  %v2180_v32 = vld [vmem:[#allocation5 + $0xba0] sm:$0xff] }
 0x320   :  { %2267 = vmatmul.mubr.bf16.vlgmr.msra.gmra.mrb[8].mxu0 %v2220_v36  ;;  %2353 = vmatmul.mubr.bf16.vlgmr.msra.gmra.mrb[8].mxu1 %v2220_v36  ;;  %v2187_v36 = vld [vmem:[#allocation5 + $0xbd8] sm:$0xff] }
 0x321   :  { %2278 = vmatpush1.bf16.msra.mxu0 %v2128_v37  ;;  %2364 = vmatpush1.bf16.msra.mxu1 %v2130_v38  ;;  %v4954_v37 = vcombine.low %v5941_v22, %v5922_v8  ;;  %v4958_v38 = vcombine.low %v5943_v23, %v5943_v23  ;;  %v2414_v22 = vld [vmem:[#allocation15] sm:$0xf] }
 0x322   :  { %2279 = vmatprep.subr.bf16.mxu0 %v2133_v39  ;;  %2365 = vmatprep.subr.bf16.mxu1 %v2135_v40  ;;  %v2184_v39 = vld [vmem:[#allocation5 + $0xbc0] sm:$0xff]  ;;  %v2186_v40 = vld [vmem:[#allocation5 + $0xbd0] sm:$0xff]  ;;  %v2419_v23 = vrot.slane %v2414_v22, %v5860_v55 }
 0x323   :  { %2309 = vmatprep.mubr.bf16.mxu0 %v2229_v41  ;;  %2395 = vmatprep.mubr.bf16.mxu1 %v2229_v41  ;;  %v2189_v41 = vld [vmem:[#allocation5 + $0xbe8] sm:$0xff] }
 0x325   :  { %2280 = vmatpush1.bf16.msra.mxu0 %v2132_v42  ;;  %2366 = vmatpush1.bf16.msra.mxu1 %v2134_v43  ;;  %v2191_v42 = vld [vmem:[#allocation5 + $0xbf8] sm:$0xff]  ;;  %v2224_v43 = vrot.slane %v4954_v37, 1 }
 0x326   :  { %2281 = vmatprep.subr.bf16.mxu0 %v2137_v44  ;;  %2367 = vmatprep.subr.bf16.mxu1 %v2139_v45  ;;  %v2225_v44 = vrot.slane %v4958_v38, 1  ;;  %v2188_v45 = vld [vmem:[#allocation5 + $0xbe0] sm:$0xff] }
 0x328   :  { %v2226_v8 = vsel %vm317_vm0, %v2224_v43, %v2225_v44 }
 0x329   :  { %2282 = vmatpush1.bf16.msra.mxu0 %v2136_v46  ;;  %2368 = vmatpush1.bf16.msra.mxu1 %v2138_v47  ;;  %v2190_v46 = vld [vmem:[#allocation5 + $0xbf0] sm:$0xff]  ;;  %v2427_v47 = vrot.slane %v2414_v22, %v5862_v56 }
 0x32a   :  { %2283 = vmatprep.subr.bf16.mxu0 %v2141_v48  ;;  %2369 = vmatprep.subr.bf16.mxu1 %v2143_v49  ;;  %v2423_v48 = vrot.slane %v2414_v22, %v5864_v58  ;;  %v2431_v49 = vrot.slane %v2414_v22, %v5866_v59 }
 0x32d   :  { %2284 = vmatpush1.bf16.msra.mxu0 %v2140_v50  ;;  %2370 = vmatpush1.bf16.msra.mxu1 %v2142_v51 }
 0x32e   :  { %2285 = vmatprep.subr.bf16.mxu0 %v2145_v52  ;;  %2371 = vmatprep.subr.bf16.mxu1 %v2147_v53 }
 0x331   :  { %2286 = vmatpush1.bf16.msra.mxu0 %v2144_v27  ;;  %2372 = vmatpush1.bf16.msra.mxu1 %v2146_v33 }
 0x332   :  { %2287 = vmatprep.subr.bf16.mxu0 %v2149_v57  ;;  %2373 = vmatprep.subr.bf16.mxu1 %v2151_v1 }
 0x335   :  { %2288 = vmatpush1.bf16.msra.mxu0 %v2148_v2  ;;  %2374 = vmatpush1.bf16.msra.mxu1 %v2150_v3 }
 0x336   :  { %2289 = vmatprep.subr.bf16.mxu0 %v2153_v4  ;;  %2375 = vmatprep.subr.bf16.mxu1 %v2155_v5 }
 0x339   :  { %2290 = vmatpush1.bf16.msra.mxu0 %v2152_v6  ;;  %2376 = vmatpush1.bf16.msra.mxu1 %v2154_v11 }
 0x33a   :  { %2291 = vmatprep.subr.bf16.mxu0 %v2157_v60  ;;  %2377 = vmatprep.subr.bf16.mxu1 %v2159_v12 }
 0x33d   :  { %2292 = vmatpush1.bf16.msra.mxu0 %v2156_v54  ;;  %2378 = vmatpush1.bf16.msra.mxu1 %v2158_v61 }
 0x33e   :  { %2293 = vmatprep.subr.bf16.mxu0 %v2161_v13  ;;  %2379 = vmatprep.subr.bf16.mxu1 %v2163_v62 }
 0x341   :  { %2294 = vmatpush1.bf16.msra.mxu0 %v2160_v63  ;;  %2380 = vmatpush1.bf16.msra.mxu1 %v2162_v14 }
 0x342   :  { %2295 = vmatprep.subr.bf16.mxu0 %v2165_v15  ;;  %2381 = vmatprep.subr.bf16.mxu1 %v2167_v16 }
 0x345   :  { %2296 = vmatpush1.bf16.msra.mxu0 %v2164_v17  ;;  %2382 = vmatpush1.bf16.msra.mxu1 %v2166_v18 }
 0x346   :  { %2297 = vmatprep.subr.bf16.mxu0 %v2169_v19  ;;  %2383 = vmatprep.subr.bf16.mxu1 %v2171_v20 }
 0x349   :  { %2298 = vmatpush1.bf16.msra.mxu0 %v2168_v21  ;;  %2384 = vmatpush1.bf16.msra.mxu1 %v2170_v24 }
 0x34a   :  { %2299 = vmatprep.subr.bf16.mxu0 %v2173_v7  ;;  %2385 = vmatprep.subr.bf16.mxu1 %v2175_v25 }
 0x34d   :  { %2300 = vmatpush1.bf16.msra.mxu0 %v2172_v26  ;;  %2386 = vmatpush1.bf16.msra.mxu1 %v2174_v28 }
 0x34e   :  { %2301 = vmatprep.subr.bf16.mxu0 %v2177_v29  ;;  %2387 = vmatprep.subr.bf16.mxu1 %v2179_v0 }
 0x351   :  { %2302 = vmatpush1.bf16.msra.mxu0 %v2176_v9  ;;  %2388 = vmatpush1.bf16.msra.mxu1 %v2178_v10 }
 0x352   :  { %2303 = vmatprep.subr.bf16.mxu0 %v2181_v30  ;;  %2389 = vmatprep.subr.bf16.mxu1 %v2183_v31 }
 0x355   :  { %2304 = vmatpush1.bf16.msra.mxu0 %v2180_v32  ;;  %2390 = vmatpush1.bf16.msra.mxu1 %v2182_v34 }
 0x356   :  { %2305 = vmatprep.subr.bf16.mxu0 %v2185_v35  ;;  %2391 = vmatprep.subr.bf16.mxu1 %v2187_v36 }
 0x359   :  { %2306 = vmatpush1.bf16.msra.mxu0 %v2184_v39  ;;  %2392 = vmatpush1.bf16.msra.mxu1 %v2186_v40 }
 0x35a   :  { %2307 = vmatprep.subr.bf16.mxu0 %v2189_v41  ;;  %2393 = vmatprep.subr.bf16.mxu1 %v2191_v42 }
 0x35d   :  { %2308 = vmatpush1.bf16.msra.mxu0 %v2188_v45  ;;  %2394 = vmatpush1.bf16.msra.mxu1 %v2190_v46 }
 0x360   :  { %2310 = vmatmul.mubr.bf16.vlgmr.msra.gmra.mrb[8].mxu0 %v2226_v8  ;;  %2396 = vmatmul.mubr.bf16.vlgmr.msra.gmra.mrb[8].mxu1 %v2226_v8 }
 0x433   :  { %v2311_v50 = vpop.f32.mrb[8].mxu0  ;;  %v2397_v51 = vpop.f32.mrb[8].mxu1 }
 0x434   :  { %v2436_v52 = vadd.f32 %v2419_v23, %v2311_v50  ;;  %v2438_v53 = vadd.f32 %v2427_v47, %v2397_v51  ;;  %v2313_v27 = vpop.f32.mrb[9].mxu0  ;;  %v2399_v33 = vpop.f32.mrb[9].mxu1 }
 0x435   :  { %v2437_v57 = vadd.f32 %v2423_v48, %v2313_v27  ;;  %v2439_v1 = vadd.f32 %v2431_v49, %v2399_v33  ;;  %v2315_v2 = vpop.f32.mrb[10].mxu0  ;;  %v2401_v3 = vpop.f32.mrb[10].mxu1 }
 0x436   :  { %v2444_v4 = vmax.f32 %v2436_v52, 0.0  ;;  %v2446_v5 = vmax.f32 %v2438_v53, 0.0  ;;  %v2440_v6 = vadd.f32 %v2419_v23, %v2315_v2  ;;  %v2442_v11 = vadd.f32 %v2427_v47, %v2401_v3  ;;  %v2317_v60 = vpop.f32.mrb[11].mxu0  ;;  %v2403_v12 = vpop.f32.mrb[11].mxu1 }
 0x437   :  { %v2445_v54 = vmax.f32 %v2437_v57, 0.0  ;;  %v2447_v61 = vmax.f32 %v2439_v1, 0.0  ;;  %v2441_v13 = vadd.f32 %v2423_v48, %v2317_v60  ;;  %v2443_v62 = vadd.f32 %v2431_v49, %v2403_v12 }
 0x438   :  { %v2448_v63 = vmax.f32 %v2440_v6, 0.0  ;;  %v2450_v14 = vmax.f32 %v2442_v11, 0.0 }
 0x439   :  { %v5009_v15 = vpack.c.bf16 %v2445_v54, %v2444_v4  ;;  %v5010_v16 = vpack.c.bf16 %v2447_v61, %v2446_v5  ;;  %v2449_v17 = vmax.f32 %v2441_v13, 0.0  ;;  %v2451_v18 = vmax.f32 %v2443_v62, 0.0 }
 0x43b   :  { %v2466_v19 = vrot.slane %v5009_v15, 7  ;;  %2474 = vst [vmem:[#allocation3] sm:$0x22] %v5009_v15  ;;  %2476 = vst [vmem:[#allocation3 + $0x10] sm:$0x44] %v5009_v15  ;;  %v4962_v20 = vrot.slane %v5009_v15, 9  ;;  %v5011_v7 = vpack.c.bf16 %v2449_v17, %v2448_v63  ;;  %v5012_v25 = vpack.c.bf16 %v2451_v18, %v2450_v14 }
 0x43c   :  { %v2467_v21 = vrot.slane %v5010_v16, 7  ;;  %2475 = vst [vmem:[#allocation3 + $0x8] sm:$0x22] %v5010_v16  ;;  %2477 = vst [vmem:[#allocation3 + $0x18] sm:$0x44] %v5010_v16  ;;  %v4963_v24 = vrot.slane %v5010_v16, 9 }
 0x43d   :  { %2470 = vst [vmem:[#allocation3 + $0x10] sm:$0x22] %v2466_v19  ;;  %2484 = vst [vmem:[#allocation3] sm:$0x44] %v4962_v20  ;;  %v2492_v26 = vrot.slane %v5011_v7, 5  ;;  %v2498_v28 = vrot.slane %v5011_v7, 6 }
 0x43e   :  { %2471 = vst [vmem:[#allocation3 + $0x18] sm:$0x22] %v2467_v21  ;;  %2485 = vst [vmem:[#allocation3 + $0x8] sm:$0x44] %v4963_v24  ;;  %v4966_v29 = vrot.slane %v5011_v7, 11  ;;  %v2493_v0 = vrot.slane %v5012_v25, 5 }
 0x43f   :  { %v2499_v9 = vrot.slane %v5012_v25, 6  ;;  %v4967_v10 = vrot.slane %v5012_v25, 11  ;;  %2496 = vst [vmem:[#allocation3 + $0x10] sm:$0x88] %v2492_v26  ;;  %2502 = vst [vmem:[#allocation3] sm:$0x88] %v2498_v28 }
 0x440   :  { %v2504_v30 = vrot.slane %v2498_v28, 4  ;;  %2516 = vst [vmem:[#allocation3 + $0x10] sm:$0x11] %v4966_v29  ;;  %2497 = vst [vmem:[#allocation3 + $0x18] sm:$0x88] %v2493_v0 }
 0x441   :  { %2503 = vst [vmem:[#allocation3 + $0x8] sm:$0x88] %v2499_v9  ;;  %v2505_v31 = vrot.slane %v2499_v9, 4  ;;  %2517 = vst [vmem:[#allocation3 + $0x18] sm:$0x11] %v4967_v10 }
 0x442   :  { %2508 = vst [vmem:[#allocation3 + $0x20] sm:$0x11] %v2504_v30 }
 0x443   :  { %2509 = vst [vmem:[#allocation3 + $0x28] sm:$0x11] %v2505_v31 }
 0x444   :  { %5588 = dma.done.wait [#allocation9 + $0x1], 49152 }
 0x445   :  { %5589 = vsyncadd [#allocation9 + $0x1], 4294918144  ;;  %v2656_v32 = vld [vmem:[#allocation6 + $0x408] sm:$0xff]  ;;  %v2655_v35 = vld [vmem:[#allocation6 + $0x400] sm:$0xff] }
 0x446   :  { %v2720_v34 = vld [vmem:[#allocation6 + $0x608] sm:$0xff]  ;;  %2807 = vmatprep.subr.bf16.mxu0 %v2656_v32  ;;  %v2719_v36 = vld [vmem:[#allocation6 + $0x600] sm:$0xff] }
 0x447   :  { %2848 = vmatprep.subr.bf16.mxu1 %v2720_v34  ;;  %v2660_v37 = vld [vmem:[#allocation6 + $0x428] sm:$0xff]  ;;  %2808 = vmatpush1.bf16.msra.mxu0 %v2655_v35  ;;  %v2659_v39 = vld [vmem:[#allocation6 + $0x420] sm:$0xff] }
 0x448   :  { %v2724_v38 = vld [vmem:[#allocation6 + $0x628] sm:$0xff]  ;;  %2849 = vmatpush1.bf16.msra.mxu1 %v2719_v36  ;;  %2809 = vmatprep.subr.bf16.mxu0 %v2660_v37  ;;  %v2723_v40 = vld [vmem:[#allocation6 + $0x620] sm:$0xff] }
 0x449   :  { %2850 = vmatprep.subr.bf16.mxu1 %v2724_v38  ;;  %v2664_v41 = vld [vmem:[#allocation6 + $0x448] sm:$0xff]  ;;  %v2663_v43 = vld [vmem:[#allocation6 + $0x440] sm:$0xff] }
 0x44a   :  { %v2728_v42 = vld [vmem:[#allocation6 + $0x648] sm:$0xff]  ;;  %v2727_v44 = vld [vmem:[#allocation6 + $0x640] sm:$0xff] }
 0x44b   :  { %2810 = vmatpush1.bf16.msra.mxu0 %v2659_v39  ;;  %v2668_v45 = vld [vmem:[#allocation6 + $0x468] sm:$0xff]  ;;  %v2667_v8 = vld [vmem:[#allocation6 + $0x460] sm:$0xff] }
 0x44c   :  { %2851 = vmatpush1.bf16.msra.mxu1 %v2723_v40  ;;  %2811 = vmatprep.subr.bf16.mxu0 %v2664_v41  ;;  %v2732_v46 = vld [vmem:[#allocation6 + $0x668] sm:$0xff]  ;;  %v2731_v22 = vld [vmem:[#allocation6 + $0x660] sm:$0xff] }
 0x44d   :  { %2852 = vmatprep.subr.bf16.mxu1 %v2728_v42  ;;  %v2672_v23 = vld [vmem:[#allocation6 + $0x488] sm:$0xff]  ;;  %v2671_v48 = vld [vmem:[#allocation6 + $0x480] sm:$0xff] }
 0x44e   :  { %v2736_v47 = vld [vmem:[#allocation6 + $0x688] sm:$0xff]  ;;  %v2735_v49 = vld [vmem:[#allocation6 + $0x680] sm:$0xff] }
 0x44f   :  { %2812 = vmatpush1.bf16.msra.mxu0 %v2663_v43  ;;  %v2676_v50 = vld [vmem:[#allocation6 + $0x4a8] sm:$0xff]  ;;  %v2675_v52 = vld [vmem:[#allocation6 + $0x4a0] sm:$0xff]  ;;  %v2658_v43 = vld [vmem:[#allocation6 + $0x418] sm:$0xff] }
 0x450   :  { %2853 = vmatpush1.bf16.msra.mxu1 %v2727_v44  ;;  %2813 = vmatprep.subr.bf16.mxu0 %v2668_v45  ;;  %v2740_v51 = vld [vmem:[#allocation6 + $0x6a8] sm:$0xff]  ;;  %v2739_v53 = vld [vmem:[#allocation6 + $0x6a0] sm:$0xff]  ;;  %v2722_v44 = vld [vmem:[#allocation6 + $0x618] sm:$0xff] }
 0x451   :  { %2854 = vmatprep.subr.bf16.mxu1 %v2732_v46  ;;  %v2680_v27 = vld [vmem:[#allocation6 + $0x4c8] sm:$0xff]  ;;  %v2679_v57 = vld [vmem:[#allocation6 + $0x4c0] sm:$0xff] }
 0x452   :  { %v2744_v33 = vld [vmem:[#allocation6 + $0x6c8] sm:$0xff]  ;;  %v5960_v1 = vld [vmem:[#allocation3 + $0x14] ss:$16 sps:$4 sm:$0x1e]  }
 0x453   :  { %2814 = vmatpush1.bf16.msra.mxu0 %v2667_v8  ;;  %v2743_v2 = vld [vmem:[#allocation6 + $0x6c0] sm:$0xff]  ;;  %v2684_v3 = vld [vmem:[#allocation6 + $0x4e8] sm:$0xff]  ;;  %v2800_v5 = vrot.slane %v5960_v1, 1  ;;  %v2657_v8 = vld [vmem:[#allocation6 + $0x410] sm:$0xff] }
 0x454   :  { %2855 = vmatpush1.bf16.msra.mxu1 %v2731_v22  ;;  %2815 = vmatprep.subr.bf16.mxu0 %v2672_v23  ;;  %v2748_v4 = vld [vmem:[#allocation6 + $0x6e8] sm:$0xff]  ;;  %v2683_v11 = vld [vmem:[#allocation6 + $0x4e0] sm:$0xff]  ;;  %v2721_v22 = vld [vmem:[#allocation6 + $0x610] sm:$0xff] }
 0x455   :  { %2856 = vmatprep.subr.bf16.mxu1 %v2736_v47  ;;  %v5963_v6 = vld [vmem:[#allocation3 + $0x1c] ss:$16 sps:$4 sm:$0x1e]   ;;  %v2747_v60 = vld [vmem:[#allocation6 + $0x6e0] sm:$0xff]  ;;  %2839 = vmatprep.mubr.bf16.mxu0 %v2800_v5 }
 0x456   :  { %v2802_v12 = vrot.slane %v5963_v6, 1  ;;  %v2688_v54 = vld [vmem:[#allocation6 + $0x508] sm:$0xff]  ;;  %v2687_v13 = vld [vmem:[#allocation6 + $0x500] sm:$0xff]  ;;  %v2662_v23 = vld [vmem:[#allocation6 + $0x438] sm:$0xff] }
 0x457   :  { %2816 = vmatpush1.bf16.msra.mxu0 %v2671_v48  ;;  %v2752_v61 = vld [vmem:[#allocation6 + $0x708] sm:$0xff]  ;;  %v2751_v62 = vld [vmem:[#allocation6 + $0x700] sm:$0xff]  ;;  %v2726_v47 = vld [vmem:[#allocation6 + $0x638] sm:$0xff] }
 0x458   :  { %2857 = vmatpush1.bf16.msra.mxu1 %v2735_v49  ;;  %2817 = vmatprep.subr.bf16.mxu0 %v2676_v50  ;;  %v2692_v63 = vld [vmem:[#allocation6 + $0x528] sm:$0xff]  ;;  %v2691_v15 = vld [vmem:[#allocation6 + $0x520] sm:$0xff]  ;;  %v2661_v48 = vld [vmem:[#allocation6 + $0x430] sm:$0xff] }
 0x459   :  { %2858 = vmatprep.subr.bf16.mxu1 %v2740_v51  ;;  %2880 = vmatprep.mubr.bf16.mxu1 %v2802_v12  ;;  %v2756_v14 = vld [vmem:[#allocation6 + $0x728] sm:$0xff]  ;;  %v2755_v16 = vld [vmem:[#allocation6 + $0x720] sm:$0xff]  ;;  %v2725_v49 = vld [vmem:[#allocation6 + $0x630] sm:$0xff] }
 0x45a   :  { %v2696_v17 = vld [vmem:[#allocation6 + $0x548] sm:$0xff]  ;;  %v2695_v19 = vld [vmem:[#allocation6 + $0x540] sm:$0xff]  ;;  %v2666_v50 = vld [vmem:[#allocation6 + $0x458] sm:$0xff] }
 0x45b   :  { %2818 = vmatpush1.bf16.msra.mxu0 %v2675_v52  ;;  %v2760_v18 = vld [vmem:[#allocation6 + $0x748] sm:$0xff]  ;;  %v2759_v20 = vld [vmem:[#allocation6 + $0x740] sm:$0xff]  ;;  %v2730_v51 = vld [vmem:[#allocation6 + $0x658] sm:$0xff] }
 0x45c   :  { %2859 = vmatpush1.bf16.msra.mxu1 %v2739_v53  ;;  %2819 = vmatprep.subr.bf16.mxu0 %v2680_v27  ;;  %v2700_v21 = vld [vmem:[#allocation6 + $0x568] sm:$0xff]  ;;  %v2699_v7 = vld [vmem:[#allocation6 + $0x560] sm:$0xff]  ;;  %v2665_v52 = vld [vmem:[#allocation6 + $0x450] sm:$0xff] }
 0x45d   :  { %2860 = vmatprep.subr.bf16.mxu1 %v2744_v33  ;;  %v2764_v24 = vld [vmem:[#allocation6 + $0x768] sm:$0xff]  ;;  %v2763_v25 = vld [vmem:[#allocation6 + $0x760] sm:$0xff]  ;;  %v2729_v53 = vld [vmem:[#allocation6 + $0x650] sm:$0xff] }
 0x45e   :  { %v2704_v26 = vld [vmem:[#allocation6 + $0x588] sm:$0xff]  ;;  %v2703_v29 = vld [vmem:[#allocation6 + $0x580] sm:$0xff]  ;;  %v2670_v27 = vld [vmem:[#allocation6 + $0x478] sm:$0xff] }
 0x45f   :  { %2820 = vmatpush1.bf16.msra.mxu0 %v2679_v57  ;;  %v2768_v28 = vld [vmem:[#allocation6 + $0x788] sm:$0xff]  ;;  %v2767_v0 = vld [vmem:[#allocation6 + $0x780] sm:$0xff]  ;;  %v2734_v33 = vld [vmem:[#allocation6 + $0x678] sm:$0xff] }
 0x460   :  { %2861 = vmatpush1.bf16.msra.mxu1 %v2743_v2  ;;  %2821 = vmatprep.subr.bf16.mxu0 %v2684_v3  ;;  %v2708_v9 = vld [vmem:[#allocation6 + $0x5a8] sm:$0xff]  ;;  %v2707_v30 = vld [vmem:[#allocation6 + $0x5a0] sm:$0xff]  ;;  %v2669_v57 = vld [vmem:[#allocation6 + $0x470] sm:$0xff] }
 0x461   :  { %2862 = vmatprep.subr.bf16.mxu1 %v2748_v4  ;;  %v2772_v10 = vld [vmem:[#allocation6 + $0x7a8] sm:$0xff]  ;;  %v2771_v31 = vld [vmem:[#allocation6 + $0x7a0] sm:$0xff]  ;;  %v2733_v2 = vld [vmem:[#allocation6 + $0x670] sm:$0xff] }
 0x462   :  { %v2712_v32 = vld [vmem:[#allocation6 + $0x5c8] sm:$0xff]  ;;  %v2711_v35 = vld [vmem:[#allocation6 + $0x5c0] sm:$0xff]  ;;  %v2674_v3 = vld [vmem:[#allocation6 + $0x498] sm:$0xff] }
 0x463   :  { %2822 = vmatpush1.bf16.msra.mxu0 %v2683_v11  ;;  %v2776_v34 = vld [vmem:[#allocation6 + $0x7c8] sm:$0xff]  ;;  %v2775_v36 = vld [vmem:[#allocation6 + $0x7c0] sm:$0xff]  ;;  %v2738_v1 = vld [vmem:[#allocation6 + $0x698] sm:$0xff] }
 0x464   :  { %2863 = vmatpush1.bf16.msra.mxu1 %v2747_v60  ;;  %2823 = vmatprep.subr.bf16.mxu0 %v2688_v54  ;;  %v2716_v37 = vld [vmem:[#allocation6 + $0x5e8] sm:$0xff]  ;;  %v5970_v39 = vld [vmem:[#allocation3 + $0x10] ss:$16 sps:$4 sm:$0x1e]   ;;  %v2678_v6 = vld [vmem:[#allocation6 + $0x4b8] sm:$0xff] }
 0x465   :  { %2864 = vmatprep.subr.bf16.mxu1 %v2752_v61  ;;  %v2780_v38 = vld [vmem:[#allocation6 + $0x7e8] sm:$0xff]  ;;  %v2715_v41 = vld [vmem:[#allocation6 + $0x5e0] sm:$0xff]  ;;  %v2799_v45 = vrot.slane %v5970_v39, 1  ;;  %v2673_v4 = vld [vmem:[#allocation6 + $0x490] sm:$0xff] }
 0x466   :  { %v5972_v40 = vld [vmem:[#allocation3 + $0x18] ss:$16 sps:$4 sm:$0x1e]   ;;  %v2779_v42 = vld [vmem:[#allocation6 + $0x7e0] sm:$0xff]  ;;  %v2677_v60 = vld [vmem:[#allocation6 + $0x4b0] sm:$0xff] }
 0x467   :  { %2824 = vmatpush1.bf16.msra.mxu0 %v2687_v13  ;;  %v2801_v46 = vrot.slane %v5972_v40, 1  ;;  %v2742_v11 = vld [vmem:[#allocation6 + $0x6b8] sm:$0xff]  ;;  %v2681_v13 = vld [vmem:[#allocation6 + $0x4d0] sm:$0xff]  ;;  %v2530_v39 = vld [vmem:[#allocation6 + $0x40] sm:$0xff] }
 0x468   :  { %2865 = vmatpush1.bf16.msra.mxu1 %v2751_v62  ;;  %2825 = vmatprep.subr.bf16.mxu0 %v2692_v63  ;;  %v2682_v54 = vld [vmem:[#allocation6 + $0x4d8] sm:$0xff]  ;;  %v2745_v62 = vld [vmem:[#allocation6 + $0x6d0] sm:$0xff]  ;;  %v2535_v40 = vld [vmem:[#allocation6 + $0x68] sm:$0xff] }
 0x469   :  { %2866 = vmatprep.subr.bf16.mxu1 %v2756_v14  ;;  %v2746_v61 = vld [vmem:[#allocation6 + $0x6d8] sm:$0xff] }
 0x46a   :  { %v2686_v63 = vld [vmem:[#allocation6 + $0x4f8] sm:$0xff] }
 0x46b   :  { %2826 = vmatpush1.bf16.msra.mxu0 %v2691_v15  ;;  %v2750_v14 = vld [vmem:[#allocation6 + $0x6f8] sm:$0xff]  ;;  %v2685_v15 = vld [vmem:[#allocation6 + $0x4f0] sm:$0xff] }
 0x46c   :  { %2867 = vmatpush1.bf16.msra.mxu1 %v2755_v16  ;;  %2827 = vmatprep.subr.bf16.mxu0 %v2696_v17  ;;  %v2749_v16 = vld [vmem:[#allocation6 + $0x6f0] sm:$0xff]  ;;  %v2690_v17 = vld [vmem:[#allocation6 + $0x518] sm:$0xff] }
 0x46d   :  { %2868 = vmatprep.subr.bf16.mxu1 %v2760_v18  ;;  %v2754_v18 = vld [vmem:[#allocation6 + $0x718] sm:$0xff] }
 0x46f   :  { %2828 = vmatpush1.bf16.msra.mxu0 %v2695_v19  ;;  %v2689_v19 = vld [vmem:[#allocation6 + $0x510] sm:$0xff] }
 0x470   :  { %2869 = vmatpush1.bf16.msra.mxu1 %v2759_v20  ;;  %2829 = vmatprep.subr.bf16.mxu0 %v2700_v21  ;;  %v2753_v20 = vld [vmem:[#allocation6 + $0x710] sm:$0xff]  ;;  %v2694_v21 = vld [vmem:[#allocation6 + $0x538] sm:$0xff] }
 0x471   :  { %2870 = vmatprep.subr.bf16.mxu1 %v2764_v24  ;;  %v2758_v24 = vld [vmem:[#allocation6 + $0x738] sm:$0xff] }
 0x473   :  { %2830 = vmatpush1.bf16.msra.mxu0 %v2699_v7  ;;  %v2693_v7 = vld [vmem:[#allocation6 + $0x530] sm:$0xff] }
 0x474   :  { %2871 = vmatpush1.bf16.msra.mxu1 %v2763_v25  ;;  %2831 = vmatprep.subr.bf16.mxu0 %v2704_v26  ;;  %v2757_v25 = vld [vmem:[#allocation6 + $0x730] sm:$0xff]  ;;  %v2698_v26 = vld [vmem:[#allocation6 + $0x558] sm:$0xff] }
 0x475   :  { %2872 = vmatprep.subr.bf16.mxu1 %v2768_v28  ;;  %v2762_v28 = vld [vmem:[#allocation6 + $0x758] sm:$0xff] }
 0x477   :  { %2832 = vmatpush1.bf16.msra.mxu0 %v2703_v29  ;;  %v2697_v29 = vld [vmem:[#allocation6 + $0x550] sm:$0xff] }
 0x478   :  { %2873 = vmatpush1.bf16.msra.mxu1 %v2767_v0  ;;  %2833 = vmatprep.subr.bf16.mxu0 %v2708_v9  ;;  %v2761_v0 = vld [vmem:[#allocation6 + $0x750] sm:$0xff]  ;;  %v2702_v9 = vld [vmem:[#allocation6 + $0x578] sm:$0xff] }
 0x479   :  { %2874 = vmatprep.subr.bf16.mxu1 %v2772_v10  ;;  %v2766_v10 = vld [vmem:[#allocation6 + $0x778] sm:$0xff] }
 0x47b   :  { %2834 = vmatpush1.bf16.msra.mxu0 %v2707_v30  ;;  %v2701_v30 = vld [vmem:[#allocation6 + $0x570] sm:$0xff] }
 0x47c   :  { %2875 = vmatpush1.bf16.msra.mxu1 %v2771_v31  ;;  %2835 = vmatprep.subr.bf16.mxu0 %v2712_v32  ;;  %v2765_v31 = vld [vmem:[#allocation6 + $0x770] sm:$0xff]  ;;  %v2706_v32 = vld [vmem:[#allocation6 + $0x598] sm:$0xff] }
 0x47d   :  { %2876 = vmatprep.subr.bf16.mxu1 %v2776_v34  ;;  %v2770_v34 = vld [vmem:[#allocation6 + $0x798] sm:$0xff] }
 0x47f   :  { %2836 = vmatpush1.bf16.msra.mxu0 %v2711_v35  ;;  %v2705_v35 = vld [vmem:[#allocation6 + $0x590] sm:$0xff] }
 0x480   :  { %2877 = vmatpush1.bf16.msra.mxu1 %v2775_v36  ;;  %2837 = vmatprep.subr.bf16.mxu0 %v2716_v37  ;;  %v2769_v36 = vld [vmem:[#allocation6 + $0x790] sm:$0xff]  ;;  %v2710_v37 = vld [vmem:[#allocation6 + $0x5b8] sm:$0xff] }
 0x481   :  { %2878 = vmatprep.subr.bf16.mxu1 %v2780_v38  ;;  %v2774_v38 = vld [vmem:[#allocation6 + $0x7b8] sm:$0xff] }
 0x483   :  { %2838 = vmatpush1.bf16.msra.mxu0 %v2715_v41  ;;  %v2709_v41 = vld [vmem:[#allocation6 + $0x5b0] sm:$0xff] }
 0x484   :  { %2879 = vmatpush1.bf16.msra.mxu1 %v2779_v42  ;;  %2889 = vmatprep.subr.bf16.mxu0 %v2658_v43  ;;  %v2773_v42 = vld [vmem:[#allocation6 + $0x7b0] sm:$0xff]  ;;  %v2714_v43 = vld [vmem:[#allocation6 + $0x5d8] sm:$0xff] }
 0x485   :  { %2930 = vmatprep.subr.bf16.mxu1 %v2722_v44  ;;  %v2778_v44 = vld [vmem:[#allocation6 + $0x7d8] sm:$0xff] }
 0x486   :  { %2840 = vmatmul.mubr.bf16.vlgmr.msra.gmra.mrb[12].mxu0 %v2799_v45 }
 0x487   :  { %2881 = vmatmul.mubr.bf16.vlgmr.msra.gmra.mrb[12].mxu1 %v2801_v46  ;;  %2890 = vmatpush1.bf16.msra.mxu0 %v2657_v8  ;;  %v2713_v8 = vld [vmem:[#allocation6 + $0x5d0] sm:$0xff] }
 0x488   :  { %2931 = vmatpush1.bf16.msra.mxu1 %v2721_v22  ;;  %2891 = vmatprep.subr.bf16.mxu0 %v2662_v23  ;;  %v2777_v22 = vld [vmem:[#allocation6 + $0x7d0] sm:$0xff]  ;;  %v2718_v23 = vld [vmem:[#allocation6 + $0x5f8] sm:$0xff] }
 0x489   :  { %2932 = vmatprep.subr.bf16.mxu1 %v2726_v47  ;;  %2921 = vmatprep.mubr.bf16.mxu0 %v2800_v5  ;;  %v2737_v5 = vld [vmem:[#allocation6 + $0x690] sm:$0xff]  ;;  %v2782_v47 = vld [vmem:[#allocation6 + $0x7f8] sm:$0xff] }
 0x48a   :  { %2962 = vmatprep.mubr.bf16.mxu1 %v2802_v12  ;;  %v2741_v12 = vld [vmem:[#allocation6 + $0x6b0] sm:$0xff] }
 0x48b   :  { %2892 = vmatpush1.bf16.msra.mxu0 %v2661_v48  ;;  %v2717_v48 = vld [vmem:[#allocation6 + $0x5f0] sm:$0xff] }
 0x48c   :  { %2933 = vmatpush1.bf16.msra.mxu1 %v2725_v49  ;;  %2893 = vmatprep.subr.bf16.mxu0 %v2666_v50  ;;  %v2781_v49 = vld [vmem:[#allocation6 + $0x7f0] sm:$0xff]  ;;  %v2523_v50 = vld [vmem:[#allocation6 + $0x8] sm:$0xff] }
 0x48d   :  { %2934 = vmatprep.subr.bf16.mxu1 %v2730_v51  ;;  %v2587_v51 = vld [vmem:[#allocation6 + $0x208] sm:$0xff] }
 0x48f   :  { %2894 = vmatpush1.bf16.msra.mxu0 %v2665_v52  ;;  %v5984_v52 = vld [vmem:[#allocation3] sm:$0xff] }
 0x490   :  { %2935 = vmatpush1.bf16.msra.mxu1 %v2729_v53  ;;  %2895 = vmatprep.subr.bf16.mxu0 %v2670_v27  ;;  %v5986_v53 = vld [vmem:[#allocation3 + $0x8] sm:$0xff]  ;;  %v2522_v27 = vld [vmem:[#allocation6] sm:$0xff] }
 0x491   :  { %2936 = vmatprep.subr.bf16.mxu1 %v2734_v33  ;;  %v2586_v33 = vld [vmem:[#allocation6 + $0x200] sm:$0xff] }
 0x493   :  { %2896 = vmatpush1.bf16.msra.mxu0 %v2669_v57  ;;  %v2527_v57 = vld [vmem:[#allocation6 + $0x28] sm:$0xff] }
 0x494   :  { %2937 = vmatpush1.bf16.msra.mxu1 %v2733_v2  ;;  %2897 = vmatprep.subr.bf16.mxu0 %v2674_v3  ;;  %v2591_v2 = vld [vmem:[#allocation6 + $0x228] sm:$0xff]  ;;  %v5990_v3 = vcombine.high %v5984_v52, %v5984_v52 }
 0x495   :  { %2938 = vmatprep.subr.bf16.mxu1 %v2738_v1  ;;  %v5994_v1 = vcombine.high %v5986_v53, %v5986_v53 }
 0x497   :  { %2898 = vmatpush1.bf16.msra.mxu0 %v2673_v4  ;;  %v2526_v4 = vld [vmem:[#allocation6 + $0x20] sm:$0xff] }
 0x498   :  { %2939 = vmatpush1.bf16.msra.mxu1 %v2737_v5  ;;  %2899 = vmatprep.subr.bf16.mxu0 %v2678_v6  ;;  %v2590_v5 = vld [vmem:[#allocation6 + $0x220] sm:$0xff]  ;;  %v2531_v6 = vld [vmem:[#allocation6 + $0x48] sm:$0xff] }
 0x499   :  { %2940 = vmatprep.subr.bf16.mxu1 %v2742_v11  ;;  %v2595_v11 = vld [vmem:[#allocation6 + $0x248] sm:$0xff] }
 0x49b   :  { %2900 = vmatpush1.bf16.msra.mxu0 %v2677_v60  ;;  %v2534_v60 = vld [vmem:[#allocation6 + $0x60] sm:$0xff] }
 0x49c   :  { %2941 = vmatpush1.bf16.msra.mxu1 %v2741_v12  ;;  %2901 = vmatprep.subr.bf16.mxu0 %v2682_v54  ;;  %v2598_v12 = vld [vmem:[#allocation6 + $0x260] sm:$0xff]  ;;  %v2539_v54 = vld [vmem:[#allocation6 + $0x88] sm:$0xff] }
 0x49d   :  { %2942 = vmatprep.subr.bf16.mxu1 %v2746_v61  ;;  %v2603_v61 = vld [vmem:[#allocation6 + $0x288] sm:$0xff] }
 0x49f   :  { %2902 = vmatpush1.bf16.msra.mxu0 %v2681_v13  ;;  %v2538_v13 = vld [vmem:[#allocation6 + $0x80] sm:$0xff] }
 0x4a0   :  { %2943 = vmatpush1.bf16.msra.mxu1 %v2745_v62  ;;  %2903 = vmatprep.subr.bf16.mxu0 %v2686_v63  ;;  %v2602_v62 = vld [vmem:[#allocation6 + $0x280] sm:$0xff]  ;;  %v2543_v63 = vld [vmem:[#allocation6 + $0xa8] sm:$0xff] }
 0x4a1   :  { %2944 = vmatprep.subr.bf16.mxu1 %v2750_v14  ;;  %v2607_v14 = vld [vmem:[#allocation6 + $0x2a8] sm:$0xff] }
 0x4a3   :  { %2904 = vmatpush1.bf16.msra.mxu0 %v2685_v15  ;;  %v2542_v15 = vld [vmem:[#allocation6 + $0xa0] sm:$0xff] }
 0x4a4   :  { %2945 = vmatpush1.bf16.msra.mxu1 %v2749_v16  ;;  %2905 = vmatprep.subr.bf16.mxu0 %v2690_v17  ;;  %v2606_v16 = vld [vmem:[#allocation6 + $0x2a0] sm:$0xff]  ;;  %v2547_v17 = vld [vmem:[#allocation6 + $0xc8] sm:$0xff] }
 0x4a5   :  { %2946 = vmatprep.subr.bf16.mxu1 %v2754_v18  ;;  %v2611_v18 = vld [vmem:[#allocation6 + $0x2c8] sm:$0xff] }
 0x4a7   :  { %2906 = vmatpush1.bf16.msra.mxu0 %v2689_v19  ;;  %v2546_v19 = vld [vmem:[#allocation6 + $0xc0] sm:$0xff] }
 0x4a8   :  { %2947 = vmatpush1.bf16.msra.mxu1 %v2753_v20  ;;  %2907 = vmatprep.subr.bf16.mxu0 %v2694_v21  ;;  %v2610_v20 = vld [vmem:[#allocation6 + $0x2c0] sm:$0xff]  ;;  %v2551_v21 = vld [vmem:[#allocation6 + $0xe8] sm:$0xff] }
 0x4a9   :  { %2948 = vmatprep.subr.bf16.mxu1 %v2758_v24  ;;  %v2615_v24 = vld [vmem:[#allocation6 + $0x2e8] sm:$0xff] }
 0x4ab   :  { %2908 = vmatpush1.bf16.msra.mxu0 %v2693_v7  ;;  %v2550_v7 = vld [vmem:[#allocation6 + $0xe0] sm:$0xff] }
 0x4ac   :  { %2949 = vmatpush1.bf16.msra.mxu1 %v2757_v25  ;;  %2909 = vmatprep.subr.bf16.mxu0 %v2698_v26  ;;  %v2614_v25 = vld [vmem:[#allocation6 + $0x2e0] sm:$0xff]  ;;  %v2555_v26 = vld [vmem:[#allocation6 + $0x108] sm:$0xff] }
 0x4ad   :  { %2950 = vmatprep.subr.bf16.mxu1 %v2762_v28  ;;  %v2619_v28 = vld [vmem:[#allocation6 + $0x308] sm:$0xff] }
 0x4af   :  { %2910 = vmatpush1.bf16.msra.mxu0 %v2697_v29  ;;  %v2554_v29 = vld [vmem:[#allocation6 + $0x100] sm:$0xff] }
 0x4b0   :  { %2951 = vmatpush1.bf16.msra.mxu1 %v2761_v0  ;;  %2911 = vmatprep.subr.bf16.mxu0 %v2702_v9  ;;  %v2618_v0 = vld [vmem:[#allocation6 + $0x300] sm:$0xff]  ;;  %v2559_v9 = vld [vmem:[#allocation6 + $0x128] sm:$0xff] }
 0x4b1   :  { %2952 = vmatprep.subr.bf16.mxu1 %v2766_v10  ;;  %v2623_v10 = vld [vmem:[#allocation6 + $0x328] sm:$0xff] }
 0x4b3   :  { %2912 = vmatpush1.bf16.msra.mxu0 %v2701_v30  ;;  %v2558_v30 = vld [vmem:[#allocation6 + $0x120] sm:$0xff] }
 0x4b4   :  { %2953 = vmatpush1.bf16.msra.mxu1 %v2765_v31  ;;  %2913 = vmatprep.subr.bf16.mxu0 %v2706_v32  ;;  %v2622_v31 = vld [vmem:[#allocation6 + $0x320] sm:$0xff]  ;;  %v2563_v32 = vld [vmem:[#allocation6 + $0x148] sm:$0xff] }
 0x4b5   :  { %2954 = vmatprep.subr.bf16.mxu1 %v2770_v34  ;;  %v2627_v34 = vld [vmem:[#allocation6 + $0x348] sm:$0xff] }
 0x4b7   :  { %2914 = vmatpush1.bf16.msra.mxu0 %v2705_v35  ;;  %v2562_v35 = vld [vmem:[#allocation6 + $0x140] sm:$0xff] }
 0x4b8   :  { %2955 = vmatpush1.bf16.msra.mxu1 %v2769_v36  ;;  %2915 = vmatprep.subr.bf16.mxu0 %v2710_v37  ;;  %v2626_v36 = vld [vmem:[#allocation6 + $0x340] sm:$0xff]  ;;  %v2567_v37 = vld [vmem:[#allocation6 + $0x168] sm:$0xff] }
 0x4b9   :  { %2956 = vmatprep.subr.bf16.mxu1 %v2774_v38  ;;  %v2631_v38 = vld [vmem:[#allocation6 + $0x368] sm:$0xff] }
 0x4bb   :  { %2916 = vmatpush1.bf16.msra.mxu0 %v2709_v41  ;;  %v2566_v41 = vld [vmem:[#allocation6 + $0x160] sm:$0xff] }
 0x4bc   :  { %2957 = vmatpush1.bf16.msra.mxu1 %v2773_v42  ;;  %2917 = vmatprep.subr.bf16.mxu0 %v2714_v43  ;;  %v2630_v42 = vld [vmem:[#allocation6 + $0x360] sm:$0xff]  ;;  %v2571_v43 = vld [vmem:[#allocation6 + $0x188] sm:$0xff] }
 0x4bd   :  { %2958 = vmatprep.subr.bf16.mxu1 %v2778_v44  ;;  %v2635_v44 = vld [vmem:[#allocation6 + $0x388] sm:$0xff] }
 0x4bf   :  { %2918 = vmatpush1.bf16.msra.mxu0 %v2713_v8  ;;  %v2570_v8 = vld [vmem:[#allocation6 + $0x180] sm:$0xff] }
 0x4c0   :  { %2959 = vmatpush1.bf16.msra.mxu1 %v2777_v22  ;;  %2919 = vmatprep.subr.bf16.mxu0 %v2718_v23  ;;  %v2634_v22 = vld [vmem:[#allocation6 + $0x380] sm:$0xff]  ;;  %v2575_v23 = vld [vmem:[#allocation6 + $0x1a8] sm:$0xff] }
 0x4c1   :  { %2960 = vmatprep.subr.bf16.mxu1 %v2782_v47  ;;  %v2639_v47 = vld [vmem:[#allocation6 + $0x3a8] sm:$0xff] }
 0x4c3   :  { %2920 = vmatpush1.bf16.msra.mxu0 %v2717_v48  ;;  %v2574_v48 = vld [vmem:[#allocation6 + $0x1a0] sm:$0xff] }
 0x4c4   :  { %2961 = vmatpush1.bf16.msra.mxu1 %v2781_v49  ;;  %2985 = vmatprep.subr.bf16.mxu0 %v2523_v50  ;;  %v2638_v49 = vld [vmem:[#allocation6 + $0x3a0] sm:$0xff]  ;;  %v2579_v50 = vld [vmem:[#allocation6 + $0x1c8] sm:$0xff] }
 0x4c5   :  { %3026 = vmatprep.subr.bf16.mxu1 %v2587_v51  ;;  %v2643_v51 = vld [vmem:[#allocation6 + $0x3c8] sm:$0xff] }
 0x4c6   :  { %2922 = vmatmul.mubr.bf16.vlgmr.msra.gmra.mrb[16].mxu0 %v2799_v45  ;;  %v2594_v45 = vld [vmem:[#allocation6 + $0x240] sm:$0xff] }
 0x4c7   :  { %2963 = vmatmul.mubr.bf16.vlgmr.msra.gmra.mrb[16].mxu1 %v2801_v46  ;;  %2986 = vmatpush1.bf16.msra.mxu0 %v2522_v27  ;;  %v2599_v46 = vld [vmem:[#allocation6 + $0x268] sm:$0xff]  ;;  %v2578_v27 = vld [vmem:[#allocation6 + $0x1c0] sm:$0xff] }
 0x4c8   :  { %3027 = vmatpush1.bf16.msra.mxu1 %v2586_v33  ;;  %2987 = vmatprep.subr.bf16.mxu0 %v2527_v57  ;;  %v2642_v33 = vld [vmem:[#allocation6 + $0x3c0] sm:$0xff]  ;;  %v2583_v57 = vld [vmem:[#allocation6 + $0x1e8] sm:$0xff] }
 0x4c9   :  { %3028 = vmatprep.subr.bf16.mxu1 %v2591_v2  ;;  %3017 = vmatprep.mubr.bf16.mxu0 %v5990_v3  ;;  %v2647_v2 = vld [vmem:[#allocation6 + $0x3e8] sm:$0xff] }
 0x4ca   :  { %3058 = vmatprep.mubr.bf16.mxu1 %v5994_v1 }
 0x4cb   :  { %2988 = vmatpush1.bf16.msra.mxu0 %v2526_v4  ;;  %v2582_v4 = vld [vmem:[#allocation6 + $0x1e0] sm:$0xff] }
 0x4cc   :  { %3029 = vmatpush1.bf16.msra.mxu1 %v2590_v5  ;;  %2989 = vmatprep.subr.bf16.mxu0 %v2531_v6  ;;  %v2646_v5 = vld [vmem:[#allocation6 + $0x3e0] sm:$0xff]  ;;  %v2525_v6 = vld [vmem:[#allocation6 + $0x18] sm:$0xff] }
 0x4cd   :  { %3030 = vmatprep.subr.bf16.mxu1 %v2595_v11  ;;  %v2589_v11 = vld [vmem:[#allocation6 + $0x218] sm:$0xff] }
 0x4cf   :  { %2990 = vmatpush1.bf16.msra.mxu0 %v2530_v39  ;;  %v6004_v39 = vcombine.low %v5984_v52, %v5984_v52  ;;  %v2528_v52 = vld [vmem:[#allocation6 + $0x30] sm:$0xff] }
 0x4d0   :  { %3031 = vmatpush1.bf16.msra.mxu1 %v2594_v45  ;;  %2991 = vmatprep.subr.bf16.mxu0 %v2535_v40  ;;  %v6008_v45 = vcombine.low %v5986_v53, %v5986_v53  ;;  %v2524_v40 = vld [vmem:[#allocation6 + $0x10] sm:$0xff]  ;;  %v2533_v53 = vld [vmem:[#allocation6 + $0x58] sm:$0xff] }
 0x4d1   :  { %3032 = vmatprep.subr.bf16.mxu1 %v2599_v46  ;;  %v2588_v46 = vld [vmem:[#allocation6 + $0x210] sm:$0xff] }
 0x4d3   :  { %2992 = vmatpush1.bf16.msra.mxu0 %v2534_v60  ;;  %v2529_v60 = vld [vmem:[#allocation6 + $0x38] sm:$0xff] }
 0x4d4   :  { %3033 = vmatpush1.bf16.msra.mxu1 %v2598_v12  ;;  %2993 = vmatprep.subr.bf16.mxu0 %v2539_v54  ;;  %v2593_v12 = vld [vmem:[#allocation6 + $0x238] sm:$0xff]  ;;  %v2592_v54 = vld [vmem:[#allocation6 + $0x230] sm:$0xff] }
 0x4d5   :  { %3034 = vmatprep.subr.bf16.mxu1 %v2603_v61  ;;  %v2597_v61 = vld [vmem:[#allocation6 + $0x258] sm:$0xff] }
 0x4d7   :  { %2994 = vmatpush1.bf16.msra.mxu0 %v2538_v13  ;;  %v2532_v13 = vld [vmem:[#allocation6 + $0x50] sm:$0xff] }
 0x4d8   :  { %3035 = vmatpush1.bf16.msra.mxu1 %v2602_v62  ;;  %2995 = vmatprep.subr.bf16.mxu0 %v2543_v63  ;;  %v2596_v62 = vld [vmem:[#allocation6 + $0x250] sm:$0xff]  ;;  %v2537_v63 = vld [vmem:[#allocation6 + $0x78] sm:$0xff] }
 0x4d9   :  { %3036 = vmatprep.subr.bf16.mxu1 %v2607_v14  ;;  %v2601_v14 = vld [vmem:[#allocation6 + $0x278] sm:$0xff] }
 0x4db   :  { %2996 = vmatpush1.bf16.msra.mxu0 %v2542_v15  ;;  %v2536_v15 = vld [vmem:[#allocation6 + $0x70] sm:$0xff] }
 0x4dc   :  { %3037 = vmatpush1.bf16.msra.mxu1 %v2606_v16  ;;  %2997 = vmatprep.subr.bf16.mxu0 %v2547_v17  ;;  %v2600_v16 = vld [vmem:[#allocation6 + $0x270] sm:$0xff]  ;;  %v2541_v17 = vld [vmem:[#allocation6 + $0x98] sm:$0xff] }
 0x4dd   :  { %3038 = vmatprep.subr.bf16.mxu1 %v2611_v18  ;;  %v2605_v18 = vld [vmem:[#allocation6 + $0x298] sm:$0xff] }
 0x4df   :  { %2998 = vmatpush1.bf16.msra.mxu0 %v2546_v19  ;;  %v2545_v19 = vld [vmem:[#allocation6 + $0xb8] sm:$0xff] }
 0x4e0   :  { %3039 = vmatpush1.bf16.msra.mxu1 %v2610_v20  ;;  %2999 = vmatprep.subr.bf16.mxu0 %v2551_v21  ;;  %v2609_v20 = vld [vmem:[#allocation6 + $0x2b8] sm:$0xff]  ;;  %v2544_v21 = vld [vmem:[#allocation6 + $0xb0] sm:$0xff] }
 0x4e1   :  { %3040 = vmatprep.subr.bf16.mxu1 %v2615_v24  ;;  %v2608_v24 = vld [vmem:[#allocation6 + $0x2b0] sm:$0xff] }
 0x4e3   :  { %3000 = vmatpush1.bf16.msra.mxu0 %v2550_v7  ;;  %v2549_v7 = vld [vmem:[#allocation6 + $0xd8] sm:$0xff] }
 0x4e4   :  { %3041 = vmatpush1.bf16.msra.mxu1 %v2614_v25  ;;  %3001 = vmatprep.subr.bf16.mxu0 %v2555_v26  ;;  %v2613_v25 = vld [vmem:[#allocation6 + $0x2d8] sm:$0xff]  ;;  %v2548_v26 = vld [vmem:[#allocation6 + $0xd0] sm:$0xff] }
 0x4e5   :  { %3042 = vmatprep.subr.bf16.mxu1 %v2619_v28  ;;  %v2612_v28 = vld [vmem:[#allocation6 + $0x2d0] sm:$0xff] }
 0x4e7   :  { %3002 = vmatpush1.bf16.msra.mxu0 %v2554_v29  ;;  %v2553_v29 = vld [vmem:[#allocation6 + $0xf8] sm:$0xff] }
 0x4e8   :  { %3043 = vmatpush1.bf16.msra.mxu1 %v2618_v0  ;;  %3003 = vmatprep.subr.bf16.mxu0 %v2559_v9  ;;  %v2617_v0 = vld [vmem:[#allocation6 + $0x2f8] sm:$0xff]  ;;  %v2552_v9 = vld [vmem:[#allocation6 + $0xf0] sm:$0xff] }
 0x4e9   :  { %3044 = vmatprep.subr.bf16.mxu1 %v2623_v10  ;;  %v2616_v10 = vld [vmem:[#allocation6 + $0x2f0] sm:$0xff] }
 0x4eb   :  { %3004 = vmatpush1.bf16.msra.mxu0 %v2558_v30  ;;  %v2557_v30 = vld [vmem:[#allocation6 + $0x118] sm:$0xff] }
 0x4ec   :  { %3045 = vmatpush1.bf16.msra.mxu1 %v2622_v31  ;;  %3005 = vmatprep.subr.bf16.mxu0 %v2563_v32  ;;  %v2621_v31 = vld [vmem:[#allocation6 + $0x318] sm:$0xff]  ;;  %v2556_v32 = vld [vmem:[#allocation6 + $0x110] sm:$0xff] }
 0x4ed   :  { %3046 = vmatprep.subr.bf16.mxu1 %v2627_v34  ;;  %v2620_v34 = vld [vmem:[#allocation6 + $0x310] sm:$0xff] }
 0x4ef   :  { %3006 = vmatpush1.bf16.msra.mxu0 %v2562_v35  ;;  %v2561_v35 = vld [vmem:[#allocation6 + $0x138] sm:$0xff] }
 0x4f0   :  { %3047 = vmatpush1.bf16.msra.mxu1 %v2626_v36  ;;  %3007 = vmatprep.subr.bf16.mxu0 %v2567_v37  ;;  %v2625_v36 = vld [vmem:[#allocation6 + $0x338] sm:$0xff]  ;;  %v2560_v37 = vld [vmem:[#allocation6 + $0x130] sm:$0xff] }
 0x4f1   :  { %3048 = vmatprep.subr.bf16.mxu1 %v2631_v38  ;;  %v2624_v38 = vld [vmem:[#allocation6 + $0x330] sm:$0xff] }
 0x4f3   :  { %3008 = vmatpush1.bf16.msra.mxu0 %v2566_v41  ;;  %v2565_v41 = vld [vmem:[#allocation6 + $0x158] sm:$0xff] }
 0x4f4   :  { %3049 = vmatpush1.bf16.msra.mxu1 %v2630_v42  ;;  %3009 = vmatprep.subr.bf16.mxu0 %v2571_v43  ;;  %v2629_v42 = vld [vmem:[#allocation6 + $0x358] sm:$0xff]  ;;  %v2564_v43 = vld [vmem:[#allocation6 + $0x150] sm:$0xff] }
 0x4f5   :  { %3050 = vmatprep.subr.bf16.mxu1 %v2635_v44  ;;  %v2628_v44 = vld [vmem:[#allocation6 + $0x350] sm:$0xff] }
 0x4f7   :  { %3010 = vmatpush1.bf16.msra.mxu0 %v2570_v8  ;;  %v2569_v8 = vld [vmem:[#allocation6 + $0x178] sm:$0xff] }
 0x4f8   :  { %3051 = vmatpush1.bf16.msra.mxu1 %v2634_v22  ;;  %3011 = vmatprep.subr.bf16.mxu0 %v2575_v23  ;;  %v2633_v22 = vld [vmem:[#allocation6 + $0x378] sm:$0xff]  ;;  %v2568_v23 = vld [vmem:[#allocation6 + $0x170] sm:$0xff] }
 0x4f9   :  { %3052 = vmatprep.subr.bf16.mxu1 %v2639_v47  ;;  %v2632_v47 = vld [vmem:[#allocation6 + $0x370] sm:$0xff] }
 0x4fb   :  { %3012 = vmatpush1.bf16.msra.mxu0 %v2574_v48  ;;  %v2573_v48 = vld [vmem:[#allocation6 + $0x198] sm:$0xff] }
 0x4fc   :  { %3053 = vmatpush1.bf16.msra.mxu1 %v2638_v49  ;;  %3013 = vmatprep.subr.bf16.mxu0 %v2579_v50  ;;  %v2637_v49 = vld [vmem:[#allocation6 + $0x398] sm:$0xff]  ;;  %v2572_v50 = vld [vmem:[#allocation6 + $0x190] sm:$0xff] }
 0x4fd   :  { %3054 = vmatprep.subr.bf16.mxu1 %v2643_v51  ;;  %v2636_v51 = vld [vmem:[#allocation6 + $0x390] sm:$0xff] }
 0x4ff   :  { %3014 = vmatpush1.bf16.msra.mxu0 %v2578_v27  ;;  %v2577_v27 = vld [vmem:[#allocation6 + $0x1b8] sm:$0xff] }
 0x500   :  { %3055 = vmatpush1.bf16.msra.mxu1 %v2642_v33  ;;  %3015 = vmatprep.subr.bf16.mxu0 %v2583_v57  ;;  %v2641_v33 = vld [vmem:[#allocation6 + $0x3b8] sm:$0xff]  ;;  %v2576_v57 = vld [vmem:[#allocation6 + $0x1b0] sm:$0xff] }
 0x501   :  { %3056 = vmatprep.subr.bf16.mxu1 %v2647_v2  ;;  %v2640_v2 = vld [vmem:[#allocation6 + $0x3b0] sm:$0xff] }
 0x503   :  { %3016 = vmatpush1.bf16.msra.mxu0 %v2582_v4  ;;  %v2581_v4 = vld [vmem:[#allocation6 + $0x1d8] sm:$0xff] }
 0x504   :  { %3057 = vmatpush1.bf16.msra.mxu1 %v2646_v5  ;;  %3067 = vmatprep.subr.bf16.mxu0 %v2525_v6  ;;  %v2645_v5 = vld [vmem:[#allocation6 + $0x3d8] sm:$0xff]  ;;  %v2580_v6 = vld [vmem:[#allocation6 + $0x1d0] sm:$0xff] }
 0x505   :  { %3108 = vmatprep.subr.bf16.mxu1 %v2589_v11  ;;  %v2644_v11 = vld [vmem:[#allocation6 + $0x3d0] sm:$0xff] }
 0x506   :  { %3018 = vmatmul.mubr.bf16.vlgmr.msra.gmra.mrb[20].mxu0 %v6004_v39 }
 0x507   :  { %3059 = vmatmul.mubr.bf16.vlgmr.msra.gmra.mrb[20].mxu1 %v6008_v45  ;;  %3068 = vmatpush1.bf16.msra.mxu0 %v2524_v40  ;;  %v2585_v40 = vld [vmem:[#allocation6 + $0x1f8] sm:$0xff] }
 0x508   :  { %3109 = vmatpush1.bf16.msra.mxu1 %v2588_v46  ;;  %3069 = vmatprep.subr.bf16.mxu0 %v2529_v60  ;;  %v2649_v46 = vld [vmem:[#allocation6 + $0x3f8] sm:$0xff]  ;;  %v2584_v60 = vld [vmem:[#allocation6 + $0x1f0] sm:$0xff] }
 0x509   :  { %3110 = vmatprep.subr.bf16.mxu1 %v2593_v12  ;;  %3099 = vmatprep.mubr.bf16.mxu0 %v5990_v3  ;;  %v2540_v3 = vld [vmem:[#allocation6 + $0x90] sm:$0xff] }
 0x50a   :  { %3140 = vmatprep.mubr.bf16.mxu1 %v5994_v1  ;;  %v2604_v1 = vld [vmem:[#allocation6 + $0x290] sm:$0xff] }
 0x50b   :  { %3070 = vmatpush1.bf16.msra.mxu0 %v2528_v52  ;;  %v2648_v12 = vld [vmem:[#allocation6 + $0x3f0] sm:$0xff]  ;;  %v3155_v52 = vld [vmem:[#allocation6 + $0x808] sm:$0xff] }
 0x50c   :  { %3111 = vmatpush1.bf16.msra.mxu1 %v2592_v54  ;;  %3071 = vmatprep.subr.bf16.mxu0 %v2533_v53  ;;  %v3219_v54 = vld [vmem:[#allocation6 + $0xa08] sm:$0xff]  ;;  %v6014_v53 = vld [vmem:[#allocation3 + $0x4] ss:$16 sps:$4 sm:$0x1e]  }
 0x50d   :  { %3112 = vmatprep.subr.bf16.mxu1 %v2597_v61  ;;  %v6016_v61 = vld [vmem:[#allocation3 + $0xc] ss:$16 sps:$4 sm:$0x1e]  }
 0x50f   :  { %3072 = vmatpush1.bf16.msra.mxu0 %v2532_v13  ;;  %v3154_v13 = vld [vmem:[#allocation6 + $0x800] sm:$0xff] }
 0x510   :  { %3113 = vmatpush1.bf16.msra.mxu1 %v2596_v62  ;;  %3073 = vmatprep.subr.bf16.mxu0 %v2537_v63  ;;  %v3218_v62 = vld [vmem:[#allocation6 + $0xa00] sm:$0xff]  ;;  %v3159_v63 = vld [vmem:[#allocation6 + $0x828] sm:$0xff] }
 0x511   :  { %3114 = vmatprep.subr.bf16.mxu1 %v2601_v14  ;;  %v3223_v14 = vld [vmem:[#allocation6 + $0xa28] sm:$0xff] }
 0x513   :  { %3074 = vmatpush1.bf16.msra.mxu0 %v2536_v15  ;;  %v3299_v15 = vrot.slane %v6014_v53, 1  ;;  %v3237_v53 = vld [vmem:[#allocation6 + $0xa98] sm:$0xff] }
 0x514   :  { %3115 = vmatpush1.bf16.msra.mxu1 %v2600_v16  ;;  %3075 = vmatprep.subr.bf16.mxu0 %v2541_v17  ;;  %v3301_v16 = vrot.slane %v6016_v61, 1  ;;  %v3158_v17 = vld [vmem:[#allocation6 + $0x820] sm:$0xff]  ;;  %v3172_v61 = vld [vmem:[#allocation6 + $0x890] sm:$0xff] }
 0x515   :  { %3116 = vmatprep.subr.bf16.mxu1 %v2605_v18  ;;  %v3222_v18 = vld [vmem:[#allocation6 + $0xa20] sm:$0xff] }
 0x517   :  { %3076 = vmatpush1.bf16.msra.mxu0 %v2540_v3  ;;  %v3163_v3 = vld [vmem:[#allocation6 + $0x848] sm:$0xff] }
 0x518   :  { %3117 = vmatpush1.bf16.msra.mxu1 %v2604_v1  ;;  %3077 = vmatprep.subr.bf16.mxu0 %v2545_v19  ;;  %v3227_v1 = vld [vmem:[#allocation6 + $0xa48] sm:$0xff] }
 0x519   :  { %3118 = vmatprep.subr.bf16.mxu1 %v2609_v20  ;;  %v3167_v19 = vld [vmem:[#allocation6 + $0x868] sm:$0xff] }
 0x51a   :  { %v3231_v20 = vld [vmem:[#allocation6 + $0xa68] sm:$0xff] }
 0x51b   :  { %3078 = vmatpush1.bf16.msra.mxu0 %v2544_v21  ;;  %v3166_v21 = vld [vmem:[#allocation6 + $0x860] sm:$0xff] }
 0x51c   :  { %3119 = vmatpush1.bf16.msra.mxu1 %v2608_v24  ;;  %3079 = vmatprep.subr.bf16.mxu0 %v2549_v7  ;;  %v3230_v24 = vld [vmem:[#allocation6 + $0xa60] sm:$0xff]  ;;  %v3171_v7 = vld [vmem:[#allocation6 + $0x888] sm:$0xff] }
 0x51d   :  { %3120 = vmatprep.subr.bf16.mxu1 %v2613_v25  ;;  %v3235_v25 = vld [vmem:[#allocation6 + $0xa88] sm:$0xff] }
 0x51f   :  { %3080 = vmatpush1.bf16.msra.mxu0 %v2548_v26  ;;  %v3170_v26 = vld [vmem:[#allocation6 + $0x880] sm:$0xff] }
 0x520   :  { %3121 = vmatpush1.bf16.msra.mxu1 %v2612_v28  ;;  %3081 = vmatprep.subr.bf16.mxu0 %v2553_v29  ;;  %v3234_v28 = vld [vmem:[#allocation6 + $0xa80] sm:$0xff]  ;;  %v3175_v29 = vld [vmem:[#allocation6 + $0x8a8] sm:$0xff] }
 0x521   :  { %3122 = vmatprep.subr.bf16.mxu1 %v2617_v0  ;;  %v3239_v0 = vld [vmem:[#allocation6 + $0xaa8] sm:$0xff] }
 0x523   :  { %3082 = vmatpush1.bf16.msra.mxu0 %v2552_v9  ;;  %v3174_v9 = vld [vmem:[#allocation6 + $0x8a0] sm:$0xff] }
 0x524   :  { %3123 = vmatpush1.bf16.msra.mxu1 %v2616_v10  ;;  %3083 = vmatprep.subr.bf16.mxu0 %v2557_v30  ;;  %v3238_v10 = vld [vmem:[#allocation6 + $0xaa0] sm:$0xff] }
 0x525   :  { %3124 = vmatprep.subr.bf16.mxu1 %v2621_v31 }
 0x527   :  { %3084 = vmatpush1.bf16.msra.mxu0 %v2556_v32  ;;  %v3179_v32 = vld [vmem:[#allocation6 + $0x8c8] sm:$0xff] }
 0x528   :  { %3125 = vmatpush1.bf16.msra.mxu1 %v2620_v34  ;;  %3085 = vmatprep.subr.bf16.mxu0 %v2561_v35  ;;  %v3243_v34 = vld [vmem:[#allocation6 + $0xac8] sm:$0xff] }
 0x529   :  { %3126 = vmatprep.subr.bf16.mxu1 %v2625_v36 }
 0x52b   :  { %3086 = vmatpush1.bf16.msra.mxu0 %v2560_v37 }
 0x52c   :  { %3127 = vmatpush1.bf16.msra.mxu1 %v2624_v38  ;;  %3087 = vmatprep.subr.bf16.mxu0 %v2565_v41 }
 0x52d   :  { %3128 = vmatprep.subr.bf16.mxu1 %v2629_v42 }
 0x52f   :  { %3088 = vmatpush1.bf16.msra.mxu0 %v2564_v43 }
 0x530   :  { %3129 = vmatpush1.bf16.msra.mxu1 %v2628_v44  ;;  %3089 = vmatprep.subr.bf16.mxu0 %v2569_v8  ;;  %v3178_v8 = vld [vmem:[#allocation6 + $0x8c0] sm:$0xff] }
 0x531   :  { %3130 = vmatprep.subr.bf16.mxu1 %v2633_v22  ;;  %v3242_v22 = vld [vmem:[#allocation6 + $0xac0] sm:$0xff] }
 0x533   :  { %3090 = vmatpush1.bf16.msra.mxu0 %v2568_v23  ;;  %v3183_v23 = vld [vmem:[#allocation6 + $0x8e8] sm:$0xff] }
 0x534   :  { %3131 = vmatpush1.bf16.msra.mxu1 %v2632_v47  ;;  %3091 = vmatprep.subr.bf16.mxu0 %v2573_v48  ;;  %v3247_v47 = vld [vmem:[#allocation6 + $0xae8] sm:$0xff]  ;;  %v3182_v48 = vld [vmem:[#allocation6 + $0x8e0] sm:$0xff] }
 0x535   :  { %3132 = vmatprep.subr.bf16.mxu1 %v2637_v49  ;;  %v3246_v49 = vld [vmem:[#allocation6 + $0xae0] sm:$0xff] }
 0x537   :  { %3092 = vmatpush1.bf16.msra.mxu0 %v2572_v50  ;;  %v3187_v50 = vld [vmem:[#allocation6 + $0x908] sm:$0xff] }
 0x538   :  { %3133 = vmatpush1.bf16.msra.mxu1 %v2636_v51  ;;  %3093 = vmatprep.subr.bf16.mxu0 %v2577_v27  ;;  %v3251_v51 = vld [vmem:[#allocation6 + $0xb08] sm:$0xff]  ;;  %v3186_v27 = vld [vmem:[#allocation6 + $0x900] sm:$0xff] }
 0x539   :  { %3134 = vmatprep.subr.bf16.mxu1 %v2641_v33  ;;  %v3250_v33 = vld [vmem:[#allocation6 + $0xb00] sm:$0xff] }
 0x53b   :  { %3094 = vmatpush1.bf16.msra.mxu0 %v2576_v57  ;;  %v3191_v57 = vld [vmem:[#allocation6 + $0x928] sm:$0xff] }
 0x53c   :  { %3135 = vmatpush1.bf16.msra.mxu1 %v2640_v2  ;;  %3095 = vmatprep.subr.bf16.mxu0 %v2581_v4  ;;  %v3255_v2 = vld [vmem:[#allocation6 + $0xb28] sm:$0xff]  ;;  %v3190_v4 = vld [vmem:[#allocation6 + $0x920] sm:$0xff] }
 0x53d   :  { %3136 = vmatprep.subr.bf16.mxu1 %v2645_v5  ;;  %v3254_v5 = vld [vmem:[#allocation6 + $0xb20] sm:$0xff] }
 0x53f   :  { %3096 = vmatpush1.bf16.msra.mxu0 %v2580_v6  ;;  %v3195_v6 = vld [vmem:[#allocation6 + $0x948] sm:$0xff] }
 0x540   :  { %3137 = vmatpush1.bf16.msra.mxu1 %v2644_v11  ;;  %3097 = vmatprep.subr.bf16.mxu0 %v2585_v40  ;;  %v3259_v11 = vld [vmem:[#allocation6 + $0xb48] sm:$0xff]  ;;  %v3194_v40 = vld [vmem:[#allocation6 + $0x940] sm:$0xff] }
 0x541   :  { %3138 = vmatprep.subr.bf16.mxu1 %v2649_v46  ;;  %v3258_v46 = vld [vmem:[#allocation6 + $0xb40] sm:$0xff] }
 0x543   :  { %3098 = vmatpush1.bf16.msra.mxu0 %v2584_v60  ;;  %v3199_v60 = vld [vmem:[#allocation6 + $0x968] sm:$0xff] }
 0x544   :  { %3139 = vmatpush1.bf16.msra.mxu1 %v2648_v12  ;;  %3306 = vmatprep.subr.bf16.mxu0 %v3155_v52  ;;  %v3263_v12 = vld [vmem:[#allocation6 + $0xb68] sm:$0xff]  ;;  %v3198_v52 = vld [vmem:[#allocation6 + $0x960] sm:$0xff] }
 0x545   :  { %3347 = vmatprep.subr.bf16.mxu1 %v3219_v54  ;;  %v3262_v54 = vld [vmem:[#allocation6 + $0xb60] sm:$0xff] }
 0x546   :  { %3100 = vmatmul.mubr.bf16.vlgmr.msra.gmra.mrb[24].mxu0 %v6004_v39  ;;  %v3162_v39 = vld [vmem:[#allocation6 + $0x840] sm:$0xff] }
 0x547   :  { %3141 = vmatmul.mubr.bf16.vlgmr.msra.gmra.mrb[24].mxu1 %v6008_v45  ;;  %3307 = vmatpush1.bf16.msra.mxu0 %v3154_v13  ;;  %v3226_v45 = vld [vmem:[#allocation6 + $0xa40] sm:$0xff]  ;;  %v3203_v13 = vld [vmem:[#allocation6 + $0x988] sm:$0xff] }
 0x548   :  { %3348 = vmatpush1.bf16.msra.mxu1 %v3218_v62  ;;  %3308 = vmatprep.subr.bf16.mxu0 %v3159_v63  ;;  %v3267_v62 = vld [vmem:[#allocation6 + $0xb88] sm:$0xff]  ;;  %v3202_v63 = vld [vmem:[#allocation6 + $0x980] sm:$0xff] }
 0x549   :  { %3349 = vmatprep.subr.bf16.mxu1 %v3223_v14  ;;  %3338 = vmatprep.mubr.bf16.mxu0 %v3299_v15  ;;  %v3266_v14 = vld [vmem:[#allocation6 + $0xb80] sm:$0xff] }
 0x54a   :  { %3379 = vmatprep.mubr.bf16.mxu1 %v3301_v16 }
 0x54b   :  { %3309 = vmatpush1.bf16.msra.mxu0 %v3158_v17  ;;  %v3207_v17 = vld [vmem:[#allocation6 + $0x9a8] sm:$0xff] }
 0x54c   :  { %3350 = vmatpush1.bf16.msra.mxu1 %v3222_v18  ;;  %3310 = vmatprep.subr.bf16.mxu0 %v3163_v3  ;;  %v3271_v18 = vld [vmem:[#allocation6 + $0xba8] sm:$0xff]  ;;  %v3206_v3 = vld [vmem:[#allocation6 + $0x9a0] sm:$0xff] }
 0x54d   :  { %3351 = vmatprep.subr.bf16.mxu1 %v3227_v1  ;;  %v3270_v1 = vld [vmem:[#allocation6 + $0xba0] sm:$0xff] }
 0x54f   :  { %3311 = vmatpush1.bf16.msra.mxu0 %v3162_v39  ;;  %v3211_v39 = vld [vmem:[#allocation6 + $0x9c8] sm:$0xff] }
 0x550   :  { %3352 = vmatpush1.bf16.msra.mxu1 %v3226_v45  ;;  %3312 = vmatprep.subr.bf16.mxu0 %v3167_v19  ;;  %v3275_v45 = vld [vmem:[#allocation6 + $0xbc8] sm:$0xff]  ;;  %v3210_v19 = vld [vmem:[#allocation6 + $0x9c0] sm:$0xff] }
 0x551   :  { %3353 = vmatprep.subr.bf16.mxu1 %v3231_v20  ;;  %v3274_v20 = vld [vmem:[#allocation6 + $0xbc0] sm:$0xff] }
 0x553   :  { %3313 = vmatpush1.bf16.msra.mxu0 %v3166_v21  ;;  %v3215_v21 = vld [vmem:[#allocation6 + $0x9e8] sm:$0xff] }
 0x554   :  { %3354 = vmatpush1.bf16.msra.mxu1 %v3230_v24  ;;  %3314 = vmatprep.subr.bf16.mxu0 %v3171_v7  ;;  %v3279_v24 = vld [vmem:[#allocation6 + $0xbe8] sm:$0xff]  ;;  %v6030_v7 = vld [vmem:[#allocation3] ss:$16 sps:$4 sm:$0x1e]  }
 0x555   :  { %3355 = vmatprep.subr.bf16.mxu1 %v3235_v25  ;;  %v6032_v25 = vld [vmem:[#allocation3 + $0x8] ss:$16 sps:$4 sm:$0x1e]  }
 0x557   :  { %3315 = vmatpush1.bf16.msra.mxu0 %v3170_v26  ;;  %v3214_v26 = vld [vmem:[#allocation6 + $0x9e0] sm:$0xff] }
 0x558   :  { %3356 = vmatpush1.bf16.msra.mxu1 %v3234_v28  ;;  %3316 = vmatprep.subr.bf16.mxu0 %v3175_v29  ;;  %v3278_v28 = vld [vmem:[#allocation6 + $0xbe0] sm:$0xff]  ;;  %v3157_v29 = vld [vmem:[#allocation6 + $0x818] sm:$0xff] }
 0x559   :  { %3357 = vmatprep.subr.bf16.mxu1 %v3239_v0  ;;  %v2841_v30 = vpop.f32.mrb[12].mxu0  ;;  %v3221_v0 = vld [vmem:[#allocation6 + $0xa18] sm:$0xff] }
 0x55a   :  { %v2882_v31 = vpop.f32.mrb[12].mxu1  ;;  %v2843_v36 = vpop.f32.mrb[13].mxu0 }
 0x55b   :  { %v6026_v35 = vadd.f32 %v2882_v31, %v2841_v30  ;;  %v2884_v37 = vpop.f32.mrb[13].mxu1  ;;  %v2845_v41 = vpop.f32.mrb[14].mxu0  ;;  %3317 = vmatpush1.bf16.msra.mxu0 %v3174_v9  ;;  %v3298_v9 = vrot.slane %v6030_v7, 1  ;;  %v3156_v30 = vld [vmem:[#allocation6 + $0x810] sm:$0xff] }
 0x55c   :  { %v6028_v38 = vadd.f32 %v2884_v37, %v2843_v36  ;;  %v2886_v42 = vpop.f32.mrb[14].mxu1  ;;  %3358 = vmatpush1.bf16.msra.mxu1 %v3238_v10  ;;  %v2846_v43 = vpop.f32.mrb[15].mxu0  ;;  %3318 = vmatprep.subr.bf16.mxu0 %v3179_v32  ;;  %v3300_v10 = vrot.slane %v6032_v25, 1  ;;  %v3220_v31 = vld [vmem:[#allocation6 + $0xa10] sm:$0xff]  ;;  %v3161_v32 = vld [vmem:[#allocation6 + $0x838] sm:$0xff] }
 0x55d   :  { %v2887_v44 = vpop.f32.mrb[15].mxu1  ;;  %3359 = vmatprep.subr.bf16.mxu1 %v3243_v34  ;;  %v3225_v34 = vld [vmem:[#allocation6 + $0xa38] sm:$0xff]  ;;  %v3160_v36 = vld [vmem:[#allocation6 + $0x830] sm:$0xff] }
 0x55e   :  { %v3224_v37 = vld [vmem:[#allocation6 + $0xa30] sm:$0xff]  ;;  %v3165_v41 = vld [vmem:[#allocation6 + $0x858] sm:$0xff] }
 0x55f   :  { %3319 = vmatpush1.bf16.msra.mxu0 %v3178_v8  ;;  %v3229_v42 = vld [vmem:[#allocation6 + $0xa58] sm:$0xff]  ;;  %v3164_v43 = vld [vmem:[#allocation6 + $0x850] sm:$0xff] }
 0x560   :  { %3360 = vmatpush1.bf16.msra.mxu1 %v3242_v22  ;;  %3320 = vmatprep.subr.bf16.mxu0 %v3183_v23  ;;  %v3228_v44 = vld [vmem:[#allocation6 + $0xa50] sm:$0xff]  ;;  %v3169_v8 = vld [vmem:[#allocation6 + $0x878] sm:$0xff] }
 0x561   :  { %3361 = vmatprep.subr.bf16.mxu1 %v3247_v47  ;;  %v3233_v22 = vld [vmem:[#allocation6 + $0xa78] sm:$0xff]  ;;  %v3168_v23 = vld [vmem:[#allocation6 + $0x870] sm:$0xff] }
 0x562   :  { %v3232_v47 = vld [vmem:[#allocation6 + $0xa70] sm:$0xff] }
 0x563   :  { %3321 = vmatpush1.bf16.msra.mxu0 %v3182_v48  ;;  %v3173_v48 = vld [vmem:[#allocation6 + $0x898] sm:$0xff] }
 0x564   :  { %3362 = vmatpush1.bf16.msra.mxu1 %v3246_v49  ;;  %3322 = vmatprep.subr.bf16.mxu0 %v3187_v50  ;;  %v3241_v49 = vld [vmem:[#allocation6 + $0xab8] sm:$0xff]  ;;  %v3176_v50 = vld [vmem:[#allocation6 + $0x8b0] sm:$0xff] }
 0x565   :  { %3363 = vmatprep.subr.bf16.mxu1 %v3251_v51  ;;  %v3240_v51 = vld [vmem:[#allocation6 + $0xab0] sm:$0xff] }
 0x567   :  { %3323 = vmatpush1.bf16.msra.mxu0 %v3186_v27 }
 0x568   :  { %3364 = vmatpush1.bf16.msra.mxu1 %v3250_v33  ;;  %3324 = vmatprep.subr.bf16.mxu0 %v3191_v57  ;;  %v3181_v57 = vld [vmem:[#allocation6 + $0x8d8] sm:$0xff] }
 0x569   :  { %3365 = vmatprep.subr.bf16.mxu1 %v3255_v2  ;;  %v3245_v2 = vld [vmem:[#allocation6 + $0xad8] sm:$0xff] }
 0x56b   :  { %3325 = vmatpush1.bf16.msra.mxu0 %v3190_v4 }
 0x56c   :  { %3366 = vmatpush1.bf16.msra.mxu1 %v3254_v5  ;;  %3326 = vmatprep.subr.bf16.mxu0 %v3195_v6 }
 0x56d   :  { %3367 = vmatprep.subr.bf16.mxu1 %v3259_v11 }
 0x56f   :  { %3327 = vmatpush1.bf16.msra.mxu0 %v3194_v40 }
 0x570   :  { %3368 = vmatpush1.bf16.msra.mxu1 %v3258_v46  ;;  %3328 = vmatprep.subr.bf16.mxu0 %v3199_v60 }
 0x571   :  { %3369 = vmatprep.subr.bf16.mxu1 %v3263_v12 }
 0x573   :  { %3329 = vmatpush1.bf16.msra.mxu0 %v3198_v52  ;;  %v3180_v52 = vld [vmem:[#allocation6 + $0x8d0] sm:$0xff] }
 0x574   :  { %3370 = vmatpush1.bf16.msra.mxu1 %v3262_v54  ;;  %3330 = vmatprep.subr.bf16.mxu0 %v3203_v13  ;;  %v3244_v54 = vld [vmem:[#allocation6 + $0xad0] sm:$0xff]  ;;  %v3185_v13 = vld [vmem:[#allocation6 + $0x8f8] sm:$0xff] }
 0x575   :  { %3371 = vmatprep.subr.bf16.mxu1 %v3267_v62  ;;  %v3249_v62 = vld [vmem:[#allocation6 + $0xaf8] sm:$0xff] }
 0x577   :  { %3331 = vmatpush1.bf16.msra.mxu0 %v3202_v63  ;;  %v3184_v63 = vld [vmem:[#allocation6 + $0x8f0] sm:$0xff] }
 0x578   :  { %3372 = vmatpush1.bf16.msra.mxu1 %v3266_v14  ;;  %3332 = vmatprep.subr.bf16.mxu0 %v3207_v17  ;;  %v3248_v14 = vld [vmem:[#allocation6 + $0xaf0] sm:$0xff]  ;;  %v3189_v17 = vld [vmem:[#allocation6 + $0x918] sm:$0xff] }
 0x579   :  { %3373 = vmatprep.subr.bf16.mxu1 %v3271_v18  ;;  %v3253_v18 = vld [vmem:[#allocation6 + $0xb18] sm:$0xff] }
 0x57b   :  { %3333 = vmatpush1.bf16.msra.mxu0 %v3206_v3  ;;  %v3188_v3 = vld [vmem:[#allocation6 + $0x910] sm:$0xff] }
 0x57c   :  { %3374 = vmatpush1.bf16.msra.mxu1 %v3270_v1  ;;  %3334 = vmatprep.subr.bf16.mxu0 %v3211_v39  ;;  %v3252_v1 = vld [vmem:[#allocation6 + $0xb10] sm:$0xff]  ;;  %v3193_v39 = vld [vmem:[#allocation6 + $0x938] sm:$0xff] }
 0x57d   :  { %3375 = vmatprep.subr.bf16.mxu1 %v3275_v45  ;;  %v3257_v45 = vld [vmem:[#allocation6 + $0xb38] sm:$0xff] }
 0x57f   :  { %3335 = vmatpush1.bf16.msra.mxu0 %v3210_v19  ;;  %v3192_v19 = vld [vmem:[#allocation6 + $0x930] sm:$0xff] }
 0x580   :  { %3376 = vmatpush1.bf16.msra.mxu1 %v3274_v20  ;;  %3336 = vmatprep.subr.bf16.mxu0 %v3215_v21  ;;  %v3256_v20 = vld [vmem:[#allocation6 + $0xb30] sm:$0xff]  ;;  %v3197_v21 = vld [vmem:[#allocation6 + $0x958] sm:$0xff] }
 0x581   :  { %3377 = vmatprep.subr.bf16.mxu1 %v3279_v24  ;;  %v3261_v24 = vld [vmem:[#allocation6 + $0xb58] sm:$0xff] }
 0x583   :  { %3337 = vmatpush1.bf16.msra.mxu0 %v3214_v26  ;;  %v3196_v26 = vld [vmem:[#allocation6 + $0x950] sm:$0xff] }
 0x584   :  { %3378 = vmatpush1.bf16.msra.mxu1 %v3278_v28  ;;  %3388 = vmatprep.subr.bf16.mxu0 %v3157_v29  ;;  %v3260_v28 = vld [vmem:[#allocation6 + $0xb50] sm:$0xff]  ;;  %v3201_v29 = vld [vmem:[#allocation6 + $0x978] sm:$0xff] }
 0x585   :  { %3429 = vmatprep.subr.bf16.mxu1 %v3221_v0  ;;  %v3265_v0 = vld [vmem:[#allocation6 + $0xb78] sm:$0xff] }
 0x586   :  { %3339 = vmatmul.mubr.bf16.vlgmr.msra.gmra.mrb[28].mxu0 %v3298_v9 }
 0x587   :  { %3380 = vmatmul.mubr.bf16.vlgmr.msra.gmra.mrb[28].mxu1 %v3300_v10  ;;  %3389 = vmatpush1.bf16.msra.mxu0 %v3156_v30  ;;  %v3200_v30 = vld [vmem:[#allocation6 + $0x970] sm:$0xff] }
 0x588   :  { %3430 = vmatpush1.bf16.msra.mxu1 %v3220_v31  ;;  %3390 = vmatprep.subr.bf16.mxu0 %v3161_v32  ;;  %v3264_v31 = vld [vmem:[#allocation6 + $0xb70] sm:$0xff]  ;;  %v3205_v32 = vld [vmem:[#allocation6 + $0x998] sm:$0xff] }
 0x589   :  { %3431 = vmatprep.subr.bf16.mxu1 %v3225_v34  ;;  %3420 = vmatprep.mubr.bf16.mxu0 %v3299_v15  ;;  %v3236_v15 = vld [vmem:[#allocation6 + $0xa90] sm:$0xff]  ;;  %v3269_v34 = vld [vmem:[#allocation6 + $0xb98] sm:$0xff] }
 0x58a   :  { %3461 = vmatprep.mubr.bf16.mxu1 %v3301_v16  ;;  %v3177_v16 = vld [vmem:[#allocation6 + $0x8b8] sm:$0xff] }
 0x58b   :  { %3391 = vmatpush1.bf16.msra.mxu0 %v3160_v36  ;;  %v3204_v36 = vld [vmem:[#allocation6 + $0x990] sm:$0xff] }
 0x58c   :  { %3432 = vmatpush1.bf16.msra.mxu1 %v3224_v37  ;;  %3392 = vmatprep.subr.bf16.mxu0 %v3165_v41  ;;  %v3268_v37 = vld [vmem:[#allocation6 + $0xb90] sm:$0xff]  ;;  %v3209_v41 = vld [vmem:[#allocation6 + $0x9b8] sm:$0xff] }
 0x58d   :  { %3433 = vmatprep.subr.bf16.mxu1 %v3229_v42  ;;  %v3273_v42 = vld [vmem:[#allocation6 + $0xbb8] sm:$0xff] }
 0x58f   :  { %3393 = vmatpush1.bf16.msra.mxu0 %v3164_v43  ;;  %v3208_v43 = vld [vmem:[#allocation6 + $0x9b0] sm:$0xff] }
 0x590   :  { %3434 = vmatpush1.bf16.msra.mxu1 %v3228_v44  ;;  %3394 = vmatprep.subr.bf16.mxu0 %v3169_v8  ;;  %v3272_v44 = vld [vmem:[#allocation6 + $0xbb0] sm:$0xff]  ;;  %v3213_v8 = vld [vmem:[#allocation6 + $0x9d8] sm:$0xff] }
 0x591   :  { %3435 = vmatprep.subr.bf16.mxu1 %v3233_v22  ;;  %v3277_v22 = vld [vmem:[#allocation6 + $0xbd8] sm:$0xff] }
 0x593   :  { %3395 = vmatpush1.bf16.msra.mxu0 %v3168_v23  ;;  %v3212_v23 = vld [vmem:[#allocation6 + $0x9d0] sm:$0xff] }
 0x594   :  { %3436 = vmatpush1.bf16.msra.mxu1 %v3232_v47  ;;  %3396 = vmatprep.subr.bf16.mxu0 %v3173_v48  ;;  %v3276_v47 = vld [vmem:[#allocation6 + $0xbd0] sm:$0xff]  ;;  %v3217_v48 = vld [vmem:[#allocation6 + $0x9f8] sm:$0xff] }
 0x595   :  { %3437 = vmatprep.subr.bf16.mxu1 %v3237_v53  ;;  %v3281_v53 = vld [vmem:[#allocation6 + $0xbf8] sm:$0xff] }
 0x597   :  { %3397 = vmatpush1.bf16.msra.mxu0 %v3172_v61  ;;  %v3216_v61 = vld [vmem:[#allocation6 + $0x9f0] sm:$0xff] }
 0x598   :  { %3438 = vmatpush1.bf16.msra.mxu1 %v3236_v15  ;;  %3398 = vmatprep.subr.bf16.mxu0 %v3177_v16  ;;  %v3280_v15 = vld [vmem:[#allocation6 + $0xbf0] sm:$0xff] }
 0x599   :  { %3439 = vmatprep.subr.bf16.mxu1 %v3241_v49  ;;  %v2923_v27 = vpop.f32.mrb[16].mxu0 }
 0x59a   :  { %v2964_v33 = vpop.f32.mrb[16].mxu1  ;;  %v2925_v5 = vpop.f32.mrb[17].mxu0 }
 0x59b   :  { %v6044_v4 = vadd.f32 %v2964_v33, %v2923_v27  ;;  %v2966_v6 = vpop.f32.mrb[17].mxu1  ;;  %v2927_v40 = vpop.f32.mrb[18].mxu0  ;;  %3399 = vmatpush1.bf16.msra.mxu0 %v3176_v50 }
 0x59c   :  { %v6046_v11 = vadd.f32 %v2966_v6, %v2925_v5  ;;  %v2968_v46 = vpop.f32.mrb[18].mxu1  ;;  %3440 = vmatpush1.bf16.msra.mxu1 %v3240_v51  ;;  %v2928_v60 = vpop.f32.mrb[19].mxu0  ;;  %3400 = vmatprep.subr.bf16.mxu0 %v3181_v57 }
 0x59d   :  { %v2969_v12 = vpop.f32.mrb[19].mxu1  ;;  %3441 = vmatprep.subr.bf16.mxu1 %v3245_v2 }
 0x59f   :  { %3401 = vmatpush1.bf16.msra.mxu0 %v3180_v52 }
 0x5a0   :  { %3442 = vmatpush1.bf16.msra.mxu1 %v3244_v54  ;;  %3402 = vmatprep.subr.bf16.mxu0 %v3185_v13 }
 0x5a1   :  { %3443 = vmatprep.subr.bf16.mxu1 %v3249_v62 }
 0x5a3   :  { %3403 = vmatpush1.bf16.msra.mxu0 %v3184_v63  ;;  %v3474_v63 = vld [vmem:[#allocation16] sm:$0xf] }
 0x5a4   :  { %3444 = vmatpush1.bf16.msra.mxu1 %v3248_v14  ;;  %3404 = vmatprep.subr.bf16.mxu0 %v3189_v17 }
 0x5a5   :  { %3445 = vmatprep.subr.bf16.mxu1 %v3253_v18 }
 0x5a7   :  { %3405 = vmatpush1.bf16.msra.mxu0 %v3188_v3  ;;  %v3479_v3 = vrot.slane %v3474_v63, %v5860_v55 }
 0x5a8   :  { %3446 = vmatpush1.bf16.msra.mxu1 %v3252_v1  ;;  %3406 = vmatprep.subr.bf16.mxu0 %v3193_v39 }
 0x5a9   :  { %3447 = vmatprep.subr.bf16.mxu1 %v3257_v45 }
 0x5ab   :  { %3407 = vmatpush1.bf16.msra.mxu0 %v3192_v19 }
 0x5ac   :  { %3448 = vmatpush1.bf16.msra.mxu1 %v3256_v20  ;;  %3408 = vmatprep.subr.bf16.mxu0 %v3197_v21 }
 0x5ad   :  { %3449 = vmatprep.subr.bf16.mxu1 %v3261_v24 }
 0x5af   :  { %3409 = vmatpush1.bf16.msra.mxu0 %v3196_v26 }
 0x5b0   :  { %3450 = vmatpush1.bf16.msra.mxu1 %v3260_v28  ;;  %3410 = vmatprep.subr.bf16.mxu0 %v3201_v29 }
 0x5b1   :  { %3451 = vmatprep.subr.bf16.mxu1 %v3265_v0 }
 0x5b3   :  { %3411 = vmatpush1.bf16.msra.mxu0 %v3200_v30 }
 0x5b4   :  { %3452 = vmatpush1.bf16.msra.mxu1 %v3264_v31  ;;  %3412 = vmatprep.subr.bf16.mxu0 %v3205_v32 }
 0x5b5   :  { %3453 = vmatprep.subr.bf16.mxu1 %v3269_v34 }
 0x5b7   :  { %3413 = vmatpush1.bf16.msra.mxu0 %v3204_v36 }
 0x5b8   :  { %3454 = vmatpush1.bf16.msra.mxu1 %v3268_v37  ;;  %3414 = vmatprep.subr.bf16.mxu0 %v3209_v41 }
 0x5b9   :  { %3455 = vmatprep.subr.bf16.mxu1 %v3273_v42 }
 0x5bb   :  { %3415 = vmatpush1.bf16.msra.mxu0 %v3208_v43  ;;  %v3487_v43 = vrot.slane %v3474_v63, %v5862_v56 }
 0x5bc   :  { %3456 = vmatpush1.bf16.msra.mxu1 %v3272_v44  ;;  %3416 = vmatprep.subr.bf16.mxu0 %v3213_v8 }
 0x5bd   :  { %3457 = vmatprep.subr.bf16.mxu1 %v3277_v22 }
 0x5bf   :  { %3417 = vmatpush1.bf16.msra.mxu0 %v3212_v23  ;;  %v3491_v23 = vrot.slane %v3474_v63, %v5866_v59 }
 0x5c0   :  { %3458 = vmatpush1.bf16.msra.mxu1 %v3276_v47  ;;  %3418 = vmatprep.subr.bf16.mxu0 %v3217_v48 }
 0x5c1   :  { %3459 = vmatprep.subr.bf16.mxu1 %v3281_v53 }
 0x5c3   :  { %3419 = vmatpush1.bf16.msra.mxu0 %v3216_v61 }
 0x5c4   :  { %3460 = vmatpush1.bf16.msra.mxu1 %v3280_v15 }
 0x5c6   :  { %3421 = vmatmul.mubr.bf16.vlgmr.msra.gmra.mrb[32].mxu0 %v3298_v9 }
 0x5c7   :  { %3462 = vmatmul.mubr.bf16.vlgmr.msra.gmra.mrb[32].mxu1 %v3300_v10 }
 0x5d9   :  { %v3019_v16 = vpop.f32.mrb[20].mxu0 }
 0x5da   :  { %v3060_v49 = vpop.f32.mrb[20].mxu1  ;;  %v3020_v50 = vadd.f32 %v3019_v16, %v6026_v35  ;;  %v3021_v51 = vpop.f32.mrb[21].mxu0 }
 0x5db   :  { %v3062_v27 = vpop.f32.mrb[21].mxu1  ;;  %v3022_v33 = vadd.f32 %v3021_v51, %v6028_v38  ;;  %v3023_v57 = vpop.f32.mrb[22].mxu0 }
 0x5dc   :  { %v3064_v2 = vpop.f32.mrb[22].mxu1  ;;  %v3061_v5 = vadd.f32 %v3060_v49, %v3020_v50  ;;  %v3024_v6 = vpop.f32.mrb[23].mxu0 }
 0x5dd   :  { %v3065_v40 = vpop.f32.mrb[23].mxu1  ;;  %v3063_v46 = vadd.f32 %v3062_v27, %v3022_v33 }
 0x619   :  { %v3101_v60 = vpop.f32.mrb[24].mxu0 }
 0x61a   :  { %v3142_v7 = vpop.f32.mrb[24].mxu1  ;;  %v3102_v9 = vadd.f32 %v3101_v60, %v6044_v4  ;;  %v3103_v25 = vpop.f32.mrb[25].mxu0  ;;  %v3483_v4 = vrot.slane %v3474_v63, %v5864_v58 }
 0x61b   :  { %v3144_v10 = vpop.f32.mrb[25].mxu1  ;;  %v3104_v12 = vadd.f32 %v3103_v25, %v6046_v11  ;;  %v3105_v52 = vpop.f32.mrb[26].mxu0 }
 0x61c   :  { %v3146_v35 = vpop.f32.mrb[26].mxu1  ;;  %v3143_v54 = vadd.f32 %v3142_v7, %v3102_v9  ;;  %v3106_v13 = vpop.f32.mrb[27].mxu0 }
 0x61d   :  { %v3147_v62 = vpop.f32.mrb[27].mxu1  ;;  %v3145_v38 = vadd.f32 %v3144_v10, %v3104_v12 }
 0x659   :  { %v3340_v14 = vpop.f32.mrb[28].mxu0 }
 0x65a   :  { %v3381_v17 = vpop.f32.mrb[28].mxu1  ;;  %v3342_v1 = vpop.f32.mrb[29].mxu0 }
 0x65b   :  { %v3382_v18 = vadd.f32 %v3381_v17, %v3340_v14  ;;  %v3383_v39 = vpop.f32.mrb[29].mxu1  ;;  %v3344_v19 = vpop.f32.mrb[30].mxu0 }
 0x65c   :  { %v3384_v45 = vadd.f32 %v3383_v39, %v3342_v1  ;;  %v3385_v20 = vpop.f32.mrb[30].mxu1  ;;  %v3345_v21 = vpop.f32.mrb[31].mxu0 }
 0x65d   :  { %v3470_v11 = vadd.f32 %v3382_v18, %v3061_v5  ;;  %v3386_v24 = vpop.f32.mrb[31].mxu1 }
 0x65e   :  { %v3471_v26 = vadd.f32 %v3384_v45, %v3063_v46 }
 0x65f   :  { %v3496_v28 = vadd.f32 %v3479_v3, %v3470_v11 }
 0x660   :  { %v3497_v29 = vadd.f32 %v3483_v4, %v3471_v26 }
 0x661   :  { %v3500_v0 = vmax.f32 %v3496_v28, 0.0 }
 0x662   :  { %v3501_v30 = vmax.f32 %v3497_v29, 0.0 }
 0x664   :  { %v5013_v31 = vpack.c.bf16 %v3501_v30, %v3500_v0 }
 0x666   :  { %v3518_v32 = vrot.slane %v5013_v31, 5  ;;  %3526 = vst [vmem:[#allocation4] sm:$0x22] %v5013_v31  ;;  %v4982_v34 = vrot.slane %v5013_v31, 10 }
 0x668   :  { %3522 = vst [vmem:[#allocation4] sm:$0x88] %v3518_v32  ;;  %3534 = vst [vmem:[#allocation4 + $0x10] sm:$0x11] %v4982_v34  ;;  %v3536_v36 = vrot.slane %v3518_v32, 4 }
 0x66a   :  { %3540 = vst [vmem:[#allocation4] sm:$0x44] %v3536_v36 }
 0x699   :  { %v3422_v37 = vpop.f32.mrb[32].mxu0 }
 0x69a   :  { %v3463_v41 = vpop.f32.mrb[32].mxu1  ;;  %v3424_v44 = vpop.f32.mrb[33].mxu0 }
 0x69b   :  { %v3464_v42 = vadd.f32 %v3463_v41, %v3422_v37  ;;  %v3465_v8 = vpop.f32.mrb[33].mxu1  ;;  %v3426_v47 = vpop.f32.mrb[34].mxu0 }
 0x69c   :  { %v3466_v22 = vadd.f32 %v3465_v8, %v3424_v44  ;;  %v3467_v48 = vpop.f32.mrb[34].mxu1  ;;  %v3427_v61 = vpop.f32.mrb[35].mxu0 }
 0x69d   :  { %v3472_v53 = vadd.f32 %v3464_v42, %v3143_v54  ;;  %v3468_v15 = vpop.f32.mrb[35].mxu1 }
 0x69e   :  { %v3473_v16 = vadd.f32 %v3466_v22, %v3145_v38 }
 0x69f   :  { %v3498_v49 = vadd.f32 %v3487_v43, %v3472_v53 }
 0x6a0   :  { %v3499_v50 = vadd.f32 %v3491_v23, %v3473_v16 }
 0x6a1   :  { %v3502_v51 = vmax.f32 %v3498_v49, 0.0 }
 0x6a2   :  { %v3503_v27 = vmax.f32 %v3499_v50, 0.0 }
 0x6a4   :  { %v5014_v33 = vpack.c.bf16 %v3503_v27, %v3502_v51 }
 0x6a6   :  { %v3519_v57 = vrot.slane %v5014_v33, 5  ;;  %3527 = vst [vmem:[#allocation4 + $0x8] sm:$0x22] %v5014_v33  ;;  %v4983_v2 = vrot.slane %v5014_v33, 10 }
 0x6a8   :  { %3523 = vst [vmem:[#allocation4 + $0x8] sm:$0x88] %v3519_v57  ;;  %3535 = vst [vmem:[#allocation4 + $0x18] sm:$0x11] %v4983_v2  ;;  %v3537_v5 = vrot.slane %v3519_v57, 4 }
 0x6aa   :  { %3541 = vst [vmem:[#allocation4 + $0x8] sm:$0x44] %v3537_v5 }
 0x6ab   :  { %5590 = dma.done.wait [#allocation9 + $0x2], 49152 }
 0x6ac   :  { %5591 = vsyncadd [#allocation9 + $0x2], 4294918144  ;;  %v3680_v6 = vld [vmem:[#allocation7 + $0x408] sm:$0xff]  ;;  %v3679_v46 = vld [vmem:[#allocation7 + $0x400] sm:$0xff] }
 0x6ad   :  { %v3744_v40 = vld [vmem:[#allocation7 + $0x608] sm:$0xff]  ;;  %3831 = vmatprep.subr.bf16.mxu0 %v3680_v6  ;;  %v3743_v60 = vld [vmem:[#allocation7 + $0x600] sm:$0xff] }
 0x6ae   :  { %3872 = vmatprep.subr.bf16.mxu1 %v3744_v40  ;;  %v3684_v7 = vld [vmem:[#allocation7 + $0x428] sm:$0xff]  ;;  %3832 = vmatpush1.bf16.msra.mxu0 %v3679_v46  ;;  %v3683_v25 = vld [vmem:[#allocation7 + $0x420] sm:$0xff] }
 0x6af   :  { %v3748_v9 = vld [vmem:[#allocation7 + $0x628] sm:$0xff]  ;;  %3873 = vmatpush1.bf16.msra.mxu1 %v3743_v60  ;;  %3833 = vmatprep.subr.bf16.mxu0 %v3684_v7  ;;  %v3747_v10 = vld [vmem:[#allocation7 + $0x620] sm:$0xff] }
 0x6b0   :  { %3874 = vmatprep.subr.bf16.mxu1 %v3748_v9  ;;  %v3688_v12 = vld [vmem:[#allocation7 + $0x448] sm:$0xff]  ;;  %v3687_v35 = vld [vmem:[#allocation7 + $0x440] sm:$0xff] }
 0x6b1   :  { %v3752_v52 = vld [vmem:[#allocation7 + $0x648] sm:$0xff]  ;;  %v3751_v54 = vld [vmem:[#allocation7 + $0x640] sm:$0xff] }
 0x6b2   :  { %3834 = vmatpush1.bf16.msra.mxu0 %v3683_v25  ;;  %v3692_v13 = vld [vmem:[#allocation7 + $0x468] sm:$0xff]  ;;  %v3691_v38 = vld [vmem:[#allocation7 + $0x460] sm:$0xff] }
 0x6b3   :  { %3875 = vmatpush1.bf16.msra.mxu1 %v3747_v10  ;;  %3835 = vmatprep.subr.bf16.mxu0 %v3688_v12  ;;  %v3756_v62 = vld [vmem:[#allocation7 + $0x668] sm:$0xff]  ;;  %v3755_v63 = vld [vmem:[#allocation7 + $0x660] sm:$0xff] }
 0x6b4   :  { %3876 = vmatprep.subr.bf16.mxu1 %v3752_v52  ;;  %v3696_v14 = vld [vmem:[#allocation7 + $0x488] sm:$0xff]  ;;  %v3695_v18 = vld [vmem:[#allocation7 + $0x480] sm:$0xff] }
 0x6b5   :  { %v3760_v17 = vld [vmem:[#allocation7 + $0x688] sm:$0xff]  ;;  %v3759_v3 = vld [vmem:[#allocation7 + $0x680] sm:$0xff] }
 0x6b6   :  { %3836 = vmatpush1.bf16.msra.mxu0 %v3687_v35  ;;  %v3700_v1 = vld [vmem:[#allocation7 + $0x4a8] sm:$0xff]  ;;  %v3699_v45 = vld [vmem:[#allocation7 + $0x4a0] sm:$0xff]  ;;  %v3682_v35 = vld [vmem:[#allocation7 + $0x418] sm:$0xff] }
 0x6b7   :  { %3877 = vmatpush1.bf16.msra.mxu1 %v3751_v54  ;;  %3837 = vmatprep.subr.bf16.mxu0 %v3692_v13  ;;  %v3764_v39 = vld [vmem:[#allocation7 + $0x6a8] sm:$0xff]  ;;  %v3763_v4 = vld [vmem:[#allocation7 + $0x6a0] sm:$0xff]  ;;  %v3746_v54 = vld [vmem:[#allocation7 + $0x618] sm:$0xff] }
 0x6b8   :  { %3878 = vmatprep.subr.bf16.mxu1 %v3756_v62  ;;  %v3704_v19 = vld [vmem:[#allocation7 + $0x4c8] sm:$0xff]  ;;  %v3703_v11 = vld [vmem:[#allocation7 + $0x4c0] sm:$0xff] }
 0x6b9   :  { %v3768_v20 = vld [vmem:[#allocation7 + $0x6c8] sm:$0xff]  ;;  %v6060_v21 = vld [vmem:[#allocation4 + $0x4] ss:$16 sps:$4 sm:$0x18]  }
 0x6ba   :  { %3838 = vmatpush1.bf16.msra.mxu0 %v3691_v38  ;;  %v3767_v24 = vld [vmem:[#allocation7 + $0x6c0] sm:$0xff]  ;;  %v3708_v26 = vld [vmem:[#allocation7 + $0x4e8] sm:$0xff]  ;;  %v3824_v29 = vrot.slane %v6060_v21, 3  ;;  %v3681_v38 = vld [vmem:[#allocation7 + $0x410] sm:$0xff] }
 0x6bb   :  { %3879 = vmatpush1.bf16.msra.mxu1 %v3755_v63  ;;  %3839 = vmatprep.subr.bf16.mxu0 %v3696_v14  ;;  %v3772_v28 = vld [vmem:[#allocation7 + $0x6e8] sm:$0xff]  ;;  %v3707_v30 = vld [vmem:[#allocation7 + $0x4e0] sm:$0xff]  ;;  %v3745_v63 = vld [vmem:[#allocation7 + $0x610] sm:$0xff] }
 0x6bc   :  { %3880 = vmatprep.subr.bf16.mxu1 %v3760_v17  ;;  %v6063_v0 = vld [vmem:[#allocation4 + $0xc] ss:$16 sps:$4 sm:$0x18]   ;;  %v3771_v31 = vld [vmem:[#allocation7 + $0x6e0] sm:$0xff]  ;;  %3863 = vmatprep.mubr.bf16.mxu0 %v3824_v29 }
 0x6bd   :  { %v3826_v32 = vrot.slane %v6063_v0, 3  ;;  %v3712_v34 = vld [vmem:[#allocation7 + $0x508] sm:$0xff]  ;;  %v3711_v37 = vld [vmem:[#allocation7 + $0x500] sm:$0xff]  ;;  %v3686_v14 = vld [vmem:[#allocation7 + $0x438] sm:$0xff] }
 0x6be   :  { %3840 = vmatpush1.bf16.msra.mxu0 %v3695_v18  ;;  %v3776_v36 = vld [vmem:[#allocation7 + $0x708] sm:$0xff]  ;;  %v3775_v41 = vld [vmem:[#allocation7 + $0x700] sm:$0xff]  ;;  %v3750_v17 = vld [vmem:[#allocation7 + $0x638] sm:$0xff] }
 0x6bf   :  { %3881 = vmatpush1.bf16.msra.mxu1 %v3759_v3  ;;  %3841 = vmatprep.subr.bf16.mxu0 %v3700_v1  ;;  %v3716_v42 = vld [vmem:[#allocation7 + $0x528] sm:$0xff]  ;;  %v3715_v44 = vld [vmem:[#allocation7 + $0x520] sm:$0xff]  ;;  %v3685_v18 = vld [vmem:[#allocation7 + $0x430] sm:$0xff] }
 0x6c0   :  { %3882 = vmatprep.subr.bf16.mxu1 %v3764_v39  ;;  %3904 = vmatprep.mubr.bf16.mxu1 %v3826_v32  ;;  %v3780_v43 = vld [vmem:[#allocation7 + $0x728] sm:$0xff]  ;;  %v3779_v8 = vld [vmem:[#allocation7 + $0x720] sm:$0xff]  ;;  %v3749_v3 = vld [vmem:[#allocation7 + $0x630] sm:$0xff] }
 0x6c1   :  { %v3720_v22 = vld [vmem:[#allocation7 + $0x548] sm:$0xff]  ;;  %v3719_v47 = vld [vmem:[#allocation7 + $0x540] sm:$0xff]  ;;  %v3690_v1 = vld [vmem:[#allocation7 + $0x458] sm:$0xff] }
 0x6c2   :  { %3842 = vmatpush1.bf16.msra.mxu0 %v3699_v45  ;;  %v3784_v23 = vld [vmem:[#allocation7 + $0x748] sm:$0xff]  ;;  %v3783_v48 = vld [vmem:[#allocation7 + $0x740] sm:$0xff]  ;;  %v3754_v39 = vld [vmem:[#allocation7 + $0x658] sm:$0xff] }
 0x6c3   :  { %3883 = vmatpush1.bf16.msra.mxu1 %v3763_v4  ;;  %3843 = vmatprep.subr.bf16.mxu0 %v3704_v19  ;;  %v3724_v53 = vld [vmem:[#allocation7 + $0x568] sm:$0xff]  ;;  %v3723_v15 = vld [vmem:[#allocation7 + $0x560] sm:$0xff]  ;;  %v3689_v45 = vld [vmem:[#allocation7 + $0x450] sm:$0xff] }
 0x6c4   :  { %3884 = vmatprep.subr.bf16.mxu1 %v3768_v20  ;;  %v3788_v61 = vld [vmem:[#allocation7 + $0x768] sm:$0xff]  ;;  %v3787_v16 = vld [vmem:[#allocation7 + $0x760] sm:$0xff]  ;;  %v3753_v4 = vld [vmem:[#allocation7 + $0x650] sm:$0xff] }
 0x6c5   :  { %v3728_v49 = vld [vmem:[#allocation7 + $0x588] sm:$0xff]  ;;  %v3727_v51 = vld [vmem:[#allocation7 + $0x580] sm:$0xff]  ;;  %v3694_v19 = vld [vmem:[#allocation7 + $0x478] sm:$0xff] }
 0x6c6   :  { %3844 = vmatpush1.bf16.msra.mxu0 %v3703_v11  ;;  %v3792_v50 = vld [vmem:[#allocation7 + $0x788] sm:$0xff]  ;;  %v3791_v27 = vld [vmem:[#allocation7 + $0x780] sm:$0xff]  ;;  %v3758_v20 = vld [vmem:[#allocation7 + $0x678] sm:$0xff] }
 0x6c7   :  { %3885 = vmatpush1.bf16.msra.mxu1 %v3767_v24  ;;  %3845 = vmatprep.subr.bf16.mxu0 %v3708_v26  ;;  %v3732_v33 = vld [vmem:[#allocation7 + $0x5a8] sm:$0xff]  ;;  %v3731_v2 = vld [vmem:[#allocation7 + $0x5a0] sm:$0xff]  ;;  %v3693_v11 = vld [vmem:[#allocation7 + $0x470] sm:$0xff] }
 0x6c8   :  { %3886 = vmatprep.subr.bf16.mxu1 %v3772_v28  ;;  %v3796_v57 = vld [vmem:[#allocation7 + $0x7a8] sm:$0xff]  ;;  %v3795_v5 = vld [vmem:[#allocation7 + $0x7a0] sm:$0xff]  ;;  %v3757_v24 = vld [vmem:[#allocation7 + $0x670] sm:$0xff] }
 0x6c9   :  { %v3736_v6 = vld [vmem:[#allocation7 + $0x5c8] sm:$0xff]  ;;  %v3735_v46 = vld [vmem:[#allocation7 + $0x5c0] sm:$0xff]  ;;  %v3698_v26 = vld [vmem:[#allocation7 + $0x498] sm:$0xff] }
 0x6ca   :  { %3846 = vmatpush1.bf16.msra.mxu0 %v3707_v30  ;;  %v3800_v40 = vld [vmem:[#allocation7 + $0x7c8] sm:$0xff]  ;;  %v3799_v60 = vld [vmem:[#allocation7 + $0x7c0] sm:$0xff]  ;;  %v3762_v21 = vld [vmem:[#allocation7 + $0x698] sm:$0xff] }
 0x6cb   :  { %3887 = vmatpush1.bf16.msra.mxu1 %v3771_v31  ;;  %3847 = vmatprep.subr.bf16.mxu0 %v3712_v34  ;;  %v3740_v7 = vld [vmem:[#allocation7 + $0x5e8] sm:$0xff]  ;;  %v6070_v25 = vld [vmem:[#allocation4] ss:$16 sps:$4 sm:$0x18]   ;;  %v3702_v0 = vld [vmem:[#allocation7 + $0x4b8] sm:$0xff] }
 0x6cc   :  { %3888 = vmatprep.subr.bf16.mxu1 %v3776_v36  ;;  %v3804_v9 = vld [vmem:[#allocation7 + $0x7e8] sm:$0xff]  ;;  %v3739_v12 = vld [vmem:[#allocation7 + $0x5e0] sm:$0xff]  ;;  %v3823_v13 = vrot.slane %v6070_v25, 3  ;;  %v3697_v28 = vld [vmem:[#allocation7 + $0x490] sm:$0xff] }
 0x6cd   :  { %v6072_v10 = vld [vmem:[#allocation4 + $0x8] ss:$16 sps:$4 sm:$0x18]   ;;  %v3803_v52 = vld [vmem:[#allocation7 + $0x7e0] sm:$0xff]  ;;  %v3701_v31 = vld [vmem:[#allocation7 + $0x4b0] sm:$0xff] }
 0x6ce   :  { %3848 = vmatpush1.bf16.msra.mxu0 %v3711_v37  ;;  %v3825_v62 = vrot.slane %v6072_v10, 3  ;;  %v3766_v30 = vld [vmem:[#allocation7 + $0x6b8] sm:$0xff]  ;;  %v3705_v37 = vld [vmem:[#allocation7 + $0x4d0] sm:$0xff]  ;;  %v3554_v25 = vld [vmem:[#allocation7 + $0x40] sm:$0xff] }
 0x6cf   :  { %3889 = vmatpush1.bf16.msra.mxu1 %v3775_v41  ;;  %3849 = vmatprep.subr.bf16.mxu0 %v3716_v42  ;;  %v3706_v34 = vld [vmem:[#allocation7 + $0x4d8] sm:$0xff]  ;;  %v3769_v41 = vld [vmem:[#allocation7 + $0x6d0] sm:$0xff]  ;;  %v3559_v10 = vld [vmem:[#allocation7 + $0x68] sm:$0xff] }
 0x6d0   :  { %3890 = vmatprep.subr.bf16.mxu1 %v3780_v43  ;;  %v3770_v36 = vld [vmem:[#allocation7 + $0x6d8] sm:$0xff] }
 0x6d1   :  { %v3710_v42 = vld [vmem:[#allocation7 + $0x4f8] sm:$0xff] }
 0x6d2   :  { %3850 = vmatpush1.bf16.msra.mxu0 %v3715_v44  ;;  %v3774_v43 = vld [vmem:[#allocation7 + $0x6f8] sm:$0xff]  ;;  %v3709_v44 = vld [vmem:[#allocation7 + $0x4f0] sm:$0xff] }
 0x6d3   :  { %3891 = vmatpush1.bf16.msra.mxu1 %v3779_v8  ;;  %3851 = vmatprep.subr.bf16.mxu0 %v3720_v22  ;;  %v3773_v8 = vld [vmem:[#allocation7 + $0x6f0] sm:$0xff]  ;;  %v3714_v22 = vld [vmem:[#allocation7 + $0x518] sm:$0xff] }
 0x6d4   :  { %3892 = vmatprep.subr.bf16.mxu1 %v3784_v23  ;;  %v3778_v23 = vld [vmem:[#allocation7 + $0x718] sm:$0xff] }
 0x6d6   :  { %3852 = vmatpush1.bf16.msra.mxu0 %v3719_v47  ;;  %v3713_v47 = vld [vmem:[#allocation7 + $0x510] sm:$0xff] }
 0x6d7   :  { %3893 = vmatpush1.bf16.msra.mxu1 %v3783_v48  ;;  %3853 = vmatprep.subr.bf16.mxu0 %v3724_v53  ;;  %v3777_v48 = vld [vmem:[#allocation7 + $0x710] sm:$0xff]  ;;  %v3718_v53 = vld [vmem:[#allocation7 + $0x538] sm:$0xff] }
 0x6d8   :  { %3894 = vmatprep.subr.bf16.mxu1 %v3788_v61  ;;  %v3782_v61 = vld [vmem:[#allocation7 + $0x738] sm:$0xff] }
 0x6da   :  { %3854 = vmatpush1.bf16.msra.mxu0 %v3723_v15  ;;  %v3717_v15 = vld [vmem:[#allocation7 + $0x530] sm:$0xff] }
 0x6db   :  { %3895 = vmatpush1.bf16.msra.mxu1 %v3787_v16  ;;  %3855 = vmatprep.subr.bf16.mxu0 %v3728_v49  ;;  %v3781_v16 = vld [vmem:[#allocation7 + $0x730] sm:$0xff]  ;;  %v3722_v49 = vld [vmem:[#allocation7 + $0x558] sm:$0xff] }
 0x6dc   :  { %3896 = vmatprep.subr.bf16.mxu1 %v3792_v50  ;;  %v3786_v50 = vld [vmem:[#allocation7 + $0x758] sm:$0xff] }
 0x6de   :  { %3856 = vmatpush1.bf16.msra.mxu0 %v3727_v51  ;;  %v3721_v51 = vld [vmem:[#allocation7 + $0x550] sm:$0xff] }
 0x6df   :  { %3897 = vmatpush1.bf16.msra.mxu1 %v3791_v27  ;;  %3857 = vmatprep.subr.bf16.mxu0 %v3732_v33  ;;  %v3785_v27 = vld [vmem:[#allocation7 + $0x750] sm:$0xff]  ;;  %v3726_v33 = vld [vmem:[#allocation7 + $0x578] sm:$0xff] }
 0x6e0   :  { %3898 = vmatprep.subr.bf16.mxu1 %v3796_v57  ;;  %v3790_v57 = vld [vmem:[#allocation7 + $0x778] sm:$0xff] }
 0x6e2   :  { %3858 = vmatpush1.bf16.msra.mxu0 %v3731_v2  ;;  %v3725_v2 = vld [vmem:[#allocation7 + $0x570] sm:$0xff] }
 0x6e3   :  { %3899 = vmatpush1.bf16.msra.mxu1 %v3795_v5  ;;  %3859 = vmatprep.subr.bf16.mxu0 %v3736_v6  ;;  %v3789_v5 = vld [vmem:[#allocation7 + $0x770] sm:$0xff]  ;;  %v3730_v6 = vld [vmem:[#allocation7 + $0x598] sm:$0xff] }
 0x6e4   :  { %3900 = vmatprep.subr.bf16.mxu1 %v3800_v40  ;;  %v3794_v40 = vld [vmem:[#allocation7 + $0x798] sm:$0xff] }
 0x6e6   :  { %3860 = vmatpush1.bf16.msra.mxu0 %v3735_v46  ;;  %v3729_v46 = vld [vmem:[#allocation7 + $0x590] sm:$0xff] }
 0x6e7   :  { %3901 = vmatpush1.bf16.msra.mxu1 %v3799_v60  ;;  %3861 = vmatprep.subr.bf16.mxu0 %v3740_v7  ;;  %v3793_v60 = vld [vmem:[#allocation7 + $0x790] sm:$0xff]  ;;  %v3734_v7 = vld [vmem:[#allocation7 + $0x5b8] sm:$0xff] }
 0x6e8   :  { %3902 = vmatprep.subr.bf16.mxu1 %v3804_v9  ;;  %v3798_v9 = vld [vmem:[#allocation7 + $0x7b8] sm:$0xff] }
 0x6ea   :  { %3862 = vmatpush1.bf16.msra.mxu0 %v3739_v12  ;;  %v3733_v12 = vld [vmem:[#allocation7 + $0x5b0] sm:$0xff] }
 0x6eb   :  { %3903 = vmatpush1.bf16.msra.mxu1 %v3803_v52  ;;  %3913 = vmatprep.subr.bf16.mxu0 %v3682_v35  ;;  %v3797_v52 = vld [vmem:[#allocation7 + $0x7b0] sm:$0xff]  ;;  %v3738_v35 = vld [vmem:[#allocation7 + $0x5d8] sm:$0xff] }
 0x6ec   :  { %3954 = vmatprep.subr.bf16.mxu1 %v3746_v54  ;;  %v3802_v54 = vld [vmem:[#allocation7 + $0x7d8] sm:$0xff] }
 0x6ed   :  { %3864 = vmatmul.mubr.bf16.vlgmr.msra.gmra.mrb[36].mxu0 %v3823_v13 }
 0x6ee   :  { %3905 = vmatmul.mubr.bf16.vlgmr.msra.gmra.mrb[36].mxu1 %v3825_v62  ;;  %3914 = vmatpush1.bf16.msra.mxu0 %v3681_v38  ;;  %v3737_v38 = vld [vmem:[#allocation7 + $0x5d0] sm:$0xff] }
 0x6ef   :  { %3955 = vmatpush1.bf16.msra.mxu1 %v3745_v63  ;;  %3915 = vmatprep.subr.bf16.mxu0 %v3686_v14  ;;  %v3801_v63 = vld [vmem:[#allocation7 + $0x7d0] sm:$0xff]  ;;  %v3742_v14 = vld [vmem:[#allocation7 + $0x5f8] sm:$0xff] }
 0x6f0   :  { %3956 = vmatprep.subr.bf16.mxu1 %v3750_v17  ;;  %3945 = vmatprep.mubr.bf16.mxu0 %v3824_v29  ;;  %v3761_v29 = vld [vmem:[#allocation7 + $0x690] sm:$0xff]  ;;  %v3806_v17 = vld [vmem:[#allocation7 + $0x7f8] sm:$0xff] }
 0x6f1   :  { %3986 = vmatprep.mubr.bf16.mxu1 %v3826_v32  ;;  %v3765_v32 = vld [vmem:[#allocation7 + $0x6b0] sm:$0xff] }
 0x6f2   :  { %3916 = vmatpush1.bf16.msra.mxu0 %v3685_v18  ;;  %v3741_v18 = vld [vmem:[#allocation7 + $0x5f0] sm:$0xff] }
 0x6f3   :  { %3957 = vmatpush1.bf16.msra.mxu1 %v3749_v3  ;;  %3917 = vmatprep.subr.bf16.mxu0 %v3690_v1  ;;  %v3805_v3 = vld [vmem:[#allocation7 + $0x7f0] sm:$0xff]  ;;  %v3547_v1 = vld [vmem:[#allocation7 + $0x8] sm:$0xff] }
 0x6f4   :  { %3958 = vmatprep.subr.bf16.mxu1 %v3754_v39  ;;  %v3611_v39 = vld [vmem:[#allocation7 + $0x208] sm:$0xff] }
 0x6f6   :  { %3918 = vmatpush1.bf16.msra.mxu0 %v3689_v45  ;;  %v6084_v45 = vld [vmem:[#allocation4] sm:$0x33] }
 0x6f7   :  { %3959 = vmatpush1.bf16.msra.mxu1 %v3753_v4  ;;  %3919 = vmatprep.subr.bf16.mxu0 %v3694_v19  ;;  %v6086_v4 = vld [vmem:[#allocation4 + $0x8] sm:$0x33]  ;;  %v3546_v19 = vld [vmem:[#allocation7] sm:$0xff] }
 0x6f8   :  { %3960 = vmatprep.subr.bf16.mxu1 %v3758_v20  ;;  %v3610_v20 = vld [vmem:[#allocation7 + $0x200] sm:$0xff] }
 0x6fa   :  { %3920 = vmatpush1.bf16.msra.mxu0 %v3693_v11  ;;  %v3551_v11 = vld [vmem:[#allocation7 + $0x28] sm:$0xff] }
 0x6fb   :  { %3961 = vmatpush1.bf16.msra.mxu1 %v3757_v24  ;;  %3921 = vmatprep.subr.bf16.mxu0 %v3698_v26  ;;  %v3615_v24 = vld [vmem:[#allocation7 + $0x228] sm:$0xff]  ;;  %v6090_v26 = vcombine.high %v6084_v45, %v6084_v45 }
 0x6fc   :  { %3962 = vmatprep.subr.bf16.mxu1 %v3762_v21  ;;  %v6094_v21 = vcombine.high %v6086_v4, %v6086_v4 }
 0x6fe   :  { %3922 = vmatpush1.bf16.msra.mxu0 %v3697_v28  ;;  %v3550_v28 = vld [vmem:[#allocation7 + $0x20] sm:$0xff] }
 0x6ff   :  { %3963 = vmatpush1.bf16.msra.mxu1 %v3761_v29  ;;  %3923 = vmatprep.subr.bf16.mxu0 %v3702_v0  ;;  %v3614_v29 = vld [vmem:[#allocation7 + $0x220] sm:$0xff]  ;;  %v3555_v0 = vld [vmem:[#allocation7 + $0x48] sm:$0xff] }
 0x700   :  { %3964 = vmatprep.subr.bf16.mxu1 %v3766_v30  ;;  %v3619_v30 = vld [vmem:[#allocation7 + $0x248] sm:$0xff] }
 0x702   :  { %3924 = vmatpush1.bf16.msra.mxu0 %v3701_v31  ;;  %v3558_v31 = vld [vmem:[#allocation7 + $0x60] sm:$0xff] }
 0x703   :  { %3965 = vmatpush1.bf16.msra.mxu1 %v3765_v32  ;;  %3925 = vmatprep.subr.bf16.mxu0 %v3706_v34  ;;  %v3622_v32 = vld [vmem:[#allocation7 + $0x260] sm:$0xff]  ;;  %v3563_v34 = vld [vmem:[#allocation7 + $0x88] sm:$0xff] }
 0x704   :  { %3966 = vmatprep.subr.bf16.mxu1 %v3770_v36  ;;  %v3627_v36 = vld [vmem:[#allocation7 + $0x288] sm:$0xff] }
 0x706   :  { %3926 = vmatpush1.bf16.msra.mxu0 %v3705_v37  ;;  %v3562_v37 = vld [vmem:[#allocation7 + $0x80] sm:$0xff] }
 0x707   :  { %3967 = vmatpush1.bf16.msra.mxu1 %v3769_v41  ;;  %3927 = vmatprep.subr.bf16.mxu0 %v3710_v42  ;;  %v3626_v41 = vld [vmem:[#allocation7 + $0x280] sm:$0xff]  ;;  %v3567_v42 = vld [vmem:[#allocation7 + $0xa8] sm:$0xff] }
 0x708   :  { %3968 = vmatprep.subr.bf16.mxu1 %v3774_v43  ;;  %v3631_v43 = vld [vmem:[#allocation7 + $0x2a8] sm:$0xff] }
 0x70a   :  { %3928 = vmatpush1.bf16.msra.mxu0 %v3709_v44  ;;  %v3566_v44 = vld [vmem:[#allocation7 + $0xa0] sm:$0xff] }
 0x70b   :  { %3969 = vmatpush1.bf16.msra.mxu1 %v3773_v8  ;;  %3929 = vmatprep.subr.bf16.mxu0 %v3714_v22  ;;  %v3630_v8 = vld [vmem:[#allocation7 + $0x2a0] sm:$0xff]  ;;  %v3571_v22 = vld [vmem:[#allocation7 + $0xc8] sm:$0xff] }
 0x70c   :  { %3970 = vmatprep.subr.bf16.mxu1 %v3778_v23  ;;  %v3635_v23 = vld [vmem:[#allocation7 + $0x2c8] sm:$0xff] }
 0x70e   :  { %3930 = vmatpush1.bf16.msra.mxu0 %v3713_v47  ;;  %v3570_v47 = vld [vmem:[#allocation7 + $0xc0] sm:$0xff] }
 0x70f   :  { %3971 = vmatpush1.bf16.msra.mxu1 %v3777_v48  ;;  %3931 = vmatprep.subr.bf16.mxu0 %v3718_v53  ;;  %v3634_v48 = vld [vmem:[#allocation7 + $0x2c0] sm:$0xff]  ;;  %v3575_v53 = vld [vmem:[#allocation7 + $0xe8] sm:$0xff] }
 0x710   :  { %3972 = vmatprep.subr.bf16.mxu1 %v3782_v61  ;;  %v3639_v61 = vld [vmem:[#allocation7 + $0x2e8] sm:$0xff] }
 0x712   :  { %3932 = vmatpush1.bf16.msra.mxu0 %v3717_v15  ;;  %v3574_v15 = vld [vmem:[#allocation7 + $0xe0] sm:$0xff] }
 0x713   :  { %3973 = vmatpush1.bf16.msra.mxu1 %v3781_v16  ;;  %3933 = vmatprep.subr.bf16.mxu0 %v3722_v49  ;;  %v3638_v16 = vld [vmem:[#allocation7 + $0x2e0] sm:$0xff]  ;;  %v3579_v49 = vld [vmem:[#allocation7 + $0x108] sm:$0xff] }
 0x714   :  { %3974 = vmatprep.subr.bf16.mxu1 %v3786_v50  ;;  %v3643_v50 = vld [vmem:[#allocation7 + $0x308] sm:$0xff] }
 0x716   :  { %3934 = vmatpush1.bf16.msra.mxu0 %v3721_v51  ;;  %v3578_v51 = vld [vmem:[#allocation7 + $0x100] sm:$0xff] }
 0x717   :  { %3975 = vmatpush1.bf16.msra.mxu1 %v3785_v27  ;;  %3935 = vmatprep.subr.bf16.mxu0 %v3726_v33  ;;  %v3642_v27 = vld [vmem:[#allocation7 + $0x300] sm:$0xff]  ;;  %v3583_v33 = vld [vmem:[#allocation7 + $0x128] sm:$0xff] }
 0x718   :  { %3976 = vmatprep.subr.bf16.mxu1 %v3790_v57  ;;  %v3647_v57 = vld [vmem:[#allocation7 + $0x328] sm:$0xff] }
 0x71a   :  { %3936 = vmatpush1.bf16.msra.mxu0 %v3725_v2  ;;  %v3582_v2 = vld [vmem:[#allocation7 + $0x120] sm:$0xff] }
 0x71b   :  { %3977 = vmatpush1.bf16.msra.mxu1 %v3789_v5  ;;  %3937 = vmatprep.subr.bf16.mxu0 %v3730_v6  ;;  %v3646_v5 = vld [vmem:[#allocation7 + $0x320] sm:$0xff]  ;;  %v3587_v6 = vld [vmem:[#allocation7 + $0x148] sm:$0xff] }
 0x71c   :  { %3978 = vmatprep.subr.bf16.mxu1 %v3794_v40  ;;  %v3651_v40 = vld [vmem:[#allocation7 + $0x348] sm:$0xff] }
 0x71e   :  { %3938 = vmatpush1.bf16.msra.mxu0 %v3729_v46  ;;  %v3586_v46 = vld [vmem:[#allocation7 + $0x140] sm:$0xff] }
 0x71f   :  { %3979 = vmatpush1.bf16.msra.mxu1 %v3793_v60  ;;  %3939 = vmatprep.subr.bf16.mxu0 %v3734_v7  ;;  %v3650_v60 = vld [vmem:[#allocation7 + $0x340] sm:$0xff]  ;;  %v3591_v7 = vld [vmem:[#allocation7 + $0x168] sm:$0xff] }
 0x720   :  { %3980 = vmatprep.subr.bf16.mxu1 %v3798_v9  ;;  %v3655_v9 = vld [vmem:[#allocation7 + $0x368] sm:$0xff] }
 0x722   :  { %3940 = vmatpush1.bf16.msra.mxu0 %v3733_v12  ;;  %v3590_v12 = vld [vmem:[#allocation7 + $0x160] sm:$0xff] }
 0x723   :  { %3981 = vmatpush1.bf16.msra.mxu1 %v3797_v52  ;;  %3941 = vmatprep.subr.bf16.mxu0 %v3738_v35  ;;  %v3654_v52 = vld [vmem:[#allocation7 + $0x360] sm:$0xff]  ;;  %v3595_v35 = vld [vmem:[#allocation7 + $0x188] sm:$0xff] }
 0x724   :  { %3982 = vmatprep.subr.bf16.mxu1 %v3802_v54  ;;  %v3659_v54 = vld [vmem:[#allocation7 + $0x388] sm:$0xff] }
 0x726   :  { %3942 = vmatpush1.bf16.msra.mxu0 %v3737_v38  ;;  %v3594_v38 = vld [vmem:[#allocation7 + $0x180] sm:$0xff] }
 0x727   :  { %3983 = vmatpush1.bf16.msra.mxu1 %v3801_v63  ;;  %3943 = vmatprep.subr.bf16.mxu0 %v3742_v14  ;;  %v3658_v63 = vld [vmem:[#allocation7 + $0x380] sm:$0xff]  ;;  %v3599_v14 = vld [vmem:[#allocation7 + $0x1a8] sm:$0xff] }
 0x728   :  { %3984 = vmatprep.subr.bf16.mxu1 %v3806_v17  ;;  %v3663_v17 = vld [vmem:[#allocation7 + $0x3a8] sm:$0xff] }
 0x72a   :  { %3944 = vmatpush1.bf16.msra.mxu0 %v3741_v18  ;;  %v3598_v18 = vld [vmem:[#allocation7 + $0x1a0] sm:$0xff] }
 0x72b   :  { %3985 = vmatpush1.bf16.msra.mxu1 %v3805_v3  ;;  %4009 = vmatprep.subr.bf16.mxu0 %v3547_v1  ;;  %v3662_v3 = vld [vmem:[#allocation7 + $0x3a0] sm:$0xff]  ;;  %v3603_v1 = vld [vmem:[#allocation7 + $0x1c8] sm:$0xff] }
 0x72c   :  { %4050 = vmatprep.subr.bf16.mxu1 %v3611_v39  ;;  %v3667_v39 = vld [vmem:[#allocation7 + $0x3c8] sm:$0xff] }
 0x72d   :  { %3946 = vmatmul.mubr.bf16.vlgmr.msra.gmra.mrb[40].mxu0 %v3823_v13  ;;  %v3618_v13 = vld [vmem:[#allocation7 + $0x240] sm:$0xff] }
 0x72e   :  { %3987 = vmatmul.mubr.bf16.vlgmr.msra.gmra.mrb[40].mxu1 %v3825_v62  ;;  %4010 = vmatpush1.bf16.msra.mxu0 %v3546_v19  ;;  %v3623_v62 = vld [vmem:[#allocation7 + $0x268] sm:$0xff]  ;;  %v3602_v19 = vld [vmem:[#allocation7 + $0x1c0] sm:$0xff] }
 0x72f   :  { %4051 = vmatpush1.bf16.msra.mxu1 %v3610_v20  ;;  %4011 = vmatprep.subr.bf16.mxu0 %v3551_v11  ;;  %v3666_v20 = vld [vmem:[#allocation7 + $0x3c0] sm:$0xff]  ;;  %v3607_v11 = vld [vmem:[#allocation7 + $0x1e8] sm:$0xff] }
 0x730   :  { %4052 = vmatprep.subr.bf16.mxu1 %v3615_v24  ;;  %4041 = vmatprep.mubr.bf16.mxu0 %v6090_v26  ;;  %v3671_v24 = vld [vmem:[#allocation7 + $0x3e8] sm:$0xff] }
 0x731   :  { %4082 = vmatprep.mubr.bf16.mxu1 %v6094_v21 }
 0x732   :  { %4012 = vmatpush1.bf16.msra.mxu0 %v3550_v28  ;;  %v3606_v28 = vld [vmem:[#allocation7 + $0x1e0] sm:$0xff] }
 0x733   :  { %4053 = vmatpush1.bf16.msra.mxu1 %v3614_v29  ;;  %4013 = vmatprep.subr.bf16.mxu0 %v3555_v0  ;;  %v3670_v29 = vld [vmem:[#allocation7 + $0x3e0] sm:$0xff]  ;;  %v3549_v0 = vld [vmem:[#allocation7 + $0x18] sm:$0xff] }
 0x734   :  { %4054 = vmatprep.subr.bf16.mxu1 %v3619_v30  ;;  %v3613_v30 = vld [vmem:[#allocation7 + $0x218] sm:$0xff] }
 0x736   :  { %4014 = vmatpush1.bf16.msra.mxu0 %v3554_v25  ;;  %v6104_v25 = vcombine.low %v6084_v45, %v6084_v45  ;;  %v3552_v45 = vld [vmem:[#allocation7 + $0x30] sm:$0xff] }
 0x737   :  { %4055 = vmatpush1.bf16.msra.mxu1 %v3618_v13  ;;  %4015 = vmatprep.subr.bf16.mxu0 %v3559_v10  ;;  %v6108_v13 = vcombine.low %v6086_v4, %v6086_v4  ;;  %v3548_v10 = vld [vmem:[#allocation7 + $0x10] sm:$0xff]  ;;  %v3557_v4 = vld [vmem:[#allocation7 + $0x58] sm:$0xff] }
 0x738   :  { %4056 = vmatprep.subr.bf16.mxu1 %v3623_v62  ;;  %v3612_v62 = vld [vmem:[#allocation7 + $0x210] sm:$0xff] }
 0x73a   :  { %4016 = vmatpush1.bf16.msra.mxu0 %v3558_v31  ;;  %v3553_v31 = vld [vmem:[#allocation7 + $0x38] sm:$0xff] }
 0x73b   :  { %4057 = vmatpush1.bf16.msra.mxu1 %v3622_v32  ;;  %4017 = vmatprep.subr.bf16.mxu0 %v3563_v34  ;;  %v3617_v32 = vld [vmem:[#allocation7 + $0x238] sm:$0xff]  ;;  %v3616_v34 = vld [vmem:[#allocation7 + $0x230] sm:$0xff] }
 0x73c   :  { %4058 = vmatprep.subr.bf16.mxu1 %v3627_v36  ;;  %v3621_v36 = vld [vmem:[#allocation7 + $0x258] sm:$0xff] }
 0x73e   :  { %4018 = vmatpush1.bf16.msra.mxu0 %v3562_v37  ;;  %v3556_v37 = vld [vmem:[#allocation7 + $0x50] sm:$0xff] }
 0x73f   :  { %4059 = vmatpush1.bf16.msra.mxu1 %v3626_v41  ;;  %4019 = vmatprep.subr.bf16.mxu0 %v3567_v42  ;;  %v3620_v41 = vld [vmem:[#allocation7 + $0x250] sm:$0xff]  ;;  %v3561_v42 = vld [vmem:[#allocation7 + $0x78] sm:$0xff] }
 0x740   :  { %4060 = vmatprep.subr.bf16.mxu1 %v3631_v43  ;;  %v3625_v43 = vld [vmem:[#allocation7 + $0x278] sm:$0xff] }
 0x742   :  { %4020 = vmatpush1.bf16.msra.mxu0 %v3566_v44  ;;  %v3560_v44 = vld [vmem:[#allocation7 + $0x70] sm:$0xff] }
 0x743   :  { %4061 = vmatpush1.bf16.msra.mxu1 %v3630_v8  ;;  %4021 = vmatprep.subr.bf16.mxu0 %v3571_v22  ;;  %v3624_v8 = vld [vmem:[#allocation7 + $0x270] sm:$0xff]  ;;  %v3565_v22 = vld [vmem:[#allocation7 + $0x98] sm:$0xff] }
 0x744   :  { %4062 = vmatprep.subr.bf16.mxu1 %v3635_v23  ;;  %v3629_v23 = vld [vmem:[#allocation7 + $0x298] sm:$0xff] }
 0x746   :  { %4022 = vmatpush1.bf16.msra.mxu0 %v3570_v47  ;;  %v3569_v47 = vld [vmem:[#allocation7 + $0xb8] sm:$0xff] }
 0x747   :  { %4063 = vmatpush1.bf16.msra.mxu1 %v3634_v48  ;;  %4023 = vmatprep.subr.bf16.mxu0 %v3575_v53  ;;  %v3633_v48 = vld [vmem:[#allocation7 + $0x2b8] sm:$0xff]  ;;  %v3568_v53 = vld [vmem:[#allocation7 + $0xb0] sm:$0xff] }
 0x748   :  { %4064 = vmatprep.subr.bf16.mxu1 %v3639_v61  ;;  %v3632_v61 = vld [vmem:[#allocation7 + $0x2b0] sm:$0xff] }
 0x74a   :  { %4024 = vmatpush1.bf16.msra.mxu0 %v3574_v15  ;;  %v3573_v15 = vld [vmem:[#allocation7 + $0xd8] sm:$0xff] }
 0x74b   :  { %4065 = vmatpush1.bf16.msra.mxu1 %v3638_v16  ;;  %4025 = vmatprep.subr.bf16.mxu0 %v3579_v49  ;;  %v3637_v16 = vld [vmem:[#allocation7 + $0x2d8] sm:$0xff]  ;;  %v3572_v49 = vld [vmem:[#allocation7 + $0xd0] sm:$0xff] }
 0x74c   :  { %4066 = vmatprep.subr.bf16.mxu1 %v3643_v50  ;;  %v3636_v50 = vld [vmem:[#allocation7 + $0x2d0] sm:$0xff] }
 0x74e   :  { %4026 = vmatpush1.bf16.msra.mxu0 %v3578_v51  ;;  %v3577_v51 = vld [vmem:[#allocation7 + $0xf8] sm:$0xff] }
 0x74f   :  { %4067 = vmatpush1.bf16.msra.mxu1 %v3642_v27  ;;  %4027 = vmatprep.subr.bf16.mxu0 %v3583_v33  ;;  %v3641_v27 = vld [vmem:[#allocation7 + $0x2f8] sm:$0xff]  ;;  %v3576_v33 = vld [vmem:[#allocation7 + $0xf0] sm:$0xff] }
 0x750   :  { %4068 = vmatprep.subr.bf16.mxu1 %v3647_v57  ;;  %v3640_v57 = vld [vmem:[#allocation7 + $0x2f0] sm:$0xff] }
 0x752   :  { %4028 = vmatpush1.bf16.msra.mxu0 %v3582_v2  ;;  %v3581_v2 = vld [vmem:[#allocation7 + $0x118] sm:$0xff] }
 0x753   :  { %4069 = vmatpush1.bf16.msra.mxu1 %v3646_v5  ;;  %4029 = vmatprep.subr.bf16.mxu0 %v3587_v6  ;;  %v3645_v5 = vld [vmem:[#allocation7 + $0x318] sm:$0xff]  ;;  %v3580_v6 = vld [vmem:[#allocation7 + $0x110] sm:$0xff] }
 0x754   :  { %4070 = vmatprep.subr.bf16.mxu1 %v3651_v40  ;;  %v3644_v40 = vld [vmem:[#allocation7 + $0x310] sm:$0xff] }
 0x756   :  { %4030 = vmatpush1.bf16.msra.mxu0 %v3586_v46  ;;  %v3585_v46 = vld [vmem:[#allocation7 + $0x138] sm:$0xff] }
 0x757   :  { %4071 = vmatpush1.bf16.msra.mxu1 %v3650_v60  ;;  %4031 = vmatprep.subr.bf16.mxu0 %v3591_v7  ;;  %v3649_v60 = vld [vmem:[#allocation7 + $0x338] sm:$0xff]  ;;  %v3584_v7 = vld [vmem:[#allocation7 + $0x130] sm:$0xff] }
 0x758   :  { %4072 = vmatprep.subr.bf16.mxu1 %v3655_v9  ;;  %v3648_v9 = vld [vmem:[#allocation7 + $0x330] sm:$0xff] }
 0x75a   :  { %4032 = vmatpush1.bf16.msra.mxu0 %v3590_v12  ;;  %v3589_v12 = vld [vmem:[#allocation7 + $0x158] sm:$0xff] }
 0x75b   :  { %4073 = vmatpush1.bf16.msra.mxu1 %v3654_v52  ;;  %4033 = vmatprep.subr.bf16.mxu0 %v3595_v35  ;;  %v3653_v52 = vld [vmem:[#allocation7 + $0x358] sm:$0xff]  ;;  %v3588_v35 = vld [vmem:[#allocation7 + $0x150] sm:$0xff] }
 0x75c   :  { %4074 = vmatprep.subr.bf16.mxu1 %v3659_v54  ;;  %v3652_v54 = vld [vmem:[#allocation7 + $0x350] sm:$0xff] }
 0x75e   :  { %4034 = vmatpush1.bf16.msra.mxu0 %v3594_v38  ;;  %v3593_v38 = vld [vmem:[#allocation7 + $0x178] sm:$0xff] }
 0x75f   :  { %4075 = vmatpush1.bf16.msra.mxu1 %v3658_v63  ;;  %4035 = vmatprep.subr.bf16.mxu0 %v3599_v14  ;;  %v3657_v63 = vld [vmem:[#allocation7 + $0x378] sm:$0xff]  ;;  %v3592_v14 = vld [vmem:[#allocation7 + $0x170] sm:$0xff] }
 0x760   :  { %4076 = vmatprep.subr.bf16.mxu1 %v3663_v17  ;;  %v3656_v17 = vld [vmem:[#allocation7 + $0x370] sm:$0xff] }
 0x762   :  { %4036 = vmatpush1.bf16.msra.mxu0 %v3598_v18  ;;  %v3597_v18 = vld [vmem:[#allocation7 + $0x198] sm:$0xff] }
 0x763   :  { %4077 = vmatpush1.bf16.msra.mxu1 %v3662_v3  ;;  %4037 = vmatprep.subr.bf16.mxu0 %v3603_v1  ;;  %v3661_v3 = vld [vmem:[#allocation7 + $0x398] sm:$0xff]  ;;  %v3596_v1 = vld [vmem:[#allocation7 + $0x190] sm:$0xff] }
 0x764   :  { %4078 = vmatprep.subr.bf16.mxu1 %v3667_v39  ;;  %v3660_v39 = vld [vmem:[#allocation7 + $0x390] sm:$0xff] }
 0x766   :  { %4038 = vmatpush1.bf16.msra.mxu0 %v3602_v19  ;;  %v3601_v19 = vld [vmem:[#allocation7 + $0x1b8] sm:$0xff] }
 0x767   :  { %4079 = vmatpush1.bf16.msra.mxu1 %v3666_v20  ;;  %4039 = vmatprep.subr.bf16.mxu0 %v3607_v11  ;;  %v3665_v20 = vld [vmem:[#allocation7 + $0x3b8] sm:$0xff]  ;;  %v3600_v11 = vld [vmem:[#allocation7 + $0x1b0] sm:$0xff] }
 0x768   :  { %4080 = vmatprep.subr.bf16.mxu1 %v3671_v24  ;;  %v3664_v24 = vld [vmem:[#allocation7 + $0x3b0] sm:$0xff] }
 0x76a   :  { %4040 = vmatpush1.bf16.msra.mxu0 %v3606_v28  ;;  %v3605_v28 = vld [vmem:[#allocation7 + $0x1d8] sm:$0xff] }
 0x76b   :  { %4081 = vmatpush1.bf16.msra.mxu1 %v3670_v29  ;;  %4091 = vmatprep.subr.bf16.mxu0 %v3549_v0  ;;  %v3669_v29 = vld [vmem:[#allocation7 + $0x3d8] sm:$0xff]  ;;  %v3604_v0 = vld [vmem:[#allocation7 + $0x1d0] sm:$0xff] }
 0x76c   :  { %4132 = vmatprep.subr.bf16.mxu1 %v3613_v30  ;;  %v3668_v30 = vld [vmem:[#allocation7 + $0x3d0] sm:$0xff] }
 0x76d   :  { %4042 = vmatmul.mubr.bf16.vlgmr.msra.gmra.mrb[44].mxu0 %v6104_v25 }
 0x76e   :  { %4083 = vmatmul.mubr.bf16.vlgmr.msra.gmra.mrb[44].mxu1 %v6108_v13  ;;  %4092 = vmatpush1.bf16.msra.mxu0 %v3548_v10  ;;  %v3609_v10 = vld [vmem:[#allocation7 + $0x1f8] sm:$0xff] }
 0x76f   :  { %4133 = vmatpush1.bf16.msra.mxu1 %v3612_v62  ;;  %4093 = vmatprep.subr.bf16.mxu0 %v3553_v31  ;;  %v3673_v62 = vld [vmem:[#allocation7 + $0x3f8] sm:$0xff]  ;;  %v6114_v31 = vld [vmem:[#allocation4] sm:$0x66] }
 0x770   :  { %4134 = vmatprep.subr.bf16.mxu1 %v3617_v32  ;;  %4123 = vmatprep.mubr.bf16.mxu0 %v6090_v26  ;;  %v3564_v26 = vld [vmem:[#allocation7 + $0x90] sm:$0xff]  ;;  %v6116_v32 = vld [vmem:[#allocation4 + $0x8] sm:$0x66] }
 0x771   :  { %4164 = vmatprep.mubr.bf16.mxu1 %v6094_v21  ;;  %v3628_v21 = vld [vmem:[#allocation7 + $0x290] sm:$0xff] }
 0x772   :  { %4094 = vmatpush1.bf16.msra.mxu0 %v3552_v45  ;;  %v3608_v45 = vld [vmem:[#allocation7 + $0x1f0] sm:$0xff] }
 0x773   :  { %4135 = vmatpush1.bf16.msra.mxu1 %v3616_v34  ;;  %4095 = vmatprep.subr.bf16.mxu0 %v3557_v4  ;;  %v3672_v34 = vld [vmem:[#allocation7 + $0x3f0] sm:$0xff]  ;;  %v4177_v4 = vld [vmem:[#allocation7 + $0x808] sm:$0xff] }
 0x774   :  { %4136 = vmatprep.subr.bf16.mxu1 %v3621_v36  ;;  %v4241_v36 = vld [vmem:[#allocation7 + $0xa08] sm:$0xff] }
 0x776   :  { %4096 = vmatpush1.bf16.msra.mxu0 %v3556_v37  ;;  %v4993_v37 = vcombine.high %v6114_v31, %v6114_v31 }
 0x777   :  { %4137 = vmatpush1.bf16.msra.mxu1 %v3620_v41  ;;  %4097 = vmatprep.subr.bf16.mxu0 %v3561_v42  ;;  %v4995_v41 = vcombine.high %v6116_v32, %v6116_v32  ;;  %v4176_v42 = vld [vmem:[#allocation7 + $0x800] sm:$0xff] }
 0x778   :  { %4138 = vmatprep.subr.bf16.mxu1 %v3625_v43  ;;  %v4240_v43 = vld [vmem:[#allocation7 + $0xa00] sm:$0xff] }
 0x77a   :  { %4098 = vmatpush1.bf16.msra.mxu0 %v3560_v44  ;;  %v4181_v44 = vld [vmem:[#allocation7 + $0x828] sm:$0xff] }
 0x77b   :  { %4139 = vmatpush1.bf16.msra.mxu1 %v3624_v8  ;;  %4099 = vmatprep.subr.bf16.mxu0 %v3565_v22  ;;  %v4245_v8 = vld [vmem:[#allocation7 + $0xa28] sm:$0xff]  ;;  %v6122_v22 = vrot.slane %v4993_v37, 1  ;;  %v4220_v37 = vld [vmem:[#allocation7 + $0x960] sm:$0xff] }
 0x77c   :  { %4140 = vmatprep.subr.bf16.mxu1 %v3629_v23  ;;  %v6124_v23 = vrot.slane %v4995_v41, 1  ;;  %v4284_v41 = vld [vmem:[#allocation7 + $0xb60] sm:$0xff] }
 0x77e   :  { %4100 = vmatpush1.bf16.msra.mxu0 %v3564_v26  ;;  %v4180_v26 = vld [vmem:[#allocation7 + $0x820] sm:$0xff] }
 0x77f   :  { %4141 = vmatpush1.bf16.msra.mxu1 %v3628_v21  ;;  %4101 = vmatprep.subr.bf16.mxu0 %v3569_v47  ;;  %v4244_v21 = vld [vmem:[#allocation7 + $0xa20] sm:$0xff]  ;;  %v4185_v47 = vld [vmem:[#allocation7 + $0x848] sm:$0xff] }
 0x780   :  { %4142 = vmatprep.subr.bf16.mxu1 %v3633_v48  ;;  %v4249_v48 = vld [vmem:[#allocation7 + $0xa48] sm:$0xff] }
 0x782   :  { %4102 = vmatpush1.bf16.msra.mxu0 %v3568_v53  ;;  %v4184_v53 = vld [vmem:[#allocation7 + $0x840] sm:$0xff] }
 0x783   :  { %4143 = vmatpush1.bf16.msra.mxu1 %v3632_v61  ;;  %4103 = vmatprep.subr.bf16.mxu0 %v3573_v15  ;;  %v4189_v61 = vld [vmem:[#allocation7 + $0x868] sm:$0xff]  ;;  %v4188_v15 = vld [vmem:[#allocation7 + $0x860] sm:$0xff] }
 0x784   :  { %4144 = vmatprep.subr.bf16.mxu1 %v3637_v16  ;;  %v4252_v16 = vld [vmem:[#allocation7 + $0xa60] sm:$0xff] }
 0x786   :  { %4104 = vmatpush1.bf16.msra.mxu0 %v3572_v49  ;;  %v4193_v49 = vld [vmem:[#allocation7 + $0x888] sm:$0xff] }
 0x787   :  { %4145 = vmatpush1.bf16.msra.mxu1 %v3636_v50  ;;  %4105 = vmatprep.subr.bf16.mxu0 %v3577_v51  ;;  %v4257_v50 = vld [vmem:[#allocation7 + $0xa88] sm:$0xff]  ;;  %v4192_v51 = vld [vmem:[#allocation7 + $0x880] sm:$0xff] }
 0x788   :  { %4146 = vmatprep.subr.bf16.mxu1 %v3641_v27  ;;  %v4256_v27 = vld [vmem:[#allocation7 + $0xa80] sm:$0xff] }
 0x78a   :  { %4106 = vmatpush1.bf16.msra.mxu0 %v3576_v33  ;;  %v4197_v33 = vld [vmem:[#allocation7 + $0x8a8] sm:$0xff] }
 0x78b   :  { %4147 = vmatpush1.bf16.msra.mxu1 %v3640_v57  ;;  %4107 = vmatprep.subr.bf16.mxu0 %v3581_v2  ;;  %v4261_v57 = vld [vmem:[#allocation7 + $0xaa8] sm:$0xff]  ;;  %v4196_v2 = vld [vmem:[#allocation7 + $0x8a0] sm:$0xff] }
 0x78c   :  { %4148 = vmatprep.subr.bf16.mxu1 %v3645_v5  ;;  %v4260_v5 = vld [vmem:[#allocation7 + $0xaa0] sm:$0xff] }
 0x78e   :  { %4108 = vmatpush1.bf16.msra.mxu0 %v3580_v6 }
 0x78f   :  { %4149 = vmatpush1.bf16.msra.mxu1 %v3644_v40  ;;  %4109 = vmatprep.subr.bf16.mxu0 %v3585_v46  ;;  %v4201_v46 = vld [vmem:[#allocation7 + $0x8c8] sm:$0xff] }
 0x790   :  { %4150 = vmatprep.subr.bf16.mxu1 %v3649_v60  ;;  %v4265_v60 = vld [vmem:[#allocation7 + $0xac8] sm:$0xff] }
 0x792   :  { %4110 = vmatpush1.bf16.msra.mxu0 %v3584_v7 }
 0x793   :  { %4151 = vmatpush1.bf16.msra.mxu1 %v3648_v9  ;;  %4111 = vmatprep.subr.bf16.mxu0 %v3589_v12 }
 0x794   :  { %4152 = vmatprep.subr.bf16.mxu1 %v3653_v52 }
 0x796   :  { %4112 = vmatpush1.bf16.msra.mxu0 %v3588_v35 }
 0x797   :  { %4153 = vmatpush1.bf16.msra.mxu1 %v3652_v54  ;;  %4113 = vmatprep.subr.bf16.mxu0 %v3593_v38 }
 0x798   :  { %4154 = vmatprep.subr.bf16.mxu1 %v3657_v63 }
 0x79a   :  { %4114 = vmatpush1.bf16.msra.mxu0 %v3592_v14  ;;  %v4200_v14 = vld [vmem:[#allocation7 + $0x8c0] sm:$0xff] }
 0x79b   :  { %4155 = vmatpush1.bf16.msra.mxu1 %v3656_v17  ;;  %4115 = vmatprep.subr.bf16.mxu0 %v3597_v18  ;;  %v4264_v17 = vld [vmem:[#allocation7 + $0xac0] sm:$0xff]  ;;  %v4205_v18 = vld [vmem:[#allocation7 + $0x8e8] sm:$0xff] }
 0x79c   :  { %4156 = vmatprep.subr.bf16.mxu1 %v3661_v3  ;;  %v4269_v3 = vld [vmem:[#allocation7 + $0xae8] sm:$0xff] }
 0x79e   :  { %4116 = vmatpush1.bf16.msra.mxu0 %v3596_v1  ;;  %v4204_v1 = vld [vmem:[#allocation7 + $0x8e0] sm:$0xff] }
 0x79f   :  { %4157 = vmatpush1.bf16.msra.mxu1 %v3660_v39  ;;  %4117 = vmatprep.subr.bf16.mxu0 %v3601_v19  ;;  %v4268_v39 = vld [vmem:[#allocation7 + $0xae0] sm:$0xff]  ;;  %v4209_v19 = vld [vmem:[#allocation7 + $0x908] sm:$0xff] }
 0x7a0   :  { %4158 = vmatprep.subr.bf16.mxu1 %v3665_v20  ;;  %v4273_v20 = vld [vmem:[#allocation7 + $0xb08] sm:$0xff] }
 0x7a2   :  { %4118 = vmatpush1.bf16.msra.mxu0 %v3600_v11  ;;  %v4208_v11 = vld [vmem:[#allocation7 + $0x900] sm:$0xff] }
 0x7a3   :  { %4159 = vmatpush1.bf16.msra.mxu1 %v3664_v24  ;;  %4119 = vmatprep.subr.bf16.mxu0 %v3605_v28  ;;  %v4272_v24 = vld [vmem:[#allocation7 + $0xb00] sm:$0xff]  ;;  %v4213_v28 = vld [vmem:[#allocation7 + $0x928] sm:$0xff] }
 0x7a4   :  { %4160 = vmatprep.subr.bf16.mxu1 %v3669_v29  ;;  %v4277_v29 = vld [vmem:[#allocation7 + $0xb28] sm:$0xff] }
 0x7a6   :  { %4120 = vmatpush1.bf16.msra.mxu0 %v3604_v0  ;;  %v4212_v0 = vld [vmem:[#allocation7 + $0x920] sm:$0xff] }
 0x7a7   :  { %4161 = vmatpush1.bf16.msra.mxu1 %v3668_v30  ;;  %4121 = vmatprep.subr.bf16.mxu0 %v3609_v10  ;;  %v4276_v30 = vld [vmem:[#allocation7 + $0xb20] sm:$0xff]  ;;  %v4217_v10 = vld [vmem:[#allocation7 + $0x948] sm:$0xff] }
 0x7a8   :  { %4162 = vmatprep.subr.bf16.mxu1 %v3673_v62  ;;  %v4281_v62 = vld [vmem:[#allocation7 + $0xb48] sm:$0xff] }
 0x7aa   :  { %4122 = vmatpush1.bf16.msra.mxu0 %v3608_v45  ;;  %v4216_v45 = vld [vmem:[#allocation7 + $0x940] sm:$0xff] }
 0x7ab   :  { %4163 = vmatpush1.bf16.msra.mxu1 %v3672_v34  ;;  %4322 = vmatprep.subr.bf16.mxu0 %v4177_v4  ;;  %v4280_v34 = vld [vmem:[#allocation7 + $0xb40] sm:$0xff]  ;;  %v4221_v4 = vld [vmem:[#allocation7 + $0x968] sm:$0xff] }
 0x7ac   :  { %4363 = vmatprep.subr.bf16.mxu1 %v4241_v36  ;;  %v4285_v36 = vld [vmem:[#allocation7 + $0xb68] sm:$0xff] }
 0x7ad   :  { %4124 = vmatmul.mubr.bf16.vlgmr.msra.gmra.mrb[48].mxu0 %v6104_v25  ;;  %v4248_v25 = vld [vmem:[#allocation7 + $0xa40] sm:$0xff] }
 0x7ae   :  { %4165 = vmatmul.mubr.bf16.vlgmr.msra.gmra.mrb[48].mxu1 %v6108_v13  ;;  %4323 = vmatpush1.bf16.msra.mxu0 %v4176_v42  ;;  %v4253_v13 = vld [vmem:[#allocation7 + $0xa68] sm:$0xff] }
 0x7af   :  { %4364 = vmatpush1.bf16.msra.mxu1 %v4240_v43  ;;  %4324 = vmatprep.subr.bf16.mxu0 %v4181_v44  ;;  %v4225_v42 = vld [vmem:[#allocation7 + $0x988] sm:$0xff]  ;;  %v4224_v44 = vld [vmem:[#allocation7 + $0x980] sm:$0xff] }
 0x7b0   :  { %4365 = vmatprep.subr.bf16.mxu1 %v4245_v8  ;;  %4354 = vmatprep.mubr.bf16.mxu0 %v6122_v22  ;;  %v4289_v43 = vld [vmem:[#allocation7 + $0xb88] sm:$0xff]  ;;  %v4288_v8 = vld [vmem:[#allocation7 + $0xb80] sm:$0xff] }
 0x7b1   :  { %4395 = vmatprep.mubr.bf16.mxu1 %v6124_v23 }
 0x7b2   :  { %4325 = vmatpush1.bf16.msra.mxu0 %v4180_v26  ;;  %v4229_v26 = vld [vmem:[#allocation7 + $0x9a8] sm:$0xff] }
 0x7b3   :  { %4366 = vmatpush1.bf16.msra.mxu1 %v4244_v21  ;;  %4326 = vmatprep.subr.bf16.mxu0 %v4185_v47  ;;  %v4293_v21 = vld [vmem:[#allocation7 + $0xba8] sm:$0xff]  ;;  %v4228_v47 = vld [vmem:[#allocation7 + $0x9a0] sm:$0xff] }
 0x7b4   :  { %4367 = vmatprep.subr.bf16.mxu1 %v4249_v48  ;;  %v4292_v48 = vld [vmem:[#allocation7 + $0xba0] sm:$0xff] }
 0x7b6   :  { %4327 = vmatpush1.bf16.msra.mxu0 %v4184_v53  ;;  %v4233_v53 = vld [vmem:[#allocation7 + $0x9c8] sm:$0xff] }
 0x7b7   :  { %4368 = vmatpush1.bf16.msra.mxu1 %v4248_v25  ;;  %4328 = vmatprep.subr.bf16.mxu0 %v4189_v61  ;;  %v4297_v25 = vld [vmem:[#allocation7 + $0xbc8] sm:$0xff]  ;;  %v4232_v61 = vld [vmem:[#allocation7 + $0x9c0] sm:$0xff] }
 0x7b8   :  { %4369 = vmatprep.subr.bf16.mxu1 %v4253_v13  ;;  %v4296_v13 = vld [vmem:[#allocation7 + $0xbc0] sm:$0xff] }
 0x7ba   :  { %4329 = vmatpush1.bf16.msra.mxu0 %v4188_v15  ;;  %v4237_v15 = vld [vmem:[#allocation7 + $0x9e8] sm:$0xff] }
 0x7bb   :  { %4370 = vmatpush1.bf16.msra.mxu1 %v4252_v16  ;;  %4330 = vmatprep.subr.bf16.mxu0 %v4193_v49  ;;  %v4301_v16 = vld [vmem:[#allocation7 + $0xbe8] sm:$0xff]  ;;  %v4992_v49 = vcombine.low %v6114_v31, %v6114_v31  ;;  %v4178_v31 = vld [vmem:[#allocation7 + $0x810] sm:$0xff] }
 0x7bc   :  { %4371 = vmatprep.subr.bf16.mxu1 %v4257_v50  ;;  %v4994_v50 = vcombine.low %v6116_v32, %v6116_v32  ;;  %v4247_v32 = vld [vmem:[#allocation7 + $0xa38] sm:$0xff] }
 0x7be   :  { %4331 = vmatpush1.bf16.msra.mxu0 %v4192_v51  ;;  %v4236_v51 = vld [vmem:[#allocation7 + $0x9e0] sm:$0xff] }
 0x7bf   :  { %4372 = vmatpush1.bf16.msra.mxu1 %v4256_v27  ;;  %4332 = vmatprep.subr.bf16.mxu0 %v4197_v33  ;;  %v4300_v27 = vld [vmem:[#allocation7 + $0xbe0] sm:$0xff]  ;;  %v4179_v33 = vld [vmem:[#allocation7 + $0x818] sm:$0xff] }
 0x7c0   :  { %4373 = vmatprep.subr.bf16.mxu1 %v4261_v57  ;;  %v3865_v6 = vpop.f32.mrb[36].mxu0  ;;  %v4243_v57 = vld [vmem:[#allocation7 + $0xa18] sm:$0xff] }
 0x7c1   :  { %v3906_v40 = vpop.f32.mrb[36].mxu1  ;;  %v3867_v9 = vpop.f32.mrb[37].mxu0 }
 0x7c2   :  { %v6130_v7 = vadd.f32 %v3906_v40, %v3865_v6  ;;  %v3908_v12 = vpop.f32.mrb[37].mxu1  ;;  %v3869_v35 = vpop.f32.mrb[38].mxu0  ;;  %4333 = vmatpush1.bf16.msra.mxu0 %v4196_v2  ;;  %v6138_v2 = vrot.slane %v4992_v49, 1  ;;  %v4242_v6 = vld [vmem:[#allocation7 + $0xa10] sm:$0xff]  ;;  %v4183_v40 = vld [vmem:[#allocation7 + $0x838] sm:$0xff] }
 0x7c3   :  { %v6132_v52 = vadd.f32 %v3908_v12, %v3867_v9  ;;  %v3910_v54 = vpop.f32.mrb[38].mxu1  ;;  %4374 = vmatpush1.bf16.msra.mxu1 %v4260_v5  ;;  %v3870_v38 = vpop.f32.mrb[39].mxu0  ;;  %4334 = vmatprep.subr.bf16.mxu0 %v4201_v46  ;;  %v6140_v5 = vrot.slane %v4994_v50, 1  ;;  %v4182_v46 = vld [vmem:[#allocation7 + $0x830] sm:$0xff]  ;;  %v4187_v9 = vld [vmem:[#allocation7 + $0x858] sm:$0xff] }
 0x7c4   :  { %v3911_v63 = vpop.f32.mrb[39].mxu1  ;;  %4375 = vmatprep.subr.bf16.mxu1 %v4265_v60  ;;  %v4246_v60 = vld [vmem:[#allocation7 + $0xa30] sm:$0xff]  ;;  %v4251_v12 = vld [vmem:[#allocation7 + $0xa58] sm:$0xff] }
 0x7c5   :  { %v4186_v35 = vld [vmem:[#allocation7 + $0x850] sm:$0xff]  ;;  %v4191_v38 = vld [vmem:[#allocation7 + $0x878] sm:$0xff] }
 0x7c6   :  { %4335 = vmatpush1.bf16.msra.mxu0 %v4200_v14  ;;  %v4250_v54 = vld [vmem:[#allocation7 + $0xa50] sm:$0xff]  ;;  %v4255_v63 = vld [vmem:[#allocation7 + $0xa78] sm:$0xff] }
 0x7c7   :  { %4376 = vmatpush1.bf16.msra.mxu1 %v4264_v17  ;;  %4336 = vmatprep.subr.bf16.mxu0 %v4205_v18  ;;  %v4190_v14 = vld [vmem:[#allocation7 + $0x870] sm:$0xff]  ;;  %v4195_v18 = vld [vmem:[#allocation7 + $0x898] sm:$0xff] }
 0x7c8   :  { %4377 = vmatprep.subr.bf16.mxu1 %v4269_v3  ;;  %v4254_v17 = vld [vmem:[#allocation7 + $0xa70] sm:$0xff]  ;;  %v4259_v3 = vld [vmem:[#allocation7 + $0xa98] sm:$0xff] }
 0x7c9   :  { %v4218_v49 = vld [vmem:[#allocation7 + $0x950] sm:$0xff] }
 0x7ca   :  { %4337 = vmatpush1.bf16.msra.mxu0 %v4204_v1  ;;  %v4199_v1 = vld [vmem:[#allocation7 + $0x8b8] sm:$0xff]  ;;  %v4282_v50 = vld [vmem:[#allocation7 + $0xb50] sm:$0xff] }
 0x7cb   :  { %4378 = vmatpush1.bf16.msra.mxu1 %v4268_v39  ;;  %4338 = vmatprep.subr.bf16.mxu0 %v4209_v19  ;;  %v4263_v39 = vld [vmem:[#allocation7 + $0xab8] sm:$0xff]  ;;  %v4198_v19 = vld [vmem:[#allocation7 + $0x8b0] sm:$0xff] }
 0x7cc   :  { %4379 = vmatprep.subr.bf16.mxu1 %v4273_v20  ;;  %v4262_v20 = vld [vmem:[#allocation7 + $0xab0] sm:$0xff] }
 0x7ce   :  { %4339 = vmatpush1.bf16.msra.mxu0 %v4208_v11 }
 0x7cf   :  { %4380 = vmatpush1.bf16.msra.mxu1 %v4272_v24  ;;  %4340 = vmatprep.subr.bf16.mxu0 %v4213_v28  ;;  %v4203_v28 = vld [vmem:[#allocation7 + $0x8d8] sm:$0xff] }
 0x7d0   :  { %4381 = vmatprep.subr.bf16.mxu1 %v4277_v29  ;;  %v4267_v29 = vld [vmem:[#allocation7 + $0xad8] sm:$0xff] }
 0x7d2   :  { %4341 = vmatpush1.bf16.msra.mxu0 %v4212_v0 }
 0x7d3   :  { %4382 = vmatpush1.bf16.msra.mxu1 %v4276_v30  ;;  %4342 = vmatprep.subr.bf16.mxu0 %v4217_v10 }
 0x7d4   :  { %4383 = vmatprep.subr.bf16.mxu1 %v4281_v62 }
 0x7d6   :  { %4343 = vmatpush1.bf16.msra.mxu0 %v4216_v45 }
 0x7d7   :  { %4384 = vmatpush1.bf16.msra.mxu1 %v4280_v34  ;;  %4344 = vmatprep.subr.bf16.mxu0 %v4221_v4 }
 0x7d8   :  { %4385 = vmatprep.subr.bf16.mxu1 %v4285_v36 }
 0x7da   :  { %4345 = vmatpush1.bf16.msra.mxu0 %v4220_v37  ;;  %v4202_v37 = vld [vmem:[#allocation7 + $0x8d0] sm:$0xff] }
 0x7db   :  { %4386 = vmatpush1.bf16.msra.mxu1 %v4284_v41  ;;  %4346 = vmatprep.subr.bf16.mxu0 %v4225_v42  ;;  %v4266_v41 = vld [vmem:[#allocation7 + $0xad0] sm:$0xff]  ;;  %v4207_v42 = vld [vmem:[#allocation7 + $0x8f8] sm:$0xff] }
 0x7dc   :  { %4387 = vmatprep.subr.bf16.mxu1 %v4289_v43  ;;  %v4271_v43 = vld [vmem:[#allocation7 + $0xaf8] sm:$0xff] }
 0x7de   :  { %4347 = vmatpush1.bf16.msra.mxu0 %v4224_v44  ;;  %v4206_v44 = vld [vmem:[#allocation7 + $0x8f0] sm:$0xff] }
 0x7df   :  { %4388 = vmatpush1.bf16.msra.mxu1 %v4288_v8  ;;  %4348 = vmatprep.subr.bf16.mxu0 %v4229_v26  ;;  %v4270_v8 = vld [vmem:[#allocation7 + $0xaf0] sm:$0xff]  ;;  %v4211_v26 = vld [vmem:[#allocation7 + $0x918] sm:$0xff] }
 0x7e0   :  { %4389 = vmatprep.subr.bf16.mxu1 %v4293_v21  ;;  %v4275_v21 = vld [vmem:[#allocation7 + $0xb18] sm:$0xff] }
 0x7e2   :  { %4349 = vmatpush1.bf16.msra.mxu0 %v4228_v47  ;;  %v4210_v47 = vld [vmem:[#allocation7 + $0x910] sm:$0xff] }
 0x7e3   :  { %4390 = vmatpush1.bf16.msra.mxu1 %v4292_v48  ;;  %4350 = vmatprep.subr.bf16.mxu0 %v4233_v53  ;;  %v4274_v48 = vld [vmem:[#allocation7 + $0xb10] sm:$0xff]  ;;  %v4215_v53 = vld [vmem:[#allocation7 + $0x938] sm:$0xff] }
 0x7e4   :  { %4391 = vmatprep.subr.bf16.mxu1 %v4297_v25  ;;  %v4279_v25 = vld [vmem:[#allocation7 + $0xb38] sm:$0xff] }
 0x7e6   :  { %4351 = vmatpush1.bf16.msra.mxu0 %v4232_v61  ;;  %v4214_v61 = vld [vmem:[#allocation7 + $0x930] sm:$0xff] }
 0x7e7   :  { %4392 = vmatpush1.bf16.msra.mxu1 %v4296_v13  ;;  %4352 = vmatprep.subr.bf16.mxu0 %v4237_v15  ;;  %v4278_v13 = vld [vmem:[#allocation7 + $0xb30] sm:$0xff]  ;;  %v4219_v15 = vld [vmem:[#allocation7 + $0x958] sm:$0xff] }
 0x7e8   :  { %4393 = vmatprep.subr.bf16.mxu1 %v4301_v16  ;;  %v4283_v16 = vld [vmem:[#allocation7 + $0xb58] sm:$0xff] }
 0x7ea   :  { %4353 = vmatpush1.bf16.msra.mxu0 %v4236_v51  ;;  %v4223_v51 = vld [vmem:[#allocation7 + $0x978] sm:$0xff] }
 0x7eb   :  { %4394 = vmatpush1.bf16.msra.mxu1 %v4300_v27  ;;  %4404 = vmatprep.subr.bf16.mxu0 %v4179_v33  ;;  %v4287_v27 = vld [vmem:[#allocation7 + $0xb78] sm:$0xff]  ;;  %v4222_v33 = vld [vmem:[#allocation7 + $0x970] sm:$0xff] }
 0x7ec   :  { %4445 = vmatprep.subr.bf16.mxu1 %v4243_v57  ;;  %v4286_v57 = vld [vmem:[#allocation7 + $0xb70] sm:$0xff] }
 0x7ed   :  { %4355 = vmatmul.mubr.bf16.vlgmr.msra.gmra.mrb[52].mxu0 %v6138_v2 }
 0x7ee   :  { %4396 = vmatmul.mubr.bf16.vlgmr.msra.gmra.mrb[52].mxu1 %v6140_v5  ;;  %4405 = vmatpush1.bf16.msra.mxu0 %v4178_v31  ;;  %v4227_v31 = vld [vmem:[#allocation7 + $0x998] sm:$0xff] }
 0x7ef   :  { %4446 = vmatpush1.bf16.msra.mxu1 %v4242_v6  ;;  %4406 = vmatprep.subr.bf16.mxu0 %v4183_v40  ;;  %v4291_v6 = vld [vmem:[#allocation7 + $0xb98] sm:$0xff]  ;;  %v4226_v40 = vld [vmem:[#allocation7 + $0x990] sm:$0xff] }
 0x7f0   :  { %4447 = vmatprep.subr.bf16.mxu1 %v4247_v32  ;;  %4436 = vmatprep.mubr.bf16.mxu0 %v6122_v22  ;;  %v4194_v22 = vld [vmem:[#allocation7 + $0x890] sm:$0xff] }
 0x7f1   :  { %4477 = vmatprep.mubr.bf16.mxu1 %v6124_v23  ;;  %v4258_v23 = vld [vmem:[#allocation7 + $0xa90] sm:$0xff] }
 0x7f2   :  { %4407 = vmatpush1.bf16.msra.mxu0 %v4182_v46  ;;  %v4290_v32 = vld [vmem:[#allocation7 + $0xb90] sm:$0xff]  ;;  %v4231_v46 = vld [vmem:[#allocation7 + $0x9b8] sm:$0xff] }
 0x7f3   :  { %4448 = vmatpush1.bf16.msra.mxu1 %v4246_v60  ;;  %4408 = vmatprep.subr.bf16.mxu0 %v4187_v9  ;;  %v4295_v60 = vld [vmem:[#allocation7 + $0xbb8] sm:$0xff]  ;;  %v4230_v9 = vld [vmem:[#allocation7 + $0x9b0] sm:$0xff] }
 0x7f4   :  { %4449 = vmatprep.subr.bf16.mxu1 %v4251_v12  ;;  %v4294_v12 = vld [vmem:[#allocation7 + $0xbb0] sm:$0xff] }
 0x7f6   :  { %4409 = vmatpush1.bf16.msra.mxu0 %v4186_v35  ;;  %v4235_v35 = vld [vmem:[#allocation7 + $0x9d8] sm:$0xff] }
 0x7f7   :  { %4450 = vmatpush1.bf16.msra.mxu1 %v4250_v54  ;;  %4410 = vmatprep.subr.bf16.mxu0 %v4191_v38  ;;  %v4299_v54 = vld [vmem:[#allocation7 + $0xbd8] sm:$0xff]  ;;  %v4234_v38 = vld [vmem:[#allocation7 + $0x9d0] sm:$0xff] }
 0x7f8   :  { %4451 = vmatprep.subr.bf16.mxu1 %v4255_v63  ;;  %v4298_v63 = vld [vmem:[#allocation7 + $0xbd0] sm:$0xff] }
 0x7fa   :  { %4411 = vmatpush1.bf16.msra.mxu0 %v4190_v14  ;;  %v4239_v14 = vld [vmem:[#allocation7 + $0x9f8] sm:$0xff] }
 0x7fb   :  { %4452 = vmatpush1.bf16.msra.mxu1 %v4254_v17  ;;  %4412 = vmatprep.subr.bf16.mxu0 %v4195_v18  ;;  %v4303_v17 = vld [vmem:[#allocation7 + $0xbf8] sm:$0xff]  ;;  %v4238_v18 = vld [vmem:[#allocation7 + $0x9f0] sm:$0xff] }
 0x7fc   :  { %4453 = vmatprep.subr.bf16.mxu1 %v4259_v3  ;;  %v4302_v3 = vld [vmem:[#allocation7 + $0xbf0] sm:$0xff] }
 0x7fe   :  { %4413 = vmatpush1.bf16.msra.mxu0 %v4194_v22 }
 0x7ff   :  { %4454 = vmatpush1.bf16.msra.mxu1 %v4258_v23  ;;  %4414 = vmatprep.subr.bf16.mxu0 %v4199_v1 }
 0x800   :  { %4455 = vmatprep.subr.bf16.mxu1 %v4263_v39  ;;  %v3947_v11 = vpop.f32.mrb[40].mxu0 }
 0x801   :  { %v3988_v24 = vpop.f32.mrb[40].mxu1  ;;  %v3949_v30 = vpop.f32.mrb[41].mxu0 }
 0x802   :  { %v6146_v0 = vadd.f32 %v3988_v24, %v3947_v11  ;;  %v3990_v10 = vpop.f32.mrb[41].mxu1  ;;  %v3951_v45 = vpop.f32.mrb[42].mxu0  ;;  %4415 = vmatpush1.bf16.msra.mxu0 %v4198_v19 }
 0x803   :  { %v6148_v62 = vadd.f32 %v3990_v10, %v3949_v30  ;;  %v3992_v34 = vpop.f32.mrb[42].mxu1  ;;  %4456 = vmatpush1.bf16.msra.mxu1 %v4262_v20  ;;  %v3952_v4 = vpop.f32.mrb[43].mxu0  ;;  %4416 = vmatprep.subr.bf16.mxu0 %v4203_v28 }
 0x804   :  { %v3993_v36 = vpop.f32.mrb[43].mxu1  ;;  %4457 = vmatprep.subr.bf16.mxu1 %v4267_v29 }
 0x806   :  { %4417 = vmatpush1.bf16.msra.mxu0 %v4202_v37 }
 0x807   :  { %4458 = vmatpush1.bf16.msra.mxu1 %v4266_v41  ;;  %4418 = vmatprep.subr.bf16.mxu0 %v4207_v42 }
 0x808   :  { %4459 = vmatprep.subr.bf16.mxu1 %v4271_v43 }
 0x80a   :  { %4419 = vmatpush1.bf16.msra.mxu0 %v4206_v44  ;;  %v4490_v44 = vld [vmem:[#allocation18] sm:$0xf] }
 0x80b   :  { %4460 = vmatpush1.bf16.msra.mxu1 %v4270_v8  ;;  %4420 = vmatprep.subr.bf16.mxu0 %v4211_v26 }
 0x80c   :  { %4461 = vmatprep.subr.bf16.mxu1 %v4275_v21 }
 0x80e   :  { %4421 = vmatpush1.bf16.msra.mxu0 %v4210_v47  ;;  %v4495_v47 = vrot.slane %v4490_v44, %v5860_v55 }
 0x80f   :  { %4462 = vmatpush1.bf16.msra.mxu1 %v4274_v48  ;;  %4422 = vmatprep.subr.bf16.mxu0 %v4215_v53 }
 0x810   :  { %4463 = vmatprep.subr.bf16.mxu1 %v4279_v25 }
 0x812   :  { %4423 = vmatpush1.bf16.msra.mxu0 %v4214_v61 }
 0x813   :  { %4464 = vmatpush1.bf16.msra.mxu1 %v4278_v13  ;;  %4424 = vmatprep.subr.bf16.mxu0 %v4219_v15 }
 0x814   :  { %4465 = vmatprep.subr.bf16.mxu1 %v4283_v16 }
 0x816   :  { %4425 = vmatpush1.bf16.msra.mxu0 %v4218_v49 }
 0x817   :  { %4466 = vmatpush1.bf16.msra.mxu1 %v4282_v50  ;;  %4426 = vmatprep.subr.bf16.mxu0 %v4223_v51 }
 0x818   :  { %4467 = vmatprep.subr.bf16.mxu1 %v4287_v27 }
 0x81a   :  { %4427 = vmatpush1.bf16.msra.mxu0 %v4222_v33 }
 0x81b   :  { %4468 = vmatpush1.bf16.msra.mxu1 %v4286_v57  ;;  %4428 = vmatprep.subr.bf16.mxu0 %v4227_v31  ;;  %v4503_v31 = vrot.slane %v4490_v44, %v5862_v56 }
 0x81c   :  { %4469 = vmatprep.subr.bf16.mxu1 %v4291_v6 }
 0x81e   :  { %4429 = vmatpush1.bf16.msra.mxu0 %v4226_v40 }
 0x81f   :  { %4470 = vmatpush1.bf16.msra.mxu1 %v4290_v32  ;;  %4430 = vmatprep.subr.bf16.mxu0 %v4231_v46  ;;  %v4507_v32 = vrot.slane %v4490_v44, %v5866_v59 }
 0x820   :  { %4471 = vmatprep.subr.bf16.mxu1 %v4295_v60 }
 0x822   :  { %4431 = vmatpush1.bf16.msra.mxu0 %v4230_v9 }
 0x823   :  { %4472 = vmatpush1.bf16.msra.mxu1 %v4294_v12  ;;  %4432 = vmatprep.subr.bf16.mxu0 %v4235_v35 }
 0x824   :  { %4473 = vmatprep.subr.bf16.mxu1 %v4299_v54 }
 0x826   :  { %4433 = vmatpush1.bf16.msra.mxu0 %v4234_v38 }
 0x827   :  { %4474 = vmatpush1.bf16.msra.mxu1 %v4298_v63  ;;  %4434 = vmatprep.subr.bf16.mxu0 %v4239_v14 }
 0x828   :  { %4475 = vmatprep.subr.bf16.mxu1 %v4303_v17 }
 0x82a   :  { %4435 = vmatpush1.bf16.msra.mxu0 %v4238_v18 }
 0x82b   :  { %4476 = vmatpush1.bf16.msra.mxu1 %v4302_v3 }
 0x82d   :  { %4437 = vmatmul.mubr.bf16.vlgmr.msra.gmra.mrb[56].mxu0 %v6138_v2 }
 0x82e   :  { %4478 = vmatmul.mubr.bf16.vlgmr.msra.gmra.mrb[56].mxu1 %v6140_v5 }
 0x840   :  { %v4043_v22 = vpop.f32.mrb[44].mxu0 }
 0x841   :  { %v4084_v23 = vpop.f32.mrb[44].mxu1  ;;  %v4044_v1 = vadd.f32 %v4043_v22, %v6130_v7  ;;  %v4045_v39 = vpop.f32.mrb[45].mxu0 }
 0x842   :  { %v4086_v19 = vpop.f32.mrb[45].mxu1  ;;  %v4046_v20 = vadd.f32 %v4045_v39, %v6132_v52  ;;  %v4047_v11 = vpop.f32.mrb[46].mxu0 }
 0x843   :  { %v4088_v24 = vpop.f32.mrb[46].mxu1  ;;  %v4085_v28 = vadd.f32 %v4084_v23, %v4044_v1  ;;  %v4048_v29 = vpop.f32.mrb[47].mxu0 }
 0x844   :  { %v4089_v30 = vpop.f32.mrb[47].mxu1  ;;  %v4087_v10 = vadd.f32 %v4086_v19, %v4046_v20 }
 0x880   :  { %v4125_v45 = vpop.f32.mrb[48].mxu0 }
 0x881   :  { %v4166_v34 = vpop.f32.mrb[48].mxu1  ;;  %v4126_v2 = vadd.f32 %v4125_v45, %v6146_v0  ;;  %v4127_v4 = vpop.f32.mrb[49].mxu0  ;;  %v4499_v0 = vrot.slane %v4490_v44, %v5864_v58 }
 0x882   :  { %v4168_v5 = vpop.f32.mrb[49].mxu1  ;;  %v4128_v36 = vadd.f32 %v4127_v4, %v6148_v62  ;;  %v4129_v37 = vpop.f32.mrb[50].mxu0 }
 0x883   :  { %v4170_v7 = vpop.f32.mrb[50].mxu1  ;;  %v4167_v41 = vadd.f32 %v4166_v34, %v4126_v2  ;;  %v4130_v42 = vpop.f32.mrb[51].mxu0 }
 0x884   :  { %v4171_v43 = vpop.f32.mrb[51].mxu1  ;;  %v4169_v52 = vadd.f32 %v4168_v5, %v4128_v36 }
 0x8c0   :  { %v4356_v8 = vpop.f32.mrb[52].mxu0 }
 0x8c1   :  { %v4397_v26 = vpop.f32.mrb[52].mxu1  ;;  %v4358_v48 = vpop.f32.mrb[53].mxu0 }
 0x8c2   :  { %v4398_v21 = vadd.f32 %v4397_v26, %v4356_v8  ;;  %v4399_v53 = vpop.f32.mrb[53].mxu1  ;;  %v4360_v61 = vpop.f32.mrb[54].mxu0 }
 0x8c3   :  { %v4400_v25 = vadd.f32 %v4399_v53, %v4358_v48  ;;  %v4401_v13 = vpop.f32.mrb[54].mxu1  ;;  %v4361_v15 = vpop.f32.mrb[55].mxu0 }
 0x8c4   :  { %v4486_v62 = vadd.f32 %v4398_v21, %v4085_v28  ;;  %v4402_v16 = vpop.f32.mrb[55].mxu1 }
 0x8c5   :  { %v4487_v49 = vadd.f32 %v4400_v25, %v4087_v10 }
 0x8c6   :  { %v6158_v50 = vadd.f32 %v4495_v47, %v4486_v62 }
 0x8c7   :  { %v4513_v51 = vadd.f32 %v4499_v0, %v4487_v49 }
 0x900   :  { %v4438_v27 = vpop.f32.mrb[56].mxu0 }
 0x901   :  { %v4479_v33 = vpop.f32.mrb[56].mxu1  ;;  %v4440_v55 = vpop.f32.mrb[57].mxu0 }
 0x902   :  { %v4480_v57 = vadd.f32 %v4479_v33, %v4438_v27  ;;  %v4481_v6 = vpop.f32.mrb[57].mxu1  ;;  %v4442_v58 = vpop.f32.mrb[58].mxu0 }
 0x903   :  { %v4482_v40 = vadd.f32 %v4481_v6, %v4440_v55  ;;  %v4483_v46 = vpop.f32.mrb[58].mxu1  ;;  %v4443_v9 = vpop.f32.mrb[59].mxu0 }
 0x904   :  { %v4488_v60 = vadd.f32 %v4480_v57, %v4167_v41  ;;  %v4484_v12 = vpop.f32.mrb[59].mxu1 }
 0x905   :  { %v4489_v35 = vadd.f32 %v4482_v40, %v4169_v52 }
 0x906   :  { %v6162_v54 = vadd.f32 %v4503_v31, %v4488_v60 }
 0x907   :  { %v4515_v38 = vadd.f32 %v4507_v32, %v4489_v35 }
 0x908   :  { %5592 = dma.done.wait [#allocation9 + $0x3], 8192 }
 0x909   :  { %5593 = vsyncadd [#allocation9 + $0x3], 4294959104  ;;  %v6164_v63 = vpack.c.bf16 %v4513_v51, %v4513_v51  ;;  %v6166_v14 = vpack.c.bf16 %v4515_v38, %v4515_v38  ;;  %v4566_v59 = vld [vmem:[#allocation8 + $0x140] sm:$0xff]  ;;  %v4567_v23 = vld [vmem:[#allocation8 + $0x148] sm:$0xff]  ;;  %v6172_v21 = vpack.c.bf16 %v6158_v50, %v6158_v50  ;;  %v6176_v47 = vpack.c.bf16 %v6162_v54, %v6162_v54  ;;  %s5620_s10 = smov [#allocation21]  }
 0x90a   :  { %v4582_v18 = vld [vmem:[#allocation8 + $0x1c0] sm:$0xff]  ;;  %5015 = vmatprep.subr.bf16.mxu0 %v4566_v59  ;;  %v4583_v1 = vld [vmem:[#allocation8 + $0x1c8] sm:$0xff]  ;;  %v4568_v20 = vld [vmem:[#allocation8 + $0x150] sm:$0xff]  ;;  %s4777_s5 = sshll.u32 %s5620_s10, 4  ;;  %s4778_s5 = int_to_ptr.vmem [resolvable:$true] %s4777_s5 }
 0x90b   :  { %v4595_v56 = vrot.slane %v6164_v63, 1  ;;  %v4597_v17 = vrot.slane %v6166_v14, 1  ;;  %v4558_v3 = vld [vmem:[#allocation8 + $0x100] sm:$0xff]  ;;  %5037 = vmatprep.subr.bf16.mxu1 %v4582_v18  ;;  %v4559_v39 = vld [vmem:[#allocation8 + $0x108] sm:$0xff]  ;;  %v4584_v11 = vld [vmem:[#allocation8 + $0x1d0] sm:$0xff]  ;;  %v4594_v61 = vrot.slane %v6172_v21, 1  ;;  %p5561_p1 = scmp.lt.s32.totalorder %s4778_s5, %s4778_s5 }
 0x90c   :  { %v4574_v22 = vld [vmem:[#allocation8 + $0x180] sm:$0xff]  ;;  %5016 = vmatpush3.bf16.msra.mxu0 %v4558_v3  ;;  %v4575_v19 = vld [vmem:[#allocation8 + $0x188] sm:$0xff]  ;;  %v4560_v24 = vld [vmem:[#allocation8 + $0x110] sm:$0xff]  ;;  %v4596_v13 = vrot.slane %v6176_v47, 1  ;;  %s5556_s19 = scalar_lea.vmem %s4778_s5, 32 }
 0x90d   :  { %4634 = vmatprep.mubr.bf16.mxu0 %v4595_v56  ;;  %4674 = vmatprep.mubr.bf16.mxu1 %v4597_v17  ;;  %v4576_v28 = vld [vmem:[#allocation8 + $0x190] sm:$0xff]  ;;  %v4569_v29 = vld [vmem:[#allocation8 + $0x158] sm:$0xff]  ;;  %v4570_v34 = vld [vmem:[#allocation8 + $0x160] sm:$0xff]  ;;  %p5557_p0 = scmp.ne.s32.totalorder %s4778_s5, %s5556_s19  ;;  %p5562_p2 = scmp.lt.s32.totalorder %s5556_s19, %s5556_s19 }
 0x90e   :  { %5038 = vmatpush3.bf16.msra.mxu1 %v4574_v22  ;;  %5017 = vmatprep.subr.bf16.mxu0 %v4567_v23  ;;  %v4585_v30 = vld [vmem:[#allocation8 + $0x1d8] sm:$0xff]  ;;  %v4586_v2 = vld [vmem:[#allocation8 + $0x1e0] sm:$0xff]  ;;  %v4571_v36 = vld [vmem:[#allocation8 + $0x168] sm:$0xff] }
 0x90f   :  { %5039 = vmatprep.subr.bf16.mxu1 %v4583_v1  ;;  %v4561_v10 = vld [vmem:[#allocation8 + $0x118] sm:$0xff]  ;;  %v4562_v4 = vld [vmem:[#allocation8 + $0x120] sm:$0xff]  ;;  %v4587_v37 = vld [vmem:[#allocation8 + $0x1e8] sm:$0xff]  ;;  %p5563_p3 = por %p5562_p2, %p5561_p1 }
 0x910   :  { %5018 = vmatpush3.bf16.msra.mxu0 %v4559_v39  ;;  %v4577_v45 = vld [vmem:[#allocation8 + $0x198] sm:$0xff]  ;;  %v4578_v5 = vld [vmem:[#allocation8 + $0x1a0] sm:$0xff]  ;;  %v4563_v7 = vld [vmem:[#allocation8 + $0x128] sm:$0xff] }
 0x911   :  { %5019 = vmatprep.subr.bf16.mxu0 %v4568_v20  ;;  %v4579_v41 = vld [vmem:[#allocation8 + $0x1a8] sm:$0xff]  ;;  %v4572_v42 = vld [vmem:[#allocation8 + $0x170] sm:$0xff]  ;;  %v4573_v8 = vld [vmem:[#allocation8 + $0x178] sm:$0xff]  ;;  %p5564_p4 = pnand %p5563_p3, %p5557_p0 }
 0x912   :  { %5040 = vmatpush3.bf16.msra.mxu1 %v4575_v19  ;;  %v4588_v43 = vld [vmem:[#allocation8 + $0x1f0] sm:$0xff]  ;;  %v4589_v26 = vld [vmem:[#allocation8 + $0x1f8] sm:$0xff]  ;;  %v4533_v25 = vld [vmem:[#allocation8 + $0x40] sm:$0xff] }
 0x913   :  { %5041 = vmatprep.subr.bf16.mxu1 %v4584_v11  ;;  %v4564_v52 = vld [vmem:[#allocation8 + $0x130] sm:$0xff]  ;;  %v4565_v48 = vld [vmem:[#allocation8 + $0x138] sm:$0xff]  ;;  %v4549_v0 = vld [vmem:[#allocation8 + $0xc0] sm:$0xff] }
 0x914   :  { %5020 = vmatpush3.bf16.msra.mxu0 %v4560_v24  ;;  %v4580_v44 = vld [vmem:[#allocation8 + $0x1b0] sm:$0xff]  ;;  %v4581_v53 = vld [vmem:[#allocation8 + $0x1b8] sm:$0xff]  ;;  %v4525_v62 = vld [vmem:[#allocation8] sm:$0xff] }
 0x915   :  { %5021 = vmatprep.subr.bf16.mxu0 %v4569_v29  ;;  %v4541_v15 = vld [vmem:[#allocation8 + $0x80] sm:$0xff]  ;;  %v4534_v16 = vld [vmem:[#allocation8 + $0x48] sm:$0xff]  ;;  %v4535_v27 = vld [vmem:[#allocation8 + $0x50] sm:$0xff] }
 0x916   :  { %5042 = vmatpush3.bf16.msra.mxu1 %v4576_v28  ;;  %v4550_v49 = vld [vmem:[#allocation8 + $0xc8] sm:$0xff]  ;;  %v4551_v33 = vld [vmem:[#allocation8 + $0xd0] sm:$0xff]  ;;  %v4536_v55 = vld [vmem:[#allocation8 + $0x58] sm:$0xff] }
 0x917   :  { %5043 = vmatprep.subr.bf16.mxu1 %v4585_v30  ;;  %v4526_v50 = vld [vmem:[#allocation8 + $0x8] sm:$0xff]  ;;  %v4527_v57 = vld [vmem:[#allocation8 + $0x10] sm:$0xff]  ;;  %v4552_v6 = vld [vmem:[#allocation8 + $0xd8] sm:$0xff] }
 0x918   :  { %5022 = vmatpush3.bf16.msra.mxu0 %v4561_v10  ;;  %v4542_v51 = vld [vmem:[#allocation8 + $0x88] sm:$0xff]  ;;  %v4543_v31 = vld [vmem:[#allocation8 + $0x90] sm:$0xff]  ;;  %v4528_v40 = vld [vmem:[#allocation8 + $0x18] sm:$0xff] }
 0x919   :  { %5023 = vmatprep.subr.bf16.mxu0 %v4570_v34  ;;  %v4544_v32 = vld [vmem:[#allocation8 + $0x98] sm:$0xff]  ;;  %v4537_v58 = vld [vmem:[#allocation8 + $0x60] sm:$0xff]  ;;  %v4538_v12 = vld [vmem:[#allocation8 + $0x68] sm:$0xff] }
 0x91a   :  { %5044 = vmatpush3.bf16.msra.mxu1 %v4577_v45  ;;  %v4553_v46 = vld [vmem:[#allocation8 + $0xe0] sm:$0xff]  ;;  %v4554_v35 = vld [vmem:[#allocation8 + $0xe8] sm:$0xff]  ;;  %v4531_v56 = vld [vmem:[#allocation8 + $0x30] sm:$0xff] }
 0x91b   :  { %5045 = vmatprep.subr.bf16.mxu1 %v4586_v2  ;;  %v4529_v60 = vld [vmem:[#allocation8 + $0x20] sm:$0xff]  ;;  %v4530_v54 = vld [vmem:[#allocation8 + $0x28] sm:$0xff]  ;;  %v4547_v17 = vld [vmem:[#allocation8 + $0xb0] sm:$0xff] }
 0x91c   :  { %5024 = vmatpush3.bf16.msra.mxu0 %v4562_v4  ;;  %v4545_v9 = vld [vmem:[#allocation8 + $0xa0] sm:$0xff]  ;;  %v4546_v38 = vld [vmem:[#allocation8 + $0xa8] sm:$0xff]  ;;  %v4540_v59 = vld [vmem:[#allocation8 + $0x78] sm:$0xff] }
 0x91d   :  { %5025 = vmatprep.subr.bf16.mxu0 %v4571_v36  ;;  %v4556_v18 = vld [vmem:[#allocation8 + $0xf8] sm:$0xff] }
 0x91e   :  { %5046 = vmatpush3.bf16.msra.mxu1 %v4578_v5  ;;  %v4532_v3 = vld [vmem:[#allocation8 + $0x38] sm:$0xff] }
 0x91f   :  { %5047 = vmatprep.subr.bf16.mxu1 %v4587_v37  ;;  %v4548_v22 = vld [vmem:[#allocation8 + $0xb8] sm:$0xff] }
 0x920   :  { %5026 = vmatpush3.bf16.msra.mxu0 %v4563_v7 }
 0x921   :  { %5027 = vmatprep.subr.bf16.mxu0 %v4572_v42 }
 0x922   :  { %5048 = vmatpush3.bf16.msra.mxu1 %v4579_v41 }
 0x923   :  { %5049 = vmatprep.subr.bf16.mxu1 %v4588_v43 }
 0x924   :  { %5028 = vmatpush3.bf16.msra.mxu0 %v4564_v52  ;;  %v4996_v52 = vld [vmem:[#allocation19] ss:$0 sm:$0xff] }
 0x925   :  { %5029 = vmatprep.subr.bf16.mxu0 %v4573_v8 }
 0x926   :  { %5050 = vmatpush3.bf16.msra.mxu1 %v4580_v44 }
 0x927   :  { %5051 = vmatprep.subr.bf16.mxu1 %v4589_v26 }
 0x928   :  { %5030 = vmatpush3.bf16.msra.mxu0 %v4565_v48 }
 0x929   :  { %5059 = vmatprep.subr.bf16.mxu0 %v4533_v25 }
 0x92a   :  { %5052 = vmatpush3.bf16.msra.mxu1 %v4581_v53 }
 0x92b   :  { %5081 = vmatprep.subr.bf16.mxu1 %v4549_v0  ;;  %4635 = vmatmul.mubr.bf16.vlgmr.msra.gmra.mrb[60].mxu0 %v4594_v61 }
 0x92c   :  { %5060 = vmatpush3.bf16.msra.mxu0 %v4525_v62  ;;  %4714 = vmatprep.mubr.bf16.mxu0 %v6164_v63  ;;  %v4539_v63 = vld [vmem:[#allocation8 + $0x70] sm:$0xff] }
 0x92d   :  { %4675 = vmatmul.mubr.bf16.vlgmr.msra.gmra.mrb[60].mxu1 %v4596_v13  ;;  %5061 = vmatprep.subr.bf16.mxu0 %v4534_v16 }
 0x92e   :  { %5082 = vmatpush3.bf16.msra.mxu1 %v4541_v15  ;;  %4754 = vmatprep.mubr.bf16.mxu1 %v6166_v14  ;;  %v4555_v14 = vld [vmem:[#allocation8 + $0xf0] sm:$0xff] }
 0x92f   :  { %5083 = vmatprep.subr.bf16.mxu1 %v4550_v49 }
 0x930   :  { %5062 = vmatpush3.bf16.msra.mxu0 %v4526_v50 }
 0x931   :  { %5063 = vmatprep.subr.bf16.mxu0 %v4535_v27 }
 0x932   :  { %5084 = vmatpush3.bf16.msra.mxu1 %v4542_v51 }
 0x933   :  { %5085 = vmatprep.subr.bf16.mxu1 %v4551_v33 }
 0x934   :  { %5064 = vmatpush3.bf16.msra.mxu0 %v4527_v57 }
 0x935   :  { %5065 = vmatprep.subr.bf16.mxu0 %v4536_v55 }
 0x936   :  { %5086 = vmatpush3.bf16.msra.mxu1 %v4543_v31 }
 0x937   :  { %5087 = vmatprep.subr.bf16.mxu1 %v4552_v6 }
 0x938   :  { %5066 = vmatpush3.bf16.msra.mxu0 %v4528_v40 }
 0x939   :  { %5067 = vmatprep.subr.bf16.mxu0 %v4537_v58 }
 0x93a   :  { %5088 = vmatpush3.bf16.msra.mxu1 %v4544_v32 }
 0x93b   :  { %5089 = vmatprep.subr.bf16.mxu1 %v4553_v46 }
 0x93c   :  { %5068 = vmatpush3.bf16.msra.mxu0 %v4529_v60 }
 0x93d   :  { %5069 = vmatprep.subr.bf16.mxu0 %v4538_v12 }
 0x93e   :  { %5090 = vmatpush3.bf16.msra.mxu1 %v4545_v9 }
 0x93f   :  { %5091 = vmatprep.subr.bf16.mxu1 %v4554_v35 }
 0x940   :  { %5070 = vmatpush3.bf16.msra.mxu0 %v4530_v54 }
 0x941   :  { %5071 = vmatprep.subr.bf16.mxu0 %v4539_v63 }
 0x942   :  { %5092 = vmatpush3.bf16.msra.mxu1 %v4546_v38 }
 0x943   :  { %5093 = vmatprep.subr.bf16.mxu1 %v4555_v14 }
 0x944   :  { %5072 = vmatpush3.bf16.msra.mxu0 %v4531_v56 }
 0x945   :  { %5073 = vmatprep.subr.bf16.mxu0 %v4540_v59 }
 0x946   :  { %5094 = vmatpush3.bf16.msra.mxu1 %v4547_v17 }
 0x947   :  { %5095 = vmatprep.subr.bf16.mxu1 %v4556_v18 }
 0x948   :  { %5074 = vmatpush3.bf16.msra.mxu0 %v4532_v3 }
 0x94a   :  { %5096 = vmatpush3.bf16.msra.mxu1 %v4548_v22 }
 0x94b   :  { %4715 = vmatmul.mubr.bf16.vlgmr.msra.gmra.mrb[64].mxu0 %v6172_v21 }
 0x94d   :  { %4755 = vmatmul.mubr.bf16.vlgmr.msra.gmra.mrb[64].mxu1 %v6176_v47 }
 0x9fe   :  { %v5031_v23 = vpop.f32.mrb[60].mxu0 }
 0x9ff   :  { %v5032_v39 = vpop.f32.mrb[61].mxu0 }
 0xa00   :  { %v5053_v1 = vpop.f32.mrb[60].mxu1  ;;  %v5033_v20 = vadd.f32 %v5032_v39, %v5031_v23  ;;  %v5034_v24 = vpop.f32.mrb[62].mxu0 }
 0xa01   :  { %v5054_v19 = vpop.f32.mrb[61].mxu1  ;;  %v5035_v29 = vpop.f32.mrb[63].mxu0 }
 0xa02   :  { %v5055_v11 = vadd.f32 %v5054_v19, %v5053_v1  ;;  %v5056_v28 = vpop.f32.mrb[62].mxu1 }
 0xa03   :  { %v5057_v30 = vpop.f32.mrb[63].mxu1 }
 0xa04   :  { %v4677_v10 = vadd.f32 %v5055_v11, %v5033_v20 }
 0xa1e   :  { %v5075_v45 = vpop.f32.mrb[64].mxu0 }
 0xa1f   :  { %v5076_v2 = vpop.f32.mrb[65].mxu0 }
 0xa20   :  { %v5097_v34 = vpop.f32.mrb[64].mxu1  ;;  %v5077_v5 = vadd.f32 %v5076_v2, %v5075_v45  ;;  %v5078_v37 = vpop.f32.mrb[66].mxu0 }
 0xa21   :  { %v5098_v4 = vpop.f32.mrb[65].mxu1  ;;  %v5079_v41 = vpop.f32.mrb[67].mxu0 }
 0xa22   :  { %v5099_v36 = vadd.f32 %v5098_v4, %v5097_v34  ;;  %v5100_v7 = vpop.f32.mrb[66].mxu1  ;;  %v4717_v43 = vadd.f32 %v5077_v5, %v4677_v10 }
 0xa23   :  { %v5101_v42 = vpop.f32.mrb[67].mxu1 }
 0xa24   :  { %v4757_v44 = vadd.f32 %v5099_v36, %v4717_v43 }
 0xa26   :  { %v4769_v8 = vadd.f32 %v4996_v52, %v4757_v44 }
 0xa28   :  { %4770 = vst [vmem:[#allocation21] sm:$0x3] %v4769_v8 }
 0xa29   :  { %5567 = shalt.err (!%p5564_p4)
}
 0xa2a   :  { %s5568_s4 = scalar_lea.hbm %s6207_s11, 32 }
 0xa2b   :  { %p5569_p5 = scmp.ne.s32.totalorder %s6207_s11, %s5568_s4  ;;  %p5572_p6 = scmp.lt.u32.totalorder %s5568_s4, %s6207_s11 }
 0xa2d   :  { %p5574_p7 = pnand %p5572_p6, %p5569_p5 }
 0xa2f   :  { %5577 = shalt.err (!%p5574_p7)
}
 0xa30   :  { %4780 = dma.vmem_to_hbm [thread:$0]  %s4778_s5, 32, %s6207_s11, [#allocation12]  }
 0xa31   :  { %5594 = dma.done.wait [#allocation12], 32  }
 0xa32   :  { %5595 = vsyncadd [#allocation12], 4294967264 }
 0xa33   :  { %4784 = vsyncpa [#allocation11], 1 }
 0xa34   :  { %4785 = vsyncpa [#allocation14], 1 }
 0xa35   :  { %4786 = vsyncpa [#allocation17], 1 }
 0xa36   :  { %4787 = vsyncpa [#allocation20], 1 }
 0xa37   :  { %4788 = vsyncpa [#allocation12], 1 }
 0xa38   :  { %4789 = vsyncmov [#allocation9] }
 0xa3b   :  { %s4790_s13 = vpop.sfrf %4789 }
 0xa3c   :  { %p4997_p8 = scmp.ne.s32.totalorder %s4790_s13, 0 }
 0xa3e   :  { %4794 = shalt.err (%p4997_p8)  }
 0xa3f   :  { %4796 = vsyncmov [#allocation9 + $0x1] }
 0xa42   :  { %s4797_s14 = vpop.sfrf %4796 }
 0xa43   :  { %p4998_p9 = scmp.ne.s32.totalorder %s4797_s14, 0 }
 0xa45   :  { %4801 = shalt.err (%p4998_p9)  }
 0xa46   :  { %4803 = vsyncmov [#allocation9 + $0x2] }
 0xa49   :  { %s4804_s15 = vpop.sfrf %4803 }
 0xa4a   :  { %p4999_p10 = scmp.ne.s32.totalorder %s4804_s15, 0 }
 0xa4c   :  { %4808 = shalt.err (%p4999_p10)  }
 0xa4d   :  { %4810 = vsyncmov [#allocation9 + $0x3] }
 0xa50   :  { %s4811_s11 = vpop.sfrf %4810 }
 0xa51   :  { %p5000_p11 = scmp.ne.s32.totalorder %s4811_s11, 0 }
 0xa53   :  { %4815 = shalt.err (%p5000_p11)  }

</bundles_post_ra>
